<compile_context>
chip_gen: v6e
topology: v6e:2x2x1
jax: 0.10.0
libtpu: 0.0.40
codegen_flags: <defaults>
</compile_context>

<pallas_src>
import functools

import jax
import jax.numpy as jnp
from jax.experimental import pallas as pl
from jax.experimental.pallas import tpu as pltpu

EPS = 1e-5
LANE = 128


def _round_up(x, m):
    return (x + m - 1) // m * m


def _vmem_limit_bytes():
    # v5e/v6e have 128 MiB physical VMEM (use up to 96 MiB); v7x has only
    # 64 MiB, so cap the scoped request at ~3/4 of capacity.
    try:
        cap = pltpu.get_tpu_info().vmem_capacity_bytes
        return int(min(96 * 2**20, cap * 3 // 4))
    except Exception:  # info query unavailable -> safe-everywhere default
        return 48 * 2**20


VMEM_LIMIT = _vmem_limit_bytes()


def _pick_row_tile(m, cap=2048):
    """Largest row tile <= cap dividing m (mem-bound kernel -> big tiles)."""
    for t in (2048, 1024, 512, 256, 128, 64, 32, 16, 8):
        if t <= m and m % t == 0:
            return t
    return m  # TODO(synk): mask a ragged tail instead of one huge block.


# ---------------------------------------------------------------------------
# Kernel 1: per-image 3x3 SAME conv (in-VMEM im2col) + per-image BN partials.
# ---------------------------------------------------------------------------
def conv3x3_stats_kernel(x_ref, w_ref, y_ref, st_ref, xpad, col, *, h, w, cp):
    """
    x_ref : (1, H, W, CP)   bf16 input image (channel-padded, NO halo)
    w_ref : (9*CP, CP)      bf16 im2col weight matrix (VMEM-resident)
    y_ref : (1, H*W, CP)    f32 pre-BN conv output
    st_ref: (1, 2, CP)      f32 per-image [sum(y), sum((y - mean_img)^2)]
    xpad  : (H+2, W+2, CP)  f32 scratch: halo-padded image (border = SAME pad)
    col   : (H*W, 9*CP)     bf16 scratch: im2col matrix
    """
    hw = h * w
    xpad[...] = jnp.zeros_like(xpad)                       # zero halo border
    xpad[1:h + 1, 1:w + 1, :] = x_ref[0].astype(jnp.float32)
    for t in range(9):                                     # build im2col
        dy, dx = t // 3, t % 3
        slab = xpad[dy:dy + h, dx:dx + w, :].reshape(hw, cp)
        col[:, t * cp:(t + 1) * cp] = slab.astype(jnp.bfloat16)
    y = jnp.dot(col[...], w_ref[...], preferred_element_type=jnp.float32)
    y_ref[0] = y
    s = jnp.sum(y, axis=0, keepdims=True)                  # (1, CP)
    mean_img = s * (1.0 / hw)
    css = jnp.sum(jnp.square(y - mean_img), axis=0, keepdims=True)
    st_ref[0, 0:1, :] = s
    st_ref[0, 1:2, :] = css


def _conv1_stats(x_bf, w_mat, *, n, h, w, cp):
    hw = h * w
    kernel = functools.partial(conv3x3_stats_kernel, h=h, w=w, cp=cp)
    # Actual issued MXU work / HBM traffic (channel padding included, since
    # that is what the hardware really does; no host-side pad copies remain).
    flops = 2 * n * hw * (9 * cp) * cp
    bytes_accessed = (2 * n * h * w * cp + 2 * 9 * cp * cp
                      + 4 * n * hw * cp + 4 * n * 2 * cp)
    return pl.pallas_call(
        kernel,
        grid=(n,),
        in_specs=[
            pl.BlockSpec((1, h, w, cp), lambda i: (i, 0, 0, 0)),
            pl.BlockSpec((9 * cp, cp), lambda i: (0, 0)),        # resident
        ],
        out_specs=(
            pl.BlockSpec((1, hw, cp), lambda i: (i, 0, 0)),
            pl.BlockSpec((1, 2, cp), lambda i: (i, 0, 0)),
        ),
        out_shape=(
            jax.ShapeDtypeStruct((n, hw, cp), jnp.float32),
            jax.ShapeDtypeStruct((n, 2, cp), jnp.float32),
        ),
        scratch_shapes=[
            pltpu.VMEM((h + 2, w + 2, cp), jnp.float32),
            pltpu.VMEM((hw, 9 * cp), jnp.bfloat16),
        ],
        compiler_params=pltpu.CompilerParams(
            dimension_semantics=("parallel",),
            vmem_limit_bytes=VMEM_LIMIT),
        cost_estimate=pl.CostEstimate(
            flops=flops, transcendentals=0, bytes_accessed=bytes_accessed),
    )(x_bf, w_mat)


# ---------------------------------------------------------------------------
# Kernel 2: fused BN1-apply + ReLU + conv2 (im2col) + per-image BN2 partials.
# h1 lives only in the VMEM halo scratch; it never round-trips through HBM.
# ---------------------------------------------------------------------------
def bn1_conv3x3_stats_kernel(y1_ref, mv1_ref, g1_ref, b1_ref, w_ref,
                             y2_ref, st_ref, hpad, col, *, h, w, cp):
    """
    y1_ref : (1, H*W, CP)   f32 pre-BN1 conv1 output for this image
    mv1_ref: (2, CP)        f32 global [mean, biased var] of conv1 (resident)
    g1_ref : (1, CP)        f32 BN1 gamma (zero-padded lanes)
    b1_ref : (1, CP)        f32 BN1 beta  (zero-padded lanes)
    w_ref  : (9*CP, CP)     bf16 im2col weights for conv2 (resident)
    y2_ref : (1, H*W, CP)   f32 pre-BN2 conv2 output
    st_ref : (1, 2, CP)     f32 per-image [sum(y2), centered sumsq(y2)]
    hpad   : (H+2, W+2, CP) f32 scratch: halo-padded normalized h1
    col    : (H*W, 9*CP)    bf16 scratch: im2col matrix
    """
    hw = h * w
    mean = mv1_ref[0:1, :]
    var = mv1_ref[1:2, :]
    # Padded channel lanes: var == 0 AND gamma == 0 => scale/shift stay 0, so
    # padded lanes of h1 stay exactly 0 (keeps the conv2 K-padding inert).
    scale = jax.lax.rsqrt(var + EPS) * g1_ref[...]
    shift = b1_ref[...] - mean * scale
    h1 = jnp.maximum(y1_ref[0] * scale + shift, 0.0)       # (HW, CP) f32
    hpad[...] = jnp.zeros_like(hpad)
    hpad[1:h + 1, 1:w + 1, :] = h1.reshape(h, w, cp)
    for t in range(9):
        dy, dx = t // 3, t % 3
        slab = hpad[dy:dy + h, dx:dx + w, :].reshape(hw, cp)
        col[:, t * cp:(t + 1) * cp] = slab.astype(jnp.bfloat16)
    y2 = jnp.dot(col[...], w_ref[...], preferred_element_type=jnp.float32)
    y2_ref[0] = y2
    s = jnp.sum(y2, axis=0, keepdims=True)
    mean_img = s * (1.0 / hw)
    css = jnp.sum(jnp.square(y2 - mean_img), axis=0, keepdims=True)
    st_ref[0, 0:1, :] = s
    st_ref[0, 1:2, :] = css


def _bn1_conv2_stats(y1, mv1, g1, be1, w_mat, *, n, h, w, cp):
    hw = h * w
    kernel = functools.partial(bn1_conv3x3_stats_kernel, h=h, w=w, cp=cp)
    flops = 2 * n * hw * (9 * cp) * cp + 6 * n * hw * cp
    bytes_accessed = (4 * n * hw * cp + 2 * 9 * cp * cp + 4 * 4 * cp
                      + 4 * n * hw * cp + 4 * n * 2 * cp)
    return pl.pallas_call(
        kernel,
        grid=(n,),
        in_specs=[
            pl.BlockSpec((1, hw, cp), lambda i: (i, 0, 0)),
            pl.BlockSpec((2, cp), lambda i: (0, 0)),             # resident
            pl.BlockSpec((1, cp), lambda i: (0, 0)),             # resident
            pl.BlockSpec((1, cp), lambda i: (0, 0)),             # resident
            pl.BlockSpec((9 * cp, cp), lambda i: (0, 0)),        # resident
        ],
        out_specs=(
            pl.BlockSpec((1, hw, cp), lambda i: (i, 0, 0)),
            pl.BlockSpec((1, 2, cp), lambda i: (i, 0, 0)),
        ),
        out_shape=(
            jax.ShapeDtypeStruct((n, hw, cp), jnp.float32),
            jax.ShapeDtypeStruct((n, 2, cp), jnp.float32),
        ),
        scratch_shapes=[
            pltpu.VMEM((h + 2, w + 2, cp), jnp.float32),
            pltpu.VMEM((hw, 9 * cp), jnp.bfloat16),
        ],
        compiler_params=pltpu.CompilerParams(
            dimension_semantics=("parallel",),
            vmem_limit_bytes=VMEM_LIMIT),
        cost_estimate=pl.CostEstimate(
            flops=flops, transcendentals=n * cp,
            bytes_accessed=bytes_accessed),
    )(y1, mv1, g1, be1, w_mat)


# ---------------------------------------------------------------------------
# Kernel 3: BN2 apply (global stats) + residual add + ReLU, row-tiled.
# ---------------------------------------------------------------------------
def bn2_add_relu_kernel(y2_ref, mv2_ref, g2_ref, b2_ref, r_ref, o_ref):
    mean = mv2_ref[0:1, :]
    var = mv2_ref[1:2, :]
    scale = jax.lax.rsqrt(var + EPS) * g2_ref[...]
    shift = b2_ref[...] - mean * scale
    o_ref[...] = jnp.maximum(y2_ref[...] * scale + shift + r_ref[...], 0.0)


def _bn2_apply(y2_flat, mv2, g2, be2, res_flat, *, tm):
    m, cp = y2_flat.shape
    row_spec = pl.BlockSpec((tm, cp), lambda i: (i, 0))
    vec_spec = pl.BlockSpec((1, cp), lambda i: (0, 0))
    mv_spec = pl.BlockSpec((2, cp), lambda i: (0, 0))
    return pl.pallas_call(
        bn2_add_relu_kernel,
        grid=(m // tm,),
        in_specs=[row_spec, mv_spec, vec_spec, vec_spec, row_spec],
        out_specs=row_spec,
        out_shape=jax.ShapeDtypeStruct((m, cp), jnp.float32),
        compiler_params=pltpu.CompilerParams(
            dimension_semantics=("parallel",),
            vmem_limit_bytes=VMEM_LIMIT),
        cost_estimate=pl.CostEstimate(
            flops=5 * m * cp, transcendentals=cp,
            bytes_accessed=4 * (3 * m * cp + 4 * cp)),
    )(y2_flat, mv2, g2, be2, res_flat)


# ---------------------------------------------------------------------------
# Host-side helpers.
# ---------------------------------------------------------------------------
def _combine_stats(st, m_img):
    """Per-image [sum, centered sumsq] -> global [mean, biased var] (2, CP)."""
    n = st.shape[0]
    s = st[:, 0, :]
    css = st[:, 1, :]
    total = n * m_img
    mean_i = s / m_img
    gmean = jnp.sum(s, axis=0) / total
    var = (jnp.sum(css, axis=0)
           + m_img * jnp.sum(jnp.square(mean_i - gmean), axis=0)) / total
    return jnp.stack([gmean, var], axis=0)


def _weight_to_mat(w_oihw, cp):
    """PyTorch (Cout, Cin, 3, 3) -> (9*CP, CP) bf16 im2col weight matrix."""
    c_out, c_in, kh, kw = w_oihw.shape
    wt = jnp.transpose(w_oihw.astype(jnp.float32), (2, 3, 1, 0))  # (3,3,Ci,Co)
    wt = wt.reshape(kh * kw, c_in, c_out)
    wt = jnp.pad(wt, ((0, 0), (0, cp - c_in), (0, cp - c_out)))
    return wt.reshape(kh * kw * cp, cp).astype(jnp.bfloat16)


def _pad_row(v, cp):
    v = v.reshape(1, -1).astype(jnp.float32)
    return jnp.pad(v, ((0, 0), (0, cp - v.shape[1])))


def residual_block(x_nchw, params):
    """Pallas ResidualBlock.forward (NCHW in/out, BatchNorm in training mode).

    Conv biases b1/b2 are accepted but unused: a per-channel bias added
    immediately before BatchNorm cancels exactly in the normalization.
    """
    w1, _b1, g1, be1, w2, _b2, g2, be2 = params
    n, c, h, w = x_nchw.shape
    cp = _round_up(c, LANE)
    hw = h * w
    m = n * hw

    # NHWC, channels padded to a full 128-lane vreg (lane-dense, MXU-shaped).
    x_nhwc = jnp.transpose(x_nchw, (0, 2, 3, 1)).astype(jnp.float32)
    x_nhwc = jnp.pad(x_nhwc, ((0, 0), (0, 0), (0, 0), (0, cp - c)))
    x_bf = x_nhwc.astype(jnp.bfloat16)          # bf16 conv1 input (half DMA)
    x_res = x_nhwc.reshape(m, cp)               # f32 residual for the final add

    w1m = _weight_to_mat(w1, cp)
    w2m = _weight_to_mat(w2, cp)

    # Stage 1: y1 = conv1(x) + per-image BN1 partials (all-parallel grid).
    y1, st1 = _conv1_stats(x_bf, w1m, n=n, h=h, w=w, cp=cp)
    mv1 = _combine_stats(st1, hw)

    # Stage 2 (fused): h1 = relu(bn1(y1)) stays in VMEM; y2 = conv2(h1).
    y2, st2 = _bn1_conv2_stats(y1, mv1, _pad_row(g1, cp), _pad_row(be1, cp),
                               w2m, n=n, h=h, w=w, cp=cp)
    mv2 = _combine_stats(st2, hw)

    # Stage 3: out = relu(bn2(y2) + x).
    out = _bn2_apply(y2.reshape(m, cp), mv2, _pad_row(g2, cp),
                     _pad_row(be2, cp), x_res, tm=_pick_row_tile(m))

    out = out.reshape(n, h, w, cp)[..., :c]
    return jnp.transpose(out, (0, 3, 1, 2))                 # back to NCHW


# ----------------------------- pure-JAX reference ---------------------------
def _ref_forward(x_nchw, params, conv_dtype=jnp.float32):
    """Reference. conv_dtype=bfloat16 mirrors the kernel's MXU operand
    precision (conv math / accumulation and all BN math stay f32)."""
    w1, b1, g1, be1, w2, b2, g2, be2 = params

    def conv(x, w, b):
        lhs = x.astype(conv_dtype).astype(jnp.float32)
        rhs = w.astype(conv_dtype).astype(jnp.float32)
        y = jax.lax.conv_general_dilated(
            lhs, rhs, window_strides=(1, 1), padding="SAME",
            dimension_numbers=("NCHW", "OIHW", "NCHW"))
        return y + b[None, :, None, None]

    def bn(y, g, be):
        mean = jnp.mean(y, axis=(0, 2, 3), keepdims=True)
        var = jnp.mean(jnp.square(y - mean), axis=(0, 2, 3), keepdims=True)
        return (y - mean) * jax.lax.rsqrt(var + EPS) * g[None, :, None, None] \
            + be[None, :, None, None]

    out = jax.nn.relu(bn(conv(x_nchw, w1, b1), g1, be1))
    out = bn(conv(out, w2, b2), g2, be2) + x_nchw
    return jax.nn.relu(out)


# ------------------------------------ main ----------------------------------
if __name__ == "__main__":
    key = jax.random.PRNGKey(0)
    N, C, H, W = 2, 4, 16, 16

    k_x, k_w1, k_b1, k_w2, k_b2 = jax.random.split(key, 5)
    x = jax.random.normal(k_x, (N, C, H, W), dtype=jnp.float32)

    w1 = jax.random.normal(k_w1, (C, C, 3, 3), dtype=jnp.float32) * 0.1
    b1 = jax.random.normal(k_b1, (C,), dtype=jnp.float32) * 0.1
    w2 = jax.random.normal(k_w2, (C, C, 3, 3), dtype=jnp.float32) * 0.1
    b2 = jax.random.normal(k_b2, (C,), dtype=jnp.float32) * 0.1
    g1 = jnp.ones((C,), jnp.float32)
    be1 = jnp.zeros((C,), jnp.float32)
    g2 = jnp.ones((C,), jnp.float32)
    be2 = jnp.zeros((C,), jnp.float32)
    params = (w1, b1, g1, be1, w2, b2, g2, be2)

    fwd = jax.jit(residual_block)
    out = jax.block_until_ready(fwd(x, params))
    assert out.shape == (N, C, H, W), out.shape

    # Tight check vs. a reference using the same bf16 MXU operand precision.
    ref_bf16 = _ref_forward(x, params, conv_dtype=jnp.bfloat16)
    assert jnp.allclose(out, ref_bf16, atol=5e-3, rtol=5e-3), \
        f"max abs err vs bf16-operand ref {jnp.max(jnp.abs(out - ref_bf16))}"

    # Sanity check vs. the pure-f32 reference (bounds bf16 rounding effects).
    ref_f32 = _ref_forward(x, params, conv_dtype=jnp.float32)
    assert jnp.allclose(out, ref_f32, atol=5e-2, rtol=5e-2), \
        f"max abs err vs f32 ref {jnp.max(jnp.abs(out - ref_f32))}"

    print("KERNEL_OK")
</pallas_src>

<mosaic_0001>
module attributes {stable_mosaic.version = 11 : i64} {
  func.func @conv3x3_stats_kernel(%arg0: i32, %arg1: memref<1x16x16x128xbf16, #tpu.memory_space<vmem>>, %arg2: memref<1152x128xbf16, #tpu.memory_space<vmem>>, %arg3: memref<1x256x128xf32, #tpu.memory_space<vmem>>, %arg4: memref<1x2x128xf32, #tpu.memory_space<vmem>>, %arg5: memref<18x18x128xf32, #tpu.memory_space<vmem>>, %arg6: memref<256x1152xbf16, #tpu.memory_space<vmem>>) attributes {dimension_semantics = [#tpu.dimension_semantics<parallel>], iteration_bounds = array<i64: 2>, scalar_prefetch = 0 : i64, scratch_operands = 2 : i64, tpu.core_type = #tpu.core_type<tc>, window_params = [{transform_indices = @transform_0, window_bounds = array<i64: 1, 16, 16, 128>}, {pipeline_mode = #tpu.pipeline_mode<synchronous>, transform_indices = @transform_1, window_bounds = array<i64: 1152, 128>}, {transform_indices = @transform_2, window_bounds = array<i64: 1, 256, 128>}, {transform_indices = @transform_3, window_bounds = array<i64: 1, 2, 128>}]} {
    %cst = arith.constant 0.000000e+00 : f32
    %0 = vector.broadcast %cst : f32 to vector<18x18x128xf32>
    %c0 = arith.constant 0 : index
    %c0_0 = arith.constant 0 : index
    %c0_1 = arith.constant 0 : index
    %1 = vector.load %arg5[%c0, %c0_0, %c0_1] : memref<18x18x128xf32, #tpu.memory_space<vmem>>, vector<18x18x128xf32>
    tpu.vector_store %arg5[%c0, %c0_0, %c0_1], %0 {strides = array<i32>} : memref<18x18x128xf32, #tpu.memory_space<vmem>>, vector<18x18x128xf32>,
    %c0_2 = arith.constant 0 : index
    %c0_3 = arith.constant 0 : index
    %c0_4 = arith.constant 0 : index
    %c0_5 = arith.constant 0 : index
    %2 = vector.load %arg1[%c0_2, %c0_3, %c0_4, %c0_5] : memref<1x16x16x128xbf16, #tpu.memory_space<vmem>>, vector<1x16x16x128xbf16>
    %3 = vector.shape_cast %2 : vector<1x16x16x128xbf16> to vector<16x16x128xbf16>
    %4 = arith.extf %3 : vector<16x16x128xbf16> to vector<16x16x128xf32>
    %c1 = arith.constant 1 : index
    %c1_6 = arith.constant 1 : index
    %c0_7 = arith.constant 0 : index
    %5 = vector.load %arg5[%c1, %c1_6, %c0_7] : memref<18x18x128xf32, #tpu.memory_space<vmem>>, vector<16x16x128xf32>
    tpu.vector_store %arg5[%c1, %c1_6, %c0_7], %4 {strides = array<i32>} : memref<18x18x128xf32, #tpu.memory_space<vmem>>, vector<16x16x128xf32>,
    %c0_8 = arith.constant 0 : index
    %c0_9 = arith.constant 0 : index
    %c0_10 = arith.constant 0 : index
    %6 = vector.load %arg5[%c0_8, %c0_9, %c0_10] : memref<18x18x128xf32, #tpu.memory_space<vmem>>, vector<16x16x128xf32>
    %7 = vector.shape_cast %6 : vector<16x16x128xf32> to vector<256x128xf32>
    %8 = arith.truncf %7 : vector<256x128xf32> to vector<256x128xbf16>
    %c0_11 = arith.constant 0 : index
    %c0_12 = arith.constant 0 : index
    %9 = vector.load %arg6[%c0_11, %c0_12] : memref<256x1152xbf16, #tpu.memory_space<vmem>>, vector<256x128xbf16>
    tpu.vector_store %arg6[%c0_11, %c0_12], %8 {strides = array<i32>} : memref<256x1152xbf16, #tpu.memory_space<vmem>>, vector<256x128xbf16>,
    %c0_13 = arith.constant 0 : index
    %c1_14 = arith.constant 1 : index
    %c0_15 = arith.constant 0 : index
    %10 = vector.load %arg5[%c0_13, %c1_14, %c0_15] : memref<18x18x128xf32, #tpu.memory_space<vmem>>, vector<16x16x128xf32>
    %11 = vector.shape_cast %10 : vector<16x16x128xf32> to vector<256x128xf32>
    %12 = arith.truncf %11 : vector<256x128xf32> to vector<256x128xbf16>
    %c0_16 = arith.constant 0 : index
    %c128 = arith.constant 128 : index
    %13 = vector.load %arg6[%c0_16, %c128] : memref<256x1152xbf16, #tpu.memory_space<vmem>>, vector<256x128xbf16>
    tpu.vector_store %arg6[%c0_16, %c128], %12 {strides = array<i32>} : memref<256x1152xbf16, #tpu.memory_space<vmem>>, vector<256x128xbf16>,
    %c0_17 = arith.constant 0 : index
    %c2 = arith.constant 2 : index
    %c0_18 = arith.constant 0 : index
    %14 = vector.load %arg5[%c0_17, %c2, %c0_18] : memref<18x18x128xf32, #tpu.memory_space<vmem>>, vector<16x16x128xf32>
    %15 = vector.shape_cast %14 : vector<16x16x128xf32> to vector<256x128xf32>
    %16 = arith.truncf %15 : vector<256x128xf32> to vector<256x128xbf16>
    %c0_19 = arith.constant 0 : index
    %c256 = arith.constant 256 : index
    %17 = vector.load %arg6[%c0_19, %c256] : memref<256x1152xbf16, #tpu.memory_space<vmem>>, vector<256x128xbf16>
    tpu.vector_store %arg6[%c0_19, %c256], %16 {strides = array<i32>} : memref<256x1152xbf16, #tpu.memory_space<vmem>>, vector<256x128xbf16>,
    %c1_20 = arith.constant 1 : index
    %c0_21 = arith.constant 0 : index
    %c0_22 = arith.constant 0 : index
    %18 = vector.load %arg5[%c1_20, %c0_21, %c0_22] : memref<18x18x128xf32, #tpu.memory_space<vmem>>, vector<16x16x128xf32>
    %19 = vector.shape_cast %18 : vector<16x16x128xf32> to vector<256x128xf32>
    %20 = arith.truncf %19 : vector<256x128xf32> to vector<256x128xbf16>
    %c0_23 = arith.constant 0 : index
    %c384 = arith.constant 384 : index
    %21 = vector.load %arg6[%c0_23, %c384] : memref<256x1152xbf16, #tpu.memory_space<vmem>>, vector<256x128xbf16>
    tpu.vector_store %arg6[%c0_23, %c384], %20 {strides = array<i32>} : memref<256x1152xbf16, #tpu.memory_space<vmem>>, vector<256x128xbf16>,
    %c1_24 = arith.constant 1 : index
    %c1_25 = arith.constant 1 : index
    %c0_26 = arith.constant 0 : index
    %22 = vector.load %arg5[%c1_24, %c1_25, %c0_26] : memref<18x18x128xf32, #tpu.memory_space<vmem>>, vector<16x16x128xf32>
    %23 = vector.shape_cast %22 : vector<16x16x128xf32> to vector<256x128xf32>
    %24 = arith.truncf %23 : vector<256x128xf32> to vector<256x128xbf16>
    %c0_27 = arith.constant 0 : index
    %c512 = arith.constant 512 : index
    %25 = vector.load %arg6[%c0_27, %c512] : memref<256x1152xbf16, #tpu.memory_space<vmem>>, vector<256x128xbf16>
    tpu.vector_store %arg6[%c0_27, %c512], %24 {strides = array<i32>} : memref<256x1152xbf16, #tpu.memory_space<vmem>>, vector<256x128xbf16>,
    %c1_28 = arith.constant 1 : index
    %c2_29 = arith.constant 2 : index
    %c0_30 = arith.constant 0 : index
    %26 = vector.load %arg5[%c1_28, %c2_29, %c0_30] : memref<18x18x128xf32, #tpu.memory_space<vmem>>, vector<16x16x128xf32>
    %27 = vector.shape_cast %26 : vector<16x16x128xf32> to vector<256x128xf32>
    %28 = arith.truncf %27 : vector<256x128xf32> to vector<256x128xbf16>
    %c0_31 = arith.constant 0 : index
    %c640 = arith.constant 640 : index
    %29 = vector.load %arg6[%c0_31, %c640] : memref<256x1152xbf16, #tpu.memory_space<vmem>>, vector<256x128xbf16>
    tpu.vector_store %arg6[%c0_31, %c640], %28 {strides = array<i32>} : memref<256x1152xbf16, #tpu.memory_space<vmem>>, vector<256x128xbf16>,
    %c2_32 = arith.constant 2 : index
    %c0_33 = arith.constant 0 : index
    %c0_34 = arith.constant 0 : index
    %30 = vector.load %arg5[%c2_32, %c0_33, %c0_34] : memref<18x18x128xf32, #tpu.memory_space<vmem>>, vector<16x16x128xf32>
    %31 = vector.shape_cast %30 : vector<16x16x128xf32> to vector<256x128xf32>
    %32 = arith.truncf %31 : vector<256x128xf32> to vector<256x128xbf16>
    %c0_35 = arith.constant 0 : index
    %c768 = arith.constant 768 : index
    %33 = vector.load %arg6[%c0_35, %c768] : memref<256x1152xbf16, #tpu.memory_space<vmem>>, vector<256x128xbf16>
    tpu.vector_store %arg6[%c0_35, %c768], %32 {strides = array<i32>} : memref<256x1152xbf16, #tpu.memory_space<vmem>>, vector<256x128xbf16>,
    %c2_36 = arith.constant 2 : index
    %c1_37 = arith.constant 1 : index
    %c0_38 = arith.constant 0 : index
    %34 = vector.load %arg5[%c2_36, %c1_37, %c0_38] : memref<18x18x128xf32, #tpu.memory_space<vmem>>, vector<16x16x128xf32>
    %35 = vector.shape_cast %34 : vector<16x16x128xf32> to vector<256x128xf32>
    %36 = arith.truncf %35 : vector<256x128xf32> to vector<256x128xbf16>
    %c0_39 = arith.constant 0 : index
    %c896 = arith.constant 896 : index
    %37 = vector.load %arg6[%c0_39, %c896] : memref<256x1152xbf16, #tpu.memory_space<vmem>>, vector<256x128xbf16>
    tpu.vector_store %arg6[%c0_39, %c896], %36 {strides = array<i32>} : memref<256x1152xbf16, #tpu.memory_space<vmem>>, vector<256x128xbf16>,
    %c2_40 = arith.constant 2 : index
    %c2_41 = arith.constant 2 : index
    %c0_42 = arith.constant 0 : index
    %38 = vector.load %arg5[%c2_40, %c2_41, %c0_42] : memref<18x18x128xf32, #tpu.memory_space<vmem>>, vector<16x16x128xf32>
    %39 = vector.shape_cast %38 : vector<16x16x128xf32> to vector<256x128xf32>
    %40 = arith.truncf %39 : vector<256x128xf32> to vector<256x128xbf16>
    %c0_43 = arith.constant 0 : index
    %c1024 = arith.constant 1024 : index
    %41 = vector.load %arg6[%c0_43, %c1024] : memref<256x1152xbf16, #tpu.memory_space<vmem>>, vector<256x128xbf16>
    tpu.vector_store %arg6[%c0_43, %c1024], %40 {strides = array<i32>} : memref<256x1152xbf16, #tpu.memory_space<vmem>>, vector<256x128xbf16>,
    %c0_44 = arith.constant 0 : index
    %c0_45 = arith.constant 0 : index
    %42 = vector.load %arg6[%c0_44, %c0_45] : memref<256x1152xbf16, #tpu.memory_space<vmem>>, vector<256x1152xbf16>
    %c0_46 = arith.constant 0 : index
    %c0_47 = arith.constant 0 : index
    %43 = vector.load %arg2[%c0_46, %c0_47] : memref<1152x128xbf16, #tpu.memory_space<vmem>>, vector<1152x128xbf16>
    %cst_48 = arith.constant dense<0.000000e+00> : vector<256x128xf32>
    %44 = tpu.matmul %42, %43, %cst_48 {dimension_numbers = #tpu.dot_dimension_numbers<[1], [0], [0], [1], [0, 0, 1, 1], [], []>} : vector<256x1152xbf16>, vector<1152x128xbf16>, vector<256x128xf32> -> vector<256x128xf32>
    %c0_49 = arith.constant 0 : index
    %c0_50 = arith.constant 0 : index
    %c0_51 = arith.constant 0 : index
    %45 = vector.load %arg3[%c0_49, %c0_50, %c0_51] : memref<1x256x128xf32, #tpu.memory_space<vmem>>, vector<1x256x128xf32>
    %46 = vector.shape_cast %45 : vector<1x256x128xf32> to vector<256x128xf32>
    %47 = vector.shape_cast %44 : vector<256x128xf32> to vector<1x256x128xf32>
    tpu.vector_store %arg3[%c0_49, %c0_50, %c0_51], %47 {strides = array<i32>} : memref<1x256x128xf32, #tpu.memory_space<vmem>>, vector<1x256x128xf32>,
    %cst_52 = arith.constant dense<0.000000e+00> : vector<128xf32>
    %48 = vector.multi_reduction <add>, %44, %cst_52 [0] : vector<256x128xf32> to vector<128xf32>
    %49 = vector.shape_cast %48 : vector<128xf32> to vector<1x128xf32>
    %cst_53 = arith.constant 3.906250e-03 : f32
    %50 = vector.broadcast %cst_53 : f32 to vector<1x128xf32>
    %51 = arith.mulf %49, %50 : vector<1x128xf32>
    %52 = vector.broadcast %51 : vector<1x128xf32> to vector<256x128xf32>
    %53 = arith.subf %44, %52 : vector<256x128xf32>
    %54 = arith.mulf %53, %53 : vector<256x128xf32>
    %cst_54 = arith.constant dense<0.000000e+00> : vector<128xf32>
    %55 = vector.multi_reduction <add>, %54, %cst_54 [0] : vector<256x128xf32> to vector<128xf32>
    %56 = vector.shape_cast %55 : vector<128xf32> to vector<1x128xf32>
    %c0_55 = arith.constant 0 : index
    %c0_56 = arith.constant 0 : index
    %c0_57 = arith.constant 0 : index
    %57 = vector.load %arg4[%c0_55, %c0_56, %c0_57] : memref<1x2x128xf32, #tpu.memory_space<vmem>>, vector<1x1x128xf32>
    %58 = vector.shape_cast %57 : vector<1x1x128xf32> to vector<1x128xf32>
    %59 = vector.shape_cast %49 : vector<1x128xf32> to vector<1x1x128xf32>
    tpu.vector_store %arg4[%c0_55, %c0_56, %c0_57], %59 {strides = array<i32>} : memref<1x2x128xf32, #tpu.memory_space<vmem>>, vector<1x1x128xf32>,
    %c0_58 = arith.constant 0 : index
    %c1_59 = arith.constant 1 : index
    %c0_60 = arith.constant 0 : index
    %60 = vector.load %arg4[%c0_58, %c1_59, %c0_60] : memref<1x2x128xf32, #tpu.memory_space<vmem>>, vector<1x1x128xf32>
    %61 = vector.shape_cast %60 : vector<1x1x128xf32> to vector<1x128xf32>
    %62 = vector.shape_cast %56 : vector<1x128xf32> to vector<1x1x128xf32>
    tpu.vector_store %arg4[%c0_58, %c1_59, %c0_60], %62 {strides = array<i32>} : memref<1x2x128xf32, #tpu.memory_space<vmem>>, vector<1x1x128xf32>,
    return
  }
  func.func @transform_0(%arg0: i32) -> (i32, i32, i32, i32) {
    %c0_i32 = arith.constant 0 : i32
    %c0_i32_0 = arith.constant 0 : i32
    %c0_i32_1 = arith.constant 0 : i32
    %c0_i32_2 = arith.constant 0 : i32
    return %arg0, %c0_i32, %c0_i32_0, %c0_i32_1 : i32, i32, i32, i32
  }
  func.func @transform_1(%arg0: i32) -> (i32, i32) {
    %c0_i32 = arith.constant 0 : i32
    %c0_i32_0 = arith.constant 0 : i32
    %c0_i32_1 = arith.constant 0 : i32
    return %c0_i32, %c0_i32_0 : i32, i32
  }
  func.func @transform_2(%arg0: i32) -> (i32, i32, i32) {
    %c0_i32 = arith.constant 0 : i32
    %c0_i32_0 = arith.constant 0 : i32
    %c0_i32_1 = arith.constant 0 : i32
    return %arg0, %c0_i32, %c0_i32_0 : i32, i32, i32
  }
  func.func @transform_3(%arg0: i32) -> (i32, i32, i32) {
    %c0_i32 = arith.constant 0 : i32
    %c0_i32_0 = arith.constant 0 : i32
    %c0_i32_1 = arith.constant 0 : i32
    return %arg0, %c0_i32, %c0_i32_0 : i32, i32, i32
  }
}

module attributes {stable_mosaic.version = 11 : i64} {
  func.func @bn2_add_relu_kernel(%arg0: i32, %arg1: memref<512x128xf32, #tpu.memory_space<vmem>>, %arg2: memref<2x128xf32, #tpu.memory_space<vmem>>, %arg3: memref<1x128xf32, #tpu.memory_space<vmem>>, %arg4: memref<1x128xf32, #tpu.memory_space<vmem>>, %arg5: memref<512x128xf32, #tpu.memory_space<vmem>>, %arg6: memref<512x128xf32, #tpu.memory_space<vmem>>) attributes {dimension_semantics = [#tpu.dimension_semantics<parallel>], iteration_bounds = array<i64: 1>, scalar_prefetch = 0 : i64, scratch_operands = 0 : i64, tpu.core_type = #tpu.core_type<tc>, window_params = [{transform_indices = @transform_0, window_bounds = array<i64: 512, 128>}, {pipeline_mode = #tpu.pipeline_mode<synchronous>, transform_indices = @transform_1, window_bounds = array<i64: 2, 128>}, {pipeline_mode = #tpu.pipeline_mode<synchronous>, transform_indices = @transform_2, window_bounds = array<i64: 1, 128>}, {pipeline_mode = #tpu.pipeline_mode<synchronous>, transform_indices = @transform_3, window_bounds = array<i64: 1, 128>}, {transform_indices = @transform_4, window_bounds = array<i64: 512, 128>}, {transform_indices = @transform_5, window_bounds = array<i64: 512, 128>}]} {
    %c0 = arith.constant 0 : index
    %c0_0 = arith.constant 0 : index
    %0 = vector.load %arg2[%c0, %c0_0] : memref<2x128xf32, #tpu.memory_space<vmem>>, vector<1x128xf32>
    %c1 = arith.constant 1 : index
    %c0_1 = arith.constant 0 : index
    %1 = vector.load %arg2[%c1, %c0_1] : memref<2x128xf32, #tpu.memory_space<vmem>>, vector<1x128xf32>
    %cst = arith.constant 9.99999974E-6 : f32
    %2 = vector.broadcast %cst : f32 to vector<1x128xf32>
    %3 = arith.addf %1, %2 : vector<1x128xf32>
    %4 = math.rsqrt %3 : vector<1x128xf32>
    %c0_2 = arith.constant 0 : index
    %c0_3 = arith.constant 0 : index
    %5 = vector.load %arg3[%c0_2, %c0_3] : memref<1x128xf32, #tpu.memory_space<vmem>>, vector<1x128xf32>
    %6 = arith.mulf %4, %5 : vector<1x128xf32>
    %c0_4 = arith.constant 0 : index
    %c0_5 = arith.constant 0 : index
    %7 = vector.load %arg4[%c0_4, %c0_5] : memref<1x128xf32, #tpu.memory_space<vmem>>, vector<1x128xf32>
    %8 = arith.mulf %0, %6 : vector<1x128xf32>
    %9 = arith.subf %7, %8 : vector<1x128xf32>
    %c0_6 = arith.constant 0 : index
    %c0_7 = arith.constant 0 : index
    %10 = vector.load %arg1[%c0_6, %c0_7] : memref<512x128xf32, #tpu.memory_space<vmem>>, vector<512x128xf32>
    %11 = vector.broadcast %6 : vector<1x128xf32> to vector<512x128xf32>
    %12 = arith.mulf %10, %11 : vector<512x128xf32>
    %13 = vector.broadcast %9 : vector<1x128xf32> to vector<512x128xf32>
    %14 = arith.addf %12, %13 : vector<512x128xf32>
    %c0_8 = arith.constant 0 : index
    %c0_9 = arith.constant 0 : index
    %15 = vector.load %arg5[%c0_8, %c0_9] : memref<512x128xf32, #tpu.memory_space<vmem>>, vector<512x128xf32>
    %16 = arith.addf %14, %15 : vector<512x128xf32>
    %cst_10 = arith.constant 0.000000e+00 : f32
    %17 = vector.broadcast %cst_10 : f32 to vector<512x128xf32>
    %18 = arith.maximumf %16, %17 : vector<512x128xf32>
    %c0_11 = arith.constant 0 : index
    %c0_12 = arith.constant 0 : index
    %19 = vector.load %arg6[%c0_11, %c0_12] : memref<512x128xf32, #tpu.memory_space<vmem>>, vector<512x128xf32>
    tpu.vector_store %arg6[%c0_11, %c0_12], %18 {strides = array<i32>} : memref<512x128xf32, #tpu.memory_space<vmem>>, vector<512x128xf32>,
    return
  }
  func.func @transform_0(%arg0: i32) -> (i32, i32) {
    %c0_i32 = arith.constant 0 : i32
    %c0_i32_0 = arith.constant 0 : i32
    return %arg0, %c0_i32 : i32, i32
  }
  func.func @transform_1(%arg0: i32) -> (i32, i32) {
    %c0_i32 = arith.constant 0 : i32
    %c0_i32_0 = arith.constant 0 : i32
    %c0_i32_1 = arith.constant 0 : i32
    return %c0_i32, %c0_i32_0 : i32, i32
  }
  func.func @transform_2(%arg0: i32) -> (i32, i32) {
    %c0_i32 = arith.constant 0 : i32
    %c0_i32_0 = arith.constant 0 : i32
    %c0_i32_1 = arith.constant 0 : i32
    return %c0_i32, %c0_i32_0 : i32, i32
  }
  func.func @transform_3(%arg0: i32) -> (i32, i32) {
    %c0_i32 = arith.constant 0 : i32
    %c0_i32_0 = arith.constant 0 : i32
    %c0_i32_1 = arith.constant 0 : i32
    return %c0_i32, %c0_i32_0 : i32, i32
  }
  func.func @transform_4(%arg0: i32) -> (i32, i32) {
    %c0_i32 = arith.constant 0 : i32
    %c0_i32_0 = arith.constant 0 : i32
    return %arg0, %c0_i32 : i32, i32
  }
  func.func @transform_5(%arg0: i32) -> (i32, i32) {
    %c0_i32 = arith.constant 0 : i32
    %c0_i32_0 = arith.constant 0 : i32
    return %arg0, %c0_i32 : i32, i32
  }
}

module attributes {stable_mosaic.version = 11 : i64} {
  func.func @bn1_conv3x3_stats_kernel(%arg0: i32, %arg1: memref<1x256x128xf32, #tpu.memory_space<vmem>>, %arg2: memref<2x128xf32, #tpu.memory_space<vmem>>, %arg3: memref<1x128xf32, #tpu.memory_space<vmem>>, %arg4: memref<1x128xf32, #tpu.memory_space<vmem>>, %arg5: memref<1152x128xbf16, #tpu.memory_space<vmem>>, %arg6: memref<1x256x128xf32, #tpu.memory_space<vmem>>, %arg7: memref<1x2x128xf32, #tpu.memory_space<vmem>>, %arg8: memref<18x18x128xf32, #tpu.memory_space<vmem>>, %arg9: memref<256x1152xbf16, #tpu.memory_space<vmem>>) attributes {dimension_semantics = [#tpu.dimension_semantics<parallel>], iteration_bounds = array<i64: 2>, scalar_prefetch = 0 : i64, scratch_operands = 2 : i64, tpu.core_type = #tpu.core_type<tc>, window_params = [{transform_indices = @transform_0, window_bounds = array<i64: 1, 256, 128>}, {pipeline_mode = #tpu.pipeline_mode<synchronous>, transform_indices = @transform_1, window_bounds = array<i64: 2, 128>}, {pipeline_mode = #tpu.pipeline_mode<synchronous>, transform_indices = @transform_2, window_bounds = array<i64: 1, 128>}, {pipeline_mode = #tpu.pipeline_mode<synchronous>, transform_indices = @transform_3, window_bounds = array<i64: 1, 128>}, {pipeline_mode = #tpu.pipeline_mode<synchronous>, transform_indices = @transform_4, window_bounds = array<i64: 1152, 128>}, {transform_indices = @transform_5, window_bounds = array<i64: 1, 256, 128>}, {transform_indices = @transform_6, window_bounds = array<i64: 1, 2, 128>}]} {
    %c0 = arith.constant 0 : index
    %c0_0 = arith.constant 0 : index
    %0 = vector.load %arg2[%c0, %c0_0] : memref<2x128xf32, #tpu.memory_space<vmem>>, vector<1x128xf32>
    %c1 = arith.constant 1 : index
    %c0_1 = arith.constant 0 : index
    %1 = vector.load %arg2[%c1, %c0_1] : memref<2x128xf32, #tpu.memory_space<vmem>>, vector<1x128xf32>
    %cst = arith.constant 9.99999974E-6 : f32
    %2 = vector.broadcast %cst : f32 to vector<1x128xf32>
    %3 = arith.addf %1, %2 : vector<1x128xf32>
    %4 = math.rsqrt %3 : vector<1x128xf32>
    %c0_2 = arith.constant 0 : index
    %c0_3 = arith.constant 0 : index
    %5 = vector.load %arg3[%c0_2, %c0_3] : memref<1x128xf32, #tpu.memory_space<vmem>>, vector<1x128xf32>
    %6 = arith.mulf %4, %5 : vector<1x128xf32>
    %c0_4 = arith.constant 0 : index
    %c0_5 = arith.constant 0 : index
    %7 = vector.load %arg4[%c0_4, %c0_5] : memref<1x128xf32, #tpu.memory_space<vmem>>, vector<1x128xf32>
    %8 = arith.mulf %0, %6 : vector<1x128xf32>
    %9 = arith.subf %7, %8 : vector<1x128xf32>
    %c0_6 = arith.constant 0 : index
    %c0_7 = arith.constant 0 : index
    %c0_8 = arith.constant 0 : index
    %10 = vector.load %arg1[%c0_6, %c0_7, %c0_8] : memref<1x256x128xf32, #tpu.memory_space<vmem>>, vector<1x256x128xf32>
    %11 = vector.shape_cast %10 : vector<1x256x128xf32> to vector<256x128xf32>
    %12 = vector.broadcast %6 : vector<1x128xf32> to vector<256x128xf32>
    %13 = arith.mulf %11, %12 : vector<256x128xf32>
    %14 = vector.broadcast %9 : vector<1x128xf32> to vector<256x128xf32>
    %15 = arith.addf %13, %14 : vector<256x128xf32>
    %cst_9 = arith.constant 0.000000e+00 : f32
    %16 = vector.broadcast %cst_9 : f32 to vector<256x128xf32>
    %17 = arith.maximumf %15, %16 : vector<256x128xf32>
    %cst_10 = arith.constant 0.000000e+00 : f32
    %18 = vector.broadcast %cst_10 : f32 to vector<18x18x128xf32>
    %c0_11 = arith.constant 0 : index
    %c0_12 = arith.constant 0 : index
    %c0_13 = arith.constant 0 : index
    %19 = vector.load %arg8[%c0_11, %c0_12, %c0_13] : memref<18x18x128xf32, #tpu.memory_space<vmem>>, vector<18x18x128xf32>
    tpu.vector_store %arg8[%c0_11, %c0_12, %c0_13], %18 {strides = array<i32>} : memref<18x18x128xf32, #tpu.memory_space<vmem>>, vector<18x18x128xf32>,
    %20 = vector.shape_cast %17 : vector<256x128xf32> to vector<16x16x128xf32>
    %c1_14 = arith.constant 1 : index
    %c1_15 = arith.constant 1 : index
    %c0_16 = arith.constant 0 : index
    %21 = vector.load %arg8[%c1_14, %c1_15, %c0_16] : memref<18x18x128xf32, #tpu.memory_space<vmem>>, vector<16x16x128xf32>
    tpu.vector_store %arg8[%c1_14, %c1_15, %c0_16], %20 {strides = array<i32>} : memref<18x18x128xf32, #tpu.memory_space<vmem>>, vector<16x16x128xf32>,
    %c0_17 = arith.constant 0 : index
    %c0_18 = arith.constant 0 : index
    %c0_19 = arith.constant 0 : index
    %22 = vector.load %arg8[%c0_17, %c0_18, %c0_19] : memref<18x18x128xf32, #tpu.memory_space<vmem>>, vector<16x16x128xf32>
    %23 = vector.shape_cast %22 : vector<16x16x128xf32> to vector<256x128xf32>
    %24 = arith.truncf %23 : vector<256x128xf32> to vector<256x128xbf16>
    %c0_20 = arith.constant 0 : index
    %c0_21 = arith.constant 0 : index
    %25 = vector.load %arg9[%c0_20, %c0_21] : memref<256x1152xbf16, #tpu.memory_space<vmem>>, vector<256x128xbf16>
    tpu.vector_store %arg9[%c0_20, %c0_21], %24 {strides = array<i32>} : memref<256x1152xbf16, #tpu.memory_space<vmem>>, vector<256x128xbf16>,
    %c0_22 = arith.constant 0 : index
    %c1_23 = arith.constant 1 : index
    %c0_24 = arith.constant 0 : index
    %26 = vector.load %arg8[%c0_22, %c1_23, %c0_24] : memref<18x18x128xf32, #tpu.memory_space<vmem>>, vector<16x16x128xf32>
    %27 = vector.shape_cast %26 : vector<16x16x128xf32> to vector<256x128xf32>
    %28 = arith.truncf %27 : vector<256x128xf32> to vector<256x128xbf16>
    %c0_25 = arith.constant 0 : index
    %c128 = arith.constant 128 : index
    %29 = vector.load %arg9[%c0_25, %c128] : memref<256x1152xbf16, #tpu.memory_space<vmem>>, vector<256x128xbf16>
    tpu.vector_store %arg9[%c0_25, %c128], %28 {strides = array<i32>} : memref<256x1152xbf16, #tpu.memory_space<vmem>>, vector<256x128xbf16>,
    %c0_26 = arith.constant 0 : index
    %c2 = arith.constant 2 : index
    %c0_27 = arith.constant 0 : index
    %30 = vector.load %arg8[%c0_26, %c2, %c0_27] : memref<18x18x128xf32, #tpu.memory_space<vmem>>, vector<16x16x128xf32>
    %31 = vector.shape_cast %30 : vector<16x16x128xf32> to vector<256x128xf32>
    %32 = arith.truncf %31 : vector<256x128xf32> to vector<256x128xbf16>
    %c0_28 = arith.constant 0 : index
    %c256 = arith.constant 256 : index
    %33 = vector.load %arg9[%c0_28, %c256] : memref<256x1152xbf16, #tpu.memory_space<vmem>>, vector<256x128xbf16>
    tpu.vector_store %arg9[%c0_28, %c256], %32 {strides = array<i32>} : memref<256x1152xbf16, #tpu.memory_space<vmem>>, vector<256x128xbf16>,
    %c1_29 = arith.constant 1 : index
    %c0_30 = arith.constant 0 : index
    %c0_31 = arith.constant 0 : index
    %34 = vector.load %arg8[%c1_29, %c0_30, %c0_31] : memref<18x18x128xf32, #tpu.memory_space<vmem>>, vector<16x16x128xf32>
    %35 = vector.shape_cast %34 : vector<16x16x128xf32> to vector<256x128xf32>
    %36 = arith.truncf %35 : vector<256x128xf32> to vector<256x128xbf16>
    %c0_32 = arith.constant 0 : index
    %c384 = arith.constant 384 : index
    %37 = vector.load %arg9[%c0_32, %c384] : memref<256x1152xbf16, #tpu.memory_space<vmem>>, vector<256x128xbf16>
    tpu.vector_store %arg9[%c0_32, %c384], %36 {strides = array<i32>} : memref<256x1152xbf16, #tpu.memory_space<vmem>>, vector<256x128xbf16>,
    %c1_33 = arith.constant 1 : index
    %c1_34 = arith.constant 1 : index
    %c0_35 = arith.constant 0 : index
    %38 = vector.load %arg8[%c1_33, %c1_34, %c0_35] : memref<18x18x128xf32, #tpu.memory_space<vmem>>, vector<16x16x128xf32>
    %39 = vector.shape_cast %38 : vector<16x16x128xf32> to vector<256x128xf32>
    %40 = arith.truncf %39 : vector<256x128xf32> to vector<256x128xbf16>
    %c0_36 = arith.constant 0 : index
    %c512 = arith.constant 512 : index
    %41 = vector.load %arg9[%c0_36, %c512] : memref<256x1152xbf16, #tpu.memory_space<vmem>>, vector<256x128xbf16>
    tpu.vector_store %arg9[%c0_36, %c512], %40 {strides = array<i32>} : memref<256x1152xbf16, #tpu.memory_space<vmem>>, vector<256x128xbf16>,
    %c1_37 = arith.constant 1 : index
    %c2_38 = arith.constant 2 : index
    %c0_39 = arith.constant 0 : index
    %42 = vector.load %arg8[%c1_37, %c2_38, %c0_39] : memref<18x18x128xf32, #tpu.memory_space<vmem>>, vector<16x16x128xf32>
    %43 = vector.shape_cast %42 : vector<16x16x128xf32> to vector<256x128xf32>
    %44 = arith.truncf %43 : vector<256x128xf32> to vector<256x128xbf16>
    %c0_40 = arith.constant 0 : index
    %c640 = arith.constant 640 : index
    %45 = vector.load %arg9[%c0_40, %c640] : memref<256x1152xbf16, #tpu.memory_space<vmem>>, vector<256x128xbf16>
    tpu.vector_store %arg9[%c0_40, %c640], %44 {strides = array<i32>} : memref<256x1152xbf16, #tpu.memory_space<vmem>>, vector<256x128xbf16>,
    %c2_41 = arith.constant 2 : index
    %c0_42 = arith.constant 0 : index
    %c0_43 = arith.constant 0 : index
    %46 = vector.load %arg8[%c2_41, %c0_42, %c0_43] : memref<18x18x128xf32, #tpu.memory_space<vmem>>, vector<16x16x128xf32>
    %47 = vector.shape_cast %46 : vector<16x16x128xf32> to vector<256x128xf32>
    %48 = arith.truncf %47 : vector<256x128xf32> to vector<256x128xbf16>
    %c0_44 = arith.constant 0 : index
    %c768 = arith.constant 768 : index
    %49 = vector.load %arg9[%c0_44, %c768] : memref<256x1152xbf16, #tpu.memory_space<vmem>>, vector<256x128xbf16>
    tpu.vector_store %arg9[%c0_44, %c768], %48 {strides = array<i32>} : memref<256x1152xbf16, #tpu.memory_space<vmem>>, vector<256x128xbf16>,
    %c2_45 = arith.constant 2 : index
    %c1_46 = arith.constant 1 : index
    %c0_47 = arith.constant 0 : index
    %50 = vector.load %arg8[%c2_45, %c1_46, %c0_47] : memref<18x18x128xf32, #tpu.memory_space<vmem>>, vector<16x16x128xf32>
    %51 = vector.shape_cast %50 : vector<16x16x128xf32> to vector<256x128xf32>
    %52 = arith.truncf %51 : vector<256x128xf32> to vector<256x128xbf16>
    %c0_48 = arith.constant 0 : index
    %c896 = arith.constant 896 : index
    %53 = vector.load %arg9[%c0_48, %c896] : memref<256x1152xbf16, #tpu.memory_space<vmem>>, vector<256x128xbf16>
    tpu.vector_store %arg9[%c0_48, %c896], %52 {strides = array<i32>} : memref<256x1152xbf16, #tpu.memory_space<vmem>>, vector<256x128xbf16>,
    %c2_49 = arith.constant 2 : index
    %c2_50 = arith.constant 2 : index
    %c0_51 = arith.constant 0 : index
    %54 = vector.load %arg8[%c2_49, %c2_50, %c0_51] : memref<18x18x128xf32, #tpu.memory_space<vmem>>, vector<16x16x128xf32>
    %55 = vector.shape_cast %54 : vector<16x16x128xf32> to vector<256x128xf32>
    %56 = arith.truncf %55 : vector<256x128xf32> to vector<256x128xbf16>
    %c0_52 = arith.constant 0 : index
    %c1024 = arith.constant 1024 : index
    %57 = vector.load %arg9[%c0_52, %c1024] : memref<256x1152xbf16, #tpu.memory_space<vmem>>, vector<256x128xbf16>
    tpu.vector_store %arg9[%c0_52, %c1024], %56 {strides = array<i32>} : memref<256x1152xbf16, #tpu.memory_space<vmem>>, vector<256x128xbf16>,
    %c0_53 = arith.constant 0 : index
    %c0_54 = arith.constant 0 : index
    %58 = vector.load %arg9[%c0_53, %c0_54] : memref<256x1152xbf16, #tpu.memory_space<vmem>>, vector<256x1152xbf16>
    %c0_55 = arith.constant 0 : index
    %c0_56 = arith.constant 0 : index
    %59 = vector.load %arg5[%c0_55, %c0_56] : memref<1152x128xbf16, #tpu.memory_space<vmem>>, vector<1152x128xbf16>
    %cst_57 = arith.constant dense<0.000000e+00> : vector<256x128xf32>
    %60 = tpu.matmul %58, %59, %cst_57 {dimension_numbers = #tpu.dot_dimension_numbers<[1], [0], [0], [1], [0, 0, 1, 1], [], []>} : vector<256x1152xbf16>, vector<1152x128xbf16>, vector<256x128xf32> -> vector<256x128xf32>
    %c0_58 = arith.constant 0 : index
    %c0_59 = arith.constant 0 : index
    %c0_60 = arith.constant 0 : index
    %61 = vector.load %arg6[%c0_58, %c0_59, %c0_60] : memref<1x256x128xf32, #tpu.memory_space<vmem>>, vector<1x256x128xf32>
    %62 = vector.shape_cast %61 : vector<1x256x128xf32> to vector<256x128xf32>
    %63 = vector.shape_cast %60 : vector<256x128xf32> to vector<1x256x128xf32>
    tpu.vector_store %arg6[%c0_58, %c0_59, %c0_60], %63 {strides = array<i32>} : memref<1x256x128xf32, #tpu.memory_space<vmem>>, vector<1x256x128xf32>,
    %cst_61 = arith.constant dense<0.000000e+00> : vector<128xf32>
    %64 = vector.multi_reduction <add>, %60, %cst_61 [0] : vector<256x128xf32> to vector<128xf32>
    %65 = vector.shape_cast %64 : vector<128xf32> to vector<1x128xf32>
    %cst_62 = arith.constant 3.906250e-03 : f32
    %66 = vector.broadcast %cst_62 : f32 to vector<1x128xf32>
    %67 = arith.mulf %65, %66 : vector<1x128xf32>
    %68 = vector.broadcast %67 : vector<1x128xf32> to vector<256x128xf32>
    %69 = arith.subf %60, %68 : vector<256x128xf32>
    %70 = arith.mulf %69, %69 : vector<256x128xf32>
    %cst_63 = arith.constant dense<0.000000e+00> : vector<128xf32>
    %71 = vector.multi_reduction <add>, %70, %cst_63 [0] : vector<256x128xf32> to vector<128xf32>
    %72 = vector.shape_cast %71 : vector<128xf32> to vector<1x128xf32>
    %c0_64 = arith.constant 0 : index
    %c0_65 = arith.constant 0 : index
    %c0_66 = arith.constant 0 : index
    %73 = vector.load %arg7[%c0_64, %c0_65, %c0_66] : memref<1x2x128xf32, #tpu.memory_space<vmem>>, vector<1x1x128xf32>
    %74 = vector.shape_cast %73 : vector<1x1x128xf32> to vector<1x128xf32>
    %75 = vector.shape_cast %65 : vector<1x128xf32> to vector<1x1x128xf32>
    tpu.vector_store %arg7[%c0_64, %c0_65, %c0_66], %75 {strides = array<i32>} : memref<1x2x128xf32, #tpu.memory_space<vmem>>, vector<1x1x128xf32>,
    %c0_67 = arith.constant 0 : index
    %c1_68 = arith.constant 1 : index
    %c0_69 = arith.constant 0 : index
    %76 = vector.load %arg7[%c0_67, %c1_68, %c0_69] : memref<1x2x128xf32, #tpu.memory_space<vmem>>, vector<1x1x128xf32>
    %77 = vector.shape_cast %76 : vector<1x1x128xf32> to vector<1x128xf32>
    %78 = vector.shape_cast %72 : vector<1x128xf32> to vector<1x1x128xf32>
    tpu.vector_store %arg7[%c0_67, %c1_68, %c0_69], %78 {strides = array<i32>} : memref<1x2x128xf32, #tpu.memory_space<vmem>>, vector<1x1x128xf32>,
    return
  }
  func.func @transform_0(%arg0: i32) -> (i32, i32, i32) {
    %c0_i32 = arith.constant 0 : i32
    %c0_i32_0 = arith.constant 0 : i32
    %c0_i32_1 = arith.constant 0 : i32
    return %arg0, %c0_i32, %c0_i32_0 : i32, i32, i32
  }
  func.func @transform_1(%arg0: i32) -> (i32, i32) {
    %c0_i32 = arith.constant 0 : i32
    %c0_i32_0 = arith.constant 0 : i32
    %c0_i32_1 = arith.constant 0 : i32
    return %c0_i32, %c0_i32_0 : i32, i32
  }
  func.func @transform_2(%arg0: i32) -> (i32, i32) {
    %c0_i32 = arith.constant 0 : i32
    %c0_i32_0 = arith.constant 0 : i32
    %c0_i32_1 = arith.constant 0 : i32
    return %c0_i32, %c0_i32_0 : i32, i32
  }
  func.func @transform_3(%arg0: i32) -> (i32, i32) {
    %c0_i32 = arith.constant 0 : i32
    %c0_i32_0 = arith.constant 0 : i32
    %c0_i32_1 = arith.constant 0 : i32
    return %c0_i32, %c0_i32_0 : i32, i32
  }
  func.func @transform_4(%arg0: i32) -> (i32, i32) {
    %c0_i32 = arith.constant 0 : i32
    %c0_i32_0 = arith.constant 0 : i32
    %c0_i32_1 = arith.constant 0 : i32
    return %c0_i32, %c0_i32_0 : i32, i32
  }
  func.func @transform_5(%arg0: i32) -> (i32, i32, i32) {
    %c0_i32 = arith.constant 0 : i32
    %c0_i32_0 = arith.constant 0 : i32
    %c0_i32_1 = arith.constant 0 : i32
    return %arg0, %c0_i32, %c0_i32_0 : i32, i32, i32
  }
  func.func @transform_6(%arg0: i32) -> (i32, i32, i32) {
    %c0_i32 = arith.constant 0 : i32
    %c0_i32_0 = arith.constant 0 : i32
    %c0_i32_1 = arith.constant 0 : i32
    return %arg0, %c0_i32, %c0_i32_0 : i32, i32, i32
  }
}

</mosaic_0001>

<bundles_post_ra>
// kernel: residual_block.5
= control target key start
LH: loop header
LB: loop body
LE: loop exit
PB: predicated region body
PF: predicated region fallthrough
CT: control target
= control target key end

     0   :  { %v93_v2 = vlaneseq  ;;  %s1243_s1 = inlined_call_operand.vmem [shape: f32[2,128], index: 1, kind: input, shape index: {}]   ;;  %s1244_s2 = inlined_call_operand.vmem [shape: f32[1,128], index: 2, kind: input, shape index: {}]   ;;  %s1245_s0 = inlined_call_operand.vmem [shape: f32[512,128], index: 0, kind: input, shape index: {}]   ;;  %s1246_s3 = inlined_call_operand.vmem [shape: f32[1,128], index: 3, kind: input, shape index: {}]   ;;  %s1247_s4 = inlined_call_operand.vmem [shape: f32[512,128], index: 4, kind: input, shape index: {}]   ;;  %s1248_s5 = inlined_call_operand.vmem [shape: f32[512,128], index: 5, kind: output, shape index: {}]  }
   0x1   :  { %v21_v0 = vld [vmem:[%s1243_s1 + $0x1] sm:$0x1]  ;;  %v24_v4 = vld [vmem:[%s1244_s2] sm:$0x1]  ;;  %v30_v11 = vld [vmem:[%s1245_s0 + $0x8] sm:$0xff] }
   0x2   :  { %v22_v1 = vadd.f32 1e-05, %v21_v0  ;;  %v94_v3 = vshrl.u32 %v93_v2, 7  ;;  %v20_v7 = vld [vmem:[%s1243_s1] sm:$0x1]  ;;  %v31_v12 = vld [vmem:[%s1245_s0 + $0x10] sm:$0xff] }
   0x3   :  { %v26_v9 = vld [vmem:[%s1246_s3] sm:$0x1]  ;;  %v32_v13 = vld [vmem:[%s1245_s0 + $0x18] sm:$0xff]  ;;  %v34_v17 = vld [vmem:[%s1245_s0 + $0x28] sm:$0xff] }
   0x4   :  { %491 = vrsqrt.f32 %v22_v1  ;;  %v95_v5 = vsub.s32 0, %v94_v3  ;;  %v29_v10 = vld [vmem:[%s1245_s0] sm:$0xff]  ;;  %v35_v18 = vld [vmem:[%s1245_s0 + $0x30] sm:$0xff]  ;;  %v36_v19 = vld [vmem:[%s1245_s0 + $0x38] sm:$0xff] }
   0x5   :  { %v33_v14 = vld [vmem:[%s1245_s0 + $0x20] sm:$0xff]  ;;  %v38_v21 = vld [vmem:[%s1245_s0 + $0x48] sm:$0xff]  ;;  %v39_v22 = vld [vmem:[%s1245_s0 + $0x50] sm:$0xff] }
   0x6   :  { %v37_v20 = vld [vmem:[%s1245_s0 + $0x40] sm:$0xff]  ;;  %v40_v27 = vld [vmem:[%s1245_s0 + $0x58] sm:$0xff]  ;;  %v42_v29 = vld [vmem:[%s1245_s0 + $0x68] sm:$0xff] }
   0x7   :  { %v41_v28 = vld [vmem:[%s1245_s0 + $0x60] sm:$0xff]  ;;  %v232_v36 = vld [vmem:[%s1247_s4 + $0x8] sm:$0xff]  ;;  %v233_v40 = vld [vmem:[%s1247_s4 + $0x10] sm:$0xff] }
   0x8   :  { %v231_v35 = vld [vmem:[%s1247_s4] sm:$0xff]  ;;  %v234_v41 = vld [vmem:[%s1247_s4 + $0x18] sm:$0xff]  ;;  %v236_v51 = vld [vmem:[%s1247_s4 + $0x28] sm:$0xff] }
   0x9   :  { %v235_v42 = vld [vmem:[%s1247_s4 + $0x20] sm:$0xff]  ;;  %v237_v52 = vld [vmem:[%s1247_s4 + $0x30] sm:$0xff]  ;;  %v238_v53 = vld [vmem:[%s1247_s4 + $0x38] sm:$0xff] }
   0xa   :  { %v239_v2 = vld [vmem:[%s1247_s4 + $0x40] sm:$0xff]  ;;  %v240_v3 = vld [vmem:[%s1247_s4 + $0x48] sm:$0xff] }
  0x11   :  { %v492_v6 = vpop.eup %491 }
  0x12   :  { %v25_v8 = vmul.f32 %v492_v6, %v24_v4 }
  0x14   :  { %v27_v15 = vmul.f32 %v25_v8, %v20_v7  ;;  %v550_v16 = vrot.slane %v25_v8, %v95_v5  ;;  %v43_v8 = vld [vmem:[%s1245_s0 + $0x70] sm:$0xff] }
  0x16   :  { %v28_v23 = vsub.f32 %v26_v9, %v27_v15  ;;  %v97_v24 = vmul.f32 %v550_v16, %v29_v10  ;;  %v98_v25 = vmul.f32 %v550_v16, %v30_v11  ;;  %v99_v26 = vmul.f32 %v550_v16, %v31_v12  ;;  %v44_v9 = vld [vmem:[%s1245_s0 + $0x78] sm:$0xff] }
  0x17   :  { %v100_v30 = vmul.f32 %v550_v16, %v32_v13  ;;  %v101_v31 = vmul.f32 %v550_v16, %v33_v14  ;;  %v102_v32 = vmul.f32 %v550_v16, %v34_v17  ;;  %v103_v33 = vmul.f32 %v550_v16, %v35_v18  ;;  %v241_v14 = vld [vmem:[%s1247_s4 + $0x50] sm:$0xff]  ;;  %v242_v15 = vld [vmem:[%s1247_s4 + $0x58] sm:$0xff] }
  0x18   :  { %v586_v34 = vrot.slane %v28_v23, %v95_v5  ;;  %v104_v37 = vmul.f32 %v550_v16, %v36_v19  ;;  %v105_v38 = vmul.f32 %v550_v16, %v37_v20  ;;  %v106_v39 = vmul.f32 %v550_v16, %v38_v21  ;;  %v243_v21 = vld [vmem:[%s1247_s4 + $0x60] sm:$0xff] }
  0x19   :  { %v107_v43 = vmul.f32 %v550_v16, %v39_v22  ;;  %v108_v44 = vmul.f32 %v550_v16, %v40_v27  ;;  %v109_v45 = vmul.f32 %v550_v16, %v41_v28  ;;  %v110_v46 = vmul.f32 %v550_v16, %v42_v29  ;;  %v244_v22 = vld [vmem:[%s1247_s4 + $0x68] sm:$0xff] }
  0x1a   :  { %v167_v47 = vadd.f32 %v586_v34, %v97_v24  ;;  %v168_v48 = vadd.f32 %v586_v34, %v98_v25  ;;  %v169_v49 = vadd.f32 %v586_v34, %v99_v26  ;;  %v170_v50 = vadd.f32 %v586_v34, %v100_v30 }
  0x1b   :  { %v171_v54 = vadd.f32 %v586_v34, %v101_v31  ;;  %v172_v55 = vadd.f32 %v586_v34, %v102_v32  ;;  %v173_v56 = vadd.f32 %v586_v34, %v103_v33  ;;  %v174_v57 = vadd.f32 %v586_v34, %v104_v37  ;;  %v245_v31 = vld [vmem:[%s1247_s4 + $0x70] sm:$0xff]  ;;  %v246_v32 = vld [vmem:[%s1247_s4 + $0x78] sm:$0xff]  ;;  %v45_v33 = vld [vmem:[%s1245_s0 + $0x80] sm:$0xff] }
  0x1c   :  { %v295_v58 = vadd.f32 %v231_v35, %v167_v47  ;;  %v296_v59 = vadd.f32 %v232_v36, %v168_v48  ;;  %v297_v60 = vadd.f32 %v233_v40, %v169_v49  ;;  %v298_v61 = vadd.f32 %v234_v41, %v170_v50  ;;  %v47_v40 = vld [vmem:[%s1245_s0 + $0x90] sm:$0xff]  ;;  %v48_v41 = vld [vmem:[%s1245_s0 + $0x98] sm:$0xff]  ;;  %v50_v47 = vld [vmem:[%s1245_s0 + $0xa8] sm:$0xff] }
  0x1d   :  { %v299_v62 = vadd.f32 %v235_v42, %v171_v54  ;;  %v300_v63 = vadd.f32 %v236_v51, %v172_v55  ;;  %v301_v0 = vadd.f32 %v237_v52, %v173_v56  ;;  %v302_v1 = vadd.f32 %v238_v53, %v174_v57  ;;  %v247_v53 = vld [vmem:[%s1247_s4 + $0x80] sm:$0xff]  ;;  %v51_v57 = vld [vmem:[%s1245_s0 + $0xb0] sm:$0xff] }
  0x1e   :  { %v359_v4 = vmax.f32 %v295_v58, 0.0  ;;  %v360_v5 = vmax.f32 %v296_v59, 0.0  ;;  %v361_v6 = vmax.f32 %v297_v60, 0.0  ;;  %v362_v7 = vmax.f32 %v298_v61, 0.0  ;;  %v52_v58 = vld [vmem:[%s1245_s0 + $0xb8] sm:$0xff]  ;;  %v248_v61 = vld [vmem:[%s1247_s4 + $0x88] sm:$0xff] }
  0x1f   :  { %v363_v10 = vmax.f32 %v299_v62, 0.0  ;;  %v364_v11 = vmax.f32 %v300_v63, 0.0  ;;  %v365_v12 = vmax.f32 %v301_v0, 0.0  ;;  %v366_v13 = vmax.f32 %v302_v1, 0.0  ;;  %v249_v62 = vld [vmem:[%s1247_s4 + $0x90] sm:$0xff]  ;;  %v250_v63 = vld [vmem:[%s1247_s4 + $0x98] sm:$0xff] }
  0x20   :  { %423 = vst [vmem:[%s1248_s5] sm:$0xff] %v359_v4  ;;  %424 = vst [vmem:[%s1248_s5 + $0x8] sm:$0xff] %v360_v5  ;;  %v175_v17 = vadd.f32 %v586_v34, %v105_v38  ;;  %v176_v18 = vadd.f32 %v586_v34, %v106_v39  ;;  %v177_v19 = vadd.f32 %v586_v34, %v107_v43  ;;  %v46_v39 = vld [vmem:[%s1245_s0 + $0x88] sm:$0xff] }
  0x21   :  { %425 = vst [vmem:[%s1248_s5 + $0x10] sm:$0xff] %v361_v6  ;;  %426 = vst [vmem:[%s1248_s5 + $0x18] sm:$0xff] %v362_v7  ;;  %v178_v20 = vadd.f32 %v586_v34, %v108_v44  ;;  %v179_v23 = vadd.f32 %v586_v34, %v109_v45  ;;  %v180_v24 = vadd.f32 %v586_v34, %v110_v46  ;;  %v49_v46 = vld [vmem:[%s1245_s0 + $0xa0] sm:$0xff]  ;;  %v252_v7 = vld [vmem:[%s1247_s4 + $0xa8] sm:$0xff] }
  0x22   :  { %427 = vst [vmem:[%s1248_s5 + $0x20] sm:$0xff] %v363_v10  ;;  %428 = vst [vmem:[%s1248_s5 + $0x28] sm:$0xff] %v364_v11  ;;  %v111_v25 = vmul.f32 %v550_v16, %v43_v8  ;;  %v112_v26 = vmul.f32 %v550_v16, %v44_v9  ;;  %v303_v27 = vadd.f32 %v239_v2, %v175_v17  ;;  %v251_v6 = vld [vmem:[%s1247_s4 + $0xa0] sm:$0xff]  ;;  %v253_v17 = vld [vmem:[%s1247_s4 + $0xb0] sm:$0xff] }
  0x23   :  { %429 = vst [vmem:[%s1248_s5 + $0x30] sm:$0xff] %v365_v12  ;;  %430 = vst [vmem:[%s1248_s5 + $0x38] sm:$0xff] %v366_v13  ;;  %v304_v28 = vadd.f32 %v240_v3, %v176_v18  ;;  %v305_v29 = vadd.f32 %v241_v14, %v177_v19  ;;  %v306_v30 = vadd.f32 %v242_v15, %v178_v20  ;;  %v254_v18 = vld [vmem:[%s1247_s4 + $0xb8] sm:$0xff]  ;;  %v53_v19 = vld [vmem:[%s1245_s0 + $0xc0] sm:$0xff] }
  0x24   :  { %v307_v35 = vadd.f32 %v243_v21, %v179_v23  ;;  %v308_v36 = vadd.f32 %v244_v22, %v180_v24  ;;  %v181_v37 = vadd.f32 %v586_v34, %v111_v25  ;;  %v182_v38 = vadd.f32 %v586_v34, %v112_v26  ;;  %v54_v24 = vld [vmem:[%s1245_s0 + $0xc8] sm:$0xff]  ;;  %v55_v25 = vld [vmem:[%s1245_s0 + $0xd0] sm:$0xff]  ;;  %v56_v26 = vld [vmem:[%s1245_s0 + $0xd8] sm:$0xff] }
  0x25   :  { %v367_v42 = vmax.f32 %v303_v27, 0.0  ;;  %v368_v43 = vmax.f32 %v304_v28, 0.0  ;;  %v369_v44 = vmax.f32 %v305_v29, 0.0  ;;  %v370_v45 = vmax.f32 %v306_v30, 0.0 }
  0x26   :  { %v371_v48 = vmax.f32 %v307_v35, 0.0  ;;  %v372_v49 = vmax.f32 %v308_v36, 0.0  ;;  %v309_v50 = vadd.f32 %v245_v31, %v181_v37  ;;  %v310_v51 = vadd.f32 %v246_v32, %v182_v38  ;;  %v57_v31 = vld [vmem:[%s1245_s0 + $0xe0] sm:$0xff]  ;;  %v58_v32 = vld [vmem:[%s1245_s0 + $0xe8] sm:$0xff] }
  0x27   :  { %431 = vst [vmem:[%s1248_s5 + $0x40] sm:$0xff] %v367_v42  ;;  %432 = vst [vmem:[%s1248_s5 + $0x48] sm:$0xff] %v368_v43  ;;  %v113_v52 = vmul.f32 %v550_v16, %v45_v33  ;;  %v114_v54 = vmul.f32 %v550_v16, %v46_v39  ;;  %v115_v55 = vmul.f32 %v550_v16, %v47_v40  ;;  %v255_v39 = vld [vmem:[%s1247_s4 + $0xc0] sm:$0xff]  ;;  %v59_v43 = vld [vmem:[%s1245_s0 + $0xf0] sm:$0xff] }
  0x28   :  { %433 = vst [vmem:[%s1248_s5 + $0x50] sm:$0xff] %v369_v44  ;;  %434 = vst [vmem:[%s1248_s5 + $0x58] sm:$0xff] %v370_v45  ;;  %v116_v56 = vmul.f32 %v550_v16, %v48_v41  ;;  %v373_v59 = vmax.f32 %v309_v50, 0.0  ;;  %v374_v60 = vmax.f32 %v310_v51, 0.0  ;;  %v117_v0 = vmul.f32 %v550_v16, %v49_v46  ;;  %v60_v44 = vld [vmem:[%s1245_s0 + $0xf8] sm:$0xff] }
  0x29   :  { %435 = vst [vmem:[%s1248_s5 + $0x60] sm:$0xff] %v371_v48  ;;  %436 = vst [vmem:[%s1248_s5 + $0x68] sm:$0xff] %v372_v49  ;;  %v118_v1 = vmul.f32 %v550_v16, %v50_v47  ;;  %v183_v2 = vadd.f32 %v586_v34, %v113_v52  ;;  %v184_v3 = vadd.f32 %v586_v34, %v114_v54  ;;  %v256_v47 = vld [vmem:[%s1247_s4 + $0xc8] sm:$0xff]  ;;  %v257_v48 = vld [vmem:[%s1247_s4 + $0xd0] sm:$0xff] }
  0x2a   :  { %v185_v4 = vadd.f32 %v586_v34, %v115_v55  ;;  %v186_v5 = vadd.f32 %v586_v34, %v116_v56  ;;  %437 = vst [vmem:[%s1248_s5 + $0x70] sm:$0xff] %v373_v59  ;;  %438 = vst [vmem:[%s1248_s5 + $0x78] sm:$0xff] %v374_v60  ;;  %v187_v8 = vadd.f32 %v586_v34, %v117_v0  ;;  %v258_v49 = vld [vmem:[%s1247_s4 + $0xd8] sm:$0xff]  ;;  %v259_v56 = vld [vmem:[%s1247_s4 + $0xe0] sm:$0xff] }
  0x2b   :  { %v188_v9 = vadd.f32 %v586_v34, %v118_v1  ;;  %v119_v10 = vmul.f32 %v550_v16, %v51_v57  ;;  %v120_v11 = vmul.f32 %v550_v16, %v52_v58  ;;  %v311_v12 = vadd.f32 %v247_v53, %v183_v2  ;;  %v260_v57 = vld [vmem:[%s1247_s4 + $0xe8] sm:$0xff]  ;;  %v261_v2 = vld [vmem:[%s1247_s4 + $0xf0] sm:$0xff] }
  0x2c   :  { %v312_v13 = vadd.f32 %v248_v61, %v184_v3  ;;  %v313_v14 = vadd.f32 %v249_v62, %v185_v4  ;;  %v314_v15 = vadd.f32 %v250_v63, %v186_v5  ;;  %v315_v20 = vadd.f32 %v251_v6, %v187_v8  ;;  %v262_v3 = vld [vmem:[%s1247_s4 + $0xf8] sm:$0xff]  ;;  %v61_v4 = vld [vmem:[%s1245_s0 + $0x100] sm:$0xff] }
  0x2d   :  { %v316_v21 = vadd.f32 %v252_v7, %v188_v9  ;;  %v189_v22 = vadd.f32 %v586_v34, %v119_v10  ;;  %v190_v23 = vadd.f32 %v586_v34, %v120_v11  ;;  %v375_v27 = vmax.f32 %v311_v12, 0.0  ;;  %v62_v9 = vld [vmem:[%s1245_s0 + $0x108] sm:$0xff]  ;;  %v63_v10 = vld [vmem:[%s1245_s0 + $0x110] sm:$0xff]  ;;  %v64_v11 = vld [vmem:[%s1245_s0 + $0x118] sm:$0xff] }
  0x2e   :  { %v376_v28 = vmax.f32 %v312_v13, 0.0  ;;  %v377_v29 = vmax.f32 %v313_v14, 0.0  ;;  %v378_v30 = vmax.f32 %v314_v15, 0.0  ;;  %v379_v33 = vmax.f32 %v315_v20, 0.0 }
  0x2f   :  { %v380_v35 = vmax.f32 %v316_v21, 0.0  ;;  %v317_v36 = vadd.f32 %v253_v17, %v189_v22  ;;  %v318_v37 = vadd.f32 %v254_v18, %v190_v23  ;;  %439 = vst [vmem:[%s1248_s5 + $0x80] sm:$0xff] %v375_v27  ;;  %v121_v38 = vmul.f32 %v550_v16, %v53_v19  ;;  %v65_v17 = vld [vmem:[%s1245_s0 + $0x120] sm:$0xff]  ;;  %v66_v18 = vld [vmem:[%s1245_s0 + $0x128] sm:$0xff] }
  0x30   :  { %440 = vst [vmem:[%s1248_s5 + $0x88] sm:$0xff] %v376_v28  ;;  %441 = vst [vmem:[%s1248_s5 + $0x90] sm:$0xff] %v377_v29  ;;  %v122_v40 = vmul.f32 %v550_v16, %v54_v24  ;;  %v123_v41 = vmul.f32 %v550_v16, %v55_v25  ;;  %v124_v42 = vmul.f32 %v550_v16, %v56_v26  ;;  %v263_v24 = vld [vmem:[%s1247_s4 + $0x100] sm:$0xff]  ;;  %v67_v28 = vld [vmem:[%s1245_s0 + $0x130] sm:$0xff] }
  0x31   :  { %442 = vst [vmem:[%s1248_s5 + $0x98] sm:$0xff] %v378_v30  ;;  %443 = vst [vmem:[%s1248_s5 + $0xa0] sm:$0xff] %v379_v33  ;;  %v381_v45 = vmax.f32 %v317_v36, 0.0  ;;  %v382_v46 = vmax.f32 %v318_v37, 0.0  ;;  %v125_v50 = vmul.f32 %v550_v16, %v57_v31  ;;  %v126_v51 = vmul.f32 %v550_v16, %v58_v32  ;;  %v68_v29 = vld [vmem:[%s1245_s0 + $0x138] sm:$0xff]  ;;  %v264_v32 = vld [vmem:[%s1247_s4 + $0x108] sm:$0xff] }
  0x32   :  { %444 = vst [vmem:[%s1248_s5 + $0xa8] sm:$0xff] %v380_v35  ;;  %v191_v52 = vadd.f32 %v586_v34, %v121_v38  ;;  %v192_v53 = vadd.f32 %v586_v34, %v122_v40  ;;  %v193_v54 = vadd.f32 %v586_v34, %v123_v41  ;;  %v194_v55 = vadd.f32 %v586_v34, %v124_v42  ;;  %v265_v33 = vld [vmem:[%s1247_s4 + $0x110] sm:$0xff]  ;;  %v266_v35 = vld [vmem:[%s1247_s4 + $0x118] sm:$0xff]  ;;  %v267_v42 = vld [vmem:[%s1247_s4 + $0x120] sm:$0xff] }
  0x33   :  { %445 = vst [vmem:[%s1248_s5 + $0xb0] sm:$0xff] %v381_v45  ;;  %446 = vst [vmem:[%s1248_s5 + $0xb8] sm:$0xff] %v382_v46  ;;  %v195_v58 = vadd.f32 %v586_v34, %v125_v50  ;;  %v196_v59 = vadd.f32 %v586_v34, %v126_v51  ;;  %v127_v60 = vmul.f32 %v550_v16, %v59_v43  ;;  %v268_v43 = vld [vmem:[%s1247_s4 + $0x128] sm:$0xff] }
  0x34   :  { %v128_v61 = vmul.f32 %v550_v16, %v60_v44  ;;  %v319_v62 = vadd.f32 %v255_v39, %v191_v52  ;;  %v320_v63 = vadd.f32 %v256_v47, %v192_v53  ;;  %v321_v0 = vadd.f32 %v257_v48, %v193_v54  ;;  %v269_v52 = vld [vmem:[%s1247_s4 + $0x130] sm:$0xff]  ;;  %v270_v53 = vld [vmem:[%s1247_s4 + $0x138] sm:$0xff]  ;;  %v69_v54 = vld [vmem:[%s1245_s0 + $0x140] sm:$0xff] }
  0x35   :  { %v322_v1 = vadd.f32 %v258_v49, %v194_v55  ;;  %v323_v5 = vadd.f32 %v259_v56, %v195_v58  ;;  %v324_v6 = vadd.f32 %v260_v57, %v196_v59  ;;  %v197_v7 = vadd.f32 %v586_v34, %v127_v60  ;;  %v70_v59 = vld [vmem:[%s1245_s0 + $0x148] sm:$0xff]  ;;  %v71_v60 = vld [vmem:[%s1245_s0 + $0x150] sm:$0xff] }
  0x36   :  { %v198_v8 = vadd.f32 %v586_v34, %v128_v61  ;;  %v383_v12 = vmax.f32 %v319_v62, 0.0  ;;  %v384_v13 = vmax.f32 %v320_v63, 0.0  ;;  %v385_v14 = vmax.f32 %v321_v0, 0.0  ;;  %v72_v61 = vld [vmem:[%s1245_s0 + $0x158] sm:$0xff] }
  0x37   :  { %v386_v15 = vmax.f32 %v322_v1, 0.0  ;;  %v387_v19 = vmax.f32 %v323_v5, 0.0  ;;  %v388_v20 = vmax.f32 %v324_v6, 0.0  ;;  %v325_v21 = vadd.f32 %v261_v2, %v197_v7  ;;  %v73_v2 = vld [vmem:[%s1245_s0 + $0x160] sm:$0xff] }
  0x38   :  { %v326_v22 = vadd.f32 %v262_v3, %v198_v8  ;;  %447 = vst [vmem:[%s1248_s5 + $0xc0] sm:$0xff] %v383_v12  ;;  %448 = vst [vmem:[%s1248_s5 + $0xc8] sm:$0xff] %v384_v13  ;;  %v129_v23 = vmul.f32 %v550_v16, %v61_v4  ;;  %v130_v25 = vmul.f32 %v550_v16, %v62_v9  ;;  %v74_v3 = vld [vmem:[%s1245_s0 + $0x168] sm:$0xff]  ;;  %v271_v9 = vld [vmem:[%s1247_s4 + $0x140] sm:$0xff] }
  0x39   :  { %449 = vst [vmem:[%s1248_s5 + $0xd0] sm:$0xff] %v385_v14  ;;  %450 = vst [vmem:[%s1248_s5 + $0xd8] sm:$0xff] %v386_v15  ;;  %v131_v26 = vmul.f32 %v550_v16, %v63_v10  ;;  %v132_v27 = vmul.f32 %v550_v16, %v64_v11  ;;  %v389_v30 = vmax.f32 %v325_v21, 0.0  ;;  %v133_v36 = vmul.f32 %v550_v16, %v65_v17  ;;  %v75_v13 = vld [vmem:[%s1245_s0 + $0x170] sm:$0xff]  ;;  %v76_v14 = vld [vmem:[%s1245_s0 + $0x178] sm:$0xff] }
  0x3a   :  { %451 = vst [vmem:[%s1248_s5 + $0xe0] sm:$0xff] %v387_v19  ;;  %452 = vst [vmem:[%s1248_s5 + $0xe8] sm:$0xff] %v388_v20  ;;  %v390_v31 = vmax.f32 %v326_v22, 0.0  ;;  %v134_v37 = vmul.f32 %v550_v16, %v66_v18  ;;  %v199_v38 = vadd.f32 %v586_v34, %v129_v23  ;;  %v200_v39 = vadd.f32 %v586_v34, %v130_v25  ;;  %v272_v18 = vld [vmem:[%s1247_s4 + $0x148] sm:$0xff]  ;;  %v273_v19 = vld [vmem:[%s1247_s4 + $0x150] sm:$0xff] }
  0x3b   :  { %v201_v40 = vadd.f32 %v586_v34, %v131_v26  ;;  %v202_v41 = vadd.f32 %v586_v34, %v132_v27  ;;  %453 = vst [vmem:[%s1248_s5 + $0xf0] sm:$0xff] %v389_v30  ;;  %v203_v44 = vadd.f32 %v586_v34, %v133_v36  ;;  %v135_v46 = vmul.f32 %v550_v16, %v67_v28  ;;  %v274_v20 = vld [vmem:[%s1247_s4 + $0x158] sm:$0xff]  ;;  %v275_v27 = vld [vmem:[%s1247_s4 + $0x160] sm:$0xff]  ;;  %v276_v28 = vld [vmem:[%s1247_s4 + $0x168] sm:$0xff] }
  0x3c   :  { %454 = vst [vmem:[%s1248_s5 + $0xf8] sm:$0xff] %v390_v31  ;;  %v204_v45 = vadd.f32 %v586_v34, %v134_v37  ;;  %v136_v47 = vmul.f32 %v550_v16, %v68_v29  ;;  %v327_v48 = vadd.f32 %v263_v24, %v199_v38  ;;  %v328_v49 = vadd.f32 %v264_v32, %v200_v39  ;;  %v277_v38 = vld [vmem:[%s1247_s4 + $0x170] sm:$0xff]  ;;  %v278_v39 = vld [vmem:[%s1247_s4 + $0x178] sm:$0xff] }
  0x3d   :  { %v329_v50 = vadd.f32 %v265_v33, %v201_v40  ;;  %v330_v51 = vadd.f32 %v266_v35, %v202_v41  ;;  %v331_v55 = vadd.f32 %v267_v42, %v203_v44  ;;  %v205_v57 = vadd.f32 %v586_v34, %v135_v46  ;;  %v77_v40 = vld [vmem:[%s1245_s0 + $0x180] sm:$0xff]  ;;  %v79_v46 = vld [vmem:[%s1245_s0 + $0x190] sm:$0xff] }
  0x3e   :  { %v332_v56 = vadd.f32 %v268_v43, %v204_v45  ;;  %v206_v58 = vadd.f32 %v586_v34, %v136_v47  ;;  %v391_v62 = vmax.f32 %v327_v48, 0.0  ;;  %v392_v63 = vmax.f32 %v328_v49, 0.0  ;;  %v78_v45 = vld [vmem:[%s1245_s0 + $0x188] sm:$0xff]  ;;  %v80_v47 = vld [vmem:[%s1245_s0 + $0x198] sm:$0xff] }
  0x3f   :  { %v393_v0 = vmax.f32 %v329_v50, 0.0  ;;  %v394_v1 = vmax.f32 %v330_v51, 0.0  ;;  %v395_v4 = vmax.f32 %v331_v55, 0.0  ;;  %v333_v6 = vadd.f32 %v269_v52, %v205_v57  ;;  %v81_v52 = vld [vmem:[%s1245_s0 + $0x1a0] sm:$0xff] }
  0x40   :  { %v396_v5 = vmax.f32 %v332_v56, 0.0  ;;  %v334_v7 = vadd.f32 %v270_v53, %v206_v58  ;;  %455 = vst [vmem:[%s1248_s5 + $0x100] sm:$0xff] %v391_v62  ;;  %456 = vst [vmem:[%s1248_s5 + $0x108] sm:$0xff] %v392_v63  ;;  %v137_v8 = vmul.f32 %v550_v16, %v69_v54  ;;  %v138_v10 = vmul.f32 %v550_v16, %v70_v59  ;;  %v82_v53 = vld [vmem:[%s1245_s0 + $0x1a8] sm:$0xff]  ;;  %v279_v59 = vld [vmem:[%s1247_s4 + $0x180] sm:$0xff] }
  0x41   :  { %457 = vst [vmem:[%s1248_s5 + $0x110] sm:$0xff] %v393_v0  ;;  %458 = vst [vmem:[%s1248_s5 + $0x118] sm:$0xff] %v394_v1  ;;  %v139_v11 = vmul.f32 %v550_v16, %v71_v60  ;;  %v140_v12 = vmul.f32 %v550_v16, %v72_v61  ;;  %v397_v15 = vmax.f32 %v333_v6, 0.0  ;;  %v141_v21 = vmul.f32 %v550_v16, %v73_v2  ;;  %v83_v63 = vld [vmem:[%s1245_s0 + $0x1b0] sm:$0xff]  ;;  %v84_v0 = vld [vmem:[%s1245_s0 + $0x1b8] sm:$0xff] }
  0x42   :  { %459 = vst [vmem:[%s1248_s5 + $0x120] sm:$0xff] %v395_v4  ;;  %460 = vst [vmem:[%s1248_s5 + $0x128] sm:$0xff] %v396_v5  ;;  %v398_v17 = vmax.f32 %v334_v7, 0.0  ;;  %v142_v22 = vmul.f32 %v550_v16, %v74_v3  ;;  %v207_v23 = vadd.f32 %v586_v34, %v137_v8  ;;  %v208_v24 = vadd.f32 %v586_v34, %v138_v10  ;;  %v280_v3 = vld [vmem:[%s1247_s4 + $0x188] sm:$0xff]  ;;  %v281_v4 = vld [vmem:[%s1247_s4 + $0x190] sm:$0xff] }
  0x43   :  { %v209_v25 = vadd.f32 %v586_v34, %v139_v11  ;;  %v210_v26 = vadd.f32 %v586_v34, %v140_v12  ;;  %461 = vst [vmem:[%s1248_s5 + $0x130] sm:$0xff] %v397_v15  ;;  %v211_v29 = vadd.f32 %v586_v34, %v141_v21  ;;  %v143_v31 = vmul.f32 %v550_v16, %v75_v13  ;;  %v282_v5 = vld [vmem:[%s1247_s4 + $0x198] sm:$0xff]  ;;  %v283_v12 = vld [vmem:[%s1247_s4 + $0x1a0] sm:$0xff]  ;;  %v284_v13 = vld [vmem:[%s1247_s4 + $0x1a8] sm:$0xff] }
  0x44   :  { %462 = vst [vmem:[%s1248_s5 + $0x138] sm:$0xff] %v398_v17  ;;  %v212_v30 = vadd.f32 %v586_v34, %v142_v22  ;;  %v144_v32 = vmul.f32 %v550_v16, %v76_v14  ;;  %v335_v33 = vadd.f32 %v271_v9, %v207_v23  ;;  %v336_v35 = vadd.f32 %v272_v18, %v208_v24  ;;  %v285_v23 = vld [vmem:[%s1247_s4 + $0x1b0] sm:$0xff]  ;;  %v286_v24 = vld [vmem:[%s1247_s4 + $0x1b8] sm:$0xff] }
  0x45   :  { %v337_v36 = vadd.f32 %v273_v19, %v209_v25  ;;  %v338_v37 = vadd.f32 %v274_v20, %v210_v26  ;;  %v339_v41 = vadd.f32 %v275_v27, %v211_v29  ;;  %v213_v43 = vadd.f32 %v586_v34, %v143_v31  ;;  %v85_v25 = vld [vmem:[%s1245_s0 + $0x1c0] sm:$0xff]  ;;  %v87_v31 = vld [vmem:[%s1245_s0 + $0x1d0] sm:$0xff] }
  0x46   :  { %v340_v42 = vadd.f32 %v276_v28, %v212_v30  ;;  %v214_v44 = vadd.f32 %v586_v34, %v144_v32  ;;  %v399_v48 = vmax.f32 %v335_v33, 0.0  ;;  %v400_v49 = vmax.f32 %v336_v35, 0.0  ;;  %v86_v30 = vld [vmem:[%s1245_s0 + $0x1c8] sm:$0xff]  ;;  %v88_v32 = vld [vmem:[%s1245_s0 + $0x1d8] sm:$0xff] }
  0x47   :  { %v401_v50 = vmax.f32 %v337_v36, 0.0  ;;  %v402_v51 = vmax.f32 %v338_v37, 0.0  ;;  %v403_v54 = vmax.f32 %v339_v41, 0.0  ;;  %v341_v56 = vadd.f32 %v277_v38, %v213_v43  ;;  %v89_v38 = vld [vmem:[%s1245_s0 + $0x1e0] sm:$0xff] }
  0x48   :  { %v404_v55 = vmax.f32 %v340_v42, 0.0  ;;  %v342_v57 = vadd.f32 %v278_v39, %v214_v44  ;;  %463 = vst [vmem:[%s1248_s5 + $0x140] sm:$0xff] %v399_v48  ;;  %464 = vst [vmem:[%s1248_s5 + $0x148] sm:$0xff] %v400_v49  ;;  %v145_v58 = vmul.f32 %v550_v16, %v77_v40  ;;  %v146_v60 = vmul.f32 %v550_v16, %v78_v45  ;;  %v90_v39 = vld [vmem:[%s1245_s0 + $0x1e8] sm:$0xff]  ;;  %v287_v45 = vld [vmem:[%s1247_s4 + $0x1c0] sm:$0xff] }
  0x49   :  { %465 = vst [vmem:[%s1248_s5 + $0x150] sm:$0xff] %v401_v50  ;;  %466 = vst [vmem:[%s1248_s5 + $0x158] sm:$0xff] %v402_v51  ;;  %v147_v61 = vmul.f32 %v550_v16, %v79_v46  ;;  %v148_v62 = vmul.f32 %v550_v16, %v80_v47  ;;  %v405_v1 = vmax.f32 %v341_v56, 0.0  ;;  %v149_v6 = vmul.f32 %v550_v16, %v81_v52  ;;  %v91_v49 = vld [vmem:[%s1245_s0 + $0x1f0] sm:$0xff]  ;;  %v92_v50 = vld [vmem:[%s1245_s0 + $0x1f8] sm:$0xff] }
  0x4a   :  { %467 = vst [vmem:[%s1248_s5 + $0x160] sm:$0xff] %v403_v54  ;;  %468 = vst [vmem:[%s1248_s5 + $0x168] sm:$0xff] %v404_v55  ;;  %v406_v2 = vmax.f32 %v342_v57, 0.0  ;;  %v150_v7 = vmul.f32 %v550_v16, %v82_v53  ;;  %v215_v8 = vadd.f32 %v586_v34, %v145_v58  ;;  %v216_v9 = vadd.f32 %v586_v34, %v146_v60  ;;  %v288_v53 = vld [vmem:[%s1247_s4 + $0x1c8] sm:$0xff]  ;;  %v289_v54 = vld [vmem:[%s1247_s4 + $0x1d0] sm:$0xff] }
  0x4b   :  { %v217_v10 = vadd.f32 %v586_v34, %v147_v61  ;;  %v218_v11 = vadd.f32 %v586_v34, %v148_v62  ;;  %469 = vst [vmem:[%s1248_s5 + $0x170] sm:$0xff] %v405_v1  ;;  %v219_v14 = vadd.f32 %v586_v34, %v149_v6  ;;  %v151_v17 = vmul.f32 %v550_v16, %v83_v63  ;;  %v290_v55 = vld [vmem:[%s1247_s4 + $0x1d8] sm:$0xff]  ;;  %v291_v62 = vld [vmem:[%s1247_s4 + $0x1e0] sm:$0xff]  ;;  %v292_v63 = vld [vmem:[%s1247_s4 + $0x1e8] sm:$0xff] }
  0x4c   :  { %470 = vst [vmem:[%s1248_s5 + $0x178] sm:$0xff] %v406_v2  ;;  %v220_v15 = vadd.f32 %v586_v34, %v150_v7  ;;  %v152_v18 = vmul.f32 %v550_v16, %v84_v0  ;;  %v343_v19 = vadd.f32 %v279_v59, %v215_v8  ;;  %v344_v20 = vadd.f32 %v280_v3, %v216_v9  ;;  %v293_v8 = vld [vmem:[%s1247_s4 + $0x1f0] sm:$0xff]  ;;  %v294_v9 = vld [vmem:[%s1247_s4 + $0x1f8] sm:$0xff] }
  0x4d   :  { %v345_v21 = vadd.f32 %v281_v4, %v217_v10  ;;  %v346_v22 = vadd.f32 %v282_v5, %v218_v11  ;;  %v347_v26 = vadd.f32 %v283_v12, %v219_v14  ;;  %v221_v28 = vadd.f32 %v586_v34, %v151_v17 }
  0x4e   :  { %v348_v27 = vadd.f32 %v284_v13, %v220_v15  ;;  %v222_v29 = vadd.f32 %v586_v34, %v152_v18  ;;  %v407_v33 = vmax.f32 %v343_v19, 0.0  ;;  %v408_v35 = vmax.f32 %v344_v20, 0.0 }
  0x4f   :  { %v409_v36 = vmax.f32 %v345_v21, 0.0  ;;  %v410_v37 = vmax.f32 %v346_v22, 0.0  ;;  %v411_v40 = vmax.f32 %v347_v26, 0.0  ;;  %v349_v42 = vadd.f32 %v285_v23, %v221_v28 }
  0x50   :  { %v412_v41 = vmax.f32 %v348_v27, 0.0  ;;  %v350_v43 = vadd.f32 %v286_v24, %v222_v29  ;;  %471 = vst [vmem:[%s1248_s5 + $0x180] sm:$0xff] %v407_v33  ;;  %472 = vst [vmem:[%s1248_s5 + $0x188] sm:$0xff] %v408_v35  ;;  %v153_v44 = vmul.f32 %v550_v16, %v85_v25  ;;  %v154_v46 = vmul.f32 %v550_v16, %v86_v30 }
  0x51   :  { %473 = vst [vmem:[%s1248_s5 + $0x190] sm:$0xff] %v409_v36  ;;  %474 = vst [vmem:[%s1248_s5 + $0x198] sm:$0xff] %v410_v37  ;;  %v155_v47 = vmul.f32 %v550_v16, %v87_v31  ;;  %v156_v48 = vmul.f32 %v550_v16, %v88_v32  ;;  %v413_v51 = vmax.f32 %v349_v42, 0.0  ;;  %v157_v56 = vmul.f32 %v550_v16, %v89_v38 }
  0x52   :  { %475 = vst [vmem:[%s1248_s5 + $0x1a0] sm:$0xff] %v411_v40  ;;  %476 = vst [vmem:[%s1248_s5 + $0x1a8] sm:$0xff] %v412_v41  ;;  %v414_v52 = vmax.f32 %v350_v43, 0.0  ;;  %v158_v57 = vmul.f32 %v550_v16, %v90_v39  ;;  %v223_v58 = vadd.f32 %v586_v34, %v153_v44  ;;  %v224_v59 = vadd.f32 %v586_v34, %v154_v46 }
  0x53   :  { %v225_v60 = vadd.f32 %v586_v34, %v155_v47  ;;  %v226_v61 = vadd.f32 %v586_v34, %v156_v48  ;;  %477 = vst [vmem:[%s1248_s5 + $0x1b0] sm:$0xff] %v413_v51  ;;  %v227_v0 = vadd.f32 %v586_v34, %v157_v56  ;;  %v159_v2 = vmul.f32 %v550_v16, %v91_v49 }
  0x54   :  { %478 = vst [vmem:[%s1248_s5 + $0x1b8] sm:$0xff] %v414_v52  ;;  %v228_v1 = vadd.f32 %v586_v34, %v158_v57  ;;  %v160_v3 = vmul.f32 %v550_v16, %v92_v50  ;;  %v351_v4 = vadd.f32 %v287_v45, %v223_v58  ;;  %v352_v5 = vadd.f32 %v288_v53, %v224_v59 }
  0x55   :  { %v353_v6 = vadd.f32 %v289_v54, %v225_v60  ;;  %v354_v7 = vadd.f32 %v290_v55, %v226_v61  ;;  %v355_v10 = vadd.f32 %v291_v62, %v227_v0  ;;  %v229_v12 = vadd.f32 %v586_v34, %v159_v2 }
  0x56   :  { %v356_v11 = vadd.f32 %v292_v63, %v228_v1  ;;  %v230_v13 = vadd.f32 %v586_v34, %v160_v3  ;;  %v415_v14 = vmax.f32 %v351_v4, 0.0  ;;  %v416_v16 = vmax.f32 %v352_v5, 0.0 }
  0x57   :  { %v417_v15 = vmax.f32 %v353_v6, 0.0  ;;  %v418_v17 = vmax.f32 %v354_v7, 0.0  ;;  %v419_v18 = vmax.f32 %v355_v10, 0.0  ;;  %v357_v20 = vadd.f32 %v293_v8, %v229_v12 }
  0x58   :  { %v420_v19 = vmax.f32 %v356_v11, 0.0  ;;  %v358_v21 = vadd.f32 %v294_v9, %v230_v13  ;;  %479 = vst [vmem:[%s1248_s5 + $0x1c0] sm:$0xff] %v415_v14  ;;  %480 = vst [vmem:[%s1248_s5 + $0x1c8] sm:$0xff] %v416_v16 }
  0x59   :  { %481 = vst [vmem:[%s1248_s5 + $0x1d0] sm:$0xff] %v417_v15  ;;  %482 = vst [vmem:[%s1248_s5 + $0x1d8] sm:$0xff] %v418_v17  ;;  %v421_v34 = vmax.f32 %v357_v20, 0.0 }
  0x5a   :  { %483 = vst [vmem:[%s1248_s5 + $0x1e0] sm:$0xff] %v419_v18  ;;  %484 = vst [vmem:[%s1248_s5 + $0x1e8] sm:$0xff] %v420_v19  ;;  %v422_v22 = vmax.f32 %v358_v21, 0.0 }
  0x5b   :  { %485 = vst [vmem:[%s1248_s5 + $0x1f0] sm:$0xff] %v421_v34 }
  0x5c   :  { %486 = vst [vmem:[%s1248_s5 + $0x1f8] sm:$0xff] %v422_v22 }

// kernel: residual_block.3
= control target key start
LH: loop header
LB: loop body
LE: loop exit
PB: predicated region body
PF: predicated region fallthrough
CT: control target
= control target key end

     0   :  { %s6372_s12 = smov 0   ;;  %s7298_s0 = inlined_call_operand.vmem [shape: bf16[2,16,16,128], index: 0, kind: input, shape index: {}]   ;;  %s7299_s1 = inlined_call_operand.vmem [shape: bf16[1152,128], index: 1, kind: input, shape index: {}]   ;;  %s7300_s2 = inlined_call_operand.vmem [shape: f32[2,256,128], index: 2, kind: output, shape index: {0}]   ;;  %s7301_s3 = inlined_call_operand.vmem [shape: f32[2,2,128], index: 3, kind: output, shape index: {1}]  }
   0x1 LB: > { %s4599_s13 = sadd.s32 4294967295, %s6348_s12   ;;  %p4603_p0 = scmp.ge.s32.totalorder %s6348_s12, 1  ;;  %s6348_s12 = sphi %s6372_s12, %s14_s12  }
   0x2   : > { %p140_p1 = scmp.lt.s32.totalorder %s6348_s12, 3 }
   0x4   : > { %p141_p2 = pnand %p4603_p0, %p140_p1 }
   0x6   : > { %144 = sbr.rel (%p141_p2) target bundleno = 644 (0x284), region = 28 }
   0xb   : > { %v6029_v0 = vld [vmem:[%s7299_s1 + $0x78] sm:$0xff]   ;;  %v6350_v2 = vmov 0.0   ;;  %v6031_v3 = vld [vmem:[%s7299_s1 + $0x70] sm:$0xff]   ;;  %p168_p3 = scmp.lt.s32.totalorder %s4599_s13, 1  ;;  %v6351_v5 = vmov 0.0|0.0   ;;  %v6033_v6 = vld [vmem:[%s7299_s1 + $0x68] sm:$0xff]  }
   0xc   : > { %v6030_v1 = vld [vmem:[%s7299_s1 + $0x38] sm:$0xff]   ;;  %183 = vst [vmem:[#allocation2] sm:$0xff] %v6350_v2  ;;  %184 = vst [vmem:[#allocation2 + $0x8] sm:$0xff] %v6350_v2  ;;  %5484 = vmatprep.subr.bf16.mxu0 %v6029_v0  ;;  %6004 = vmatprep.subr.bf16.mxu1 %v6029_v0  ;;  %v6032_v4 = vld [vmem:[%s7299_s1 + $0x30] sm:$0xff]  }
   0xd   : > { %185 = vst [vmem:[#allocation2 + $0x10] sm:$0x3] %v6350_v2  ;;  %186 = vst [vmem:[#allocation2 + $0x18] sm:$0xff] %v6350_v2  ;;  %5485 = vmatpush3.bf16.msra.mxu0 %v6030_v1  ;;  %6012 = vmatpush3.bf16.msra.mxu1 %v6030_v1  ;;  %s7321_s13 = smov (!%p168_p3, %s4599_s13), 1  ;;  %v6034_v7 = vld [vmem:[%s7299_s1 + $0x28] sm:$0xff]   ;;  %v6035_v8 = vld [vmem:[%s7299_s1 + $0x60] sm:$0xff]  }
   0xe   : > { %187 = vst [vmem:[#allocation2 + $0x20] sm:$0xff] %v6350_v2  ;;  %188 = vst [vmem:[#allocation2 + $0x28] sm:$0x3] %v6350_v2  ;;  %5486 = vmatprep.subr.bf16.mxu0 %v6031_v3  ;;  %6005 = vmatprep.subr.bf16.mxu1 %v6031_v3  ;;  %s5115_s28 = sshll.u32 %s7321_s13, 7  ;;  %v6036_v9 = vld [vmem:[%s7299_s1 + $0x20] sm:$0xff]   ;;  %v6037_v10 = vld [vmem:[%s7299_s1 + $0x58] sm:$0xff]  }
   0xf   : > { %189 = vst [vmem:[#allocation2 + $0x30] sm:$0xff] %v6350_v2  ;;  %190 = vst [vmem:[#allocation2 + $0x38] sm:$0xff] %v6350_v2  ;;  %s6417_s8 = scalar_lea.vmem %s7298_s0, %s5115_s28  ;;  %v6038_v11 = vld [vmem:[%s7299_s1 + $0x18] sm:$0xff]   ;;  %v6039_v12 = vld [vmem:[%s7299_s1 + $0x50] sm:$0xff]   ;;  %s4608_s20 = sshll.u32 %s7321_s13, 1 }
  0x10   : > { %191 = vst [vmem:[#allocation2 + $0x40] sm:$0x3] %v6350_v2  ;;  %192 = vst [vmem:[#allocation2 + $0x48] sm:$0xff] %v6350_v2  ;;  %v5479_v15 = vld [vmem:[%s6417_s8 + $0x58] sm:$0xff]   ;;  %v6040_v22 = vld [vmem:[%s7299_s1 + $0x10] sm:$0xff]   ;;  %s7228_s23 = scalar_lea.vmem %s7301_s3, %s4608_s20 }
  0x11   : > { %193 = vst [vmem:[#allocation2 + $0x50] sm:$0xff] %v6350_v2  ;;  %194 = vst [vmem:[#allocation2 + $0x58] sm:$0x3] %v6350_v2  ;;  %5487 = vmatpush3.bf16.msra.mxu0 %v6032_v4  ;;  %6013 = vmatpush3.bf16.msra.mxu1 %v6032_v4  ;;  %v5451_v18 = vunpack.c.l.bf16 %v5479_v15  ;;  %v5452_v19 = vunpack.c.h.bf16 %v5479_v15  ;;  %v6048_v20 = vld [vmem:[%s6417_s8 + $0x58] ss:$0 sps:$4 sm:$0xff]   ;;  %v6041_v23 = vld [vmem:[%s7299_s1 + $0x48] sm:$0xff]  }
  0x12   : > { %195 = vst [vmem:[#allocation2 + $0x60] sm:$0xff] %v6350_v2  ;;  %196 = vst [vmem:[#allocation2 + $0x68] sm:$0xff] %v6350_v2  ;;  %5488 = vmatprep.subr.bf16.mxu0 %v6033_v6  ;;  %6006 = vmatprep.subr.bf16.mxu1 %v6033_v6  ;;  %v6049_v21 = vld [vmem:[%s6417_s8 + $0x5c] ss:$0 sps:$4 sm:$0xff]   ;;  %v6042_v24 = vld [vmem:[%s7299_s1 + $0x8] sm:$0xff]  }
  0x13   : > { %197 = vst [vmem:[#allocation2 + $0x70] sm:$0x3] %v6350_v2  ;;  %198 = vst [vmem:[#allocation2 + $0x78] sm:$0xff] %v6350_v2  ;;  %v526_v13 = vld [vmem:[#allocation2 + $0x1] sm:$0xff]  ;;  %v6059_v29 = vld [vmem:[%s6417_s8] ss:$0 sps:$4 sm:$0xff]  }
  0x14   : > { %199 = vst [vmem:[#allocation2 + $0x80] sm:$0xff] %v6350_v2  ;;  %200 = vst [vmem:[#allocation2 + $0x88] sm:$0x3] %v6350_v2  ;;  %v527_v14 = vld [vmem:[#allocation2 + $0x9] sm:$0xff]  ;;  %v5149_v16 = vpack.c.bf16 %v526_v13, %v526_v13  ;;  %v6043_v25 = vld [vmem:[%s7299_s1 + $0x40] sm:$0xff]  }
  0x15   : > { %201 = vst [vmem:[#allocation2 + $0x90] sm:$0xff] %v6350_v2  ;;  %202 = vst [vmem:[#allocation2 + $0x98] sm:$0xff] %v6350_v2  ;;  %5489 = vmatpush3.bf16.msra.mxu0 %v6034_v7  ;;  %6014 = vmatpush3.bf16.msra.mxu1 %v6034_v7  ;;  %v5150_v17 = vpack.c.bf16 %v527_v14, %v527_v14  ;;  %v5406_v26 = vld [vmem:[%s6417_s8] sm:$0xff]   ;;  %v6053_v37 = vld [vmem:[%s7299_s1 + $0xf8] sm:$0xff]  }
  0x16   : > { %203 = vst [vmem:[#allocation2 + $0xa0] sm:$0x3] %v6350_v2  ;;  %204 = vst [vmem:[#allocation2 + $0xa8] sm:$0xff] %v6350_v2  ;;  %5490 = vmatprep.subr.bf16.mxu0 %v6035_v8  ;;  %6007 = vmatprep.subr.bf16.mxu1 %v6035_v8  ;;  %v5407_v27 = vunpack.c.l.bf16 %v5406_v26  ;;  %v5408_v28 = vunpack.c.h.bf16 %v5406_v26  ;;  %v6060_v30 = vld [vmem:[%s6417_s8 + $0x4] ss:$0 sps:$4 sm:$0xff]   ;;  %v6054_v43 = vld [vmem:[%s7299_s1 + $0x178] sm:$0xff]  }
  0x17   : > { %205 = vst [vmem:[#allocation2 + $0xb0] sm:$0xff] %v6350_v2  ;;  %206 = vst [vmem:[#allocation2 + $0xb8] sm:$0x3] %v6350_v2  ;;  %v5480_v31 = vld [vmem:[%s6417_s8 + $0x60] sm:$0xff]   ;;  %v6056_v45 = vld [vmem:[%s7299_s1 + $0x138] sm:$0xff]  }
  0x18   : > { %207 = vst [vmem:[#allocation2 + $0xc0] sm:$0xff] %v6350_v2  ;;  %208 = vst [vmem:[#allocation2 + $0xc8] sm:$0xff] %v6350_v2  ;;  %v6044_v32 = vld [vmem:[%s7299_s1] sm:$0xff]   ;;  %v5455_v33 = vunpack.c.l.bf16 %v5480_v31  ;;  %v5456_v34 = vunpack.c.h.bf16 %v5480_v31  ;;  %v6072_v46 = vld [vmem:[%s7299_s1 + $0x170] sm:$0xff]  }
  0x19   : > { %209 = vst [vmem:[#allocation2 + $0xd0] sm:$0x3] %v6350_v2  ;;  %210 = vst [vmem:[#allocation2 + $0xd8] sm:$0xff] %v6350_v2  ;;  %5491 = vmatpush3.bf16.msra.mxu0 %v6036_v9  ;;  %6015 = vmatpush3.bf16.msra.mxu1 %v6036_v9  ;;  %v6063_v35 = vld [vmem:[%s6417_s8 + $0x60] ss:$0 sps:$4 sm:$0xff]   ;;  %v6074_v53 = vld [vmem:[%s7299_s1 + $0x130] sm:$0xff]  }
  0x1a   : > { %211 = vst [vmem:[#allocation2 + $0xe0] sm:$0xff] %v6350_v2  ;;  %212 = vst [vmem:[#allocation2 + $0xe8] sm:$0x3] %v6350_v2  ;;  %5492 = vmatprep.subr.bf16.mxu0 %v6037_v10  ;;  %6008 = vmatprep.subr.bf16.mxu1 %v6037_v10  ;;  %v6064_v36 = vld [vmem:[%s6417_s8 + $0x64] ss:$0 sps:$4 sm:$0xff]   ;;  %v5469_v56 = vld [vmem:[%s6417_s8 + $0x8] sm:$0xff]  }
  0x1b   : > { %213 = vst [vmem:[#allocation2 + $0xf0] sm:$0xff] %v6350_v2  ;;  %214 = vst [vmem:[#allocation2 + $0xf8] sm:$0xff] %v6350_v2  ;;  %v6075_v57 = vld [vmem:[%s6417_s8 + $0x8] ss:$0 sps:$4 sm:$0xff]   ;;  %v6076_v58 = vld [vmem:[%s6417_s8 + $0xc] ss:$0 sps:$4 sm:$0xff]   ;;  %v5411_v60 = vunpack.c.l.bf16 %v5469_v56  ;;  %v5412_v61 = vunpack.c.h.bf16 %v5469_v56 }
  0x1c   : > { %215 = vst [vmem:[#allocation2 + $0x100] sm:$0x3] %v6350_v2  ;;  %216 = vst [vmem:[#allocation2 + $0x108] sm:$0xff] %v6350_v2  ;;  %v6055_v59 = vld [vmem:[%s7299_s1 + $0xb8] sm:$0xff]   ;;  %v5481_v62 = vld [vmem:[%s6417_s8 + $0x68] sm:$0xff]  }
  0x1d   : > { %217 = vst [vmem:[#allocation2 + $0x110] sm:$0xff] %v6350_v2  ;;  %218 = vst [vmem:[#allocation2 + $0x118] sm:$0x3] %v6350_v2  ;;  %5493 = vmatpush3.bf16.msra.mxu0 %v6038_v11  ;;  %6016 = vmatpush3.bf16.msra.mxu1 %v6038_v11  ;;  %v6079_v63 = vld [vmem:[%s6417_s8 + $0x68] ss:$0 sps:$4 sm:$0xff]   ;;  %v5460_v3 = vunpack.c.h.bf16 %v5481_v62  ;;  %v6058_v6 = vld [vmem:[%s7299_s1 + $0xb0] sm:$0xff]  }
  0x1e   : > { %219 = vst [vmem:[#allocation2 + $0x120] sm:$0xff] %v6350_v2  ;;  %220 = vst [vmem:[#allocation2 + $0x128] sm:$0xff] %v6350_v2  ;;  %5494 = vmatprep.subr.bf16.mxu0 %v6039_v12  ;;  %6009 = vmatprep.subr.bf16.mxu1 %v6039_v12  ;;  %v6080_v0 = vld [vmem:[%s6417_s8 + $0x6c] ss:$0 sps:$4 sm:$0xff]   ;;  %v5470_v8 = vld [vmem:[%s6417_s8 + $0x10] sm:$0xff]  }
  0x1f   : > { %221 = vst [vmem:[#allocation2 + $0x130] sm:$0x3] %v6350_v2  ;;  %222 = vst [vmem:[#allocation2 + $0x138] sm:$0xff] %v6350_v2  ;;  %v6069_v7 = vld [vmem:[%s7299_s1 + $0xe8] sm:$0xff]   ;;  %v6089_v9 = vld [vmem:[%s6417_s8 + $0x10] ss:$0 sps:$4 sm:$0xff]   ;;  %v5415_v11 = vunpack.c.l.bf16 %v5470_v8  ;;  %v5416_v12 = vunpack.c.h.bf16 %v5470_v8 }
  0x20   : > { %223 = vst [vmem:[#allocation2 + $0x140] sm:$0xff] %v6350_v2  ;;  %224 = vst [vmem:[#allocation2 + $0x148] sm:$0x3] %v6350_v2  ;;  %v6070_v14 = vld [vmem:[%s7299_s1 + $0xa8] sm:$0xff]   ;;  %v6090_v26 = vld [vmem:[%s6417_s8 + $0x14] ss:$0 sps:$4 sm:$0xff]  }
  0x21   : > { %225 = vst [vmem:[#allocation2 + $0x150] sm:$0xff] %v6350_v2  ;;  %226 = vst [vmem:[#allocation2 + $0x158] sm:$0xff] %v6350_v2  ;;  %5495 = vmatpush3.bf16.msra.mxu0 %v6040_v22  ;;  %6017 = vmatpush3.bf16.msra.mxu1 %v6040_v22  ;;  %v6094_v31 = vld [vmem:[%s6417_s8 + $0x74] ss:$0 sps:$4 sm:$0xff]   ;;  %v6106_v56 = vld [vmem:[%s6417_s8 + $0x1c] ss:$0 sps:$4 sm:$0xff]  }
  0x22   : > { %227 = vst [vmem:[#allocation2 + $0x160] sm:$0x3] %v6350_v2  ;;  %228 = vst [vmem:[#allocation2 + $0x168] sm:$0xff] %v6350_v2  ;;  %5496 = vmatprep.subr.bf16.mxu0 %v6041_v23  ;;  %6010 = vmatprep.subr.bf16.mxu1 %v6041_v23 }
  0x23   : > { %229 = vst [vmem:[#allocation2 + $0x170] sm:$0xff] %v6350_v2  ;;  %230 = vst [vmem:[#allocation2 + $0x178] sm:$0x3] %v6350_v2 }
  0x24   : > { %231 = vst [vmem:[#allocation2 + $0x180] sm:$0xff] %v6350_v2  ;;  %232 = vst [vmem:[#allocation2 + $0x188] sm:$0xff] %v6350_v2 }
  0x25   : > { %233 = vst [vmem:[#allocation2 + $0x190] sm:$0x3] %v6350_v2  ;;  %234 = vst [vmem:[#allocation2 + $0x198] sm:$0xff] %v6350_v2  ;;  %5497 = vmatpush3.bf16.msra.mxu0 %v6042_v24  ;;  %6018 = vmatpush3.bf16.msra.mxu1 %v6042_v24 }
  0x26   : > { %235 = vst [vmem:[#allocation2 + $0x1a0] sm:$0xff] %v6350_v2  ;;  %236 = vst [vmem:[#allocation2 + $0x1a8] sm:$0x3] %v6350_v2  ;;  %5498 = vmatprep.subr.bf16.mxu0 %v6043_v25  ;;  %6011 = vmatprep.subr.bf16.mxu1 %v6043_v25  ;;  %v5459_v2 = vunpack.c.l.bf16 %v5481_v62  ;;  %v6103_v62 = vld [vmem:[%s7299_s1 + $0xc0] sm:$0xff]  }
  0x27   : > { %494 = vst [vmem:[#allocation3] sm:$0xf] %v6351_v5  ;;  %495 = vst [vmem:[#allocation3 + $0x24] sm:$0xf] %v6351_v5  ;;  %v6057_v5 = vld [vmem:[%s7299_s1 + $0xf0] sm:$0xff]  }
  0x28   : > { %686 = vst [vmem:[#allocation3 + $0x4] sm:$0xf] %v5149_v16  ;;  %687 = vst [vmem:[#allocation3 + $0x28] sm:$0xf] %v5150_v17  ;;  %v6071_v17 = vld [vmem:[%s7299_s1 + $0xe0] sm:$0xff]  }
  0x29   : > { %324 = vst [vmem:[#allocation2 + $0x121] sm:$0xff] %v5451_v18  ;;  %325 = vst [vmem:[#allocation2 + $0x129] sm:$0xff] %v5452_v19  ;;  %5499 = vmatpush3.bf16.msra.mxu0 %v6044_v32  ;;  %6019 = vmatpush3.bf16.msra.mxu1 %v6044_v32  ;;  %v6073_v32 = vld [vmem:[%s7299_s1 + $0xa0] sm:$0xff]  }
  0x2a   : > { %710 = vst [vmem:[#allocation3 + $0x364] sm:$0xf] %v6048_v20  ;;  %711 = vst [vmem:[#allocation3 + $0x388] sm:$0xf] %v6049_v21  ;;  %5596 = vmatprep.subr.bf16.mxu1 %v6053_v37  ;;  %5708 = vmatprep.subr.bf16.mxu0 %v6054_v43  ;;  %v6102_v37 = vld [vmem:[%s7299_s1 + $0x128] sm:$0xff]  }
  0x2b   : > { %302 = vst [vmem:[#allocation2 + $0x19] sm:$0xff] %v5407_v27  ;;  %303 = vst [vmem:[#allocation2 + $0x21] sm:$0xff] %v5408_v28  ;;  %v5482_v27 = vld [vmem:[%s6417_s8 + $0x70] sm:$0xff]   ;;  %v6105_v43 = vld [vmem:[%s6417_s8 + $0x18] ss:$0 sps:$4 sm:$0xff]  }
  0x2c   : > { %688 = vst [vmem:[#allocation3 + $0x4c] sm:$0xf] %v6059_v29  ;;  %689 = vst [vmem:[#allocation3 + $0x70] sm:$0xf] %v6060_v30  ;;  %v6093_v28 = vld [vmem:[%s6417_s8 + $0x70] ss:$0 sps:$4 sm:$0xff]   ;;  %v5463_v29 = vunpack.c.l.bf16 %v5482_v27  ;;  %v5464_v30 = vunpack.c.h.bf16 %v5482_v27 }
  0x2d   : > { %326 = vst [vmem:[#allocation2 + $0x139] sm:$0xff] %v5455_v33  ;;  %327 = vst [vmem:[#allocation2 + $0x141] sm:$0xff] %v5456_v34  ;;  %v6100_v33 = vld [vmem:[%s7299_s1 + $0x168] sm:$0xff]   ;;  %v6085_v34 = vld [vmem:[%s7299_s1 + $0xd8] sm:$0xff]  }
  0x2e   : > { %712 = vst [vmem:[#allocation3 + $0x3ac] sm:$0xf] %v6063_v35  ;;  %713 = vst [vmem:[#allocation3 + $0x3d0] sm:$0xf] %v6064_v36  ;;  %v6045_v44 = vld [vmem:[#allocation3] ss:$36 sps:$4 sm:$0xff]  }
  0x2f   : > { %v6047_v38 = vld [vmem:[#allocation3 + $0x4] ss:$36 sps:$4 sm:$0xff]   ;;  %690 = vst [vmem:[#allocation3 + $0x94] sm:$0xf] %v6075_v57  ;;  %691 = vst [vmem:[#allocation3 + $0xb8] sm:$0xf] %v6076_v58 }
  0x30   : > { %v358_v39 = vld [vmem:[#allocation2 + $0x120] sm:$0xff]  ;;  %v359_v40 = vld [vmem:[#allocation2 + $0x128] sm:$0xff]  ;;  %3567 = vmatprep.mubr.bf16.mxu0 %v6047_v38  ;;  %304 = vst [vmem:[#allocation2 + $0x31] sm:$0xff] %v5411_v60  ;;  %305 = vst [vmem:[#allocation2 + $0x39] sm:$0xff] %v5412_v61 }
  0x31   : > { %v5141_v41 = vpack.c.bf16 %v358_v39, %v358_v39  ;;  %v5142_v42 = vpack.c.bf16 %v359_v40, %v359_v40  ;;  %3568 = vmatmul.mubr.bf16.vlgmr.msra.gmra.mxu0 %v6045_v44  ;;  %v6052_v4 = vld [vmem:[#allocation3 + $0x364] ss:$36 sps:$4 sm:$0xff]   ;;  %714 = vst [vmem:[#allocation3 + $0x3f4] sm:$0xf] %v6079_v63  ;;  %715 = vst [vmem:[#allocation3 + $0x418] sm:$0xf] %v6080_v0 }
  0x32   : > { %v336_v47 = vld [vmem:[#allocation2 + $0x18] sm:$0xff]  ;;  %v337_v48 = vld [vmem:[#allocation2 + $0x20] sm:$0xff]  ;;  %5709 = vmatpush3.bf16.msra.mxu0 %v6056_v45  ;;  %328 = vst [vmem:[#allocation2 + $0x151] sm:$0xff] %v5459_v2  ;;  %329 = vst [vmem:[#allocation2 + $0x159] sm:$0xff] %v5460_v3  ;;  %3663 = vmatprep.mubr.bf16.mxu1 %v6052_v4 }
  0x33   : > { %518 = vst [vmem:[#allocation3 + $0x360] sm:$0xf] %v5141_v41  ;;  %519 = vst [vmem:[#allocation3 + $0x384] sm:$0xf] %v5142_v42  ;;  %v5119_v49 = vpack.c.bf16 %v336_v47, %v336_v47  ;;  %v5120_v50 = vpack.c.bf16 %v337_v48, %v337_v48  ;;  %5710 = vmatprep.subr.bf16.mxu0 %v6072_v46  ;;  %v6061_v10 = vld [vmem:[#allocation3 + $0x4c] ss:$36 sps:$4 sm:$0xff]  }
  0x34   : > { %v360_v51 = vld [vmem:[#allocation2 + $0x138] sm:$0xff]  ;;  %v361_v52 = vld [vmem:[#allocation2 + $0x140] sm:$0xff]  ;;  %692 = vst [vmem:[#allocation3 + $0xdc] sm:$0xf] %v6089_v9  ;;  %3575 = vmatprep.mubr.bf16.mxu0 %v6061_v10  ;;  %306 = vst [vmem:[#allocation2 + $0x49] sm:$0xff] %v5415_v11 }
  0x35   : > { %v5143_v54 = vpack.c.bf16 %v360_v51, %v360_v51  ;;  %v5144_v55 = vpack.c.bf16 %v361_v52, %v361_v52  ;;  %496 = vst [vmem:[#allocation3 + $0x48] sm:$0xf] %v5119_v49  ;;  %497 = vst [vmem:[#allocation3 + $0x6c] sm:$0xf] %v5120_v50  ;;  %v6065_v13 = vld [vmem:[#allocation3 + $0x3ac] ss:$36 sps:$4 sm:$0xff]  }
  0x36   : > { %1070 = vst [vmem:[#allocation3 + $0xc] sm:$0xf] %v5119_v49  ;;  %1071 = vst [vmem:[#allocation3 + $0x30] sm:$0xf] %v5120_v50  ;;  %5711 = vmatpush3.bf16.msra.mxu0 %v6074_v53  ;;  %v6086_v38 = vld [vmem:[%s7299_s1 + $0x98] sm:$0xff]   ;;  %v6087_v41 = vld [vmem:[%s7299_s1 + $0xd0] sm:$0xff]  }
  0x37   : > { %520 = vst [vmem:[#allocation3 + $0x3a8] sm:$0xf] %v5143_v54  ;;  %521 = vst [vmem:[#allocation3 + $0x3cc] sm:$0xf] %v5144_v55  ;;  %v338_v18 = vld [vmem:[#allocation2 + $0x30] sm:$0xff]  ;;  %v339_v19 = vld [vmem:[#allocation2 + $0x38] sm:$0xff]  ;;  %5712 = vmatprep.subr.bf16.mxu0 %v6100_v33 }
  0x38   : > { %307 = vst [vmem:[#allocation2 + $0x51] sm:$0xff] %v5416_v12  ;;  %v5121_v20 = vpack.c.bf16 %v338_v18, %v338_v18  ;;  %v5122_v23 = vpack.c.bf16 %v339_v19, %v339_v19  ;;  %693 = vst [vmem:[#allocation3 + $0x100] sm:$0xf] %v6090_v26  ;;  %v5471_v42 = vld [vmem:[%s6417_s8 + $0x18] sm:$0xff]   ;;  %v6077_v44 = vld [vmem:[#allocation3 + $0x94] ss:$36 sps:$4 sm:$0xff]  }
  0x39   : > { %v362_v21 = vld [vmem:[#allocation2 + $0x150] sm:$0xff]  ;;  %v363_v22 = vld [vmem:[#allocation2 + $0x158] sm:$0xff]  ;;  %716 = vst [vmem:[#allocation3 + $0x43c] sm:$0xf] %v6093_v28  ;;  %330 = vst [vmem:[#allocation2 + $0x169] sm:$0xff] %v5463_v29  ;;  %v5419_v46 = vunpack.c.l.bf16 %v5471_v42  ;;  %v5420_v47 = vunpack.c.h.bf16 %v5471_v42 }
  0x3a   : > { %v6050_v1 = vld [vmem:[#allocation3 + $0x360] ss:$36 sps:$4 sm:$0xff]   ;;  %v5145_v24 = vpack.c.bf16 %v362_v21, %v362_v21  ;;  %v5146_v25 = vpack.c.bf16 %v363_v22, %v363_v22  ;;  %498 = vst [vmem:[#allocation3 + $0x90] sm:$0xf] %v5121_v20  ;;  %1072 = vst [vmem:[#allocation3 + $0x54] sm:$0xf] %v5121_v20  ;;  %5713 = vmatpush3.bf16.msra.mxu0 %v6102_v37 }
  0x3b   : > { %3664 = vmatmul.mubr.bf16.vlgmr.msra.gmra.mxu1 %v6050_v1  ;;  %499 = vst [vmem:[#allocation3 + $0xb4] sm:$0xf] %v5122_v23  ;;  %1073 = vst [vmem:[#allocation3 + $0x78] sm:$0xf] %v5122_v23  ;;  %v340_v35 = vld [vmem:[#allocation2 + $0x48] sm:$0xff]  ;;  %v6088_v45 = vld [vmem:[%s7299_s1 + $0x90] sm:$0xff]  }
  0x3c   : > { %5597 = vmatpush3.bf16.msra.mxu1 %v6055_v59  ;;  %v6067_v15 = vld [vmem:[#allocation3 + $0x48] ss:$36 sps:$4 sm:$0xff]   ;;  %3671 = vmatprep.mubr.bf16.mxu1 %v6065_v13  ;;  %522 = vst [vmem:[#allocation3 + $0x3f0] sm:$0xf] %v5145_v24  ;;  %523 = vst [vmem:[#allocation3 + $0x414] sm:$0xf] %v5146_v25  ;;  %v5123_v39 = vpack.c.bf16 %v340_v35, %v340_v35 }
  0x3d   : > { %5598 = vmatprep.subr.bf16.mxu1 %v6057_v5  ;;  %3576 = vmatmul.mubr.bf16.gmra.mxu0 %v6067_v15  ;;  %331 = vst [vmem:[#allocation2 + $0x171] sm:$0xff] %v5464_v30  ;;  %717 = vst [vmem:[#allocation3 + $0x460] sm:$0xf] %v6094_v31  ;;  %v6081_v48 = vld [vmem:[#allocation3 + $0x3f4] ss:$36 sps:$4 sm:$0xff]   ;;  %v6113_v5 = vld [vmem:[%s7299_s1 + $0x1f8] sm:$0xff]  }
  0x3e   : > { %v6068_v16 = vld [vmem:[#allocation3 + $0x3a8] ss:$36 sps:$4 sm:$0xff]   ;;  %500 = vst [vmem:[#allocation3 + $0xd8] sm:$0xf] %v5123_v39  ;;  %1074 = vst [vmem:[#allocation3 + $0x9c] sm:$0xf] %v5123_v39  ;;  %3583 = vmatprep.mubr.bf16.mxu0 %v6077_v44 }
  0x3f   : > { %v341_v36 = vld [vmem:[#allocation2 + $0x50] sm:$0xff]  ;;  %v6099_v50 = vld [vmem:[%s7299_s1 + $0xc8] sm:$0xff]   ;;  %694 = vst [vmem:[#allocation3 + $0x124] sm:$0xf] %v6105_v43  ;;  %308 = vst [vmem:[#allocation2 + $0x61] sm:$0xff] %v5419_v46 }
  0x40   : > { %5599 = vmatpush3.bf16.msra.mxu1 %v6058_v6  ;;  %v5124_v40 = vpack.c.bf16 %v341_v36, %v341_v36  ;;  %v364_v52 = vld [vmem:[#allocation2 + $0x168] sm:$0xff]  ;;  %309 = vst [vmem:[#allocation2 + $0x69] sm:$0xff] %v5420_v47  ;;  %695 = vst [vmem:[#allocation3 + $0x148] sm:$0xf] %v6106_v56  ;;  %v6104_v1 = vld [vmem:[%s7299_s1 + $0x80] sm:$0xff]  }
  0x41   : > { %5600 = vmatprep.subr.bf16.mxu1 %v6069_v7  ;;  %v5147_v54 = vpack.c.bf16 %v364_v52, %v364_v52  ;;  %v718_v57 = vld [vmem:[#allocation2 + $0x2] sm:$0xff]  ;;  %v719_v58 = vld [vmem:[#allocation2 + $0xa] sm:$0xff]  ;;  %v6117_v10 = vld [vmem:[%s6417_s8 + $0x20] ss:$0 sps:$4 sm:$0xff]  }
  0x42   : > { %501 = vst [vmem:[#allocation3 + $0xfc] sm:$0xf] %v5124_v40  ;;  %1075 = vst [vmem:[#allocation3 + $0xc0] sm:$0xf] %v5124_v40  ;;  %v6083_v49 = vld [vmem:[#allocation3 + $0x90] ss:$36 sps:$4 sm:$0xff]   ;;  %v5181_v60 = vpack.c.bf16 %v718_v57, %v718_v57  ;;  %v5182_v61 = vpack.c.bf16 %v719_v58, %v719_v58 }
  0x43   : > { %3672 = vmatmul.mubr.bf16.gmra.mxu1 %v6068_v16  ;;  %v6084_v51 = vld [vmem:[#allocation3 + $0x3f0] ss:$36 sps:$4 sm:$0xff]   ;;  %v6101_v59 = vld [vmem:[%s7299_s1 + $0x88] sm:$0xff]   ;;  %524 = vst [vmem:[#allocation3 + $0x438] sm:$0xf] %v5147_v54  ;;  %v722_v26 = vld [vmem:[#allocation2 + $0x32] sm:$0xff] }
  0x44   : > { %5601 = vmatpush3.bf16.msra.mxu1 %v6070_v14  ;;  %v365_v53 = vld [vmem:[#allocation2 + $0x170] sm:$0xff]  ;;  %3679 = vmatprep.mubr.bf16.mxu1 %v6081_v48  ;;  %878 = vst [vmem:[#allocation3 + $0x8] sm:$0xf] %v5181_v60  ;;  %879 = vst [vmem:[#allocation3 + $0x2c] sm:$0xf] %v5182_v61  ;;  %v6115_v2 = vld [vmem:[%s7299_s1 + $0x160] sm:$0xff]   ;;  %v5185_v28 = vpack.c.bf16 %v722_v26, %v722_v26 }
  0x45   : > { %5602 = vmatprep.subr.bf16.mxu1 %v6071_v17  ;;  %3584 = vmatmul.mubr.bf16.gmra.mxu0 %v6083_v49  ;;  %v5148_v55 = vpack.c.bf16 %v365_v53, %v365_v53  ;;  %v6091_v63 = vld [vmem:[#allocation3 + $0xdc] ss:$36 sps:$4 sm:$0xff]   ;;  %v6116_v6 = vld [vmem:[%s7299_s1 + $0x120] sm:$0xff]   ;;  %696 = vst [vmem:[#allocation3 + $0x16c] sm:$0xf] %v6117_v10  ;;  %v6133_v30 = vld [vmem:[%s7299_s1 + $0x158] sm:$0xff]  }
  0x46   : > { %3591 = vmatprep.mubr.bf16.mxu0 %v6091_v63  ;;  %v342_v3 = vld [vmem:[#allocation2 + $0x60] sm:$0xff]  ;;  %5714 = vmatprep.subr.bf16.mxu0 %v6115_v2  ;;  %v5473_v16 = vld [vmem:[%s6417_s8 + $0x28] sm:$0xff]   ;;  %882 = vst [vmem:[#allocation3 + $0x98] sm:$0xf] %v5185_v28  ;;  %v6135_v33 = vld [vmem:[%s7299_s1 + $0x118] sm:$0xff]  }
  0x47   : > { %525 = vst [vmem:[#allocation3 + $0x45c] sm:$0xf] %v5148_v55  ;;  %v343_v4 = vld [vmem:[#allocation2 + $0x68] sm:$0xff]  ;;  %v5125_v7 = vpack.c.bf16 %v342_v3, %v342_v3  ;;  %v5472_v9 = vld [vmem:[%s6417_s8 + $0x20] sm:$0xff]   ;;  %5715 = vmatpush3.bf16.msra.mxu0 %v6116_v6  ;;  %v5427_v20 = vunpack.c.l.bf16 %v5473_v16  ;;  %v5428_v21 = vunpack.c.h.bf16 %v5473_v16  ;;  %1456 = vst [vmem:[#allocation3 + $0x5c] sm:$0xf] %v5185_v28 }
  0x48   : > { %5603 = vmatpush3.bf16.msra.mxu1 %v6073_v32  ;;  %v5126_v8 = vpack.c.bf16 %v343_v4, %v343_v4  ;;  %v6118_v11 = vld [vmem:[%s6417_s8 + $0x24] ss:$0 sps:$4 sm:$0xff]   ;;  %v5423_v12 = vunpack.c.l.bf16 %v5472_v9  ;;  %v5424_v13 = vunpack.c.h.bf16 %v5472_v9  ;;  %v720_v14 = vld [vmem:[#allocation2 + $0x1a] sm:$0xff]  ;;  %v6095_v17 = vld [vmem:[#allocation3 + $0x43c] ss:$36 sps:$4 sm:$0xff]   ;;  %5716 = vmatprep.subr.bf16.mxu0 %v6133_v30 }
  0x49   : > { %5604 = vmatprep.subr.bf16.mxu1 %v6085_v34  ;;  %v6097_v0 = vld [vmem:[#allocation3 + $0xd8] ss:$36 sps:$4 sm:$0xff]   ;;  %502 = vst [vmem:[#allocation3 + $0x120] sm:$0xf] %v5125_v7  ;;  %697 = vst [vmem:[#allocation3 + $0x190] sm:$0xf] %v6118_v11  ;;  %v5183_v18 = vpack.c.bf16 %v720_v14, %v720_v14 }
  0x4a   : > { %v721_v15 = vld [vmem:[#allocation2 + $0x22] sm:$0xff]  ;;  %503 = vst [vmem:[#allocation3 + $0x144] sm:$0xf] %v5126_v8  ;;  %1076 = vst [vmem:[#allocation3 + $0xe4] sm:$0xf] %v5125_v7  ;;  %v723_v27 = vld [vmem:[#allocation2 + $0x3a] sm:$0xff] }
  0x4b   : > { %3680 = vmatmul.mubr.bf16.gmra.mxu1 %v6084_v51  ;;  %v5184_v19 = vpack.c.bf16 %v721_v15, %v721_v15  ;;  %1077 = vst [vmem:[#allocation3 + $0x108] sm:$0xf] %v5126_v8  ;;  %310 = vst [vmem:[#allocation2 + $0x79] sm:$0xff] %v5423_v12  ;;  %v6111_v23 = vld [vmem:[#allocation3 + $0xc] ss:$36 sps:$4 sm:$0xff]   ;;  %v5186_v29 = vpack.c.bf16 %v723_v27, %v723_v27  ;;  %v6134_v35 = vld [vmem:[%s7299_s1 + $0x1f0] sm:$0xff]   ;;  %5717 = vmatpush3.bf16.msra.mxu0 %v6135_v33 }
  0x4c   : > { %5605 = vmatpush3.bf16.msra.mxu1 %v6086_v38  ;;  %311 = vst [vmem:[#allocation2 + $0x81] sm:$0xff] %v5424_v13  ;;  %3687 = vmatprep.mubr.bf16.mxu1 %v6095_v17  ;;  %880 = vst [vmem:[#allocation3 + $0x50] sm:$0xf] %v5183_v18  ;;  %v6125_v24 = vld [vmem:[%s6417_s8 + $0x28] ss:$0 sps:$4 sm:$0xff]   ;;  %v6114_v32 = vld [vmem:[%s7299_s1 + $0x1b8] sm:$0xff]  }
  0x4d   : > { %5606 = vmatprep.subr.bf16.mxu1 %v6087_v41  ;;  %3592 = vmatmul.mubr.bf16.gmra.mxu0 %v6097_v0  ;;  %881 = vst [vmem:[#allocation3 + $0x74] sm:$0xf] %v5184_v19  ;;  %312 = vst [vmem:[#allocation2 + $0x91] sm:$0xff] %v5427_v20  ;;  %v6126_v25 = vld [vmem:[%s6417_s8 + $0x2c] ss:$0 sps:$4 sm:$0xff]   ;;  %v6136_v46 = vld [vmem:[%s7299_s1 + $0x1b0] sm:$0xff]  }
  0x4e   : > { %v6098_v22 = vld [vmem:[#allocation3 + $0x438] ss:$36 sps:$4 sm:$0xff]   ;;  %313 = vst [vmem:[#allocation2 + $0x99] sm:$0xff] %v5428_v21  ;;  %1454 = vst [vmem:[#allocation3 + $0x14] sm:$0xf] %v5183_v18  ;;  %v5474_v47 = vld [vmem:[%s6417_s8 + $0x30] sm:$0xff]  }
  0x4f   : > { %1455 = vst [vmem:[#allocation3 + $0x38] sm:$0xf] %v5184_v19  ;;  %698 = vst [vmem:[#allocation3 + $0x1b4] sm:$0xf] %v6125_v24  ;;  %v6109_v31 = vld [vmem:[#allocation3 + $0x8] ss:$36 sps:$4 sm:$0xff]   ;;  %v5431_v51 = vunpack.c.l.bf16 %v5474_v47  ;;  %v5432_v52 = vunpack.c.h.bf16 %v5474_v47 }
  0x50   : > { %5607 = vmatpush3.bf16.msra.mxu1 %v6088_v45  ;;  %699 = vst [vmem:[#allocation3 + $0x1d8] sm:$0xf] %v6126_v25  ;;  %883 = vst [vmem:[#allocation3 + $0xbc] sm:$0xf] %v5186_v29  ;;  %v6107_v34 = vld [vmem:[#allocation3 + $0x124] ss:$36 sps:$4 sm:$0xff]  }
  0x51   : > { %5608 = vmatprep.subr.bf16.mxu1 %v6099_v50  ;;  %1457 = vst [vmem:[#allocation3 + $0x80] sm:$0xf] %v5186_v29  ;;  %v6112_v36 = vld [vmem:[#allocation3 + $0x120] ss:$36 sps:$4 sm:$0xff]   ;;  %3599 = vmatprep.mubr.bf16.mxu0 %v6107_v34  ;;  %v6121_v41 = vld [vmem:[#allocation3 + $0x54] ss:$36 sps:$4 sm:$0xff]  }
  0x52   : > { %v344_v37 = vld [vmem:[#allocation2 + $0x78] sm:$0xff]  ;;  %v6137_v48 = vld [vmem:[%s6417_s8 + $0x30] ss:$0 sps:$4 sm:$0xff]   ;;  %v6138_v49 = vld [vmem:[%s6417_s8 + $0x34] ss:$0 sps:$4 sm:$0xff]   ;;  %314 = vst [vmem:[#allocation2 + $0xa9] sm:$0xff] %v5431_v51 }
  0x53   : > { %3688 = vmatmul.mubr.bf16.gmra.mxu1 %v6098_v22  ;;  %v345_v38 = vld [vmem:[#allocation2 + $0x80] sm:$0xff]  ;;  %v5127_v39 = vpack.c.bf16 %v344_v37, %v344_v37  ;;  %v6129_v53 = vld [vmem:[#allocation3 + $0x9c] ss:$36 sps:$4 sm:$0xff]   ;;  %700 = vst [vmem:[#allocation3 + $0x1fc] sm:$0xf] %v6137_v48  ;;  %315 = vst [vmem:[#allocation2 + $0xb1] sm:$0xff] %v5432_v52 }
  0x54   : > { %5609 = vmatpush3.bf16.msra.mxu1 %v6101_v59  ;;  %3728 = vmatprep.mubr.bf16.mxu1 %v6111_v23  ;;  %v5128_v40 = vpack.c.bf16 %v345_v38, %v345_v38  ;;  %v346_v42 = vld [vmem:[#allocation2 + $0x90] sm:$0xff]  ;;  %v6124_v50 = vld [vmem:[#allocation3 + $0x50] ss:$36 sps:$4 sm:$0xff]   ;;  %701 = vst [vmem:[#allocation3 + $0x220] sm:$0xf] %v6138_v49  ;;  %v5475_v60 = vld [vmem:[%s6417_s8 + $0x38] sm:$0xff]  }
  0x55   : > { %5610 = vmatprep.subr.bf16.mxu1 %v6103_v62  ;;  %3600 = vmatmul.mubr.bf16.gmra.mxu0 %v6112_v36  ;;  %v347_v43 = vld [vmem:[#allocation2 + $0x98] sm:$0xff]  ;;  %504 = vst [vmem:[#allocation3 + $0x168] sm:$0xf] %v5127_v39  ;;  %v5129_v44 = vpack.c.bf16 %v346_v42, %v346_v42  ;;  %1078 = vst [vmem:[#allocation3 + $0x12c] sm:$0xf] %v5127_v39  ;;  %v724_v54 = vld [vmem:[#allocation2 + $0x4a] sm:$0xff]  ;;  %v5435_v0 = vunpack.c.l.bf16 %v5475_v60 }
  0x56   : > { %505 = vst [vmem:[#allocation3 + $0x18c] sm:$0xf] %v5128_v40  ;;  %v5130_v45 = vpack.c.bf16 %v347_v43, %v347_v43  ;;  %1079 = vst [vmem:[#allocation3 + $0x150] sm:$0xf] %v5128_v40  ;;  %v725_v55 = vld [vmem:[#allocation2 + $0x52] sm:$0xff]  ;;  %v5187_v56 = vpack.c.bf16 %v724_v54, %v724_v54  ;;  %v726_v3 = vld [vmem:[#allocation2 + $0x62] sm:$0xff] }
  0x57   : > { %506 = vst [vmem:[#allocation3 + $0x1b0] sm:$0xf] %v5129_v44  ;;  %1080 = vst [vmem:[#allocation3 + $0x174] sm:$0xf] %v5129_v44  ;;  %v5188_v57 = vpack.c.bf16 %v725_v55, %v725_v55  ;;  %v6145_v58 = vld [vmem:[%s7299_s1 + $0x150] sm:$0xff]   ;;  %v5189_v6 = vpack.c.bf16 %v726_v3, %v726_v3  ;;  %v6155_v11 = vld [vmem:[%s7299_s1 + $0x1e8] sm:$0xff]  }
  0x58   : > { %5611 = vmatpush3.bf16.msra.mxu1 %v6104_v1  ;;  %507 = vst [vmem:[#allocation3 + $0x1d4] sm:$0xf] %v5130_v45  ;;  %1081 = vst [vmem:[#allocation3 + $0x198] sm:$0xf] %v5130_v45  ;;  %v6146_v59 = vld [vmem:[%s7299_s1 + $0x110] sm:$0xff]   ;;  %5718 = vmatprep.subr.bf16.mxu0 %v6145_v58  ;;  %v5436_v1 = vunpack.c.h.bf16 %v5475_v60  ;;  %v6156_v14 = vld [vmem:[%s7299_s1 + $0x1a8] sm:$0xff]  }
  0x59   : > { %5820 = vmatprep.subr.bf16.mxu1 %v6113_v5  ;;  %884 = vst [vmem:[#allocation3 + $0xe0] sm:$0xf] %v5187_v56  ;;  %885 = vst [vmem:[#allocation3 + $0x104] sm:$0xf] %v5188_v57  ;;  %v6147_v61 = vld [vmem:[%s6417_s8 + $0x38] ss:$0 sps:$4 sm:$0xff]   ;;  %5719 = vmatpush3.bf16.msra.mxu0 %v6146_v59 }
  0x5a   : > { %v6148_v62 = vld [vmem:[%s6417_s8 + $0x3c] ss:$0 sps:$4 sm:$0xff]   ;;  %1458 = vst [vmem:[#allocation3 + $0xa4] sm:$0xf] %v5187_v56  ;;  %1459 = vst [vmem:[#allocation3 + $0xc8] sm:$0xf] %v5188_v57 }
  0x5b   : > { %3729 = vmatmul.mubr.bf16.vlgmr.msra.gmra.mxu1 %v6109_v31  ;;  %v6119_v63 = vld [vmem:[#allocation3 + $0x16c] ss:$36 sps:$4 sm:$0xff]   ;;  %702 = vst [vmem:[#allocation3 + $0x244] sm:$0xf] %v6147_v61  ;;  %703 = vst [vmem:[#allocation3 + $0x268] sm:$0xf] %v6148_v62 }
  0x5c   : > { %5821 = vmatpush3.bf16.msra.mxu1 %v6114_v32  ;;  %3736 = vmatprep.mubr.bf16.mxu1 %v6121_v41  ;;  %v727_v4 = vld [vmem:[#allocation2 + $0x6a] sm:$0xff]  ;;  %316 = vst [vmem:[#allocation2 + $0xc1] sm:$0xff] %v5435_v0  ;;  %317 = vst [vmem:[#allocation2 + $0xc9] sm:$0xff] %v5436_v1  ;;  %v6141_v15 = vld [vmem:[#allocation3 + $0xe4] ss:$36 sps:$4 sm:$0xff]  }
  0x5d   : > { %5822 = vmatprep.subr.bf16.mxu1 %v6134_v35  ;;  %v6123_v2 = vld [vmem:[#allocation3 + $0x168] ss:$36 sps:$4 sm:$0xff]   ;;  %3607 = vmatprep.mubr.bf16.mxu0 %v6119_v63  ;;  %v6127_v5 = vld [vmem:[#allocation3 + $0x1b4] ss:$36 sps:$4 sm:$0xff]   ;;  %v5190_v7 = vpack.c.bf16 %v727_v4, %v727_v4  ;;  %v349_v10 = vld [vmem:[#allocation2 + $0xb0] sm:$0xff] }
  0x5e   : > { %3608 = vmatmul.mubr.bf16.gmra.mxu0 %v6123_v2  ;;  %v6132_v8 = vld [vmem:[#allocation3 + $0x98] ss:$36 sps:$4 sm:$0xff]   ;;  %886 = vst [vmem:[#allocation3 + $0x128] sm:$0xf] %v5189_v6  ;;  %1460 = vst [vmem:[#allocation3 + $0xec] sm:$0xf] %v5189_v6  ;;  %v5132_v13 = vpack.c.bf16 %v349_v10, %v349_v10 }
  0x5f   : > { %3615 = vmatprep.mubr.bf16.mxu0 %v6127_v5  ;;  %v348_v9 = vld [vmem:[#allocation2 + $0xa8] sm:$0xff]  ;;  %887 = vst [vmem:[#allocation3 + $0x14c] sm:$0xf] %v5190_v7  ;;  %1461 = vst [vmem:[#allocation3 + $0x110] sm:$0xf] %v5190_v7  ;;  %v5476_v17 = vld [vmem:[%s6417_s8 + $0x40] sm:$0xff]  }
  0x60   : > { %5823 = vmatpush3.bf16.msra.mxu1 %v6136_v46  ;;  %v5131_v12 = vpack.c.bf16 %v348_v9, %v348_v9  ;;  %v6131_v16 = vld [vmem:[#allocation3 + $0x1b0] ss:$36 sps:$4 sm:$0xff]   ;;  %509 = vst [vmem:[#allocation3 + $0x21c] sm:$0xf] %v5132_v13  ;;  %1083 = vst [vmem:[#allocation3 + $0x1e0] sm:$0xf] %v5132_v13  ;;  %v5439_v19 = vunpack.c.l.bf16 %v5476_v17  ;;  %v5440_v20 = vunpack.c.h.bf16 %v5476_v17 }
  0x61   : > { %5824 = vmatprep.subr.bf16.mxu1 %v6155_v11  ;;  %v6157_v18 = vld [vmem:[%s6417_s8 + $0x40] ss:$0 sps:$4 sm:$0xff]   ;;  %v6158_v21 = vld [vmem:[%s6417_s8 + $0x44] ss:$0 sps:$4 sm:$0xff]   ;;  %v6165_v30 = vld [vmem:[%s7299_s1 + $0x148] sm:$0xff]  }
  0x62   : > { %508 = vst [vmem:[#allocation3 + $0x1f8] sm:$0xf] %v5131_v12  ;;  %1082 = vst [vmem:[#allocation3 + $0x1bc] sm:$0xf] %v5131_v12  ;;  %v728_v22 = vld [vmem:[#allocation2 + $0x7a] sm:$0xff]  ;;  %v729_v23 = vld [vmem:[#allocation2 + $0x82] sm:$0xff]  ;;  %5720 = vmatprep.subr.bf16.mxu0 %v6165_v30 }
  0x63   : > { %3737 = vmatmul.mubr.bf16.gmra.mxu1 %v6124_v50  ;;  %v350_v24 = vld [vmem:[#allocation2 + $0xc0] sm:$0xff]  ;;  %v351_v25 = vld [vmem:[#allocation2 + $0xc8] sm:$0xff]  ;;  %704 = vst [vmem:[#allocation3 + $0x28c] sm:$0xf] %v6157_v18  ;;  %v5191_v26 = vpack.c.bf16 %v728_v22, %v728_v22  ;;  %v5192_v27 = vpack.c.bf16 %v729_v23, %v729_v23  ;;  %1278 = vst [vmem:[#allocation3 + $0x250] sm:$0xf] %v6157_v18 }
  0x64   : > { %3744 = vmatprep.mubr.bf16.mxu1 %v6129_v53  ;;  %5825 = vmatpush3.bf16.msra.mxu1 %v6156_v14  ;;  %v5133_v28 = vpack.c.bf16 %v350_v24, %v350_v24  ;;  %v5134_v29 = vpack.c.bf16 %v351_v25, %v351_v25  ;;  %318 = vst [vmem:[#allocation2 + $0xd9] sm:$0xff] %v5439_v19  ;;  %319 = vst [vmem:[#allocation2 + $0xe1] sm:$0xff] %v5440_v20  ;;  %v6144_v31 = vld [vmem:[#allocation3 + $0xe0] ss:$36 sps:$4 sm:$0xff]   ;;  %v6151_v32 = vld [vmem:[#allocation3 + $0x12c] ss:$36 sps:$4 sm:$0xff]  }
  0x65   : > { %705 = vst [vmem:[#allocation3 + $0x2b0] sm:$0xf] %v6158_v21  ;;  %1279 = vst [vmem:[#allocation3 + $0x274] sm:$0xf] %v6158_v21  ;;  %v6166_v33 = vld [vmem:[%s7299_s1 + $0x108] sm:$0xff]   ;;  %v730_v41 = vld [vmem:[#allocation2 + $0x92] sm:$0xff] }
  0x66   : > { %3616 = vmatmul.mubr.bf16.gmra.mxu0 %v6131_v16  ;;  %888 = vst [vmem:[#allocation3 + $0x170] sm:$0xf] %v5191_v26  ;;  %889 = vst [vmem:[#allocation3 + $0x194] sm:$0xf] %v5192_v27  ;;  %v5477_v34 = vld [vmem:[%s6417_s8 + $0x48] sm:$0xff]   ;;  %v731_v42 = vld [vmem:[#allocation2 + $0x9a] sm:$0xff]  ;;  %v5193_v43 = vpack.c.bf16 %v730_v41, %v730_v41 }
  0x67   : > { %1462 = vst [vmem:[#allocation3 + $0x134] sm:$0xf] %v5191_v26  ;;  %1463 = vst [vmem:[#allocation3 + $0x158] sm:$0xf] %v5192_v27  ;;  %v6167_v35 = vld [vmem:[%s6417_s8 + $0x48] ss:$0 sps:$4 sm:$0xff]   ;;  %5721 = vmatpush3.bf16.msra.mxu0 %v6166_v33  ;;  %v5443_v38 = vunpack.c.l.bf16 %v5477_v34  ;;  %v5444_v39 = vunpack.c.h.bf16 %v5477_v34  ;;  %v5194_v44 = vpack.c.bf16 %v731_v42, %v731_v42 }
  0x68   : > { %510 = vst [vmem:[#allocation3 + $0x240] sm:$0xf] %v5133_v28  ;;  %511 = vst [vmem:[#allocation3 + $0x264] sm:$0xf] %v5134_v29  ;;  %v6168_v36 = vld [vmem:[%s6417_s8 + $0x4c] ss:$0 sps:$4 sm:$0xff]  }
  0x69   : > { %1084 = vst [vmem:[#allocation3 + $0x204] sm:$0xf] %v5133_v28  ;;  %1085 = vst [vmem:[#allocation3 + $0x228] sm:$0xf] %v5134_v29  ;;  %v6139_v37 = vld [vmem:[#allocation3 + $0x1fc] ss:$36 sps:$4 sm:$0xff]  }
  0x6a   : > { %v6143_v40 = vld [vmem:[#allocation3 + $0x1f8] ss:$36 sps:$4 sm:$0xff]   ;;  %706 = vst [vmem:[#allocation3 + $0x2d4] sm:$0xf] %v6167_v35  ;;  %707 = vst [vmem:[#allocation3 + $0x2f8] sm:$0xf] %v6168_v36  ;;  %3623 = vmatprep.mubr.bf16.mxu0 %v6139_v37 }
  0x6b   : > { %3745 = vmatmul.mubr.bf16.gmra.mxu1 %v6132_v8  ;;  %1280 = vst [vmem:[#allocation3 + $0x298] sm:$0xf] %v6167_v35  ;;  %1281 = vst [vmem:[#allocation3 + $0x2bc] sm:$0xf] %v6168_v36  ;;  %v6175_v45 = vld [vmem:[%s7299_s1 + $0x1e0] sm:$0xff]   ;;  %v352_v46 = vld [vmem:[#allocation2 + $0xd8] sm:$0xff] }
  0x6c   : > { %3752 = vmatprep.mubr.bf16.mxu1 %v6141_v15  ;;  %320 = vst [vmem:[#allocation2 + $0xf1] sm:$0xff] %v5443_v38  ;;  %321 = vst [vmem:[#allocation2 + $0xf9] sm:$0xff] %v5444_v39  ;;  %v353_v47 = vld [vmem:[#allocation2 + $0xe0] sm:$0xff]  ;;  %v5135_v48 = vpack.c.bf16 %v352_v46, %v352_v46  ;;  %5826 = vmatprep.subr.bf16.mxu1 %v6175_v45  ;;  %v6149_v50 = vld [vmem:[#allocation3 + $0x244] ss:$36 sps:$4 sm:$0xff]  }
  0x6d   : > { %v5136_v49 = vpack.c.bf16 %v353_v47, %v353_v47  ;;  %890 = vst [vmem:[#allocation3 + $0x1b8] sm:$0xf] %v5193_v43  ;;  %891 = vst [vmem:[#allocation3 + $0x1dc] sm:$0xf] %v5194_v44  ;;  %v6154_v51 = vld [vmem:[#allocation3 + $0x128] ss:$36 sps:$4 sm:$0xff]  }
  0x6e   : > { %1464 = vst [vmem:[#allocation3 + $0x17c] sm:$0xf] %v5193_v43  ;;  %1465 = vst [vmem:[#allocation3 + $0x1a0] sm:$0xf] %v5194_v44  ;;  %3624 = vmatmul.mubr.bf16.gmra.mxu0 %v6143_v40  ;;  %v6161_v52 = vld [vmem:[#allocation3 + $0x174] ss:$36 sps:$4 sm:$0xff]  }
  0x6f   : > { %512 = vst [vmem:[#allocation3 + $0x288] sm:$0xf] %v5135_v48  ;;  %513 = vst [vmem:[#allocation3 + $0x2ac] sm:$0xf] %v5136_v49  ;;  %3631 = vmatprep.mubr.bf16.mxu0 %v6149_v50  ;;  %v6153_v53 = vld [vmem:[#allocation3 + $0x240] ss:$36 sps:$4 sm:$0xff]  }
  0x70   : > { %1086 = vst [vmem:[#allocation3 + $0x24c] sm:$0xf] %v5135_v48  ;;  %1087 = vst [vmem:[#allocation3 + $0x270] sm:$0xf] %v5136_v49  ;;  %v6176_v54 = vld [vmem:[%s7299_s1 + $0x1a0] sm:$0xff]   ;;  %v5478_v61 = vld [vmem:[%s6417_s8 + $0x50] sm:$0xff]  }
  0x71   : > { %v6177_v55 = vld [vmem:[%s7299_s1 + $0x140] sm:$0xff]   ;;  %5827 = vmatpush3.bf16.msra.mxu1 %v6176_v54  ;;  %v6179_v62 = vld [vmem:[%s6417_s8 + $0x50] ss:$0 sps:$4 sm:$0xff]   ;;  %v6180_v63 = vld [vmem:[%s6417_s8 + $0x54] ss:$0 sps:$4 sm:$0xff]   ;;  %v5447_v0 = vunpack.c.l.bf16 %v5478_v61  ;;  %v5448_v1 = vunpack.c.h.bf16 %v5478_v61 }
  0x72   : > { %v6178_v58 = vld [vmem:[%s7299_s1 + $0x100] sm:$0xff]   ;;  %5722 = vmatprep.subr.bf16.mxu0 %v6177_v55  ;;  %708 = vst [vmem:[#allocation3 + $0x31c] sm:$0xf] %v6179_v62  ;;  %709 = vst [vmem:[#allocation3 + $0x340] sm:$0xf] %v6180_v63  ;;  %v732_v2 = vld [vmem:[#allocation2 + $0xaa] sm:$0xff] }
  0x73   : > { %3753 = vmatmul.mubr.bf16.gmra.mxu1 %v6144_v31  ;;  %v354_v56 = vld [vmem:[#allocation2 + $0xf0] sm:$0xff]  ;;  %v355_v57 = vld [vmem:[#allocation2 + $0xf8] sm:$0xff]  ;;  %5723 = vmatpush3.bf16.msra.mxu0 %v6178_v58  ;;  %1282 = vst [vmem:[#allocation3 + $0x2e0] sm:$0xf] %v6179_v62  ;;  %1283 = vst [vmem:[#allocation3 + $0x304] sm:$0xf] %v6180_v63  ;;  %v5195_v6 = vpack.c.bf16 %v732_v2, %v732_v2 }
  0x74   : > { %3760 = vmatprep.mubr.bf16.mxu1 %v6151_v32  ;;  %v5137_v59 = vpack.c.bf16 %v354_v56, %v354_v56  ;;  %v5138_v60 = vpack.c.bf16 %v355_v57, %v355_v57  ;;  %v733_v3 = vld [vmem:[#allocation2 + $0xb2] sm:$0xff]  ;;  %v6159_v4 = vld [vmem:[#allocation3 + $0x28c] ss:$36 sps:$4 sm:$0xff]   ;;  %322 = vst [vmem:[#allocation2 + $0x109] sm:$0xff] %v5447_v0  ;;  %323 = vst [vmem:[#allocation2 + $0x111] sm:$0xff] %v5448_v1 }
  0x75   : > { %v6164_v5 = vld [vmem:[#allocation3 + $0x170] ss:$36 sps:$4 sm:$0xff]   ;;  %v5196_v7 = vpack.c.bf16 %v733_v3, %v733_v3  ;;  %v6171_v8 = vld [vmem:[#allocation3 + $0x1bc] ss:$36 sps:$4 sm:$0xff]   ;;  %892 = vst [vmem:[#allocation3 + $0x200] sm:$0xf] %v5195_v6 }
  0x76   : > { %514 = vst [vmem:[#allocation3 + $0x2d0] sm:$0xf] %v5137_v59  ;;  %515 = vst [vmem:[#allocation3 + $0x2f4] sm:$0xf] %v5138_v60  ;;  %3632 = vmatmul.mubr.bf16.gmra.mxu0 %v6153_v53  ;;  %v734_v9 = vld [vmem:[#allocation2 + $0xc2] sm:$0xff]  ;;  %v735_v10 = vld [vmem:[#allocation2 + $0xca] sm:$0xff] }
  0x77   : > { %1088 = vst [vmem:[#allocation3 + $0x294] sm:$0xf] %v5137_v59  ;;  %1089 = vst [vmem:[#allocation3 + $0x2b8] sm:$0xf] %v5138_v60  ;;  %3639 = vmatprep.mubr.bf16.mxu0 %v6159_v4  ;;  %v6163_v11 = vld [vmem:[#allocation3 + $0x288] ss:$36 sps:$4 sm:$0xff]   ;;  %v5197_v12 = vpack.c.bf16 %v734_v9, %v734_v9  ;;  %v5198_v13 = vpack.c.bf16 %v735_v10, %v735_v10 }
  0x78   : > { %893 = vst [vmem:[#allocation3 + $0x224] sm:$0xf] %v5196_v7  ;;  %v1102_v14 = vld [vmem:[#allocation2 + $0x19] sm:$0xff]  ;;  %v1103_v15 = vld [vmem:[#allocation2 + $0x21] sm:$0xff]  ;;  %1466 = vst [vmem:[#allocation3 + $0x1c4] sm:$0xf] %v5195_v6 }
  0x79   : > { %1467 = vst [vmem:[#allocation3 + $0x1e8] sm:$0xf] %v5196_v7  ;;  %v5245_v16 = vpack.c.bf16 %v1102_v14, %v1102_v14  ;;  %v5246_v17 = vpack.c.bf16 %v1103_v15, %v1103_v15  ;;  %v6193_v18 = vld [vmem:[%s7299_s1 + $0x1d8] sm:$0xff]   ;;  %894 = vst [vmem:[#allocation3 + $0x248] sm:$0xf] %v5197_v12  ;;  %v737_v28 = vld [vmem:[#allocation2 + $0xe2] sm:$0xff] }
  0x7a   : > { %895 = vst [vmem:[#allocation3 + $0x26c] sm:$0xf] %v5198_v13  ;;  %v6611_v19 = vld [vmem:[%s7299_s1 + $0x238] sm:$0xff]   ;;  %1468 = vst [vmem:[#allocation3 + $0x20c] sm:$0xf] %v5197_v12  ;;  %5828 = vmatprep.subr.bf16.mxu1 %v6193_v18  ;;  %v5200_v31 = vpack.c.bf16 %v737_v28, %v737_v28  ;;  %v1106_v41 = vld [vmem:[#allocation2 + $0x49] sm:$0xff] }
  0x7b   : > { %3761 = vmatmul.mubr.bf16.gmra.mxu1 %v6154_v51  ;;  %1469 = vst [vmem:[#allocation3 + $0x230] sm:$0xf] %v5198_v13  ;;  %1262 = vst [vmem:[#allocation3 + $0x10] sm:$0xf] %v5245_v16  ;;  %v6195_v20 = vld [vmem:[%s7299_s1 + $0x198] sm:$0xff]   ;;  %5956 = vmatprep.subr.bf16.mxu0 %v6611_v19  ;;  %v356_v24 = vld [vmem:[#allocation2 + $0x108] sm:$0xff]  ;;  %v5249_v43 = vpack.c.bf16 %v1106_v41, %v1106_v41 }
  0x7c   : > { %3768 = vmatprep.mubr.bf16.mxu1 %v6161_v52  ;;  %1263 = vst [vmem:[#allocation3 + $0x34] sm:$0xf] %v5246_v17  ;;  %v736_v21 = vld [vmem:[#allocation2 + $0xda] sm:$0xff]  ;;  %v6169_v22 = vld [vmem:[#allocation3 + $0x2d4] ss:$36 sps:$4 sm:$0xff]   ;;  %v357_v25 = vld [vmem:[#allocation2 + $0x110] sm:$0xff]  ;;  %5829 = vmatpush3.bf16.msra.mxu1 %v6195_v20  ;;  %v5139_v26 = vpack.c.bf16 %v356_v24, %v356_v24 }
  0x7d   : > { %v5199_v23 = vpack.c.bf16 %v736_v21, %v736_v21  ;;  %v5140_v27 = vpack.c.bf16 %v357_v25, %v357_v25  ;;  %v1104_v29 = vld [vmem:[#allocation2 + $0x31] sm:$0xff]  ;;  %v1105_v30 = vld [vmem:[#allocation2 + $0x39] sm:$0xff]  ;;  %v6174_v34 = vld [vmem:[#allocation3 + $0x1b8] ss:$36 sps:$4 sm:$0xff]   ;;  %897 = vst [vmem:[#allocation3 + $0x2b4] sm:$0xf] %v5200_v31 }
  0x7e   : > { %3640 = vmatmul.mubr.bf16.gmra.mxu0 %v6163_v11  ;;  %v5247_v32 = vpack.c.bf16 %v1104_v29, %v1104_v29  ;;  %v5248_v33 = vpack.c.bf16 %v1105_v30, %v1105_v30  ;;  %516 = vst [vmem:[#allocation3 + $0x318] sm:$0xf] %v5139_v26  ;;  %v738_v35 = vld [vmem:[#allocation2 + $0xf2] sm:$0xff]  ;;  %v739_v36 = vld [vmem:[#allocation2 + $0xfa] sm:$0xff]  ;;  %1090 = vst [vmem:[#allocation3 + $0x2dc] sm:$0xf] %v5139_v26 }
  0x7f   : > { %896 = vst [vmem:[#allocation3 + $0x290] sm:$0xf] %v5199_v23  ;;  %1470 = vst [vmem:[#allocation3 + $0x254] sm:$0xf] %v5199_v23  ;;  %3647 = vmatprep.mubr.bf16.mxu0 %v6169_v22  ;;  %v6183_v37 = vld [vmem:[#allocation3 + $0x204] ss:$36 sps:$4 sm:$0xff]   ;;  %v5201_v38 = vpack.c.bf16 %v738_v35, %v738_v35  ;;  %v5202_v39 = vpack.c.bf16 %v739_v36, %v739_v36 }
  0x80   : > { %517 = vst [vmem:[#allocation3 + $0x33c] sm:$0xf] %v5140_v27  ;;  %1091 = vst [vmem:[#allocation3 + $0x300] sm:$0xf] %v5140_v27  ;;  %v6173_v40 = vld [vmem:[#allocation3 + $0x2d0] ss:$36 sps:$4 sm:$0xff]  }
  0x81   : > { %1264 = vst [vmem:[#allocation3 + $0x58] sm:$0xf] %v5247_v32  ;;  %1265 = vst [vmem:[#allocation3 + $0x7c] sm:$0xf] %v5248_v33  ;;  %v1107_v42 = vld [vmem:[#allocation2 + $0x51] sm:$0xff]  ;;  %v932_v55 = vld [vmem:[#allocation2 + $0x120] sm:$0xff] }
  0x82   : > { %1471 = vst [vmem:[#allocation3 + $0x278] sm:$0xf] %v5200_v31  ;;  %1839 = vst [vmem:[#allocation3 + $0x1c] sm:$0xf] %v5247_v32  ;;  %v5250_v44 = vpack.c.bf16 %v1107_v42, %v1107_v42  ;;  %v6208_v45 = vld [vmem:[%s7299_s1 + $0x1d0] sm:$0xff]   ;;  %v5235_v58 = vpack.c.bf16 %v932_v55, %v932_v55  ;;  %v933_v60 = vld [vmem:[#allocation2 + $0x128] sm:$0xff] }
  0x83   : > { %3769 = vmatmul.mubr.bf16.gmra.mxu1 %v6164_v5  ;;  %1840 = vst [vmem:[#allocation3 + $0x40] sm:$0xf] %v5248_v33  ;;  %898 = vst [vmem:[#allocation3 + $0x2d8] sm:$0xf] %v5201_v38  ;;  %v6181_v46 = vld [vmem:[#allocation3 + $0x31c] ss:$36 sps:$4 sm:$0xff]   ;;  %5830 = vmatprep.subr.bf16.mxu1 %v6208_v45  ;;  %v5236_v0 = vpack.c.bf16 %v933_v60, %v933_v60 }
  0x84   : > { %3776 = vmatprep.mubr.bf16.mxu1 %v6171_v8  ;;  %899 = vst [vmem:[#allocation3 + $0x2fc] sm:$0xf] %v5202_v39  ;;  %1472 = vst [vmem:[#allocation3 + $0x29c] sm:$0xf] %v5201_v38  ;;  %v6186_v47 = vld [vmem:[#allocation3 + $0x200] ss:$36 sps:$4 sm:$0xff]  }
  0x85   : > { %1473 = vst [vmem:[#allocation3 + $0x2c0] sm:$0xf] %v5202_v39  ;;  %1266 = vst [vmem:[#allocation3 + $0xa0] sm:$0xf] %v5249_v43  ;;  %v6187_v48 = vld [vmem:[#allocation3 + $0x24c] ss:$36 sps:$4 sm:$0xff]  }
  0x86   : > { %3648 = vmatmul.mubr.bf16.gmra.mxu0 %v6173_v40  ;;  %1841 = vst [vmem:[#allocation3 + $0x64] sm:$0xf] %v5249_v43  ;;  %1267 = vst [vmem:[#allocation3 + $0xc4] sm:$0xf] %v5250_v44  ;;  %v6191_v50 = vld [vmem:[#allocation3 + $0x14] ss:$36 sps:$4 sm:$0xff]  }
  0x87   : > { %1842 = vst [vmem:[#allocation3 + $0x88] sm:$0xf] %v5250_v44  ;;  %3655 = vmatprep.mubr.bf16.mxu0 %v6181_v46  ;;  %v6185_v49 = vld [vmem:[#allocation3 + $0x318] ss:$36 sps:$4 sm:$0xff]   ;;  %v6210_v51 = vld [vmem:[%s7299_s1 + $0x190] sm:$0xff]   ;;  %v934_v5 = vld [vmem:[#allocation2 + $0x138] sm:$0xff] }
  0x88   : > { %v740_v52 = vld [vmem:[#allocation2 + $0x10a] sm:$0xff]  ;;  %v741_v53 = vld [vmem:[#allocation2 + $0x112] sm:$0xff]  ;;  %5831 = vmatpush3.bf16.msra.mxu1 %v6210_v51  ;;  %v1108_v61 = vld [vmem:[#allocation2 + $0x61] sm:$0xff]  ;;  %1092 = vst [vmem:[#allocation3 + $0x324] sm:$0xf] %v5235_v58  ;;  %v5237_v9 = vpack.c.bf16 %v934_v5, %v934_v5 }
  0x89   : > { %v5203_v54 = vpack.c.bf16 %v740_v52, %v740_v52  ;;  %v6192_v56 = vld [vmem:[#allocation3 + $0x248] ss:$36 sps:$4 sm:$0xff]   ;;  %v5204_v57 = vpack.c.bf16 %v741_v53, %v741_v53  ;;  %v6196_v59 = vld [vmem:[#allocation3 + $0x294] ss:$36 sps:$4 sm:$0xff]   ;;  %v5251_v1 = vpack.c.bf16 %v1108_v61, %v1108_v61  ;;  %v6626_v12 = vld [vmem:[%s7299_s1 + $0x230] sm:$0xff]  }
  0x8a   : > { %v1109_v62 = vld [vmem:[#allocation2 + $0x69] sm:$0xff]  ;;  %v6189_v63 = vld [vmem:[#allocation3 + $0x10] ss:$36 sps:$4 sm:$0xff]   ;;  %1093 = vst [vmem:[#allocation3 + $0x348] sm:$0xf] %v5236_v0  ;;  %v937_v27 = vld [vmem:[#allocation2 + $0x158] sm:$0xff] }
  0x8b   : > { %3777 = vmatmul.mubr.bf16.gmra.mxu1 %v6174_v34  ;;  %900 = vst [vmem:[#allocation3 + $0x320] sm:$0xf] %v5203_v54  ;;  %1474 = vst [vmem:[#allocation3 + $0x2e4] sm:$0xf] %v5203_v54  ;;  %v5252_v2 = vpack.c.bf16 %v1109_v62, %v1109_v62  ;;  %v742_v3 = vld [vmem:[#allocation2 + $0x122] sm:$0xff]  ;;  %v743_v4 = vld [vmem:[#allocation2 + $0x12a] sm:$0xff]  ;;  %v5240_v31 = vpack.c.bf16 %v937_v27, %v937_v27 }
  0x8c   : > { %3784 = vmatprep.mubr.bf16.mxu1 %v6183_v37  ;;  %901 = vst [vmem:[#allocation3 + $0x344] sm:$0xf] %v5204_v57  ;;  %1475 = vst [vmem:[#allocation3 + $0x308] sm:$0xf] %v5204_v57  ;;  %v5205_v6 = vpack.c.bf16 %v742_v3, %v742_v3  ;;  %v5206_v7 = vpack.c.bf16 %v743_v4, %v743_v4  ;;  %v935_v8 = vld [vmem:[#allocation2 + $0x140] sm:$0xff]  ;;  %v6223_v16 = vld [vmem:[%s7299_s1 + $0x1c8] sm:$0xff]  }
  0x8d   : > { %v1110_v10 = vld [vmem:[#allocation2 + $0x79] sm:$0xff]  ;;  %v1111_v11 = vld [vmem:[#allocation2 + $0x81] sm:$0xff]  ;;  %1268 = vst [vmem:[#allocation3 + $0xe8] sm:$0xf] %v5251_v1  ;;  %1269 = vst [vmem:[#allocation3 + $0x10c] sm:$0xf] %v5252_v2  ;;  %v5238_v13 = vpack.c.bf16 %v935_v8, %v935_v8  ;;  %5832 = vmatprep.subr.bf16.mxu1 %v6223_v16 }
  0x8e   : > { %3656 = vmatmul.mubr.bf16.gmra.mxu0 %v6185_v49  ;;  %v5253_v14 = vpack.c.bf16 %v1110_v10, %v1110_v10  ;;  %v5254_v15 = vpack.c.bf16 %v1111_v11, %v1111_v11  ;;  %1843 = vst [vmem:[#allocation3 + $0xac] sm:$0xf] %v5251_v1  ;;  %1844 = vst [vmem:[#allocation3 + $0xd0] sm:$0xf] %v5252_v2  ;;  %v6198_v17 = vld [vmem:[#allocation3 + $0x5c] ss:$36 sps:$4 sm:$0xff]  }
  0x8f   : > { %3889 = vmatprep.mubr.bf16.mxu0 %v6191_v50  ;;  %902 = vst [vmem:[#allocation3 + $0x368] sm:$0xf] %v5205_v6  ;;  %903 = vst [vmem:[#allocation3 + $0x38c] sm:$0xf] %v5206_v7  ;;  %v6225_v18 = vld [vmem:[%s7299_s1 + $0x188] sm:$0xff]   ;;  %v744_v20 = vld [vmem:[#allocation2 + $0x13a] sm:$0xff] }
  0x90   : > { %1094 = vst [vmem:[#allocation3 + $0x36c] sm:$0xf] %v5237_v9  ;;  %1476 = vst [vmem:[#allocation3 + $0x32c] sm:$0xf] %v5205_v6  ;;  %v745_v21 = vld [vmem:[#allocation2 + $0x142] sm:$0xff]  ;;  %v936_v22 = vld [vmem:[#allocation2 + $0x150] sm:$0xff]  ;;  %5833 = vmatpush3.bf16.msra.mxu1 %v6225_v18  ;;  %v5207_v25 = vpack.c.bf16 %v744_v20, %v744_v20 }
  0x91   : > { %1477 = vst [vmem:[#allocation3 + $0x350] sm:$0xf] %v5206_v7  ;;  %1095 = vst [vmem:[#allocation3 + $0x390] sm:$0xf] %v5238_v13  ;;  %v6200_v23 = vld [vmem:[#allocation3 + $0x290] ss:$36 sps:$4 sm:$0xff]   ;;  %v5208_v26 = vpack.c.bf16 %v745_v21, %v745_v21  ;;  %v5239_v28 = vpack.c.bf16 %v936_v22, %v936_v22 }
  0x92   : > { %1270 = vst [vmem:[#allocation3 + $0x130] sm:$0xf] %v5253_v14  ;;  %1271 = vst [vmem:[#allocation3 + $0x154] sm:$0xf] %v5254_v15  ;;  %v6224_v24 = vld [vmem:[%s7299_s1 + $0x228] sm:$0xff]   ;;  %v1112_v29 = vld [vmem:[#allocation2 + $0x91] sm:$0xff] }
  0x93   : > { %3785 = vmatmul.mubr.bf16.gmra.mxu1 %v6186_v47  ;;  %1845 = vst [vmem:[#allocation3 + $0xf4] sm:$0xf] %v5253_v14  ;;  %1846 = vst [vmem:[#allocation3 + $0x118] sm:$0xf] %v5254_v15  ;;  %v1113_v30 = vld [vmem:[#allocation2 + $0x99] sm:$0xff]  ;;  %v5255_v32 = vpack.c.bf16 %v1112_v29, %v1112_v29  ;;  %v938_v38 = vld [vmem:[#allocation2 + $0x168] sm:$0xff] }
  0x94   : > { %3792 = vmatprep.mubr.bf16.mxu1 %v6187_v48  ;;  %v5256_v33 = vpack.c.bf16 %v1113_v30, %v1113_v30  ;;  %v746_v34 = vld [vmem:[#allocation2 + $0x152] sm:$0xff]  ;;  %v747_v35 = vld [vmem:[#allocation2 + $0x15a] sm:$0xff]  ;;  %904 = vst [vmem:[#allocation3 + $0x3b0] sm:$0xf] %v5207_v25  ;;  %905 = vst [vmem:[#allocation3 + $0x3d4] sm:$0xf] %v5208_v26 }
  0x95   : > { %1096 = vst [vmem:[#allocation3 + $0x3b4] sm:$0xf] %v5239_v28  ;;  %v5209_v36 = vpack.c.bf16 %v746_v34, %v746_v34  ;;  %v5210_v37 = vpack.c.bf16 %v747_v35, %v747_v35  ;;  %v939_v39 = vld [vmem:[#allocation2 + $0x170] sm:$0xff]  ;;  %1478 = vst [vmem:[#allocation3 + $0x374] sm:$0xf] %v5207_v25  ;;  %v6238_v48 = vld [vmem:[%s7299_s1 + $0x1c0] sm:$0xff]  }
  0x96   : > { %3890 = vmatmul.mubr.bf16.vlgmr.msra.gmra.mxu0 %v6189_v63  ;;  %v1114_v40 = vld [vmem:[#allocation2 + $0xa9] sm:$0xff]  ;;  %1479 = vst [vmem:[#allocation3 + $0x398] sm:$0xf] %v5208_v26  ;;  %1097 = vst [vmem:[#allocation3 + $0x3d8] sm:$0xf] %v5240_v31  ;;  %v5242_v42 = vpack.c.bf16 %v939_v39, %v939_v39  ;;  %v1115_v46 = vld [vmem:[#allocation2 + $0xb1] sm:$0xff]  ;;  %5834 = vmatprep.subr.bf16.mxu1 %v6238_v48 }
  0x97   : > { %5957 = vmatpush3.bf16.msra.mxu0 %v6611_v19  ;;  %3897 = vmatprep.mubr.bf16.mxu0 %v6198_v17  ;;  %v6202_v41 = vld [vmem:[#allocation3 + $0x2dc] ss:$36 sps:$4 sm:$0xff]   ;;  %1272 = vst [vmem:[#allocation3 + $0x178] sm:$0xf] %v5255_v32  ;;  %1273 = vst [vmem:[#allocation3 + $0x19c] sm:$0xf] %v5256_v33  ;;  %v5241_v19 = vpack.c.bf16 %v938_v38, %v938_v38  ;;  %v5257_v43 = vpack.c.bf16 %v1114_v40, %v1114_v40 }
  0x98   : > { %5958 = vmatprep.subr.bf16.mxu0 %v6626_v12  ;;  %1847 = vst [vmem:[#allocation3 + $0x13c] sm:$0xf] %v5255_v32  ;;  %1848 = vst [vmem:[#allocation3 + $0x160] sm:$0xf] %v5256_v33  ;;  %v6201_v44 = vld [vmem:[#allocation3 + $0x58] ss:$36 sps:$4 sm:$0xff]   ;;  %v5258_v47 = vpack.c.bf16 %v1115_v46, %v1115_v46 }
  0x99   : > { %906 = vst [vmem:[#allocation3 + $0x3f8] sm:$0xf] %v5209_v36  ;;  %907 = vst [vmem:[#allocation3 + $0x41c] sm:$0xf] %v5210_v37  ;;  %v6204_v45 = vld [vmem:[#allocation3 + $0xa4] ss:$36 sps:$4 sm:$0xff]  }
  0x9a   : > { %1480 = vst [vmem:[#allocation3 + $0x3bc] sm:$0xf] %v5209_v36  ;;  %1481 = vst [vmem:[#allocation3 + $0x3e0] sm:$0xf] %v5210_v37  ;;  %v6206_v49 = vld [vmem:[#allocation3 + $0x2d8] ss:$36 sps:$4 sm:$0xff]  }
  0x9b   : > { %3793 = vmatmul.mubr.bf16.gmra.mxu1 %v6192_v56  ;;  %5959 = vmatpush3.bf16.msra.mxu0 %v6626_v12  ;;  %1098 = vst [vmem:[#allocation3 + $0x3fc] sm:$0xf] %v5241_v19  ;;  %1099 = vst [vmem:[#allocation3 + $0x420] sm:$0xf] %v5242_v42  ;;  %v6211_v50 = vld [vmem:[#allocation3 + $0x324] ss:$36 sps:$4 sm:$0xff]  }
  0x9c   : > { %3800 = vmatprep.mubr.bf16.mxu1 %v6196_v59  ;;  %1274 = vst [vmem:[#allocation3 + $0x1c0] sm:$0xf] %v5257_v43  ;;  %1849 = vst [vmem:[#allocation3 + $0x184] sm:$0xf] %v5257_v43  ;;  %5960 = vmatprep.subr.bf16.mxu0 %v6224_v24  ;;  %v6207_v51 = vld [vmem:[#allocation3 + $0xa0] ss:$36 sps:$4 sm:$0xff]  }
  0x9d   : > { %1275 = vst [vmem:[#allocation3 + $0x1e4] sm:$0xf] %v5258_v47  ;;  %1850 = vst [vmem:[#allocation3 + $0x1a8] sm:$0xf] %v5258_v47  ;;  %v6213_v52 = vld [vmem:[#allocation3 + $0xec] ss:$36 sps:$4 sm:$0xff]  }
  0x9e   : > { %3898 = vmatmul.mubr.bf16.gmra.mxu0 %v6201_v44  ;;  %v6239_v53 = vld [vmem:[%s7299_s1 + $0x220] sm:$0xff]   ;;  %v5483_v55 = vld [vmem:[%s6417_s8 + $0x78] sm:$0xff]   ;;  %v748_v58 = vld [vmem:[#allocation2 + $0x16a] sm:$0xff] }
  0x9f   : > { %3905 = vmatprep.mubr.bf16.mxu0 %v6204_v45  ;;  %5961 = vmatpush3.bf16.msra.mxu0 %v6224_v24  ;;  %v6240_v54 = vld [vmem:[%s7299_s1 + $0x180] sm:$0xff]   ;;  %v5467_v56 = vunpack.c.l.bf16 %v5483_v55  ;;  %v5468_v57 = vunpack.c.h.bf16 %v5483_v55  ;;  %v749_v59 = vld [vmem:[#allocation2 + $0x172] sm:$0xff]  ;;  %v5211_v61 = vpack.c.bf16 %v748_v58, %v748_v58  ;;  %v1117_v63 = vld [vmem:[#allocation2 + $0xc9] sm:$0xff] }
  0xa0   : > { %5962 = vmatprep.subr.bf16.mxu0 %v6239_v53  ;;  %v1116_v60 = vld [vmem:[#allocation2 + $0xc1] sm:$0xff]  ;;  %5835 = vmatpush3.bf16.msra.mxu1 %v6240_v54  ;;  %v5212_v62 = vpack.c.bf16 %v749_v59, %v749_v59  ;;  %v6215_v1 = vld [vmem:[#allocation3 + $0x320] ss:$36 sps:$4 sm:$0xff]   ;;  %v6216_v2 = vld [vmem:[#allocation3 + $0xe8] ss:$36 sps:$4 sm:$0xff]   ;;  %v5260_v3 = vpack.c.bf16 %v1117_v63, %v1117_v63 }
  0xa1   : > { %v5259_v0 = vpack.c.bf16 %v1116_v60, %v1116_v60  ;;  %332 = vst [vmem:[#allocation2 + $0x181] sm:$0xff] %v5467_v56  ;;  %333 = vst [vmem:[#allocation2 + $0x189] sm:$0xff] %v5468_v57  ;;  %v6217_v4 = vld [vmem:[#allocation3 + $0x36c] ss:$36 sps:$4 sm:$0xff]   ;;  %v1487_v5 = vld [vmem:[#allocation2 + $0x30] sm:$0xff] }
  0xa2   : > { %908 = vst [vmem:[#allocation3 + $0x440] sm:$0xf] %v5211_v61  ;;  %909 = vst [vmem:[#allocation3 + $0x464] sm:$0xf] %v5212_v62  ;;  %v1488_v6 = vld [vmem:[#allocation2 + $0x38] sm:$0xff]  ;;  %v5309_v8 = vpack.c.bf16 %v1487_v5, %v1487_v5  ;;  %v1489_v11 = vld [vmem:[#allocation2 + $0x48] sm:$0xff] }
  0xa3   : > { %3801 = vmatmul.mubr.bf16.gmra.mxu1 %v6200_v23  ;;  %5963 = vmatpush3.bf16.msra.mxu0 %v6239_v53  ;;  %1276 = vst [vmem:[#allocation3 + $0x208] sm:$0xf] %v5259_v0  ;;  %1482 = vst [vmem:[#allocation3 + $0x404] sm:$0xf] %v5211_v61  ;;  %v6219_v7 = vld [vmem:[#allocation3 + $0x134] ss:$36 sps:$4 sm:$0xff]   ;;  %v5310_v9 = vpack.c.bf16 %v1488_v6, %v1488_v6  ;;  %v5311_v13 = vpack.c.bf16 %v1489_v11, %v1489_v11 }
  0xa4   : > { %3808 = vmatprep.mubr.bf16.mxu1 %v6202_v41  ;;  %1483 = vst [vmem:[#allocation3 + $0x428] sm:$0xf] %v5212_v62  ;;  %1851 = vst [vmem:[#allocation3 + $0x1cc] sm:$0xf] %v5259_v0  ;;  %v6253_v10 = vld [vmem:[%s7299_s1 + $0x218] sm:$0xff]   ;;  %v1490_v12 = vld [vmem:[#allocation2 + $0x50] sm:$0xff] }
  0xa5   : > { %1277 = vst [vmem:[#allocation3 + $0x22c] sm:$0xf] %v5260_v3  ;;  %1852 = vst [vmem:[#allocation3 + $0x1f0] sm:$0xf] %v5260_v3  ;;  %5964 = vmatprep.subr.bf16.mxu0 %v6253_v10  ;;  %v5312_v14 = vpack.c.bf16 %v1490_v12, %v1490_v12  ;;  %v1491_v15 = vld [vmem:[#allocation2 + $0x60] sm:$0xff]  ;;  %v1492_v16 = vld [vmem:[#allocation2 + $0x68] sm:$0xff] }
  0xa6   : > { %3906 = vmatmul.mubr.bf16.gmra.mxu0 %v6207_v51  ;;  %1647 = vst [vmem:[#allocation3 + $0x18] sm:$0xf] %v5309_v8  ;;  %1648 = vst [vmem:[#allocation3 + $0x3c] sm:$0xf] %v5310_v9  ;;  %v6221_v17 = vld [vmem:[#allocation3 + $0x368] ss:$36 sps:$4 sm:$0xff]   ;;  %v5313_v21 = vpack.c.bf16 %v1491_v15, %v1491_v15  ;;  %v5314_v22 = vpack.c.bf16 %v1492_v16, %v1492_v16 }
  0xa7   : > { %3913 = vmatprep.mubr.bf16.mxu0 %v6213_v52  ;;  %5965 = vmatpush3.bf16.msra.mxu0 %v6253_v10  ;;  %1649 = vst [vmem:[#allocation3 + $0x60] sm:$0xf] %v5311_v13  ;;  %1650 = vst [vmem:[#allocation3 + $0x84] sm:$0xf] %v5312_v14  ;;  %v6222_v25 = vld [vmem:[#allocation3 + $0x130] ss:$36 sps:$4 sm:$0xff]  }
  0xa8   : > { %v940_v18 = vld [vmem:[#allocation2 + $0x180] sm:$0xff]  ;;  %v941_v20 = vld [vmem:[#allocation2 + $0x188] sm:$0xff]  ;;  %1651 = vst [vmem:[#allocation3 + $0xa8] sm:$0xf] %v5313_v21  ;;  %1652 = vst [vmem:[#allocation3 + $0xcc] sm:$0xf] %v5314_v22 }
  0xa9   : > { %v5243_v23 = vpack.c.bf16 %v940_v18, %v940_v18  ;;  %v5244_v24 = vpack.c.bf16 %v941_v20, %v941_v20  ;;  %v6226_v26 = vld [vmem:[#allocation3 + $0x3b4] ss:$36 sps:$4 sm:$0xff]   ;;  %v6266_v27 = vld [vmem:[%s7299_s1 + $0x210] sm:$0xff]   ;;  %v1493_v33 = vld [vmem:[#allocation2 + $0x78] sm:$0xff] }
  0xaa   : > { %v1124_v28 = vld [vmem:[#allocation2 + $0x121] sm:$0xff]  ;;  %v1125_v29 = vld [vmem:[#allocation2 + $0x129] sm:$0xff]  ;;  %5966 = vmatprep.subr.bf16.mxu0 %v6266_v27  ;;  %v5315_v35 = vpack.c.bf16 %v1493_v33, %v1493_v33  ;;  %v1126_v37 = vld [vmem:[#allocation2 + $0x139] sm:$0xff] }
  0xab   : > { %3809 = vmatmul.mubr.bf16.gmra.mxu1 %v6206_v49  ;;  %1100 = vst [vmem:[#allocation3 + $0x444] sm:$0xf] %v5243_v23  ;;  %1101 = vst [vmem:[#allocation3 + $0x468] sm:$0xf] %v5244_v24  ;;  %v6228_v30 = vld [vmem:[#allocation3 + $0x17c] ss:$36 sps:$4 sm:$0xff]   ;;  %v5267_v31 = vpack.c.bf16 %v1124_v28, %v1124_v28  ;;  %v5268_v32 = vpack.c.bf16 %v1125_v29, %v1125_v29  ;;  %5967 = vmatpush3.bf16.msra.mxu0 %v6266_v27 }
  0xac   : > { %3816 = vmatprep.mubr.bf16.mxu1 %v6211_v50  ;;  %v1494_v34 = vld [vmem:[#allocation2 + $0x80] sm:$0xff]  ;;  %v1495_v39 = vld [vmem:[#allocation2 + $0x90] sm:$0xff]  ;;  %v5269_v40 = vpack.c.bf16 %v1126_v37, %v1126_v37  ;;  %1653 = vst [vmem:[#allocation3 + $0xf0] sm:$0xf] %v5315_v35  ;;  %v1496_v42 = vld [vmem:[#allocation2 + $0x98] sm:$0xff] }
  0xad   : > { %1284 = vst [vmem:[#allocation3 + $0x328] sm:$0xf] %v5267_v31  ;;  %1285 = vst [vmem:[#allocation3 + $0x34c] sm:$0xf] %v5268_v32  ;;  %v5316_v36 = vpack.c.bf16 %v1494_v34, %v1494_v34  ;;  %v1127_v38 = vld [vmem:[#allocation2 + $0x141] sm:$0xff]  ;;  %v5317_v19 = vpack.c.bf16 %v1495_v39, %v1495_v39  ;;  %v5318_v44 = vpack.c.bf16 %v1496_v42, %v1496_v42  ;;  %v1128_v49 = vld [vmem:[#allocation2 + $0x151] sm:$0xff] }
  0xae   : > { %3914 = vmatmul.mubr.bf16.gmra.mxu0 %v6216_v2  ;;  %1859 = vst [vmem:[#allocation3 + $0x2ec] sm:$0xf] %v5267_v31  ;;  %1860 = vst [vmem:[#allocation3 + $0x310] sm:$0xf] %v5268_v32  ;;  %v5270_v41 = vpack.c.bf16 %v1127_v38, %v1127_v38  ;;  %v6230_v43 = vld [vmem:[#allocation3 + $0x3b0] ss:$36 sps:$4 sm:$0xff]   ;;  %v5271_v51 = vpack.c.bf16 %v1128_v49, %v1128_v49 }
  0xaf   : > { %3921 = vmatprep.mubr.bf16.mxu0 %v6219_v7  ;;  %1654 = vst [vmem:[#allocation3 + $0x114] sm:$0xf] %v5316_v36  ;;  %1286 = vst [vmem:[#allocation3 + $0x370] sm:$0xf] %v5269_v40  ;;  %v6232_v45 = vld [vmem:[#allocation3 + $0x3fc] ss:$36 sps:$4 sm:$0xff]  }
  0xb0   : > { %1287 = vst [vmem:[#allocation3 + $0x394] sm:$0xf] %v5270_v41  ;;  %1655 = vst [vmem:[#allocation3 + $0x138] sm:$0xf] %v5317_v19  ;;  %v6231_v46 = vld [vmem:[#allocation3 + $0x178] ss:$36 sps:$4 sm:$0xff]  }
  0xb1   : > { %1861 = vst [vmem:[#allocation3 + $0x334] sm:$0xf] %v5269_v40  ;;  %1862 = vst [vmem:[#allocation3 + $0x358] sm:$0xf] %v5270_v41  ;;  %v6234_v47 = vld [vmem:[#allocation3 + $0x1c4] ss:$36 sps:$4 sm:$0xff]  }
  0xb2   : > { %1656 = vst [vmem:[#allocation3 + $0x15c] sm:$0xf] %v5318_v44  ;;  %v6279_v48 = vld [vmem:[%s7299_s1 + $0x208] sm:$0xff]   ;;  %v1129_v50 = vld [vmem:[#allocation2 + $0x159] sm:$0xff]  ;;  %v1498_v54 = vld [vmem:[#allocation2 + $0xb0] sm:$0xff] }
  0xb3   : > { %3817 = vmatmul.mubr.bf16.gmra.mxu1 %v6215_v1  ;;  %v5272_v52 = vpack.c.bf16 %v1129_v50, %v1129_v50  ;;  %5968 = vmatprep.subr.bf16.mxu0 %v6279_v48  ;;  %v1497_v53 = vld [vmem:[#allocation2 + $0xa8] sm:$0xff]  ;;  %1288 = vst [vmem:[#allocation3 + $0x3b8] sm:$0xf] %v5271_v51  ;;  %v5320_v56 = vpack.c.bf16 %v1498_v54, %v1498_v54  ;;  %1863 = vst [vmem:[#allocation3 + $0x37c] sm:$0xf] %v5271_v51  ;;  %v1131_v62 = vld [vmem:[#allocation2 + $0x171] sm:$0xff] }
  0xb4   : > { %3824 = vmatprep.mubr.bf16.mxu1 %v6217_v4  ;;  %v5319_v55 = vpack.c.bf16 %v1497_v53, %v1497_v53  ;;  %5969 = vmatpush3.bf16.msra.mxu0 %v6279_v48  ;;  %v6236_v57 = vld [vmem:[#allocation3 + $0x3f8] ss:$36 sps:$4 sm:$0xff]   ;;  %v6237_v58 = vld [vmem:[#allocation3 + $0x1c0] ss:$36 sps:$4 sm:$0xff]   ;;  %v6243_v60 = vld [vmem:[#allocation3 + $0x20c] ss:$36 sps:$4 sm:$0xff]   ;;  %v5274_v3 = vpack.c.bf16 %v1131_v62, %v1131_v62 }
  0xb5   : > { %1289 = vst [vmem:[#allocation3 + $0x3dc] sm:$0xf] %v5272_v52  ;;  %1864 = vst [vmem:[#allocation3 + $0x3a0] sm:$0xf] %v5272_v52  ;;  %v6241_v59 = vld [vmem:[#allocation3 + $0x444] ss:$36 sps:$4 sm:$0xff]  }
  0xb6   : > { %3922 = vmatmul.mubr.bf16.gmra.mxu0 %v6222_v25  ;;  %1657 = vst [vmem:[#allocation3 + $0x180] sm:$0xf] %v5319_v55  ;;  %1658 = vst [vmem:[#allocation3 + $0x1a4] sm:$0xf] %v5320_v56  ;;  %v1130_v61 = vld [vmem:[#allocation2 + $0x169] sm:$0xff]  ;;  %v1499_v63 = vld [vmem:[#allocation2 + $0xc0] sm:$0xff] }
  0xb7   : > { %3929 = vmatprep.mubr.bf16.mxu0 %v6228_v30  ;;  %v6341_v0 = vld [vmem:[#allocation2] sm:$0xff]  ;;  %v5273_v2 = vpack.c.bf16 %v1130_v61, %v1130_v61  ;;  %v1500_v4 = vld [vmem:[#allocation2 + $0xc8] sm:$0xff]  ;;  %v5321_v5 = vpack.c.bf16 %v1499_v63, %v1499_v63  ;;  %v6293_v8 = vld [vmem:[%s6417_s8 + $0x78] ss:$0 sps:$4 sm:$0xff]   ;;  %1291 = vst [vmem:[#allocation3 + $0x424] sm:$0xf] %v5274_v3 }
  0xb8   : > { %v5339_v1 = vpack.c.bf16 %v6341_v0, %v6341_v0  ;;  %v5322_v6 = vpack.c.bf16 %v1500_v4, %v1500_v4  ;;  %v6292_v7 = vld [vmem:[%s7299_s1 + $0x200] sm:$0xff]   ;;  %v6294_v9 = vld [vmem:[%s6417_s8 + $0x7c] ss:$0 sps:$4 sm:$0xff]   ;;  %1866 = vst [vmem:[#allocation3 + $0x3e8] sm:$0xf] %v5274_v3  ;;  %v1325_v11 = vld [vmem:[#allocation2 + $0x18a] sm:$0xff] }
  0xb9   : > { %1290 = vst [vmem:[#allocation3 + $0x400] sm:$0xf] %v5273_v2  ;;  %1659 = vst [vmem:[#allocation3 + $0x1c8] sm:$0xf] %v5321_v5  ;;  %5970 = vmatprep.subr.bf16.mxu0 %v6292_v7  ;;  %v1324_v10 = vld [vmem:[#allocation2 + $0x182] sm:$0xff]  ;;  %v5308_v14 = vpack.c.bf16 %v1325_v11, %v1325_v11  ;;  %v1693_v23 = vld [vmem:[#allocation2 + $0xd9] sm:$0xff] }
  0xba   : > { %1677 = vst [vmem:[#allocation3 + $0x450] sm:$0xf] %v5339_v1  ;;  %1678 = vst [vmem:[#allocation3 + $0x474] sm:$0xf] %v5339_v1  ;;  %v6251_v12 = vld [vmem:[#allocation3 + $0x1c] ss:$36 sps:$4 sm:$0xff]   ;;  %5971 = vmatpush3.bf16.msra.mxu0 %v6292_v7  ;;  %v5307_v13 = vpack.c.bf16 %v1324_v10, %v1324_v10 }
  0xbb   : > { %3825 = vmatmul.mubr.bf16.gmra.mxu1 %v6221_v17  ;;  %1865 = vst [vmem:[#allocation3 + $0x3c4] sm:$0xf] %v5273_v2  ;;  %1660 = vst [vmem:[#allocation3 + $0x1ec] sm:$0xf] %v5322_v6  ;;  %v6245_v15 = vld [vmem:[#allocation3 + $0x440] ss:$36 sps:$4 sm:$0xff]  }
  0xbc   : > { %3832 = vmatprep.mubr.bf16.mxu1 %v6226_v26  ;;  %1292 = vst [vmem:[#allocation3 + $0x448] sm:$0xf] %v6293_v8  ;;  %1293 = vst [vmem:[#allocation3 + $0x46c] sm:$0xf] %v6294_v9  ;;  %v6246_v16 = vld [vmem:[#allocation3 + $0x208] ss:$36 sps:$4 sm:$0xff]   ;;  %v5355_v26 = vpack.c.bf16 %v1693_v23, %v1693_v23 }
  0xbd   : > { %v1501_v17 = vld [vmem:[#allocation2 + $0xd8] sm:$0xff]  ;;  %v1502_v18 = vld [vmem:[#allocation2 + $0xe0] sm:$0xff]  ;;  %1484 = vst [vmem:[#allocation3 + $0x44c] sm:$0xf] %v5307_v13  ;;  %1485 = vst [vmem:[#allocation3 + $0x470] sm:$0xf] %v5308_v14 }
  0xbe   : > { %3930 = vmatmul.mubr.bf16.gmra.mxu0 %v6231_v46  ;;  %v6247_v20 = vld [vmem:[#allocation3 + $0x254] ss:$36 sps:$4 sm:$0xff]   ;;  %v5323_v21 = vpack.c.bf16 %v1501_v17, %v1501_v17  ;;  %v5324_v22 = vpack.c.bf16 %v1502_v18, %v1502_v18  ;;  %v1503_v25 = vld [vmem:[#allocation2 + $0xf0] sm:$0xff]  ;;  %2059 = vst [vmem:[#allocation3 + $0x410] sm:$0xf] %v5307_v13  ;;  %v1504_v28 = vld [vmem:[#allocation2 + $0xf8] sm:$0xff] }
  0xbf   : > { %3937 = vmatprep.mubr.bf16.mxu0 %v6234_v47  ;;  %v1694_v24 = vld [vmem:[#allocation2 + $0xe1] sm:$0xff]  ;;  %2060 = vst [vmem:[#allocation3 + $0x434] sm:$0xf] %v5308_v14  ;;  %v5325_v29 = vpack.c.bf16 %v1503_v25, %v1503_v25  ;;  %v1695_v30 = vld [vmem:[#allocation2 + $0xf1] sm:$0xff]  ;;  %v1696_v31 = vld [vmem:[#allocation2 + $0xf9] sm:$0xff]  ;;  %v5326_v32 = vpack.c.bf16 %v1504_v28, %v1504_v28  ;;  %s5116_s8 = sshll.u32 %s7321_s13, 8 }
  0xc0   : > { %v5356_v27 = vpack.c.bf16 %v1694_v24, %v1694_v24  ;;  %1661 = vst [vmem:[#allocation3 + $0x210] sm:$0xf] %v5323_v21  ;;  %1662 = vst [vmem:[#allocation3 + $0x234] sm:$0xf] %v5324_v22  ;;  %v5357_v33 = vpack.c.bf16 %v1695_v30, %v1695_v30  ;;  %v5358_v34 = vpack.c.bf16 %v1696_v31, %v1696_v31  ;;  %v1871_v35 = vld [vmem:[#allocation2 + $0x32] sm:$0xff]  ;;  %v1872_v36 = vld [vmem:[#allocation2 + $0x3a] sm:$0xff]  ;;  %s6989_s19 = scalar_lea.vmem %s7300_s2, %s5116_s8 }
  0xc1   : > { %v1873_v37 = vld [vmem:[#allocation2 + $0x4a] sm:$0xff]  ;;  %1853 = vst [vmem:[#allocation3 + $0x214] sm:$0xf] %v5355_v26  ;;  %1663 = vst [vmem:[#allocation3 + $0x258] sm:$0xf] %v5325_v29  ;;  %v5373_v38 = vpack.c.bf16 %v1871_v35, %v1871_v35  ;;  %v5374_v39 = vpack.c.bf16 %v1872_v36, %v1872_v36  ;;  %v1874_v41 = vld [vmem:[#allocation2 + $0x52] sm:$0xff] }
  0xc2   : > { %1854 = vst [vmem:[#allocation3 + $0x238] sm:$0xf] %v5356_v27  ;;  %v5375_v40 = vpack.c.bf16 %v1873_v37, %v1873_v37  ;;  %1664 = vst [vmem:[#allocation3 + $0x27c] sm:$0xf] %v5326_v32  ;;  %v5376_v19 = vpack.c.bf16 %v1874_v41, %v1874_v41  ;;  %v1505_v42 = vld [vmem:[#allocation2 + $0x108] sm:$0xff]  ;;  %v1698_v51 = vld [vmem:[#allocation2 + $0x111] sm:$0xff] }
  0xc3   : > { %3833 = vmatmul.mubr.bf16.gmra.mxu1 %v6230_v43  ;;  %1855 = vst [vmem:[#allocation3 + $0x25c] sm:$0xf] %v5357_v33  ;;  %1856 = vst [vmem:[#allocation3 + $0x280] sm:$0xf] %v5358_v34  ;;  %v1506_v43 = vld [vmem:[#allocation2 + $0x110] sm:$0xff]  ;;  %v5327_v47 = vpack.c.bf16 %v1505_v42, %v1505_v42  ;;  %v1875_v52 = vld [vmem:[#allocation2 + $0x62] sm:$0xff]  ;;  %v5360_v53 = vpack.c.bf16 %v1698_v51, %v1698_v51 }
  0xc4   : > { %3840 = vmatprep.mubr.bf16.mxu1 %v6232_v45  ;;  %2031 = vst [vmem:[#allocation3 + $0x20] sm:$0xf] %v5373_v38  ;;  %2032 = vst [vmem:[#allocation3 + $0x44] sm:$0xf] %v5374_v39  ;;  %v1697_v44 = vld [vmem:[#allocation2 + $0x109] sm:$0xff]  ;;  %v5328_v48 = vpack.c.bf16 %v1506_v43, %v1506_v43  ;;  %v5377_v55 = vpack.c.bf16 %v1875_v52, %v1875_v52  ;;  %v1877_v56 = vld [vmem:[#allocation2 + $0x7a] sm:$0xff] }
  0xc5   : > { %2033 = vst [vmem:[#allocation3 + $0x68] sm:$0xf] %v5375_v40  ;;  %v6249_v45 = vld [vmem:[#allocation3 + $0x18] ss:$36 sps:$4 sm:$0xff]   ;;  %v6252_v46 = vld [vmem:[#allocation3 + $0x250] ss:$36 sps:$4 sm:$0xff]   ;;  %v5359_v49 = vpack.c.bf16 %v1697_v44, %v1697_v44 }
  0xc6   : > { %3938 = vmatmul.mubr.bf16.gmra.mxu0 %v6237_v58  ;;  %v6256_v50 = vld [vmem:[#allocation3 + $0x64] ss:$36 sps:$4 sm:$0xff]   ;;  %2034 = vst [vmem:[#allocation3 + $0x8c] sm:$0xf] %v5376_v19  ;;  %1665 = vst [vmem:[#allocation3 + $0x2a0] sm:$0xf] %v5327_v47 }
  0xc7   : > { %3945 = vmatprep.mubr.bf16.mxu0 %v6243_v60  ;;  %1666 = vst [vmem:[#allocation3 + $0x2c4] sm:$0xf] %v5328_v48  ;;  %1857 = vst [vmem:[#allocation3 + $0x2a4] sm:$0xf] %v5359_v49  ;;  %v1876_v54 = vld [vmem:[#allocation2 + $0x6a] sm:$0xff]  ;;  %v5379_v60 = vpack.c.bf16 %v1877_v56, %v1877_v56  ;;  %v1507_v63 = vld [vmem:[#allocation2 + $0x120] sm:$0xff] }
  0xc8   : > { %v6254_v58 = vld [vmem:[#allocation3 + $0x29c] ss:$36 sps:$4 sm:$0xff]   ;;  %1858 = vst [vmem:[#allocation3 + $0x2c8] sm:$0xf] %v5360_v53  ;;  %2035 = vst [vmem:[#allocation3 + $0xb0] sm:$0xf] %v5377_v55  ;;  %v5329_v4 = vpack.c.bf16 %v1507_v63, %v1507_v63 }
  0xc9   : > { %2037 = vst [vmem:[#allocation3 + $0xf8] sm:$0xf] %v5379_v60  ;;  %v6259_v62 = vld [vmem:[#allocation3 + $0x60] ss:$36 sps:$4 sm:$0xff]   ;;  %v1508_v0 = vld [vmem:[#allocation2 + $0x128] sm:$0xff]  ;;  %v1880_v6 = vld [vmem:[#allocation2 + $0x9a] sm:$0xff] }
  0xca   : > { %v1879_v1 = vld [vmem:[#allocation2 + $0x92] sm:$0xff]  ;;  %v6258_v2 = vld [vmem:[#allocation3 + $0x298] ss:$36 sps:$4 sm:$0xff]   ;;  %v6262_v3 = vld [vmem:[#allocation3 + $0xac] ss:$36 sps:$4 sm:$0xff]   ;;  %v5330_v5 = vpack.c.bf16 %v1508_v0, %v1508_v0  ;;  %v5382_v8 = vpack.c.bf16 %v1880_v6, %v1880_v6 }
  0xcb   : > { %3841 = vmatmul.mubr.bf16.gmra.mxu1 %v6236_v57  ;;  %v1878_v57 = vld [vmem:[#allocation2 + $0x82] sm:$0xff]  ;;  %v5381_v7 = vpack.c.bf16 %v1879_v1, %v1879_v1  ;;  %v1881_v9 = vld [vmem:[#allocation2 + $0xaa] sm:$0xff]  ;;  %v1882_v10 = vld [vmem:[#allocation2 + $0xb2] sm:$0xff]  ;;  %1667 = vst [vmem:[#allocation3 + $0x2e8] sm:$0xf] %v5329_v4 }
  0xcc   : > { %3848 = vmatprep.mubr.bf16.mxu1 %v6241_v59  ;;  %v5378_v59 = vpack.c.bf16 %v1876_v54, %v1876_v54  ;;  %v5380_v61 = vpack.c.bf16 %v1878_v57, %v1878_v57  ;;  %1668 = vst [vmem:[#allocation3 + $0x30c] sm:$0xf] %v5330_v5  ;;  %v5383_v11 = vpack.c.bf16 %v1881_v9, %v1881_v9  ;;  %v1509_v13 = vld [vmem:[#allocation2 + $0x138] sm:$0xff]  ;;  %v1510_v14 = vld [vmem:[#allocation2 + $0x140] sm:$0xff]  ;;  %2040 = vst [vmem:[#allocation3 + $0x164] sm:$0xf] %v5382_v8 }
  0xcd   : > { %2039 = vst [vmem:[#allocation3 + $0x140] sm:$0xf] %v5381_v7  ;;  %v5331_v17 = vpack.c.bf16 %v1509_v13, %v1509_v13  ;;  %v5332_v18 = vpack.c.bf16 %v1510_v14, %v1510_v14  ;;  %v6265_v21 = vld [vmem:[#allocation3 + $0xa8] ss:$36 sps:$4 sm:$0xff]   ;;  %v1884_v22 = vld [vmem:[#allocation2 + $0xca] sm:$0xff]  ;;  %v1886_v24 = vld [vmem:[#allocation2 + $0xe2] sm:$0xff] }
  0xce   : > { %3946 = vmatmul.mubr.bf16.gmra.mxu0 %v6246_v16  ;;  %2036 = vst [vmem:[#allocation3 + $0xd4] sm:$0xf] %v5378_v59  ;;  %2038 = vst [vmem:[#allocation3 + $0x11c] sm:$0xf] %v5380_v61  ;;  %v6260_v16 = vld [vmem:[#allocation3 + $0x2e4] ss:$36 sps:$4 sm:$0xff]   ;;  %v5386_v25 = vpack.c.bf16 %v1884_v22, %v1884_v22  ;;  %v5388_v27 = vpack.c.bf16 %v1886_v24, %v1886_v24 }
  0xcf   : > { %3953 = vmatprep.mubr.bf16.mxu0 %v6247_v20  ;;  %2041 = vst [vmem:[#allocation3 + $0x188] sm:$0xf] %v5383_v11  ;;  %1669 = vst [vmem:[#allocation3 + $0x330] sm:$0xf] %v5331_v17  ;;  %v1885_v23 = vld [vmem:[#allocation2 + $0xda] sm:$0xff]  ;;  %v1511_v28 = vld [vmem:[#allocation2 + $0x150] sm:$0xff] }
  0xd0   : > { %1670 = vst [vmem:[#allocation3 + $0x354] sm:$0xf] %v5332_v18  ;;  %v5387_v26 = vpack.c.bf16 %v1885_v23, %v1885_v23  ;;  %v1512_v29 = vld [vmem:[#allocation2 + $0x158] sm:$0xff]  ;;  %v5333_v31 = vpack.c.bf16 %v1511_v28, %v1511_v28  ;;  %v1889_v35 = vld [vmem:[#allocation2 + $0x10a] sm:$0xff]  ;;  %2044 = vst [vmem:[#allocation3 + $0x1f4] sm:$0xf] %v5386_v25 }
  0xd1   : > { %v1887_v30 = vld [vmem:[#allocation2 + $0xf2] sm:$0xff]  ;;  %v5334_v32 = vpack.c.bf16 %v1512_v29, %v1512_v29  ;;  %v1888_v33 = vld [vmem:[#allocation2 + $0xfa] sm:$0xff]  ;;  %v6269_v37 = vld [vmem:[#allocation3 + $0xf4] ss:$36 sps:$4 sm:$0xff]   ;;  %2046 = vst [vmem:[#allocation3 + $0x23c] sm:$0xf] %v5388_v27  ;;  %v5391_v39 = vpack.c.bf16 %v1889_v35, %v1889_v35 }
  0xd2   : > { %v5389_v34 = vpack.c.bf16 %v1887_v30, %v1887_v30  ;;  %v1890_v36 = vld [vmem:[#allocation2 + $0x112] sm:$0xff]  ;;  %2045 = vst [vmem:[#allocation3 + $0x218] sm:$0xf] %v5387_v26  ;;  %v5390_v38 = vpack.c.bf16 %v1888_v33, %v1888_v33  ;;  %1671 = vst [vmem:[#allocation3 + $0x378] sm:$0xf] %v5333_v31  ;;  %v1513_v42 = vld [vmem:[#allocation2 + $0x168] sm:$0xff] }
  0xd3   : > { %3849 = vmatmul.mubr.bf16.gmra.mxu1 %v6245_v15  ;;  %v1883_v15 = vld [vmem:[#allocation2 + $0xc2] sm:$0xff]  ;;  %v5392_v40 = vpack.c.bf16 %v1890_v36, %v1890_v36  ;;  %v6264_v41 = vld [vmem:[#allocation3 + $0x2e0] ss:$36 sps:$4 sm:$0xff]   ;;  %1672 = vst [vmem:[#allocation3 + $0x39c] sm:$0xf] %v5334_v32  ;;  %v1896_v9 = vld [vmem:[#allocation2 + $0x15a] sm:$0xff] }
  0xd4   : > { %4050 = vmatprep.mubr.bf16.mxu1 %v6251_v12  ;;  %v5384_v12 = vpack.c.bf16 %v1882_v10, %v1882_v10  ;;  %v5385_v20 = vpack.c.bf16 %v1883_v15, %v1883_v15  ;;  %2047 = vst [vmem:[#allocation3 + $0x260] sm:$0xf] %v5389_v34  ;;  %v6267_v19 = vld [vmem:[#allocation3 + $0x32c] ss:$36 sps:$4 sm:$0xff]   ;;  %2048 = vst [vmem:[#allocation3 + $0x284] sm:$0xf] %v5390_v38 }
  0xd5   : > { %2049 = vst [vmem:[#allocation3 + $0x2a8] sm:$0xf] %v5391_v39  ;;  %2050 = vst [vmem:[#allocation3 + $0x2cc] sm:$0xf] %v5392_v40  ;;  %v1514_v43 = vld [vmem:[#allocation2 + $0x170] sm:$0xff]  ;;  %v1891_v44 = vld [vmem:[#allocation2 + $0x122] sm:$0xff] }
  0xd6   : > { %3954 = vmatmul.mubr.bf16.gmra.mxu0 %v6252_v46  ;;  %2042 = vst [vmem:[#allocation3 + $0x1ac] sm:$0xf] %v5384_v12  ;;  %2043 = vst [vmem:[#allocation3 + $0x1d0] sm:$0xf] %v5385_v20  ;;  %v5335_v46 = vpack.c.bf16 %v1513_v42, %v1513_v42  ;;  %v5336_v47 = vpack.c.bf16 %v1514_v43, %v1514_v43  ;;  %v1892_v48 = vld [vmem:[#allocation2 + $0x12a] sm:$0xff]  ;;  %v5393_v49 = vpack.c.bf16 %v1891_v44, %v1891_v44  ;;  %v1894_v51 = vld [vmem:[#allocation2 + $0x142] sm:$0xff] }
  0xd7   : > { %3961 = vmatprep.mubr.bf16.mxu0 %v6254_v58  ;;  %v6272_v52 = vld [vmem:[#allocation3 + $0xf0] ss:$36 sps:$4 sm:$0xff]   ;;  %v5394_v53 = vpack.c.bf16 %v1892_v48, %v1892_v48  ;;  %v5396_v55 = vpack.c.bf16 %v1894_v51, %v1894_v51  ;;  %v6275_v56 = vld [vmem:[#allocation3 + $0x13c] ss:$36 sps:$4 sm:$0xff]   ;;  %v6271_v58 = vld [vmem:[#allocation3 + $0x328] ss:$36 sps:$4 sm:$0xff]   ;;  %v5398_v12 = vpack.c.bf16 %v1896_v9, %v1896_v9 }
  0xd8   : > { %1673 = vst [vmem:[#allocation3 + $0x3c0] sm:$0xf] %v5335_v46  ;;  %1674 = vst [vmem:[#allocation3 + $0x3e4] sm:$0xf] %v5336_v47  ;;  %v6273_v60 = vld [vmem:[#allocation3 + $0x374] ss:$36 sps:$4 sm:$0xff]  }
  0xd9   : > { %2051 = vst [vmem:[#allocation3 + $0x2f0] sm:$0xf] %v5393_v49  ;;  %2052 = vst [vmem:[#allocation3 + $0x314] sm:$0xf] %v5394_v53  ;;  %v1515_v63 = vld [vmem:[#allocation2 + $0x180] sm:$0xff]  ;;  %v1516_v0 = vld [vmem:[#allocation2 + $0x188] sm:$0xff] }
  0xda   : > { %2054 = vst [vmem:[#allocation3 + $0x35c] sm:$0xf] %v5396_v55  ;;  %v1707_v1 = vld [vmem:[#allocation2 + $0x181] sm:$0xff]  ;;  %v5337_v4 = vpack.c.bf16 %v1515_v63, %v1515_v63  ;;  %v5338_v5 = vpack.c.bf16 %v1516_v0, %v1516_v0  ;;  %v1708_v6 = vld [vmem:[#allocation2 + $0x189] sm:$0xff]  ;;  %v1895_v8 = vld [vmem:[#allocation2 + $0x152] sm:$0xff] }
  0xdb   : > { %4051 = vmatmul.mubr.bf16.vlgmr.msra.gmra.mxu1 %v6249_v45  ;;  %v5369_v7 = vpack.c.bf16 %v1707_v1, %v1707_v1  ;;  %v5370_v10 = vpack.c.bf16 %v1708_v6, %v1708_v6  ;;  %v5397_v11 = vpack.c.bf16 %v1895_v8, %v1895_v8  ;;  %v1897_v13 = vld [vmem:[#allocation2 + $0x16a] sm:$0xff]  ;;  %v1898_v14 = vld [vmem:[#allocation2 + $0x172] sm:$0xff]  ;;  %2056 = vst [vmem:[#allocation3 + $0x3a4] sm:$0xf] %v5398_v12  ;;  %v6277_v24 = vld [vmem:[#allocation3 + $0x370] ss:$36 sps:$4 sm:$0xff]  }
  0xdc   : > { %4058 = vmatprep.mubr.bf16.mxu1 %v6256_v50  ;;  %v1893_v50 = vld [vmem:[#allocation2 + $0x13a] sm:$0xff]  ;;  %1675 = vst [vmem:[#allocation3 + $0x408] sm:$0xf] %v5337_v4  ;;  %1676 = vst [vmem:[#allocation3 + $0x42c] sm:$0xf] %v5338_v5  ;;  %v5399_v18 = vpack.c.bf16 %v1897_v13, %v1897_v13  ;;  %v5400_v20 = vpack.c.bf16 %v1898_v14, %v1898_v14  ;;  %v1902_v33 = vld [vmem:[#allocation2 + $0x1a2] sm:$0xff] }
  0xdd   : > { %v5395_v54 = vpack.c.bf16 %v1893_v50, %v1893_v50  ;;  %v1709_v15 = vld [vmem:[#allocation2 + $0x199] sm:$0xff]  ;;  %1867 = vst [vmem:[#allocation3 + $0x40c] sm:$0xf] %v5369_v7  ;;  %1868 = vst [vmem:[#allocation3 + $0x430] sm:$0xf] %v5370_v10  ;;  %v1710_v27 = vld [vmem:[#allocation2 + $0x1a1] sm:$0xff] }
  0xde   : > { %3962 = vmatmul.mubr.bf16.gmra.mxu0 %v6258_v2  ;;  %v6282_v23 = vld [vmem:[#allocation3 + $0x184] ss:$36 sps:$4 sm:$0xff]   ;;  %2055 = vst [vmem:[#allocation3 + $0x380] sm:$0xf] %v5397_v11  ;;  %2057 = vst [vmem:[#allocation3 + $0x3c8] sm:$0xf] %v5399_v18  ;;  %v5372_v30 = vpack.c.bf16 %v1710_v27, %v1710_v27 }
  0xdf   : > { %3969 = vmatprep.mubr.bf16.mxu0 %v6260_v16  ;;  %2053 = vst [vmem:[#allocation3 + $0x338] sm:$0xf] %v5395_v54  ;;  %v6278_v16 = vld [vmem:[#allocation3 + $0x138] ss:$36 sps:$4 sm:$0xff]   ;;  %2058 = vst [vmem:[#allocation3 + $0x3ec] sm:$0xf] %v5400_v20 }
  0xe0   : > { %v6280_v26 = vld [vmem:[#allocation3 + $0x3bc] ss:$36 sps:$4 sm:$0xff]   ;;  %v1901_v31 = vld [vmem:[#allocation2 + $0x19a] sm:$0xff]  ;;  %1870 = vst [vmem:[#allocation3 + $0x478] sm:$0xf] %v5372_v30 }
  0xe1   : > { %v5403_v34 = vpack.c.bf16 %v1901_v31, %v1901_v31  ;;  %v6285_v39 = vld [vmem:[#allocation3 + $0x180] ss:$36 sps:$4 sm:$0xff]   ;;  %v6288_v42 = vld [vmem:[#allocation3 + $0x1cc] ss:$36 sps:$4 sm:$0xff]   ;;  %v6284_v43 = vld [vmem:[#allocation3 + $0x3b8] ss:$36 sps:$4 sm:$0xff]  }
  0xe2   : > { %v6286_v47 = vld [vmem:[#allocation3 + $0x404] ss:$36 sps:$4 sm:$0xff]   ;;  %v6297_v53 = vld [vmem:[#allocation3 + $0x214] ss:$36 sps:$4 sm:$0xff]   ;;  %v6303_v6 = vld [vmem:[#allocation3 + $0x25c] ss:$36 sps:$4 sm:$0xff]  }
  0xe3   : > { %4059 = vmatmul.mubr.bf16.gmra.mxu1 %v6259_v62  ;;  %2061 = vst [vmem:[#allocation3 + $0x458] sm:$0xf] %v5403_v34  ;;  %v6291_v51 = vld [vmem:[#allocation3 + $0x1c8] ss:$36 sps:$4 sm:$0xff]   ;;  %v6290_v54 = vld [vmem:[#allocation3 + $0x400] ss:$36 sps:$4 sm:$0xff]  }
  0xe4   : > { %4066 = vmatprep.mubr.bf16.mxu1 %v6262_v3  ;;  %v6300_v5 = vld [vmem:[#allocation3 + $0x210] ss:$36 sps:$4 sm:$0xff]   ;;  %v6299_v7 = vld [vmem:[#allocation3 + $0x448] ss:$36 sps:$4 sm:$0xff]   ;;  %v6304_v10 = vld [vmem:[#allocation3 + $0x20] ss:$36 sps:$4 sm:$0xff]  }
  0xe5   : > { %v6301_v18 = vld [vmem:[#allocation3 + $0x258] ss:$36 sps:$4 sm:$0xff]   ;;  %v6308_v20 = vld [vmem:[#allocation3 + $0x2a4] ss:$36 sps:$4 sm:$0xff]  }
  0xe6   : > { %3970 = vmatmul.mubr.bf16.gmra.mxu0 %v6264_v41 }
  0xe7   : > { %3977 = vmatprep.mubr.bf16.mxu0 %v6267_v19 }
  0xeb   : > { %4067 = vmatmul.mubr.bf16.gmra.mxu1 %v6265_v21  ;;  %v5371_v21 = vpack.c.bf16 %v1709_v15, %v1709_v15 }
  0xec   : > { %4074 = vmatprep.mubr.bf16.mxu1 %v6269_v37  ;;  %v5404_v37 = vpack.c.bf16 %v1902_v33, %v1902_v33 }
  0xed   : > { %1869 = vst [vmem:[#allocation3 + $0x454] sm:$0xf] %v5371_v21 }
  0xee   : > { %3978 = vmatmul.mubr.bf16.gmra.mxu0 %v6271_v58  ;;  %2062 = vst [vmem:[#allocation3 + $0x47c] sm:$0xf] %v5404_v37  ;;  %v6295_v58 = vld [vmem:[#allocation3 + $0x44c] ss:$36 sps:$4 sm:$0xff]  }
  0xef   : > { %3985 = vmatprep.mubr.bf16.mxu0 %v6273_v60 }
  0xf1   : > { %v5500_v45 = vpop.f32.mrf.mxu0 }
  0xf3   : > { %v5501_v57 = vpop.f32.mrf.mxu0  ;;  %4075 = vmatmul.mubr.bf16.gmra.mxu1 %v6272_v52 }
  0xf4   : > { %v6664_v59 = vadd.f32 %v5501_v57, %v5500_v45  ;;  %4082 = vmatprep.mubr.bf16.mxu1 %v6275_v56 }
  0xf5   : > { %v5503_v61 = vpop.f32.mrf.mxu0 }
  0xf6   : > { %3986 = vmatmul.mubr.bf16.gmra.mxu0 %v6277_v24 }
  0xf7   : > { %v5504_v62 = vpop.f32.mrf.mxu0  ;;  %3993 = vmatprep.mubr.bf16.mxu0 %v6280_v26  ;;  %v6309_v26 = vld [vmem:[#allocation3 + $0xb0] ss:$36 sps:$4 sm:$0xff]  }
  0xf8   : > { %v6666_v3 = vadd.f32 %v5504_v62, %v5503_v61 }
  0xfb   : > { %v5572_v2 = vpop.f32.mrf.mxu1  ;;  %4083 = vmatmul.mubr.bf16.gmra.mxu1 %v6278_v16 }
  0xfc   : > { %4090 = vmatprep.mubr.bf16.mxu1 %v6282_v23  ;;  %v6305_v23 = vld [vmem:[#allocation3 + $0x68] ss:$36 sps:$4 sm:$0xff]  }
  0xfd   : > { %v5573_v17 = vpop.f32.mrf.mxu1  ;;  %v5506_v29 = vpop.f32.mrf.mxu0 }
  0xfe   : > { %v6668_v22 = vadd.f32 %v5573_v17, %v5572_v2  ;;  %3994 = vmatmul.mubr.bf16.gmra.mxu0 %v6284_v43 }
  0xff   : > { %v5575_v25 = vpop.f32.mrf.mxu1  ;;  %v5507_v36 = vpop.f32.mrf.mxu0  ;;  %4001 = vmatprep.mubr.bf16.mxu0 %v6286_v47 }
 0x100   : > { %v6672_v38 = vadd.f32 %v5507_v36, %v5506_v29 }
 0x101   : > { %v5576_v28 = vpop.f32.mrf.mxu1  ;;  %v5509_v41 = vpop.f32.mrf.mxu0 }
 0x102   : > { %v6670_v32 = vadd.f32 %v5576_v28, %v5575_v25 }
 0x103   : > { %v5578_v35 = vpop.f32.mrf.mxu1  ;;  %v5510_v45 = vpop.f32.mrf.mxu0  ;;  %4091 = vmatmul.mubr.bf16.gmra.mxu1 %v6285_v39  ;;  %v6313_v39 = vld [vmem:[#allocation3 + $0x2ec] ss:$36 sps:$4 sm:$0xff]  }
 0x104   : > { %v6676_v46 = vadd.f32 %v5510_v45, %v5509_v41  ;;  %4098 = vmatprep.mubr.bf16.mxu1 %v6288_v42  ;;  %v6310_v42 = vld [vmem:[#allocation3 + $0xf8] ss:$36 sps:$4 sm:$0xff]  }
 0x105   : > { %v5579_v40 = vpop.f32.mrf.mxu1  ;;  %v5512_v50 = vpop.f32.mrf.mxu0 }
 0x106   : > { %v6674_v19 = vadd.f32 %v5579_v40, %v5578_v35  ;;  %4002 = vmatmul.mubr.bf16.gmra.mxu0 %v6290_v54  ;;  %v6306_v35 = vld [vmem:[#allocation3 + $0x2a0] ss:$36 sps:$4 sm:$0xff]  }
 0x107   : > { %v5581_v44 = vpop.f32.mrf.mxu1  ;;  %v5513_v55 = vpop.f32.mrf.mxu0  ;;  %4009 = vmatprep.mubr.bf16.mxu0 %v6295_v58 }
 0x108   : > { %v6680_v56 = vadd.f32 %v5513_v55, %v5512_v50 }
 0x109   : > { %v5582_v48 = vpop.f32.mrf.mxu1  ;;  %v5515_v61 = vpop.f32.mrf.mxu0 }
 0x10a   : > { %v6678_v49 = vadd.f32 %v5582_v48, %v5581_v44  ;;  %v6314_v44 = vld [vmem:[#allocation3 + $0x140] ss:$36 sps:$4 sm:$0xff]  }
 0x10b   : > { %v5584_v52 = vpop.f32.mrf.mxu1  ;;  %4099 = vmatmul.mubr.bf16.gmra.mxu1 %v6291_v51  ;;  %v5516_v63 = vpop.f32.mrf.mxu0 }
 0x10c   : > { %4106 = vmatprep.mubr.bf16.mxu1 %v6297_v53  ;;  %v6684_v0 = vadd.f32 %v5516_v63, %v5515_v61  ;;  %v6311_v53 = vld [vmem:[#allocation3 + $0x2e8] ss:$36 sps:$4 sm:$0xff]   ;;  %v6319_v63 = vld [vmem:[#allocation3 + $0x1d0] ss:$36 sps:$4 sm:$0xff]  }
 0x10d   : > { %v5585_v57 = vpop.f32.mrf.mxu1  ;;  %v5518_v4 = vpop.f32.mrf.mxu0 }
 0x10e   : > { %v6682_v60 = vadd.f32 %v5585_v57, %v5584_v52  ;;  %4010 = vmatmul.mubr.bf16.gmra.mxu0 %v6299_v7  ;;  %v6318_v57 = vld [vmem:[#allocation3 + $0x334] ss:$36 sps:$4 sm:$0xff]  }
 0x10f   : > { %v5587_v62 = vpop.f32.mrf.mxu1  ;;  %v5519_v8 = vpop.f32.mrf.mxu0  ;;  %5972 = vmatprep.mubr.bf16.mxu0 %v6304_v10 }
 0x110   : > { %v6688_v9 = vadd.f32 %v5519_v8, %v5518_v4 }
 0x111   : > { %v5588_v1 = vpop.f32.mrf.mxu1  ;;  %v5521_v12 = vpop.f32.mrf.mxu0 }
 0x112   : > { %v6686_v2 = vadd.f32 %v5588_v1, %v5587_v62  ;;  %v6315_v62 = vld [vmem:[#allocation3 + $0x188] ss:$36 sps:$4 sm:$0xff]  }
 0x113   : > { %v5590_v11 = vpop.f32.mrf.mxu1  ;;  %4107 = vmatmul.mubr.bf16.gmra.mxu1 %v6300_v5  ;;  %v5522_v14 = vpop.f32.mrf.mxu0 }
 0x114   : > { %4114 = vmatprep.mubr.bf16.mxu1 %v6303_v6  ;;  %v6692_v16 = vadd.f32 %v5522_v14, %v5521_v12  ;;  %v6316_v12 = vld [vmem:[#allocation3 + $0x330] ss:$36 sps:$4 sm:$0xff]  }
 0x115   : > { %v5591_v13 = vpop.f32.mrf.mxu1  ;;  %v5524_v25 = vpop.f32.mrf.mxu0 }
 0x116   : > { %v6690_v15 = vadd.f32 %v5591_v13, %v5590_v11  ;;  %5973 = vmatmul.mubr.bf16.vlgmr.msra.gmra.mxu0 %v6305_v23  ;;  %v6324_v23 = vld [vmem:[#allocation3 + $0x260] ss:$36 sps:$4 sm:$0xff]  }
 0x117   : > { %v5593_v17 = vpop.f32.mrf.mxu1  ;;  %v5525_v28 = vpop.f32.mrf.mxu0  ;;  %5976 = vmatprep.mubr.bf16.mxu0 %v6309_v26 }
 0x118   : > { %v6696_v29 = vadd.f32 %v5525_v28, %v5524_v25 }
 0x119   : > { %v5594_v21 = vpop.f32.mrf.mxu1  ;;  %v5527_v33 = vpop.f32.mrf.mxu0 }
 0x11a   : > { %v6694_v24 = vadd.f32 %v5594_v21, %v5593_v17  ;;  %v6323_v17 = vld [vmem:[#allocation3 + $0x37c] ss:$36 sps:$4 sm:$0xff]  }
 0x11b   : > { %v5612_v27 = vpop.f32.mrf.mxu1  ;;  %4115 = vmatmul.mubr.bf16.gmra.mxu1 %v6301_v18  ;;  %v5528_v37 = vpop.f32.mrf.mxu0  ;;  %v6320_v21 = vld [vmem:[#allocation3 + $0x218] ss:$36 sps:$4 sm:$0xff]  }
 0x11c   : > { %4122 = vmatprep.mubr.bf16.mxu1 %v6308_v20  ;;  %v6701_v40 = vadd.f32 %v5528_v37, %v5527_v33 }
 0x11d   : > { %v5613_v30 = vpop.f32.mrf.mxu1 }
 0x11e   : > { %v5614_v31 = vadd.f32 %v5613_v30, %v5612_v27  ;;  %v5530_v48 = vpop.f32.mrf.mxu0  ;;  %5977 = vmatmul.mubr.bf16.gmra.mxu0 %v6310_v42 }
 0x11f   : > { %v5615_v34 = vpop.f32.mrf.mxu1  ;;  %5980 = vmatprep.mubr.bf16.mxu0 %v6314_v44  ;;  %v6325_v44 = vld [vmem:[#allocation3 + $0x2a8] ss:$36 sps:$4 sm:$0xff]  }
 0x120   : > { %v6699_v36 = vadd.f32 %v5614_v31, %v6664_v59  ;;  %v5531_v59 = vpop.f32.mrf.mxu0 }
 0x121   : > { %v5616_v41 = vpop.f32.mrf.mxu1  ;;  %v6706_v54 = vadd.f32 %v5531_v59, %v5530_v48 }
 0x122   : > { %v5617_v43 = vadd.f32 %v5616_v41, %v5615_v34  ;;  %v5533_v58 = vpop.f32.mrf.mxu0  ;;  %v6328_v41 = vld [vmem:[#allocation3 + $0x3c4] ss:$36 sps:$4 sm:$0xff]  }
 0x123   : > { %v5618_v45 = vpop.f32.mrf.mxu1  ;;  %4123 = vmatmul.mubr.bf16.gmra.mxu1 %v6306_v35  ;;  %v6321_v35 = vld [vmem:[#allocation3 + $0x378] ss:$36 sps:$4 sm:$0xff]  }
 0x124   : > { %v6704_v47 = vadd.f32 %v5617_v43, %v6666_v3  ;;  %4130 = vmatprep.mubr.bf16.mxu1 %v6313_v39  ;;  %v5534_v1 = vpop.f32.mrf.mxu0 }
 0x125   : > { %v5619_v50 = vpop.f32.mrf.mxu1  ;;  %v6711_v5 = vadd.f32 %v5534_v1, %v5533_v58 }
 0x126   : > { %v5620_v51 = vadd.f32 %v5619_v50, %v5618_v45  ;;  %v5536_v7 = vpop.f32.mrf.mxu0  ;;  %5981 = vmatmul.mubr.bf16.gmra.mxu0 %v6315_v62  ;;  %v6329_v45 = vld [vmem:[#allocation3 + $0x2f0] ss:$36 sps:$4 sm:$0xff]  }
 0x127   : > { %v5621_v52 = vpop.f32.mrf.mxu1  ;;  %5984 = vmatprep.mubr.bf16.mxu0 %v6319_v63  ;;  %v6333_v63 = vld [vmem:[#allocation3 + $0x40c] ss:$36 sps:$4 sm:$0xff]  }
 0x128   : > { %v6709_v55 = vadd.f32 %v5620_v51, %v6672_v38  ;;  %v5537_v10 = vpop.f32.mrf.mxu0 }
 0x129   : > { %v5622_v61 = vpop.f32.mrf.mxu1  ;;  %v6716_v13 = vadd.f32 %v5537_v10, %v5536_v7  ;;  %v6330_v7 = vld [vmem:[#allocation3 + $0x338] ss:$36 sps:$4 sm:$0xff]  }
 0x12a   : > { %v5623_v3 = vadd.f32 %v5622_v61, %v5621_v52  ;;  %v5539_v18 = vpop.f32.mrf.mxu0  ;;  %v6326_v61 = vld [vmem:[#allocation3 + $0x3c0] ss:$36 sps:$4 sm:$0xff]  }
 0x12b   : > { %v5624_v4 = vpop.f32.mrf.mxu1  ;;  %4131 = vmatmul.mubr.bf16.gmra.mxu1 %v6311_v53 }
 0x12c   : > { %v6714_v6 = vadd.f32 %v5623_v3, %v6676_v46  ;;  %4138 = vmatprep.mubr.bf16.mxu1 %v6318_v57  ;;  %v5540_v25 = vpop.f32.mrf.mxu0 }
 0x12d   : > { %v5625_v8 = vpop.f32.mrf.mxu1  ;;  %v6721_v27 = vadd.f32 %v5540_v25, %v5539_v18 }
 0x12e   : > { %v5626_v38 = vadd.f32 %v5625_v8, %v5624_v4  ;;  %v5542_v30 = vpop.f32.mrf.mxu0  ;;  %5985 = vmatmul.mubr.bf16.gmra.mxu0 %v6320_v21  ;;  %v6334_v8 = vld [vmem:[#allocation3 + $0x380] ss:$36 sps:$4 sm:$0xff]  }
 0x12f   : > { %v5627_v11 = vpop.f32.mrf.mxu1  ;;  %5988 = vmatprep.mubr.bf16.mxu0 %v6324_v23 }
 0x130   : > { %v6719_v14 = vadd.f32 %v5626_v38, %v6680_v56  ;;  %v5543_v33 = vpop.f32.mrf.mxu0 }
 0x131   : > { %v5628_v20 = vpop.f32.mrf.mxu1  ;;  %v6726_v37 = vadd.f32 %v5543_v33, %v5542_v30  ;;  %v6339_v33 = vld [vmem:[#allocation3 + $0x410] ss:$36 sps:$4 sm:$0xff]  }
 0x132   : > { %v5629_v46 = vadd.f32 %v5628_v20, %v5627_v11  ;;  %v5545_v42 = vpop.f32.mrf.mxu0 }
 0x133   : > { %v5630_v26 = vpop.f32.mrf.mxu1  ;;  %4139 = vmatmul.mubr.bf16.gmra.mxu1 %v6316_v12 }
 0x134   : > { %v6724_v28 = vadd.f32 %v5629_v46, %v6684_v0  ;;  %4146 = vmatprep.mubr.bf16.mxu1 %v6323_v17  ;;  %v5546_v48 = vpop.f32.mrf.mxu0  ;;  %v6331_v46 = vld [vmem:[#allocation3 + $0x408] ss:$36 sps:$4 sm:$0xff]  }
 0x135   : > { %v5631_v31 = vpop.f32.mrf.mxu1  ;;  %v6731_v51 = vadd.f32 %v5546_v48, %v5545_v42  ;;  %v6336_v48 = vld [vmem:[#allocation3 + $0x450] ss:$36 sps:$4 sm:$0xff]  }
 0x136   : > { %v5632_v56 = vadd.f32 %v5631_v31, %v5630_v26  ;;  %v5548_v52 = vpop.f32.mrf.mxu0  ;;  %5989 = vmatmul.mubr.bf16.gmra.mxu0 %v6325_v44  ;;  %v6338_v26 = vld [vmem:[#allocation3 + $0x454] ss:$36 sps:$4 sm:$0xff]  }
 0x137   : > { %v5633_v34 = vpop.f32.mrf.mxu1  ;;  %5992 = vmatprep.mubr.bf16.mxu0 %v6329_v45 }
 0x138   : > { %v6729_v39 = vadd.f32 %v5632_v56, %v6688_v9  ;;  %v5549_v57 = vpop.f32.mrf.mxu0  ;;  %v6335_v56 = vld [vmem:[#allocation3 + $0x3c8] ss:$36 sps:$4 sm:$0xff]  }
 0x139   : > { %v5634_v43 = vpop.f32.mrf.mxu1  ;;  %v6736_v62 = vadd.f32 %v5549_v57, %v5548_v52  ;;  %v6340_v57 = vld [vmem:[#allocation3 + $0x458] ss:$36 sps:$4 sm:$0xff]  }
 0x13a   : > { %v5635_v0 = vadd.f32 %v5634_v43, %v5633_v34  ;;  %v5551_v1 = vpop.f32.mrf.mxu0 }
 0x13b   : > { %v5636_v50 = vpop.f32.mrf.mxu1  ;;  %4147 = vmatmul.mubr.bf16.gmra.mxu1 %v6321_v35 }
 0x13c   : > { %v6734_v59 = vadd.f32 %v5635_v0, %v6692_v16  ;;  %4154 = vmatprep.mubr.bf16.mxu1 %v6328_v41  ;;  %v5552_v38 = vpop.f32.mrf.mxu0 }
 0x13d   : > { %v5637_v53 = vpop.f32.mrf.mxu1  ;;  %v6741_v11 = vadd.f32 %v5552_v38, %v5551_v1 }
 0x13e   : > { %v5638_v9 = vadd.f32 %v5637_v53, %v5636_v50  ;;  %v5554_v17 = vpop.f32.mrf.mxu0  ;;  %5993 = vmatmul.mubr.bf16.gmra.mxu0 %v6330_v7 }
 0x13f   : > { %v5639_v58 = vpop.f32.mrf.mxu1  ;;  %5996 = vmatprep.mubr.bf16.mxu0 %v6334_v8 }
 0x140   : > { %v6739_v3 = vadd.f32 %v5638_v9, %v6696_v29  ;;  %v5555_v20 = vpop.f32.mrf.mxu0 }
 0x141   : > { %v5640_v4 = vpop.f32.mrf.mxu1  ;;  %v6746_v23 = vadd.f32 %v5555_v20, %v5554_v17 }
 0x142   : > { %v5641_v16 = vadd.f32 %v5640_v4, %v5639_v58  ;;  %v5557_v30 = vpop.f32.mrf.mxu0 }
 0x143   : > { %v5642_v10 = vpop.f32.mrf.mxu1  ;;  %4155 = vmatmul.mubr.bf16.gmra.mxu1 %v6326_v61 }
 0x144   : > { %v6744_v12 = vadd.f32 %v5641_v16, %v6701_v40  ;;  %4162 = vmatprep.mubr.bf16.mxu1 %v6333_v63  ;;  %v5558_v34 = vpop.f32.mrf.mxu0 }
 0x145   : > { %v5643_v18 = vpop.f32.mrf.mxu1  ;;  %v6751_v41 = vadd.f32 %v5558_v34, %v5557_v30 }
 0x146   : > { %v5644_v29 = vadd.f32 %v5643_v18, %v5642_v10  ;;  %v5560_v43 = vpop.f32.mrf.mxu0  ;;  %5997 = vmatmul.mubr.bf16.gmra.mxu0 %v6335_v56 }
 0x147   : > { %v5645_v21 = vpop.f32.mrf.mxu1  ;;  %6000 = vmatprep.mubr.bf16.mxu0 %v6339_v33 }
 0x148   : > { %v6749_v25 = vadd.f32 %v5644_v29, %v6706_v54  ;;  %v5561_v0 = vpop.f32.mrf.mxu0 }
 0x149   : > { %v5646_v31 = vpop.f32.mrf.mxu1  ;;  %v6756_v50 = vadd.f32 %v5561_v0, %v5560_v43 }
 0x14a   : > { %v5647_v40 = vadd.f32 %v5646_v31, %v5645_v21  ;;  %v5563_v53 = vpop.f32.mrf.mxu0 }
 0x14b   : > { %v5648_v35 = vpop.f32.mrf.mxu1  ;;  %4163 = vmatmul.mubr.bf16.gmra.mxu1 %v6331_v46 }
 0x14c   : > { %v6754_v42 = vadd.f32 %v5647_v40, %v6711_v5  ;;  %4170 = vmatprep.mubr.bf16.mxu1 %v6338_v26  ;;  %v5564_v5 = vpop.f32.mrf.mxu0 }
 0x14d   : > { %v5649_v44 = vpop.f32.mrf.mxu1  ;;  %v5565_v63 = vadd.f32 %v5564_v5, %v5563_v53 }
 0x14e   : > { %v5650_v54 = vadd.f32 %v5649_v44, %v5648_v35  ;;  %v5566_v4 = vpop.f32.mrf.mxu0  ;;  %6001 = vmatmul.mubr.bf16.gmra.mxu0 %v6340_v57 }
 0x14f   : > { %v5651_v45 = vpop.f32.mrf.mxu1 }
 0x150   : > { %v6759_v52 = vadd.f32 %v5650_v54, %v6716_v13  ;;  %v5567_v8 = vpop.f32.mrf.mxu0 }
 0x151   : > { %v5652_v9 = vpop.f32.mrf.mxu1  ;;  %v5568_v10 = vadd.f32 %v5567_v8, %v5566_v4 }
 0x152   : > { %v5653_v58 = vadd.f32 %v5652_v9, %v5651_v45  ;;  %v5569_v17 = vpop.f32.mrf.mxu0 }
 0x153   : > { %v5654_v61 = vpop.f32.mrf.mxu1  ;;  %4171 = vmatmul.mubr.bf16.gmra.mxu1 %v6336_v48 }
 0x154   : > { %v6762_v1 = vadd.f32 %v5653_v58, %v6721_v27  ;;  %v5570_v20 = vpop.f32.mrf.mxu0 }
 0x155   : > { %v5655_v7 = vpop.f32.mrf.mxu1  ;;  %v6767_v46 = vadd.f32 %v5570_v20, %v5569_v17 }
 0x156   : > { %v5656_v16 = vadd.f32 %v5655_v7, %v5654_v61  ;;  %v5724_v26 = vpop.f32.mrf.mxu0 }
 0x157   : > { %v5657_v38 = vpop.f32.mrf.mxu1 }
 0x158   : > { %v6765_v13 = vadd.f32 %v5656_v16, %v6726_v37  ;;  %v5725_v56 = vpop.f32.mrf.mxu0 }
 0x159   : > { %v5658_v18 = vpop.f32.mrf.mxu1  ;;  %v5726_v37 = vadd.f32 %v5725_v56, %v5724_v26 }
 0x15a   : > { %v5659_v29 = vadd.f32 %v5658_v18, %v5657_v38  ;;  %v5727_v34 = vpop.f32.mrf.mxu0 }
 0x15b   : > { %v5660_v21 = vpop.f32.mrf.mxu1  ;;  %v6776_v43 = vadd.f32 %v5726_v37, %v6699_v36 }
 0x15c   : > { %v6770_v27 = vadd.f32 %v5659_v29, %v6731_v51  ;;  %v5728_v54 = vpop.f32.mrf.mxu0 }
 0x15d   : > { %v5661_v30 = vpop.f32.mrf.mxu1  ;;  %v5729_v45 = vadd.f32 %v5728_v54, %v5727_v34 }
 0x15e   : > { %v5662_v31 = vadd.f32 %v5661_v30, %v5660_v21  ;;  %v5730_v48 = vpop.f32.mrf.mxu0 }
 0x15f   : > { %v5663_v40 = vpop.f32.mrf.mxu1  ;;  %v6782_v9 = vadd.f32 %v5729_v45, %v6704_v47 }
 0x160   : > { %v6773_v33 = vadd.f32 %v5662_v31, %v6736_v62  ;;  %v5731_v57 = vpop.f32.mrf.mxu0 }
 0x161   : > { %v5664_v35 = vpop.f32.mrf.mxu1  ;;  %v5732_v36 = vadd.f32 %v5731_v57, %v5730_v48 }
 0x162   : > { %v5665_v44 = vadd.f32 %v5664_v35, %v5663_v40  ;;  %v5733_v61 = vpop.f32.mrf.mxu0 }
 0x163   : > { %v5666_v0 = vpop.f32.mrf.mxu1  ;;  %v6788_v7 = vadd.f32 %v5732_v36, %v6709_v55 }
 0x164   : > { %v6779_v51 = vadd.f32 %v5665_v44, %v6741_v11  ;;  %v5734_v16 = vpop.f32.mrf.mxu0 }
 0x165   : > { %v5667_v53 = vpop.f32.mrf.mxu1  ;;  %v5735_v47 = vadd.f32 %v5734_v16, %v5733_v61 }
 0x166   : > { %v5668_v62 = vadd.f32 %v5667_v53, %v5666_v0  ;;  %v5736_v17 = vpop.f32.mrf.mxu0 }
 0x167   : > { %v5669_v58 = vpop.f32.mrf.mxu1  ;;  %v6794_v29 = vadd.f32 %v5735_v47, %v6714_v6 }
 0x168   : > { %v6785_v5 = vadd.f32 %v5668_v62, %v6746_v23  ;;  %v5737_v20 = vpop.f32.mrf.mxu0 }
 0x169   : > { %v5670_v4 = vpop.f32.mrf.mxu1  ;;  %v5738_v55 = vadd.f32 %v5737_v20, %v5736_v17 }
 0x16a   : > { %v5671_v11 = vadd.f32 %v5670_v4, %v5669_v58  ;;  %v5739_v30 = vpop.f32.mrf.mxu0 }
 0x16b   : > { %v5672_v8 = vpop.f32.mrf.mxu1  ;;  %v6800_v56 = vadd.f32 %v5738_v55, %v6719_v14 }
 0x16c   : > { %v6791_v38 = vadd.f32 %v5671_v11, %v6751_v41  ;;  %v5740_v40 = vpop.f32.mrf.mxu0 }
 0x16d   : > { %v5673_v18 = vpop.f32.mrf.mxu1  ;;  %v5741_v35 = vadd.f32 %v5740_v40, %v5739_v30 }
 0x16e   : > { %v5674_v23 = vadd.f32 %v5673_v18, %v5672_v8  ;;  %v5742_v6 = vpop.f32.mrf.mxu0 }
 0x16f   : > { %v5675_v21 = vpop.f32.mrf.mxu1  ;;  %v6805_v54 = vadd.f32 %v5741_v35, %v6724_v28 }
 0x170   : > { %v6797_v26 = vadd.f32 %v5674_v23, %v6756_v50  ;;  %v5743_v50 = vpop.f32.mrf.mxu0 }
 0x171   : > { %v5676_v31 = vpop.f32.mrf.mxu1  ;;  %v5744_v53 = vadd.f32 %v5743_v50, %v5742_v6 }
 0x172   : > { %v5677_v41 = vadd.f32 %v5676_v31, %v5675_v21  ;;  %v5745_v62 = vpop.f32.mrf.mxu0 }
 0x173   : > { %v5678_v37 = vpop.f32.mrf.mxu1  ;;  %v6810_v57 = vadd.f32 %v5744_v53, %v6729_v39 }
 0x174   : > { %v6802_v34 = vadd.f32 %v5677_v41, %v5565_v63  ;;  %v5746_v63 = vpop.f32.mrf.mxu0 }
 0x175   : > { %v5679_v44 = vpop.f32.mrf.mxu1  ;;  %v5747_v4 = vadd.f32 %v5746_v63, %v5745_v62 }
 0x176   : > { %v5680_v0 = vadd.f32 %v5679_v44, %v5678_v37  ;;  %v5748_v28 = vpop.f32.mrf.mxu0 }
 0x177   : > { %v5681_v45 = vpop.f32.mrf.mxu1  ;;  %v6816_v16 = vadd.f32 %v5747_v4, %v6734_v59 }
 0x178   : > { %v6807_v48 = vadd.f32 %v5680_v0, %v5568_v10  ;;  %v5749_v8 = vpop.f32.mrf.mxu0 }
 0x179   : > { %v5682_v14 = vpop.f32.mrf.mxu1  ;;  %v5750_v39 = vadd.f32 %v5749_v8, %v5748_v28 }
 0x17a   : > { %v5683_v58 = vadd.f32 %v5682_v14, %v5681_v45  ;;  %v5751_v18 = vpop.f32.mrf.mxu0 }
 0x17b   : > { %v5684_v36 = vpop.f32.mrf.mxu1  ;;  %v6822_v20 = vadd.f32 %v5750_v39, %v6739_v3 }
 0x17c   : > { %v6813_v61 = vadd.f32 %v5683_v58, %v6767_v46  ;;  %v5752_v21 = vpop.f32.mrf.mxu0 }
 0x17d   : > { %v5685_v11 = vpop.f32.mrf.mxu1  ;;  %v5753_v59 = vadd.f32 %v5752_v21, %v5751_v18 }
 0x17e   : > { %v5686_v10 = vadd.f32 %v5685_v11, %v5684_v36  ;;  %v5754_v31 = vpop.f32.mrf.mxu0 }
 0x17f   : > { %v5687_v47 = vpop.f32.mrf.mxu1  ;;  %v6828_v40 = vadd.f32 %v5753_v59, %v6744_v12 }
 0x180   : > { %v6819_v17 = vadd.f32 %v5686_v10, %v6668_v22  ;;  %v5755_v37 = vpop.f32.mrf.mxu0 }
 0x181   : > { %v5688_v23 = vpop.f32.mrf.mxu1  ;;  %v5756_v3 = vadd.f32 %v5755_v37, %v5754_v31 }
 0x182   : > { %v5689_v46 = vadd.f32 %v5688_v23, %v5687_v47  ;;  %v5757_v44 = vpop.f32.mrf.mxu0 }
 0x183   : > { %v5690_v55 = vpop.f32.mrf.mxu1  ;;  %v6834_v50 = vadd.f32 %v5756_v3, %v6749_v25 }
 0x184   : > { %v6825_v30 = vadd.f32 %v5689_v46, %v6670_v32  ;;  %v5758_v45 = vpop.f32.mrf.mxu0 }
 0x185   : > { %v5691_v41 = vpop.f32.mrf.mxu1  ;;  %v5759_v12 = vadd.f32 %v5758_v45, %v5757_v44 }
 0x186   : > { %v5692_v22 = vadd.f32 %v5691_v41, %v5690_v55  ;;  %v5760_v14 = vpop.f32.mrf.mxu0 }
 0x187   : > { %v5693_v35 = vpop.f32.mrf.mxu1  ;;  %v6840_v63 = vadd.f32 %v5759_v12, %v6754_v42 }
 0x188   : > { %v6831_v6 = vadd.f32 %v5692_v22, %v6674_v19  ;;  %v5761_v36 = vpop.f32.mrf.mxu0 }
 0x189   : > { %v5694_v0 = vpop.f32.mrf.mxu1  ;;  %v5762_v25 = vadd.f32 %v5761_v36, %v5760_v14 }
 0x18a   : > { %v5695_v32 = vadd.f32 %v5694_v0, %v5693_v35  ;;  %v5763_v11 = vpop.f32.mrf.mxu0 }
 0x18b   : > { %v5696_v53 = vpop.f32.mrf.mxu1  ;;  %v6846_v8 = vadd.f32 %v5762_v25, %v6759_v52 }
 0x18c   : > { %v6837_v62 = vadd.f32 %v5695_v32, %v6678_v49  ;;  %v5764_v47 = vpop.f32.mrf.mxu0 }
 0x18d   : > { %v5697_v58 = vpop.f32.mrf.mxu1  ;;  %v5765_v42 = vadd.f32 %v5764_v47, %v5763_v11 }
 0x18e   : > { %v5698_v19 = vadd.f32 %v5697_v58, %v5696_v53  ;;  %v5766_v23 = vpop.f32.mrf.mxu0 }
 0x18f   : > { %v5699_v4 = vpop.f32.mrf.mxu1  ;;  %v6852_v21 = vadd.f32 %v5765_v42, %v6762_v1 }
 0x190   : > { %v6843_v28 = vadd.f32 %v5698_v19, %v6682_v60  ;;  %v5767_v55 = vpop.f32.mrf.mxu0 }
 0x191   : > { %v5700_v10 = vpop.f32.mrf.mxu1  ;;  %v5768_v52 = vadd.f32 %v5767_v55, %v5766_v23 }
 0x192   : > { %v5701_v49 = vadd.f32 %v5700_v10, %v5699_v4  ;;  %v5769_v41 = vpop.f32.mrf.mxu0 }
 0x193   : > { %v5702_v39 = vpop.f32.mrf.mxu1  ;;  %v6858_v37 = vadd.f32 %v5768_v52, %v6765_v13 }
 0x194   : > { %v6849_v18 = vadd.f32 %v5701_v49, %v6686_v2  ;;  %v5770_v35 = vpop.f32.mrf.mxu0 }
 0x195   : > { %v5703_v46 = vpop.f32.mrf.mxu1  ;;  %v5771_v1 = vadd.f32 %v5770_v35, %v5769_v41 }
 0x196   : > { %v5704_v60 = vadd.f32 %v5703_v46, %v5702_v39  ;;  %v5772_v0 = vpop.f32.mrf.mxu0 }
 0x197   : > { %v5705_v59 = vpop.f32.mrf.mxu1  ;;  %v6864_v45 = vadd.f32 %v5771_v1, %v6770_v27 }
 0x198   : > { %v6855_v31 = vadd.f32 %v5704_v60, %v6690_v15  ;;  %v5773_v53 = vpop.f32.mrf.mxu0 }
 0x199   : > { %v5706_v22 = vpop.f32.mrf.mxu1  ;;  %v5774_v14 = vadd.f32 %v5773_v53, %v5772_v0 }
 0x19a   : > { %7302 = vst [vmem:[#allocation4_spill] sm:$0xff] %v6855_v31  ;;  %v5707_v2 = vadd.f32 %v5706_v22, %v5705_v59  ;;  %v5775_v13 = vpop.f32.mrf.mxu0 }
 0x19b   : > { %v5836_v3 = vpop.f32.mrf.mxu1  ;;  %v6870_v36 = vadd.f32 %v5774_v14, %v6773_v33 }
 0x19c   : > { %v6861_v44 = vadd.f32 %v5707_v2, %v6694_v24  ;;  %v5776_v4 = vpop.f32.mrf.mxu0 }
 0x19d   : > { %v5837_v32 = vpop.f32.mrf.mxu1  ;;  %v5777_v11 = vadd.f32 %v5776_v4, %v5775_v13 }
 0x19e   : > { %7303 = vst [vmem:[#allocation5_spill] sm:$0xff] %v6861_v44  ;;  %v5838_v15 = vadd.f32 %v5837_v32, %v5836_v3  ;;  %v5778_v10 = vpop.f32.mrf.mxu0 }
 0x19f   : > { %v5839_v12 = vpop.f32.mrf.mxu1  ;;  %v6880_v47 = vadd.f32 %v5777_v11, %v6779_v51 }
 0x1a0   : > { %v6867_v58 = vadd.f32 %v5838_v15, %v6776_v43  ;;  %v5779_v43 = vpop.f32.mrf.mxu0 }
 0x1a1   : > { %v5840_v19 = vpop.f32.mrf.mxu1  ;;  %v5780_v42 = vadd.f32 %v5779_v43, %v5778_v10 }
 0x1a2   : > { %v5841_v24 = vadd.f32 %v5840_v19, %v5839_v12  ;;  %v5781_v33 = vpop.f32.mrf.mxu0 }
 0x1a3   : > { %v6872_v25 = vpop.f32.mrf.mxu1  ;;  %v6887_v46 = vadd.f32 %v5780_v42, %v6785_v5 }
 0x1a4   : > { %v6875_v27 = vadd.f32 %v5841_v24, %v6782_v9  ;;  %v5782_v60 = vpop.f32.mrf.mxu0 }
 0x1a5   : > { %v6877_v49 = vpop.f32.mrf.mxu1  ;;  %v5783_v9 = vadd.f32 %v5782_v60, %v5781_v33 }
 0x1a6   : > { %v5784_v59 = vpop.f32.mrf.mxu0 }
 0x1a7   : > { %v6882_v39 = vpop.f32.mrf.mxu1  ;;  %v6894_v51 = vadd.f32 %v5783_v9, %v6791_v38 }
 0x1a8   : > { %v5785_v41 = vpop.f32.mrf.mxu0 }
 0x1a9   : > { %v6884_v23 = vpop.f32.mrf.mxu1  ;;  %v5786_v2 = vadd.f32 %v5785_v41, %v5784_v59 }
 0x1aa   : > { %v5787_v35 = vpop.f32.mrf.mxu0 }
 0x1ab   : > { %v6889_v55 = vpop.f32.mrf.mxu1  ;;  %v6901_v5 = vadd.f32 %v5786_v2, %v6797_v26 }
 0x1ac   : > { %v5788_v1 = vpop.f32.mrf.mxu0 }
 0x1ad   : > { %v6891_v52 = vpop.f32.mrf.mxu1  ;;  %v5789_v32 = vadd.f32 %v5788_v1, %v5787_v35 }
 0x1ae   : > { %v5790_v15 = vpop.f32.mrf.mxu0 }
 0x1af   : > { %v6896_v22 = vpop.f32.mrf.mxu1  ;;  %v6908_v38 = vadd.f32 %v5789_v32, %v6802_v34 }
 0x1b0   : > { %v5791_v12 = vpop.f32.mrf.mxu0 }
 0x1b1   : > { %v6898_v3 = vpop.f32.mrf.mxu1  ;;  %v5792_v13 = vadd.f32 %v5791_v12, %v5790_v15 }
 0x1b2   : > { %v5793_v19 = vpop.f32.mrf.mxu0 }
 0x1b3   : > { %v6903_v0 = vpop.f32.mrf.mxu1  ;;  %v6915_v26 = vadd.f32 %v5792_v13, %v6807_v48 }
 0x1b4   : > { %v5794_v4 = vpop.f32.mrf.mxu0 }
 0x1b5   : > { %v6905_v53 = vpop.f32.mrf.mxu1  ;;  %v5795_v10 = vadd.f32 %v5794_v4, %v5793_v19 }
 0x1b6   : > { %v5796_v43 = vpop.f32.mrf.mxu0 }
 0x1b7   : > { %v6910_v14 = vpop.f32.mrf.mxu1  ;;  %v6922_v34 = vadd.f32 %v5795_v10, %v6813_v61 }
 0x1b8   : > { %v5797_v33 = vpop.f32.mrf.mxu0 }
 0x1b9   : > { %v6912_v24 = vpop.f32.mrf.mxu1  ;;  %v5798_v9 = vadd.f32 %v5797_v33, %v5796_v43 }
 0x1ba   : > { %v5799_v59 = vpop.f32.mrf.mxu0 }
 0x1bb   : > { %v6917_v11 = vpop.f32.mrf.mxu1  ;;  %v6929_v48 = vadd.f32 %v5798_v9, %v6819_v17 }
 0x1bc   : > { %v5800_v2 = vpop.f32.mrf.mxu0 }
 0x1bd   : > { %v6919_v42 = vpop.f32.mrf.mxu1  ;;  %7304 = vst [vmem:[#allocation6_spill] sm:$0xff] %v6929_v48  ;;  %v5801_v1 = vadd.f32 %v5800_v2, %v5799_v59 }
 0x1be   : > { %v5802_v32 = vpop.f32.mrf.mxu0 }
 0x1bf   : > { %v6924_v60 = vpop.f32.mrf.mxu1  ;;  %v6936_v61 = vadd.f32 %v5801_v1, %v6825_v30 }
 0x1c0   : > { %v5803_v12 = vpop.f32.mrf.mxu0 }
 0x1c1   : > { %v6926_v41 = vpop.f32.mrf.mxu1  ;;  %7305 = vst [vmem:[#allocation7_spill] sm:$0xff] %v6936_v61  ;;  %v5804_v19 = vadd.f32 %v5803_v12, %v5802_v32 }
 0x1c2   : > { %v5805_v4 = vpop.f32.mrf.mxu0 }
 0x1c3   : > { %v6931_v35 = vpop.f32.mrf.mxu1  ;;  %v6943_v17 = vadd.f32 %v5804_v19, %v6831_v6 }
 0x1c4   : > { %v5806_v43 = vpop.f32.mrf.mxu0 }
 0x1c5   : > { %v6933_v15 = vpop.f32.mrf.mxu1  ;;  %v5807_v9 = vadd.f32 %v5806_v43, %v5805_v4 }
 0x1c6   : > { %v5808_v59 = vpop.f32.mrf.mxu0 }
 0x1c7   : > { %v6938_v13 = vpop.f32.mrf.mxu1  ;;  %v6950_v30 = vadd.f32 %v5807_v9, %v6837_v62 }
 0x1c8   : > { %v5809_v1 = vpop.f32.mrf.mxu0 }
 0x1c9   : > { %v6940_v10 = vpop.f32.mrf.mxu1  ;;  %v5810_v32 = vadd.f32 %v5809_v1, %v5808_v59  ;;  %v5844_v1 = vadd.f32 %v6877_v49, %v6872_v25 }
 0x1ca   : > { %v5811_v12 = vpop.f32.mrf.mxu0 }
 0x1cb   : > { %v6945_v33 = vpop.f32.mrf.mxu1  ;;  %v6957_v6 = vadd.f32 %v5810_v32, %v6843_v28 }
 0x1cc   : > { %v5812_v19 = vpop.f32.mrf.mxu0 }
 0x1cd   : > { %v6947_v2 = vpop.f32.mrf.mxu1  ;;  %7306 = vst [vmem:[#allocation8_spill] sm:$0xff] %v6957_v6  ;;  %v5813_v4 = vadd.f32 %v5812_v19, %v5811_v12 }
 0x1ce   : > { %v6961_v43 = vpop.f32.mrf.mxu0 }
 0x1cf   : > { %v6952_v44 = vpop.f32.mrf.mxu1  ;;  %v6966_v62 = vadd.f32 %v5813_v4, %v6849_v18  ;;  %v5847_v18 = vadd.f32 %v6884_v23, %v6882_v39  ;;  %v4061_v4 = vadd.f32 %v5844_v1, %v6788_v7  ;;  %v5856_v39 = vadd.f32 %v6905_v53, %v6903_v0 }
 0x1d0   : > { %v6968_v9 = vpop.f32.mrf.mxu0 }
 0x1d1   : > { %v6954_v31 = vpop.f32.mrf.mxu1  ;;  %7307 = vst [vmem:[#allocation9_spill] sm:$0xff] %v6966_v62  ;;  %7308 = vst [vmem:[#allocation10_spill] sm:$0xff] %v6968_v9  ;;  %v4064_v23 = vadd.f32 %v5847_v18, %v6794_v29  ;;  %v4077_v53 = vadd.f32 %v5856_v39, %v6810_v57  ;;  %v5868_v57 = vadd.f32 %v6933_v15, %v6931_v35 }
 0x1d2   : > { %v6974_v28 = vpop.f32.mrf.mxu0 }
 0x1d3   : > { %v6959_v61 = vpop.f32.mrf.mxu1  ;;  %7309 = vst [vmem:[#allocation11_spill] sm:$0xff] %v6974_v28 }
 0x1d4   : > { %v6979_v12 = vpop.f32.mrf.mxu0 }
 0x1d5   : > { %v6963_v48 = vpop.f32.mrf.mxu1  ;;  %7310 = vst [vmem:[#allocation12_spill] sm:$0xff] %v6979_v12 }
 0x1d6   : > { %v5974_v25 = vpop.f32.mrf.mxu0 }
 0x1d7   : > { %v6970_v59 = vpop.f32.mrf.mxu1  ;;  %v6993_v62 = vadd.f32 %v5974_v25, %v4061_v4  ;;  %v5850_v4 = vadd.f32 %v6891_v52, %v6889_v55  ;;  %v5853_v52 = vadd.f32 %v6898_v3, %v6896_v22 }
 0x1d8   : > { %v4213_v6 = vpop.f32.mrf.mxu0 }
 0x1d9   : > { %v6976_v32 = vpop.f32.mrf.mxu1  ;;  %4342 = vst [vmem:[%s6989_s19 + $0x10] sm:$0xff] %v6993_v62  ;;  %v7002_v7 = vadd.f32 %v4213_v6, %v6867_v58  ;;  %v5859_v58 = vadd.f32 %v6912_v24, %v6910_v14  ;;  %v4069_v24 = vadd.f32 %v5850_v4, %v6800_v56  ;;  %v5862_v56 = vadd.f32 %v6919_v42, %v6917_v11 }
 0x1da   : > { %v5975_v1 = vpop.f32.mrf.mxu0  ;;  %v4072_v4 = vadd.f32 %v5853_v52, %v6805_v54  ;;  %v4093_v42 = vadd.f32 %v5868_v57, %v6834_v50  ;;  %v5865_v54 = vadd.f32 %v6926_v41, %v6924_v60  ;;  %v5880_v50 = vadd.f32 %v6963_v48, %v6959_v61 }
 0x1db   : > { %v6981_v19 = vpop.f32.mrf.mxu1  ;;  %4340 = vst [vmem:[%s6989_s19] sm:$0xff] %v7002_v7  ;;  %v7011_v25 = vadd.f32 %v5975_v1, %v4064_v23  ;;  %v4080_v3 = vadd.f32 %v5859_v58, %v6816_v16  ;;  %v5871_v16 = vadd.f32 %v6940_v10, %v6938_v13  ;;  %v4085_v52 = vadd.f32 %v5862_v56, %v6822_v20 }
 0x1dc   : > { %v4216_v9 = vpop.f32.mrf.mxu0  ;;  %v5874_v20 = vadd.f32 %v6947_v2, %v6945_v33  ;;  %v4088_v56 = vadd.f32 %v5865_v54, %v6828_v40  ;;  %v4109_v33 = vadd.f32 %v5880_v50, %v6858_v37  ;;  %v5877_v40 = vadd.f32 %v6954_v31, %v6952_v44 }
 0x1dd   : > { %v6991_v49 = vpop.f32.mrf.mxu1  ;;  %4343 = vst [vmem:[%s6989_s19 + $0x18] sm:$0xff] %v7011_v25  ;;  %v7020_v29 = vadd.f32 %v4216_v9, %v6875_v27  ;;  %v4096_v41 = vadd.f32 %v5871_v16, %v6840_v63  ;;  %v5883_v63 = vadd.f32 %v6976_v32, %v6970_v59 }
 0x1de   : > { %v5978_v6 = vpop.f32.mrf.mxu0  ;;  %v4101_v32 = vadd.f32 %v5874_v20, %v6846_v8  ;;  %v5886_v8 = vadd.f32 %v6991_v49, %v6981_v19 }
 0x1df   : > { %v6995_v12 = vpop.f32.mrf.mxu1  ;;  %4341 = vst [vmem:[%s6989_s19 + $0x8] sm:$0xff] %v7020_v29  ;;  %v4372_v18 = vadd.f32 %v7020_v29, %v7002_v7  ;;  %v7031_v14 = vadd.f32 %v5978_v6, %v4077_v53  ;;  %v4112_v31 = vadd.f32 %v5883_v63, %v6864_v45 }
 0x1e0   : > { %v4229_v27 = vpop.f32.mrf.mxu0 }
 0x1e1   : > { %v7005_v28 = vpop.f32.mrf.mxu1  ;;  %v4373_v39 = vadd.f32 %v4372_v18, %v6993_v62  ;;  %4346 = vst [vmem:[%s6989_s19 + $0x30] sm:$0xff] %v7031_v14  ;;  %v7041_v22 = vadd.f32 %v4229_v27, %v4069_v24 }
 0x1e2   : > { %v5979_v23 = vpop.f32.mrf.mxu0 }
 0x1e3   : > { %v7013_v0 = vpop.f32.mrf.mxu1  ;;  %4344 = vst [vmem:[%s6989_s19 + $0x20] sm:$0xff] %v7041_v22  ;;  %v4374_v35 = vadd.f32 %v4373_v39, %v7011_v25  ;;  %v7051_v15 = vadd.f32 %v5979_v23, %v4080_v3 }
 0x1e4   : > { %v4232_v53 = vpop.f32.mrf.mxu0 }
 0x1e5   : > { %v7023_v55 = vpop.f32.mrf.mxu1  ;;  %v4375_v58 = vadd.f32 %v4374_v35, %v7041_v22  ;;  %4347 = vst [vmem:[%s6989_s19 + $0x38] sm:$0xff] %v7051_v15  ;;  %v7061_v11 = vadd.f32 %v4232_v53, %v4072_v4 }
 0x1e6   : > { %v5982_v18 = vpop.f32.mrf.mxu0 }
 0x1e7   : > { %v7034_v9 = vpop.f32.mrf.mxu1  ;;  %4345 = vst [vmem:[%s6989_s19 + $0x28] sm:$0xff] %v7061_v11  ;;  %v4376_v13 = vadd.f32 %v4375_v58, %v7061_v11  ;;  %v7071_v10 = vadd.f32 %v5982_v18, %v4093_v42 }
 0x1e8   : > { %v4245_v27 = vpop.f32.mrf.mxu0 }
 0x1e9   : > { %v7044_v1 = vpop.f32.mrf.mxu1  ;;  %v4377_v57 = vadd.f32 %v4376_v13, %v7031_v14  ;;  %4350 = vst [vmem:[%s6989_s19 + $0x50] sm:$0xff] %v7071_v10  ;;  %v7081_v60 = vadd.f32 %v4245_v27, %v4085_v52  ;;  %v5892_v13 = vadd.f32 %v7023_v55, %v7013_v0  ;;  %v4104_v55 = vadd.f32 %v5877_v40, %v6852_v21 }
 0x1ea   : > { %v5983_v3 = vpop.f32.mrf.mxu0  ;;  %v5889_v21 = vadd.f32 %v7005_v28, %v6995_v12 }
 0x1eb   : > { %v7054_v6 = vpop.f32.mrf.mxu1  ;;  %4348 = vst [vmem:[%s6989_s19 + $0x40] sm:$0xff] %v7081_v60  ;;  %v4378_v48 = vadd.f32 %v4377_v57, %v7051_v15  ;;  %v7091_v61 = vadd.f32 %v5983_v3, %v4096_v41  ;;  %v5895_v3 = vadd.f32 %v7044_v1, %v7034_v9  ;;  %v4125_v19 = vadd.f32 %v5892_v13, %v6887_v46 }
 0x1ec   : > { %v4248_v35 = vpop.f32.mrf.mxu0  ;;  %v4117_v1 = vadd.f32 %v5886_v8, %v6870_v36 }
 0x1ed   : > { %v7064_v24 = vpop.f32.mrf.mxu1  ;;  %v4379_v53 = vadd.f32 %v4378_v48, %v7081_v60  ;;  %4351 = vst [vmem:[%s6989_s19 + $0x58] sm:$0xff] %v7091_v61  ;;  %v7099_v16 = vadd.f32 %v4248_v35, %v4088_v56  ;;  %v4128_v28 = vadd.f32 %v5895_v3, %v6894_v51 }
 0x1ee   : > { %v5986_v2 = vpop.f32.mrf.mxu0  ;;  %v5898_v40 = vadd.f32 %v7064_v24, %v7054_v6 }
 0x1ef   : > { %v7074_v39 = vpop.f32.mrf.mxu1  ;;  %4349 = vst [vmem:[%s6989_s19 + $0x48] sm:$0xff] %v7099_v16  ;;  %v4380_v42 = vadd.f32 %v4379_v53, %v7099_v16  ;;  %v7107_v59 = vadd.f32 %v5986_v2, %v4109_v33 }
 0x1f0   : > { %v4261_v18 = vpop.f32.mrf.mxu0 }
 0x1f1   : > { %v7084_v23 = vpop.f32.mrf.mxu1  ;;  %v4381_v37 = vadd.f32 %v4380_v42, %v7071_v10  ;;  %4354 = vst [vmem:[%s6989_s19 + $0x70] sm:$0xff] %v7107_v59  ;;  %v7115_v52 = vadd.f32 %v4261_v18, %v4101_v32 }
 0x1f2   : > { %v5987_v44 = vpop.f32.mrf.mxu0 }
 0x1f3   : > { %v5902_v4 = vpop.f32.mrf.mxu1  ;;  %4352 = vst [vmem:[%s6989_s19 + $0x60] sm:$0xff] %v7115_v52  ;;  %v4382_v50 = vadd.f32 %v4381_v37, %v7091_v61  ;;  %v7123_v0 = vadd.f32 %v5987_v44, %v4112_v31  ;;  %v5901_v31 = vadd.f32 %v7084_v23, %v7074_v39 }
 0x1f4   : > { %v4264_v57 = vpop.f32.mrf.mxu0 }
 0x1f5   : > { %v5903_v58 = vpop.f32.mrf.mxu1  ;;  %v4383_v45 = vadd.f32 %v4382_v50, %v7115_v52  ;;  %4355 = vst [vmem:[%s6989_s19 + $0x78] sm:$0xff] %v7123_v0  ;;  %v7131_v20 = vadd.f32 %v4264_v57, %v4104_v55 }
 0x1f6   : > { %v5990_v49 = vpop.f32.mrf.mxu0  ;;  %v5904_v53 = vadd.f32 %v5903_v58, %v5902_v4  ;;  %v4120_v58 = vadd.f32 %v5889_v21, %v6880_v47 }
 0x1f7   : > { %v5905_v54 = vpop.f32.mrf.mxu1  ;;  %4353 = vst [vmem:[%s6989_s19 + $0x68] sm:$0xff] %v7131_v20  ;;  %v4384_v56 = vadd.f32 %v4383_v45, %v7131_v20  ;;  %v7139_v9 = vadd.f32 %v5990_v49, %v4125_v19  ;;  %v4136_v19 = vadd.f32 %v5901_v31, %v6908_v38 }
 0x1f8   : > { %v4277_v35 = vpop.f32.mrf.mxu0  ;;  %v4141_v6 = vadd.f32 %v5904_v53, %v6915_v26 }
 0x1f9   : > { %v5906_v27 = vpop.f32.mrf.mxu1  ;;  %v4385_v46 = vadd.f32 %v4384_v56, %v7107_v59  ;;  %4358 = vst [vmem:[%s6989_s19 + $0x90] sm:$0xff] %v7139_v9  ;;  %v7145_v33 = vadd.f32 %v4277_v35, %v4117_v1 }
 0x1fa   : > { %v5991_v12 = vpop.f32.mrf.mxu0  ;;  %v5907_v18 = vadd.f32 %v5906_v27, %v5905_v54  ;;  %v4133_v54 = vadd.f32 %v5898_v40, %v6901_v5 }
 0x1fb   : > { %v5908_v41 = vpop.f32.mrf.mxu1  ;;  %4356 = vst [vmem:[%s6989_s19 + $0x80] sm:$0xff] %v7145_v33  ;;  %v4386_v36 = vadd.f32 %v4385_v46, %v7123_v0  ;;  %v7153_v4 = vadd.f32 %v5991_v12, %v4128_v28  ;;  %v7311_v28 = vld [vmem:[#allocation6_spill] sm:$0xff] }
 0x1fc   : > { %v4280_v42 = vpop.f32.mrf.mxu0  ;;  %v4144_v39 = vadd.f32 %v5907_v18, %v6922_v34 }
 0x1fd   : > { %v5909_v48 = vpop.f32.mrf.mxu1  ;;  %v4387_v51 = vadd.f32 %v4386_v36, %v7145_v33  ;;  %4359 = vst [vmem:[%s6989_s19 + $0x98] sm:$0xff] %v7153_v4  ;;  %v7159_v13 = vadd.f32 %v4280_v42, %v4120_v58 }
 0x1fe   : > { %v5994_v24 = vpop.f32.mrf.mxu0  ;;  %v5910_v3 = vadd.f32 %v5909_v48, %v5908_v41 }
 0x1ff   : > { %v5911_v63 = vpop.f32.mrf.mxu1  ;;  %4357 = vst [vmem:[%s6989_s19 + $0x88] sm:$0xff] %v7159_v13  ;;  %v4388_v47 = vadd.f32 %v4387_v51, %v7159_v13  ;;  %v7167_v44 = vadd.f32 %v5994_v24, %v4141_v6 }
 0x200   : > { %v4293_v27 = vpop.f32.mrf.mxu0  ;;  %v4149_v12 = vadd.f32 %v5910_v3, %v7311_v28 }
 0x201   : > { %v5912_v2 = vpop.f32.mrf.mxu1  ;;  %v4389_v50 = vadd.f32 %v4388_v47, %v7139_v9  ;;  %4362 = vst [vmem:[%s6989_s19 + $0xb0] sm:$0xff] %v7167_v44  ;;  %v7173_v55 = vadd.f32 %v4293_v27, %v4133_v54 }
 0x202   : > { %v5995_v23 = vpop.f32.mrf.mxu0  ;;  %v5913_v53 = vadd.f32 %v5912_v2, %v5911_v63  ;;  %v7312_v63 = vld [vmem:[#allocation10_spill] sm:$0xff] }
 0x203   : > { %v5914_v32 = vpop.f32.mrf.mxu1  ;;  %4360 = vst [vmem:[%s6989_s19 + $0xa0] sm:$0xff] %v7173_v55  ;;  %v4390_v5 = vadd.f32 %v4389_v50, %v7153_v4  ;;  %v7179_v45 = vadd.f32 %v5995_v23, %v4144_v39  ;;  %v5816_v2 = vadd.f32 %v7312_v63, %v6961_v43  ;;  %v7314_v43 = vld [vmem:[#allocation4_spill] sm:$0xff]  ;;  %v7315_v50 = vld [vmem:[#allocation11_spill] sm:$0xff] }
 0x204   : > { %v4296_v49 = vpop.f32.mrf.mxu0 }
 0x205   : > { %v5915_v37 = vpop.f32.mrf.mxu1  ;;  %v4391_v56 = vadd.f32 %v4390_v5, %v7173_v55  ;;  %4363 = vst [vmem:[%s6989_s19 + $0xb8] sm:$0xff] %v7179_v45  ;;  %v7185_v1 = vadd.f32 %v4296_v49, %v4136_v19  ;;  %v7317_v49 = vld [vmem:[#allocation8_spill] sm:$0xff] }
 0x206   : > { %v5916_v26 = vadd.f32 %v5915_v37, %v5914_v32  ;;  %v5998_v48 = vpop.f32.mrf.mxu0  ;;  %v7313_v37 = vld [vmem:[#allocation7_spill] sm:$0xff] }
 0x207   : > { %v5917_v8 = vpop.f32.mrf.mxu1  ;;  %4361 = vst [vmem:[%s6989_s19 + $0xa8] sm:$0xff] %v7185_v1  ;;  %v4392_v38 = vadd.f32 %v4391_v56, %v7185_v1  ;;  %v4152_v31 = vadd.f32 %v5913_v53, %v7313_v37  ;;  %v7318_v53 = vld [vmem:[#allocation5_spill] sm:$0xff] }
 0x208   : > { %v4157_v41 = vadd.f32 %v5916_v26, %v6943_v17  ;;  %v4309_v40 = vpop.f32.mrf.mxu0  ;;  %v7316_v26 = vld [vmem:[#allocation12_spill] sm:$0xff] }
 0x209   : > { %v5918_v57 = vpop.f32.mrf.mxu1  ;;  %v4393_v58 = vadd.f32 %v4392_v38, %v7167_v44  ;;  %v7197_v17 = vadd.f32 %v4309_v40, %v4149_v12  ;;  %v5819_v39 = vadd.f32 %v7316_v26, %v7315_v50 }
 0x20a   : > { %v5919_v34 = vadd.f32 %v5918_v57, %v5917_v8  ;;  %v7191_v46 = vadd.f32 %v5998_v48, %v4157_v41  ;;  %v5999_v32 = vpop.f32.mrf.mxu0  ;;  %v4012_v8 = vadd.f32 %v5816_v2, %v7314_v43 }
 0x20b   : > { %v5920_v21 = vpop.f32.mrf.mxu1  ;;  %4364 = vst [vmem:[%s6989_s19 + $0xc0] sm:$0xff] %v7197_v17  ;;  %v4394_v6 = vadd.f32 %v4393_v58, %v7179_v45  ;;  %v4015_v38 = vadd.f32 %v5819_v39, %v7318_v53 }
 0x20c   : > { %4366 = vst [vmem:[%s6989_s19 + $0xd0] sm:$0xff] %v7191_v46  ;;  %v4160_v42 = vadd.f32 %v5919_v34, %v6950_v30  ;;  %v4312_v47 = vpop.f32.mrf.mxu0 }
 0x20d   : > { %v5921_v35 = vpop.f32.mrf.mxu1  ;;  %v4395_v27 = vadd.f32 %v4394_v6, %v7197_v17  ;;  %v4313_v30 = vadd.f32 %v4312_v47, %v4152_v31 }
 0x20e   : > { %v5922_v51 = vadd.f32 %v5921_v35, %v5920_v21  ;;  %v7205_v24 = vadd.f32 %v5999_v32, %v4160_v42  ;;  %v6002_v23 = vpop.f32.mrf.mxu0  ;;  %v7319_v42 = vld [vmem:[#allocation9_spill] sm:$0xff] }
 0x20f   : > { %v5923_v36 = vpop.f32.mrf.mxu1  ;;  %4365 = vst [vmem:[%s6989_s19 + $0xc8] sm:$0xff] %v4313_v30  ;;  %v4396_v5 = vadd.f32 %v4395_v27, %v4313_v30 }
 0x210   : > { %4367 = vst [vmem:[%s6989_s19 + $0xd8] sm:$0xff] %v7205_v24  ;;  %v4165_v21 = vadd.f32 %v5922_v51, %v7317_v49  ;;  %v4325_v56 = vpop.f32.mrf.mxu0 }
 0x211   : > { %v5924_v18 = vpop.f32.mrf.mxu1  ;;  %v4397_v41 = vadd.f32 %v4396_v5, %v7191_v46 }
 0x212   : > { %v5925_v3 = vadd.f32 %v5924_v18, %v5923_v36  ;;  %v4326_v35 = vadd.f32 %v4325_v56, %v4165_v21  ;;  %v6003_v28 = vpop.f32.mrf.mxu0 }
 0x213   : > { %v5926_v54 = vpop.f32.mrf.mxu1  ;;  %v4398_v36 = vadd.f32 %v4397_v41, %v7205_v24 }
 0x214   : > { %4368 = vst [vmem:[%s6989_s19 + $0xe0] sm:$0xff] %v4326_v35  ;;  %v4168_v63 = vadd.f32 %v5925_v3, %v7319_v42  ;;  %v4328_v2 = vpop.f32.mrf.mxu0 }
 0x215   : > { %v5927_v57 = vpop.f32.mrf.mxu1  ;;  %v4399_v32 = vadd.f32 %v4398_v36, %v4326_v35 }
 0x216   : > { %v5928_v19 = vadd.f32 %v5927_v57, %v5926_v54  ;;  %v4329_v51 = vadd.f32 %v4328_v2, %v4168_v63 }
 0x217   : > { %v5929_v34 = vpop.f32.mrf.mxu1 }
 0x218   : > { %v4173_v48 = vadd.f32 %v5928_v19, %v4012_v8  ;;  %4369 = vst [vmem:[%s6989_s19 + $0xe8] sm:$0xff] %v4329_v51  ;;  %v4400_v37 = vadd.f32 %v4399_v32, %v4329_v51 }
 0x219   : > { %v5930_v12 = vpop.f32.mrf.mxu1 }
 0x21a   : > { %v4334_v40 = vadd.f32 %v6002_v23, %v4173_v48  ;;  %v5931_v58 = vadd.f32 %v5930_v12, %v5929_v34 }
 0x21c   : > { %4370 = vst [vmem:[%s6989_s19 + $0xf0] sm:$0xff] %v4334_v40  ;;  %v4176_v18 = vadd.f32 %v5931_v58, %v4015_v38  ;;  %v4401_v31 = vadd.f32 %v4400_v37, %v4334_v40 }
 0x21e   : > { %v4337_v6 = vadd.f32 %v6003_v28, %v4176_v18 }
 0x220   : > { %4371 = vst [vmem:[%s6989_s19 + $0xf8] sm:$0xff] %v4337_v6  ;;  %v4402_v47 = vadd.f32 %v4401_v31, %v4337_v6 }
 0x222   : > { %v4403_v54 = vrot.slane %v4402_v47, 4 }
 0x224   : > { %v4404_v27 = vadd.f32 %v4403_v54, %v4402_v47 }
 0x226   : > { %v4405_v43 = vrot.slane %v4404_v27, 2 }
 0x228   : > { %v4406_v8 = vadd.f32 %v4405_v43, %v4404_v27 }
 0x22a   : > { %v4407_v50 = vrot.slane %v4406_v8, 1 }
 0x22c   : > { %v4408_v26 = vadd.f32 %v4407_v50, %v4406_v8 }
 0x22e   : > { %v4409_v39 = vmul.f32 0.00390625, %v4408_v26  ;;  %4511 = vst [vmem:[%s7228_s23] sm:$0x1] %v4408_v26 }
 0x230   : > { %v4419_v23 = vsub.f32 %v7099_v16, %v4409_v39  ;;  %v4421_v57 = vsub.f32 %v7091_v61, %v4409_v39  ;;  %v4422_v3 = vsub.f32 %v7115_v52, %v4409_v39  ;;  %v4423_v5 = vsub.f32 %v7131_v20, %v4409_v39 }
 0x231   : > { %v4424_v19 = vsub.f32 %v7107_v59, %v4409_v39  ;;  %v4425_v49 = vsub.f32 %v7123_v0, %v4409_v39  ;;  %v4426_v21 = vsub.f32 %v7145_v33, %v4409_v39  ;;  %v4427_v56 = vsub.f32 %v7159_v13, %v4409_v39 }
 0x232   : > { %v4428_v34 = vsub.f32 %v7139_v9, %v4409_v39  ;;  %v4429_v41 = vsub.f32 %v7153_v4, %v4409_v39  ;;  %v4430_v16 = vsub.f32 %v7173_v55, %v4409_v39  ;;  %v4431_v61 = vsub.f32 %v7185_v1, %v4409_v39 }
 0x233   : > { %v4432_v52 = vsub.f32 %v7167_v44, %v4409_v39  ;;  %v7245_v20 = vsub.f32 %v7179_v45, %v4409_v39  ;;  %v7248_v59 = vsub.f32 %v7197_v17, %v4409_v39  ;;  %v7250_v0 = vsub.f32 %v4313_v30, %v4409_v39 }
 0x234   : > { %v7253_v33 = vsub.f32 %v7191_v46, %v4409_v39  ;;  %v7256_v9 = vsub.f32 %v7205_v24, %v4409_v39  ;;  %v7258_v4 = vsub.f32 %v4326_v35, %v4409_v39  ;;  %v7260_v13 = vsub.f32 %v4329_v51, %v4409_v39 }
 0x235   : > { %v7262_v55 = vsub.f32 %v4334_v40, %v4409_v39  ;;  %v7264_v44 = vsub.f32 %v4337_v6, %v4409_v39  ;;  %v4410_v45 = vsub.f32 %v7002_v7, %v4409_v39  ;;  %v4411_v1 = vsub.f32 %v7020_v29, %v4409_v39 }
 0x236   : > { %v4412_v17 = vsub.f32 %v6993_v62, %v4409_v39  ;;  %v4413_v48 = vsub.f32 %v7011_v25, %v4409_v39  ;;  %v4414_v24 = vsub.f32 %v7041_v22, %v4409_v39  ;;  %v4415_v38 = vsub.f32 %v7061_v11, %v4409_v39 }
 0x237   : > { %v4442_v30 = vmul.f32 %v4410_v45, %v4410_v45  ;;  %v4443_v46 = vmul.f32 %v4411_v1, %v4411_v1  ;;  %v4416_v40 = vsub.f32 %v7031_v14, %v4409_v39  ;;  %v4417_v29 = vsub.f32 %v7051_v15, %v4409_v39 }
 0x238   : > { %v4444_v35 = vmul.f32 %v4412_v17, %v4412_v17  ;;  %v4445_v28 = vmul.f32 %v4413_v48, %v4413_v48  ;;  %v4446_v36 = vmul.f32 %v4414_v24, %v4414_v24  ;;  %v4447_v58 = vmul.f32 %v4415_v38, %v4415_v38 }
 0x239   : > { %v4474_v53 = vadd.f32 %v4443_v46, %v4442_v30  ;;  %v4418_v42 = vsub.f32 %v7081_v60, %v4409_v39  ;;  %v4448_v63 = vmul.f32 %v4416_v40, %v4416_v40  ;;  %v4449_v2 = vmul.f32 %v4417_v29, %v4417_v29 }
 0x23a   : > { %v4420_v32 = vsub.f32 %v7071_v10, %v4409_v39  ;;  %v4451_v51 = vmul.f32 %v4419_v23, %v4419_v23  ;;  %v4453_v31 = vmul.f32 %v4421_v57, %v4421_v57  ;;  %v4454_v54 = vmul.f32 %v4422_v3, %v4422_v3 }
 0x23b   : > { %v4475_v12 = vadd.f32 %v4474_v53, %v4444_v35  ;;  %v4450_v18 = vmul.f32 %v4418_v42, %v4418_v42  ;;  %v4455_v27 = vmul.f32 %v4423_v5, %v4423_v5  ;;  %v4456_v8 = vmul.f32 %v4424_v19, %v4424_v19 }
 0x23c   : > { %v4452_v37 = vmul.f32 %v4420_v32, %v4420_v32  ;;  %v4457_v50 = vmul.f32 %v4425_v49, %v4425_v49  ;;  %v4458_v45 = vmul.f32 %v4426_v21, %v4426_v21  ;;  %v4459_v17 = vmul.f32 %v4427_v56, %v4427_v56 }
 0x23d   : > { %v4476_v7 = vadd.f32 %v4475_v12, %v4445_v28  ;;  %v4460_v39 = vmul.f32 %v4428_v34, %v4428_v34  ;;  %v4461_v23 = vmul.f32 %v4429_v41, %v4429_v41  ;;  %v4462_v48 = vmul.f32 %v4430_v16, %v4430_v16 }
 0x23e   : > { %v4463_v57 = vmul.f32 %v4431_v61, %v4431_v61  ;;  %v4464_v3 = vmul.f32 %v4432_v52, %v4432_v52  ;;  %v4465_v5 = vmul.f32 %v7245_v20, %v7245_v20  ;;  %v4466_v49 = vmul.f32 %v7248_v59, %v7248_v59 }
 0x23f   : > { %v4477_v62 = vadd.f32 %v4476_v7, %v4446_v36  ;;  %v4467_v56 = vmul.f32 %v7250_v0, %v7250_v0  ;;  %v4468_v41 = vmul.f32 %v7253_v33, %v7253_v33  ;;  %v4469_v61 = vmul.f32 %v7256_v9, %v7256_v9 }
 0x240   : > { %v4470_v20 = vmul.f32 %v7258_v4, %v7258_v4  ;;  %v4471_v59 = vmul.f32 %v7260_v13, %v7260_v13  ;;  %v4472_v0 = vmul.f32 %v7262_v55, %v7262_v55  ;;  %v4473_v33 = vmul.f32 %v7264_v44, %v7264_v44 }
 0x241   : > { %v4478_v25 = vadd.f32 %v4477_v62, %v4447_v58 }
 0x243   : > { %v4479_v22 = vadd.f32 %v4478_v25, %v4448_v63 }
 0x245   : > { %v4480_v11 = vadd.f32 %v4479_v22, %v4449_v2 }
 0x247   : > { %v4481_v6 = vadd.f32 %v4480_v11, %v4450_v18 }
 0x249   : > { %v4482_v14 = vadd.f32 %v4481_v6, %v4451_v51 }
 0x24b   : > { %v4483_v47 = vadd.f32 %v4482_v14, %v4452_v37 }
 0x24d   : > { %v4484_v15 = vadd.f32 %v4483_v47, %v4453_v31 }
 0x24f   : > { %v4485_v43 = vadd.f32 %v4484_v15, %v4454_v54 }
 0x251   : > { %v4486_v60 = vadd.f32 %v4485_v43, %v4455_v27 }
 0x253   : > { %v4487_v26 = vadd.f32 %v4486_v60, %v4456_v8 }
 0x255   : > { %v4488_v1 = vadd.f32 %v4487_v26, %v4457_v50 }
 0x257   : > { %v4489_v10 = vadd.f32 %v4488_v1, %v4458_v45 }
 0x259   : > { %v4490_v30 = vadd.f32 %v4489_v10, %v4459_v17 }
 0x25b   : > { %v4491_v46 = vadd.f32 %v4490_v30, %v4460_v39 }
 0x25d   : > { %v4492_v24 = vadd.f32 %v4491_v46, %v4461_v23 }
 0x25f   : > { %v4493_v35 = vadd.f32 %v4492_v24, %v4462_v48 }
 0x261   : > { %v4494_v53 = vadd.f32 %v4493_v35, %v4463_v57 }
 0x263   : > { %v4495_v19 = vadd.f32 %v4494_v53, %v4464_v3 }
 0x265   : > { %v4496_v21 = vadd.f32 %v4495_v19, %v4465_v5 }
 0x267   : > { %v4497_v34 = vadd.f32 %v4496_v21, %v4466_v49 }
 0x269   : > { %v4498_v16 = vadd.f32 %v4497_v34, %v4467_v56 }
 0x26b   : > { %v4499_v52 = vadd.f32 %v4498_v16, %v4468_v41 }
 0x26d   : > { %v4500_v38 = vadd.f32 %v4499_v52, %v4469_v61 }
 0x26f   : > { %v4501_v28 = vadd.f32 %v4500_v38, %v4470_v20 }
 0x271   : > { %v4502_v12 = vadd.f32 %v4501_v28, %v4471_v59 }
 0x273   : > { %v4503_v40 = vadd.f32 %v4502_v12, %v4472_v0 }
 0x275   : > { %v4504_v36 = vadd.f32 %v4503_v40, %v4473_v33 }
 0x277   : > { %v4505_v9 = vrot.slane %v4504_v36, 4 }
 0x279   : > { %v4506_v7 = vadd.f32 %v4505_v9, %v4504_v36 }
 0x27b   : > { %v4507_v29 = vrot.slane %v4506_v7, 2 }
 0x27d   : > { %v4508_v58 = vadd.f32 %v4507_v29, %v4506_v7 }
 0x27f   : > { %v4509_v62 = vrot.slane %v4508_v58, 1 }
 0x281   : > { %v4510_v4 = vadd.f32 %v4509_v62, %v4508_v58 }
 0x283   : > { %4512 = vst [vmem:[%s7228_s23 + $0x1] sm:$0x1] %v4510_v4 }
 0x284 PF: > { %s14_s12 = sadd.s32 1, %s6348_s12  }
 0x285   : > { %p11_p4 = scmp.ge.s32.totalorder %s14_s12, 4  }
 0x287   :  { %13 = sbr.rel (!%p11_p4) target bundleno = 1 (0x1), region = 72 }

// kernel: residual_block.4
= control target key start
LH: loop header
LB: loop body
LE: loop exit
PB: predicated region body
PF: predicated region fallthrough
CT: control target
= control target key end

     0   :  { %s6442_s21 = smov 0   ;;  %s7399_s0 = inlined_call_operand.vmem [shape: f32[2,256,128], index: 0, kind: input, shape index: {}]   ;;  %s7400_s1 = inlined_call_operand.vmem [shape: f32[2,128], index: 1, kind: input, shape index: {}]   ;;  %s7401_s2 = inlined_call_operand.vmem [shape: f32[1,128], index: 2, kind: input, shape index: {}]   ;;  %s7402_s3 = inlined_call_operand.vmem [shape: f32[1,128], index: 3, kind: input, shape index: {}]   ;;  %s7403_s4 = inlined_call_operand.vmem [shape: bf16[1152,128], index: 4, kind: input, shape index: {}]   ;;  %s7404_s5 = inlined_call_operand.vmem [shape: f32[2,256,128], index: 5, kind: output, shape index: {0}]   ;;  %s7405_s6 = inlined_call_operand.vmem [shape: f32[2,2,128], index: 6, kind: output, shape index: {1}]  }
   0x1 LB: > { %s4763_s22 = sadd.s32 4294967295, %s6403_s21   ;;  %p4767_p0 = scmp.ge.s32.totalorder %s6403_s21, 1  ;;  %s6403_s21 = sphi %s6442_s21, %s17_s21  }
   0x2   : > { %p215_p1 = scmp.lt.s32.totalorder %s6403_s21, 3 }
   0x4   : > { %p216_p2 = pnand %p4767_p0, %p215_p1 }
   0x6   : > { %219 = sbr.rel (%p216_p2) target bundleno = 658 (0x292), region = 40 }
   0xb   : > { %v6114_v0 = vld [vmem:[%s7403_s4 + $0x78] sm:$0xff]   ;;  %v6405_v2 = vmov 0.0   ;;  %v6116_v3 = vld [vmem:[%s7403_s4 + $0x70] sm:$0xff]   ;;  %v6406_v5 = vmov 0.0|0.0   ;;  %v6118_v6 = vld [vmem:[%s7403_s4 + $0x68] sm:$0xff]   ;;  %p249_p3 = scmp.lt.s32.totalorder %s4763_s22, 1  ;;  %v305_v23 = vlaneseq }
   0xc   : > { %v6115_v1 = vld [vmem:[%s7403_s4 + $0x38] sm:$0xff]   ;;  %411 = vst [vmem:[#allocation2] sm:$0xff] %v6405_v2  ;;  %412 = vst [vmem:[#allocation2 + $0x8] sm:$0xff] %v6405_v2  ;;  %5569 = vmatprep.subr.bf16.mxu0 %v6114_v0  ;;  %6089 = vmatprep.subr.bf16.mxu1 %v6114_v0  ;;  %v6117_v4 = vld [vmem:[%s7403_s4 + $0x30] sm:$0xff]  }
   0xd   : > { %413 = vst [vmem:[#allocation2 + $0x10] sm:$0x3] %v6405_v2  ;;  %414 = vst [vmem:[#allocation2 + $0x18] sm:$0xff] %v6405_v2  ;;  %5570 = vmatpush3.bf16.msra.mxu0 %v6115_v1  ;;  %6097 = vmatpush3.bf16.msra.mxu1 %v6115_v1  ;;  %v6119_v7 = vld [vmem:[%s7403_s4 + $0x28] sm:$0xff]   ;;  %v6120_v8 = vld [vmem:[%s7403_s4 + $0x60] sm:$0xff]   ;;  %s7419_s22 = smov (!%p249_p3, %s4763_s22), 1 }
   0xe   : > { %415 = vst [vmem:[#allocation2 + $0x20] sm:$0xff] %v6405_v2  ;;  %416 = vst [vmem:[#allocation2 + $0x28] sm:$0x3] %v6405_v2  ;;  %5571 = vmatprep.subr.bf16.mxu0 %v6116_v3  ;;  %6090 = vmatprep.subr.bf16.mxu1 %v6116_v3  ;;  %v6121_v9 = vld [vmem:[%s7403_s4 + $0x20] sm:$0xff]   ;;  %v6122_v10 = vld [vmem:[%s7403_s4 + $0x58] sm:$0xff]   ;;  %s5279_s11 = sshll.u32 %s7419_s22, 8 }
   0xf   : > { %417 = vst [vmem:[#allocation2 + $0x30] sm:$0xff] %v6405_v2  ;;  %418 = vst [vmem:[#allocation2 + $0x38] sm:$0xff] %v6405_v2  ;;  %v6123_v11 = vld [vmem:[%s7403_s4 + $0x18] sm:$0xff]   ;;  %v6124_v12 = vld [vmem:[%s7403_s4 + $0x50] sm:$0xff]   ;;  %v306_v27 = vshrl.u32 %v305_v23, 7  ;;  %s6522_s20 = scalar_lea.vmem %s7399_s0, %s5279_s11  ;;  %s7106_s13 = scalar_lea.vmem %s7404_s5, %s5279_s11 }
  0x10   : > { %419 = vst [vmem:[#allocation2 + $0x40] sm:$0x3] %v6405_v2  ;;  %420 = vst [vmem:[#allocation2 + $0x48] sm:$0xff] %v6405_v2  ;;  %v265_v17 = vld [vmem:[%s7400_s1 + $0x1] sm:$0x1]  ;;  %v6125_v19 = vld [vmem:[%s7403_s4 + $0x10] sm:$0xff]  }
  0x11   : > { %421 = vst [vmem:[#allocation2 + $0x50] sm:$0xff] %v6405_v2  ;;  %422 = vst [vmem:[#allocation2 + $0x58] sm:$0x3] %v6405_v2  ;;  %5572 = vmatpush3.bf16.msra.mxu0 %v6117_v4  ;;  %6098 = vmatpush3.bf16.msra.mxu1 %v6117_v4  ;;  %v266_v18 = vadd.f32 1e-05, %v265_v17  ;;  %v6126_v20 = vld [vmem:[%s7403_s4 + $0x48] sm:$0xff]  }
  0x12   : > { %423 = vst [vmem:[#allocation2 + $0x60] sm:$0xff] %v6405_v2  ;;  %424 = vst [vmem:[#allocation2 + $0x68] sm:$0xff] %v6405_v2  ;;  %5573 = vmatprep.subr.bf16.mxu0 %v6118_v6  ;;  %6091 = vmatprep.subr.bf16.mxu1 %v6118_v6  ;;  %v6127_v21 = vld [vmem:[%s7403_s4 + $0x8] sm:$0xff]   ;;  %v6128_v22 = vld [vmem:[%s7403_s4 + $0x40] sm:$0xff]   ;;  %v307_v33 = vsub.s32 0, %v306_v27  ;;  %s4772_s11 = sshll.u32 %s7419_s22, 1 }
  0x13   : > { %425 = vst [vmem:[#allocation2 + $0x70] sm:$0x3] %v6405_v2  ;;  %426 = vst [vmem:[#allocation2 + $0x78] sm:$0xff] %v6405_v2  ;;  %v690_v13 = vld [vmem:[#allocation2 + $0x1] sm:$0xff]  ;;  %6394 = vrsqrt.f32 %v266_v18  ;;  %v6138_v26 = vld [vmem:[%s7403_s4 + $0xf8] sm:$0xff]   ;;  %s7309_s16 = scalar_lea.vmem %s7405_s6, %s4772_s11 }
  0x14   : > { %427 = vst [vmem:[#allocation2 + $0x80] sm:$0xff] %v6405_v2  ;;  %428 = vst [vmem:[#allocation2 + $0x88] sm:$0x3] %v6405_v2  ;;  %v691_v14 = vld [vmem:[#allocation2 + $0x9] sm:$0xff]  ;;  %v5313_v15 = vpack.c.bf16 %v690_v13, %v690_v13  ;;  %v6129_v24 = vld [vmem:[%s7403_s4] sm:$0xff]  }
  0x15   : > { %429 = vst [vmem:[#allocation2 + $0x90] sm:$0xff] %v6405_v2  ;;  %430 = vst [vmem:[#allocation2 + $0x98] sm:$0xff] %v6405_v2  ;;  %5574 = vmatpush3.bf16.msra.mxu0 %v6119_v7  ;;  %6099 = vmatpush3.bf16.msra.mxu1 %v6119_v7  ;;  %v5314_v16 = vpack.c.bf16 %v691_v14, %v691_v14  ;;  %v6139_v28 = vld [vmem:[%s7403_s4 + $0x178] sm:$0xff]   ;;  %v268_v29 = vld [vmem:[%s7401_s2] sm:$0x1] }
  0x16   : > { %431 = vst [vmem:[#allocation2 + $0xa0] sm:$0x3] %v6405_v2  ;;  %432 = vst [vmem:[#allocation2 + $0xa8] sm:$0xff] %v6405_v2  ;;  %5575 = vmatprep.subr.bf16.mxu0 %v6120_v8  ;;  %6092 = vmatprep.subr.bf16.mxu1 %v6120_v8  ;;  %v264_v31 = vld [vmem:[%s7400_s1] sm:$0x1]  ;;  %v6142_v32 = vld [vmem:[%s7403_s4 + $0x138] sm:$0xff]  }
  0x17   : > { %433 = vst [vmem:[#allocation2 + $0xb0] sm:$0xff] %v6405_v2  ;;  %434 = vst [vmem:[#allocation2 + $0xb8] sm:$0x3] %v6405_v2  ;;  %v6154_v34 = vld [vmem:[%s7403_s4 + $0x170] sm:$0xff]   ;;  %v270_v36 = vld [vmem:[%s7402_s3] sm:$0x1] }
  0x18   : > { %435 = vst [vmem:[#allocation2 + $0xc0] sm:$0xff] %v6405_v2  ;;  %436 = vst [vmem:[#allocation2 + $0xc8] sm:$0xff] %v6405_v2  ;;  %v273_v37 = vld [vmem:[%s6522_s20] sm:$0xff]  ;;  %v274_v38 = vld [vmem:[%s6522_s20 + $0x8] sm:$0xff] }
  0x19   : > { %437 = vst [vmem:[#allocation2 + $0xd0] sm:$0x3] %v6405_v2  ;;  %438 = vst [vmem:[#allocation2 + $0xd8] sm:$0xff] %v6405_v2  ;;  %5576 = vmatpush3.bf16.msra.mxu0 %v6121_v9  ;;  %6100 = vmatpush3.bf16.msra.mxu1 %v6121_v9  ;;  %v295_v39 = vld [vmem:[%s6522_s20 + $0xb0] sm:$0xff]  ;;  %v296_v41 = vld [vmem:[%s6522_s20 + $0xb8] sm:$0xff] }
  0x1a   : > { %439 = vst [vmem:[#allocation2 + $0xe0] sm:$0xff] %v6405_v2  ;;  %440 = vst [vmem:[#allocation2 + $0xe8] sm:$0x3] %v6405_v2  ;;  %5577 = vmatprep.subr.bf16.mxu0 %v6122_v10  ;;  %6093 = vmatprep.subr.bf16.mxu1 %v6122_v10  ;;  %v275_v42 = vld [vmem:[%s6522_s20 + $0x10] sm:$0xff]  ;;  %v276_v43 = vld [vmem:[%s6522_s20 + $0x18] sm:$0xff] }
  0x1b   : > { %441 = vst [vmem:[#allocation2 + $0xf0] sm:$0xff] %v6405_v2  ;;  %442 = vst [vmem:[#allocation2 + $0xf8] sm:$0xff] %v6405_v2  ;;  %v297_v44 = vld [vmem:[%s6522_s20 + $0xc0] sm:$0xff]  ;;  %v6156_v45 = vld [vmem:[%s7403_s4 + $0x130] sm:$0xff]  }
  0x1c   : > { %443 = vst [vmem:[#allocation2 + $0x100] sm:$0x3] %v6405_v2  ;;  %444 = vst [vmem:[#allocation2 + $0x108] sm:$0xff] %v6405_v2  ;;  %v298_v46 = vld [vmem:[%s6522_s20 + $0xc8] sm:$0xff]  ;;  %v277_v47 = vld [vmem:[%s6522_s20 + $0x20] sm:$0xff] }
  0x1d   : > { %445 = vst [vmem:[#allocation2 + $0x110] sm:$0xff] %v6405_v2  ;;  %446 = vst [vmem:[#allocation2 + $0x118] sm:$0x3] %v6405_v2  ;;  %5578 = vmatpush3.bf16.msra.mxu0 %v6123_v11  ;;  %6101 = vmatpush3.bf16.msra.mxu1 %v6123_v11  ;;  %v278_v50 = vld [vmem:[%s6522_s20 + $0x28] sm:$0xff]  ;;  %v299_v51 = vld [vmem:[%s6522_s20 + $0xd0] sm:$0xff] }
  0x1e   : > { %447 = vst [vmem:[#allocation2 + $0x120] sm:$0xff] %v6405_v2  ;;  %448 = vst [vmem:[#allocation2 + $0x128] sm:$0xff] %v6405_v2  ;;  %5579 = vmatprep.subr.bf16.mxu0 %v6124_v12  ;;  %6094 = vmatprep.subr.bf16.mxu1 %v6124_v12  ;;  %v300_v56 = vld [vmem:[%s6522_s20 + $0xd8] sm:$0xff]  ;;  %v279_v61 = vld [vmem:[%s6522_s20 + $0x30] sm:$0xff] }
  0x1f   : > { %449 = vst [vmem:[#allocation2 + $0x130] sm:$0x3] %v6405_v2  ;;  %450 = vst [vmem:[#allocation2 + $0x138] sm:$0xff] %v6405_v2  ;;  %v280_v62 = vld [vmem:[%s6522_s20 + $0x38] sm:$0xff]  ;;  %v6172_v11 = vld [vmem:[%s7403_s4 + $0x168] sm:$0xff]  }
  0x20   : > { %451 = vst [vmem:[#allocation2 + $0x140] sm:$0xff] %v6405_v2  ;;  %452 = vst [vmem:[#allocation2 + $0x148] sm:$0x3] %v6405_v2  ;;  %v6395_v35 = vpop.eup %6394 }
  0x21   : > { %453 = vst [vmem:[#allocation2 + $0x150] sm:$0xff] %v6405_v2  ;;  %454 = vst [vmem:[#allocation2 + $0x158] sm:$0xff] %v6405_v2  ;;  %5580 = vmatpush3.bf16.msra.mxu0 %v6125_v19  ;;  %6102 = vmatpush3.bf16.msra.mxu1 %v6125_v19  ;;  %v269_v40 = vmul.f32 %v6395_v35, %v268_v29 }
  0x22   : > { %455 = vst [vmem:[#allocation2 + $0x160] sm:$0x3] %v6405_v2  ;;  %456 = vst [vmem:[#allocation2 + $0x168] sm:$0xff] %v6405_v2  ;;  %5581 = vmatprep.subr.bf16.mxu0 %v6126_v20  ;;  %6095 = vmatprep.subr.bf16.mxu1 %v6126_v20  ;;  %v301_v20 = vld [vmem:[%s6522_s20 + $0xe0] sm:$0xff] }
  0x23   : > { %457 = vst [vmem:[#allocation2 + $0x170] sm:$0xff] %v6405_v2  ;;  %458 = vst [vmem:[#allocation2 + $0x178] sm:$0x3] %v6405_v2  ;;  %v271_v48 = vmul.f32 %v269_v40, %v264_v31  ;;  %v6548_v49 = vrot.slane %v269_v40, %v307_v33 }
  0x24   : > { %459 = vst [vmem:[#allocation2 + $0x180] sm:$0xff] %v6405_v2  ;;  %460 = vst [vmem:[#allocation2 + $0x188] sm:$0xff] %v6405_v2 }
  0x25   : > { %461 = vst [vmem:[#allocation2 + $0x190] sm:$0x3] %v6405_v2  ;;  %462 = vst [vmem:[#allocation2 + $0x198] sm:$0xff] %v6405_v2  ;;  %5582 = vmatpush3.bf16.msra.mxu0 %v6127_v21  ;;  %6103 = vmatpush3.bf16.msra.mxu1 %v6127_v21  ;;  %v272_v52 = vsub.f32 %v270_v36, %v271_v48  ;;  %v309_v53 = vmul.f32 %v6548_v49, %v273_v37 }
  0x26   : > { %463 = vst [vmem:[#allocation2 + $0x1a0] sm:$0xff] %v6405_v2  ;;  %464 = vst [vmem:[#allocation2 + $0x1a8] sm:$0x3] %v6405_v2  ;;  %5583 = vmatprep.subr.bf16.mxu0 %v6128_v22  ;;  %6096 = vmatprep.subr.bf16.mxu1 %v6128_v22  ;;  %v310_v54 = vmul.f32 %v6548_v49, %v274_v38  ;;  %v331_v55 = vmul.f32 %v6548_v49, %v295_v39 }
  0x27   : > { %658 = vst [vmem:[#allocation3] sm:$0xf] %v6406_v5  ;;  %659 = vst [vmem:[#allocation3 + $0x24] sm:$0xf] %v6406_v5  ;;  %v332_v57 = vmul.f32 %v6548_v49, %v296_v41  ;;  %v311_v58 = vmul.f32 %v6548_v49, %v275_v42  ;;  %v312_v59 = vmul.f32 %v6548_v49, %v276_v43  ;;  %v281_v43 = vld [vmem:[%s6522_s20 + $0x40] sm:$0xff] }
  0x28   : > { %850 = vst [vmem:[#allocation3 + $0x4] sm:$0xf] %v5313_v15  ;;  %851 = vst [vmem:[#allocation3 + $0x28] sm:$0xf] %v5314_v16  ;;  %v333_v60 = vmul.f32 %v6548_v49, %v297_v44  ;;  %v6562_v63 = vrot.slane %v272_v52, %v307_v33  ;;  %v334_v0 = vmul.f32 %v6548_v49, %v298_v46 }
  0x29   : > { %5584 = vmatpush3.bf16.msra.mxu0 %v6129_v24  ;;  %6104 = vmatpush3.bf16.msra.mxu1 %v6129_v24  ;;  %v313_v1 = vmul.f32 %v6548_v49, %v277_v47  ;;  %v314_v2 = vmul.f32 %v6548_v49, %v278_v50  ;;  %v335_v3 = vmul.f32 %v6548_v49, %v299_v51 }
  0x2a   : > { %5681 = vmatprep.subr.bf16.mxu1 %v6138_v26  ;;  %5793 = vmatprep.subr.bf16.mxu0 %v6139_v28  ;;  %v336_v4 = vmul.f32 %v6548_v49, %v300_v56  ;;  %v315_v5 = vmul.f32 %v6548_v49, %v279_v61  ;;  %v316_v6 = vmul.f32 %v6548_v49, %v280_v62  ;;  %v6176_v26 = vld [vmem:[%s7403_s4 + $0x128] sm:$0xff]  }
  0x2b   : > { %v347_v7 = vadd.f32 %v6562_v63, %v309_v53  ;;  %v348_v8 = vadd.f32 %v6562_v63, %v310_v54  ;;  %v369_v9 = vadd.f32 %v6562_v63, %v331_v55  ;;  %v370_v10 = vadd.f32 %v6562_v63, %v332_v57  ;;  %v282_v53 = vld [vmem:[%s6522_s20 + $0x48] sm:$0xff]  ;;  %v6187_v54 = vld [vmem:[%s7403_s4 + $0x160] sm:$0xff]  }
  0x2c   : > { %v349_v12 = vadd.f32 %v6562_v63, %v311_v58  ;;  %v350_v13 = vadd.f32 %v6562_v63, %v312_v59  ;;  %v371_v14 = vadd.f32 %v6562_v63, %v333_v60  ;;  %v372_v15 = vadd.f32 %v6562_v63, %v334_v0  ;;  %v6602_v59 = vld [vmem:[#allocation2 + $0x2] sm:$0xff]  ;;  %v6604_v60 = vld [vmem:[#allocation2 + $0xa] sm:$0xff] }
  0x2d   : > { %v379_v16 = vmax.f32 %v347_v7, 0.0  ;;  %v380_v17 = vmax.f32 %v348_v8, 0.0  ;;  %v401_v18 = vmax.f32 %v369_v9, 0.0  ;;  %v402_v19 = vmax.f32 %v370_v10, 0.0 }
  0x2e   : > { %v6130_v30 = vld [vmem:[#allocation3] ss:$36 sps:$4 sm:$0xff]   ;;  %v381_v21 = vmax.f32 %v349_v12, 0.0  ;;  %v382_v22 = vmax.f32 %v350_v13, 0.0  ;;  %v403_v23 = vmax.f32 %v371_v14, 0.0  ;;  %v404_v24 = vmax.f32 %v372_v15, 0.0 }
  0x2f   : > { %v6132_v25 = vld [vmem:[#allocation3 + $0x4] ss:$36 sps:$4 sm:$0xff]   ;;  %466 = vst [vmem:[#allocation2 + $0x19] sm:$0xff] %v379_v16  ;;  %467 = vst [vmem:[#allocation2 + $0x21] sm:$0xff] %v380_v17  ;;  %v5315_v27 = vpack.c.bf16 %v379_v16, %v379_v16  ;;  %v5316_v28 = vpack.c.bf16 %v380_v17, %v380_v17  ;;  %v5337_v29 = vpack.c.bf16 %v401_v18, %v401_v18 }
  0x30   : > { %3731 = vmatprep.mubr.bf16.mxu0 %v6132_v25  ;;  %v302_v25 = vld [vmem:[%s6522_s20 + $0xe8] sm:$0xff]  ;;  %488 = vst [vmem:[#allocation2 + $0x121] sm:$0xff] %v401_v18  ;;  %489 = vst [vmem:[#allocation2 + $0x129] sm:$0xff] %v402_v19  ;;  %v5317_v31 = vpack.c.bf16 %v381_v21, %v381_v21  ;;  %v5339_v33 = vpack.c.bf16 %v403_v23, %v403_v23  ;;  %v351_v35 = vadd.f32 %v6562_v63, %v313_v1 }
  0x31   : > { %3732 = vmatmul.mubr.bf16.vlgmr.msra.gmra.mxu0 %v6130_v30  ;;  %v5338_v30 = vpack.c.bf16 %v402_v19, %v402_v19  ;;  %468 = vst [vmem:[#allocation2 + $0x31] sm:$0xff] %v381_v21  ;;  %469 = vst [vmem:[#allocation2 + $0x39] sm:$0xff] %v382_v22  ;;  %v352_v36 = vadd.f32 %v6562_v63, %v314_v2  ;;  %v373_v37 = vadd.f32 %v6562_v63, %v335_v3 }
  0x32   : > { %5794 = vmatpush3.bf16.msra.mxu0 %v6142_v32  ;;  %v5318_v32 = vpack.c.bf16 %v382_v22, %v382_v22  ;;  %490 = vst [vmem:[#allocation2 + $0x139] sm:$0xff] %v403_v23  ;;  %491 = vst [vmem:[#allocation2 + $0x141] sm:$0xff] %v404_v24  ;;  %v374_v38 = vadd.f32 %v6562_v63, %v336_v4  ;;  %v353_v39 = vadd.f32 %v6562_v63, %v315_v5  ;;  %v6188_v22 = vld [vmem:[%s7403_s4 + $0x120] sm:$0xff]   ;;  %v283_v23 = vld [vmem:[%s6522_s20 + $0x50] sm:$0xff] }
  0x33   : > { %5795 = vmatprep.subr.bf16.mxu0 %v6154_v34  ;;  %v5340_v34 = vpack.c.bf16 %v404_v24, %v404_v24  ;;  %852 = vst [vmem:[#allocation3 + $0x4c] sm:$0xf] %v5315_v27  ;;  %853 = vst [vmem:[#allocation3 + $0x70] sm:$0xf] %v5316_v28  ;;  %v354_v40 = vadd.f32 %v6562_v63, %v316_v6  ;;  %v337_v41 = vmul.f32 %v6548_v49, %v301_v20  ;;  %v284_v24 = vld [vmem:[%s6522_s20 + $0x58] sm:$0xff] }
  0x34   : > { %874 = vst [vmem:[#allocation3 + $0x364] sm:$0xf] %v5337_v29  ;;  %875 = vst [vmem:[#allocation3 + $0x388] sm:$0xf] %v5338_v30  ;;  %v338_v42 = vmul.f32 %v6548_v49, %v302_v25  ;;  %v383_v44 = vmax.f32 %v351_v35, 0.0  ;;  %v405_v46 = vmax.f32 %v373_v37, 0.0  ;;  %v318_v21 = vmul.f32 %v6548_v49, %v282_v53 }
  0x35   : > { %854 = vst [vmem:[#allocation3 + $0x94] sm:$0xf] %v5317_v31  ;;  %855 = vst [vmem:[#allocation3 + $0xb8] sm:$0xf] %v5318_v32  ;;  %v406_v47 = vmax.f32 %v374_v38, 0.0  ;;  %v385_v48 = vmax.f32 %v353_v39, 0.0  ;;  %v375_v51 = vadd.f32 %v6562_v63, %v337_v41  ;;  %v5346_v27 = vpack.c.bf16 %v6604_v60, %v6604_v60 }
  0x36   : > { %5796 = vmatpush3.bf16.msra.mxu0 %v6156_v45  ;;  %876 = vst [vmem:[#allocation3 + $0x3ac] sm:$0xf] %v5339_v33  ;;  %877 = vst [vmem:[#allocation3 + $0x3d0] sm:$0xf] %v5340_v34  ;;  %v384_v45 = vmax.f32 %v352_v36, 0.0  ;;  %v386_v50 = vmax.f32 %v354_v40, 0.0  ;;  %v376_v52 = vadd.f32 %v6562_v63, %v338_v42  ;;  %v5319_v55 = vpack.c.bf16 %v383_v44, %v383_v44 }
  0x37   : > { %5797 = vmatprep.subr.bf16.mxu0 %v6172_v11  ;;  %470 = vst [vmem:[#allocation2 + $0x49] sm:$0xff] %v383_v44  ;;  %492 = vst [vmem:[#allocation2 + $0x151] sm:$0xff] %v405_v46  ;;  %v5341_v57 = vpack.c.bf16 %v405_v46, %v405_v46  ;;  %v5342_v58 = vpack.c.bf16 %v406_v47, %v406_v47  ;;  %v500_v61 = vld [vmem:[#allocation2 + $0x18] sm:$0xff]  ;;  %v501_v62 = vld [vmem:[#allocation2 + $0x20] sm:$0xff]  ;;  %v5321_v1 = vpack.c.bf16 %v385_v48, %v385_v48 }
  0x38   : > { %471 = vst [vmem:[#allocation2 + $0x51] sm:$0xff] %v384_v45  ;;  %v5320_v56 = vpack.c.bf16 %v384_v45, %v384_v45  ;;  %493 = vst [vmem:[#allocation2 + $0x159] sm:$0xff] %v406_v47  ;;  %v522_v0 = vld [vmem:[#allocation2 + $0x120] sm:$0xff]  ;;  %v5322_v2 = vpack.c.bf16 %v386_v50, %v386_v50  ;;  %v407_v3 = vmax.f32 %v375_v51, 0.0  ;;  %v408_v4 = vmax.f32 %v376_v52, 0.0  ;;  %v523_v7 = vld [vmem:[#allocation2 + $0x128] sm:$0xff] }
  0x39   : > { %472 = vst [vmem:[#allocation2 + $0x61] sm:$0xff] %v385_v48  ;;  %473 = vst [vmem:[#allocation2 + $0x69] sm:$0xff] %v386_v50  ;;  %v5283_v5 = vpack.c.bf16 %v500_v61, %v500_v61  ;;  %v5284_v6 = vpack.c.bf16 %v501_v62, %v501_v62  ;;  %v5305_v8 = vpack.c.bf16 %v522_v0, %v522_v0  ;;  %v502_v9 = vld [vmem:[#allocation2 + $0x30] sm:$0xff]  ;;  %v503_v10 = vld [vmem:[#allocation2 + $0x38] sm:$0xff] }
  0x3a   : > { %5798 = vmatpush3.bf16.msra.mxu0 %v6176_v26  ;;  %856 = vst [vmem:[#allocation3 + $0xdc] sm:$0xf] %v5319_v55  ;;  %857 = vst [vmem:[#allocation3 + $0x100] sm:$0xf] %v5320_v56  ;;  %v317_v11 = vmul.f32 %v6548_v49, %v281_v43  ;;  %v5306_v12 = vpack.c.bf16 %v523_v7, %v523_v7  ;;  %v5285_v13 = vpack.c.bf16 %v502_v9, %v502_v9  ;;  %v524_v15 = vld [vmem:[#allocation2 + $0x138] sm:$0xff]  ;;  %v525_v16 = vld [vmem:[#allocation2 + $0x140] sm:$0xff] }
  0x3b   : > { %5799 = vmatprep.subr.bf16.mxu0 %v6187_v54  ;;  %878 = vst [vmem:[#allocation3 + $0x3f4] sm:$0xf] %v5341_v57  ;;  %879 = vst [vmem:[#allocation3 + $0x418] sm:$0xf] %v5342_v58  ;;  %v5286_v14 = vpack.c.bf16 %v503_v10, %v503_v10  ;;  %v5343_v17 = vpack.c.bf16 %v407_v3, %v407_v3  ;;  %v5307_v18 = vpack.c.bf16 %v524_v15, %v524_v15  ;;  %v884_v29 = vld [vmem:[#allocation2 + $0x1a] sm:$0xff]  ;;  %v885_v30 = vld [vmem:[#allocation2 + $0x22] sm:$0xff] }
  0x3c   : > { %858 = vst [vmem:[#allocation3 + $0x124] sm:$0xf] %v5321_v1  ;;  %859 = vst [vmem:[#allocation3 + $0x148] sm:$0xf] %v5322_v2  ;;  %v5308_v19 = vpack.c.bf16 %v525_v16, %v525_v16  ;;  %v5344_v20 = vpack.c.bf16 %v408_v4, %v408_v4  ;;  %v355_v25 = vadd.f32 %v6562_v63, %v317_v11  ;;  %v285_v31 = vld [vmem:[%s6522_s20 + $0x60] sm:$0xff]  ;;  %v286_v36 = vld [vmem:[%s6522_s20 + $0x68] sm:$0xff] }
  0x3d   : > { %494 = vst [vmem:[#allocation2 + $0x169] sm:$0xff] %v407_v3  ;;  %495 = vst [vmem:[#allocation2 + $0x171] sm:$0xff] %v408_v4  ;;  %v5345_v26 = vpack.c.bf16 %v6602_v59, %v6602_v59  ;;  %v319_v28 = vmul.f32 %v6548_v49, %v283_v23  ;;  %v356_v32 = vadd.f32 %v6562_v63, %v318_v21  ;;  %v886_v37 = vld [vmem:[#allocation2 + $0x32] sm:$0xff]  ;;  %v887_v45 = vld [vmem:[#allocation2 + $0x3a] sm:$0xff] }
  0x3e   : > { %660 = vst [vmem:[#allocation3 + $0x48] sm:$0xf] %v5283_v5  ;;  %661 = vst [vmem:[#allocation3 + $0x6c] sm:$0xf] %v5284_v6  ;;  %5800 = vmatpush3.bf16.msra.mxu0 %v6188_v22  ;;  %v320_v33 = vmul.f32 %v6548_v49, %v284_v24  ;;  %v5347_v34 = vpack.c.bf16 %v884_v29, %v884_v29  ;;  %v5348_v35 = vpack.c.bf16 %v885_v30, %v885_v30  ;;  %v504_v38 = vld [vmem:[#allocation2 + $0x48] sm:$0xff]  ;;  %v526_v40 = vld [vmem:[#allocation2 + $0x150] sm:$0xff] }
  0x3f   : > { %682 = vst [vmem:[#allocation3 + $0x360] sm:$0xf] %v5305_v8  ;;  %1234 = vst [vmem:[#allocation3 + $0xc] sm:$0xf] %v5283_v5  ;;  %v505_v39 = vld [vmem:[#allocation2 + $0x50] sm:$0xff]  ;;  %v387_v41 = vmax.f32 %v355_v25, 0.0  ;;  %v357_v42 = vadd.f32 %v6562_v63, %v319_v28  ;;  %v321_v43 = vmul.f32 %v6548_v49, %v285_v31  ;;  %v322_v44 = vmul.f32 %v6548_v49, %v286_v36 }
  0x40   : > { %1235 = vst [vmem:[#allocation3 + $0x30] sm:$0xf] %v5284_v6  ;;  %683 = vst [vmem:[#allocation3 + $0x384] sm:$0xf] %v5306_v12  ;;  %v5287_v46 = vpack.c.bf16 %v504_v38, %v504_v38  ;;  %v5288_v47 = vpack.c.bf16 %v505_v39, %v505_v39  ;;  %v527_v48 = vld [vmem:[#allocation2 + $0x158] sm:$0xff]  ;;  %v5309_v50 = vpack.c.bf16 %v526_v40, %v526_v40  ;;  %v506_v51 = vld [vmem:[#allocation2 + $0x60] sm:$0xff] }
  0x41   : > { %662 = vst [vmem:[#allocation3 + $0x90] sm:$0xf] %v5285_v13  ;;  %663 = vst [vmem:[#allocation3 + $0xb4] sm:$0xf] %v5286_v14  ;;  %v507_v52 = vld [vmem:[#allocation2 + $0x68] sm:$0xff]  ;;  %v388_v53 = vmax.f32 %v356_v32, 0.0  ;;  %v5310_v54 = vpack.c.bf16 %v527_v48, %v527_v48  ;;  %v5289_v55 = vpack.c.bf16 %v506_v51, %v506_v51  ;;  %v5323_v57 = vpack.c.bf16 %v387_v41, %v387_v41 }
  0x42   : > { %880 = vst [vmem:[#allocation3 + $0x43c] sm:$0xf] %v5343_v17  ;;  %1236 = vst [vmem:[#allocation3 + $0x54] sm:$0xf] %v5285_v13  ;;  %v5290_v56 = vpack.c.bf16 %v507_v52, %v507_v52  ;;  %v6199_v58 = vld [vmem:[%s7403_s4 + $0x158] sm:$0xff]   ;;  %v358_v62 = vadd.f32 %v6562_v63, %v320_v33  ;;  %v389_v0 = vmax.f32 %v357_v42, 0.0  ;;  %v359_v1 = vadd.f32 %v6562_v63, %v321_v43 }
  0x43   : > { %1237 = vst [vmem:[#allocation3 + $0x78] sm:$0xf] %v5286_v14  ;;  %684 = vst [vmem:[#allocation3 + $0x3a8] sm:$0xf] %v5307_v18  ;;  %v5324_v61 = vpack.c.bf16 %v388_v53, %v388_v53  ;;  %v6133_v2 = vld [vmem:[#allocation3 + $0x4c] ss:$36 sps:$4 sm:$0xff]   ;;  %v360_v6 = vadd.f32 %v6562_v63, %v322_v44  ;;  %v5349_v7 = vpack.c.bf16 %v886_v37, %v886_v37  ;;  %5801 = vmatprep.subr.bf16.mxu0 %v6199_v58 }
  0x44   : > { %685 = vst [vmem:[#allocation3 + $0x3cc] sm:$0xf] %v5308_v19  ;;  %881 = vst [vmem:[#allocation3 + $0x460] sm:$0xf] %v5344_v20  ;;  %v528_v59 = vld [vmem:[#allocation2 + $0x168] sm:$0xff]  ;;  %v529_v60 = vld [vmem:[#allocation2 + $0x170] sm:$0xff]  ;;  %v5325_v11 = vpack.c.bf16 %v389_v0, %v389_v0  ;;  %v5350_v13 = vpack.c.bf16 %v887_v45, %v887_v45  ;;  %3739 = vmatprep.mubr.bf16.mxu0 %v6133_v2 }
  0x45   : > { %1042 = vst [vmem:[#allocation3 + $0x8] sm:$0xf] %v5345_v26  ;;  %1043 = vst [vmem:[#allocation3 + $0x2c] sm:$0xf] %v5346_v27  ;;  %v6141_v3 = vld [vmem:[%s7403_s4 + $0xb8] sm:$0xff]   ;;  %v5311_v4 = vpack.c.bf16 %v528_v59, %v528_v59  ;;  %v5312_v5 = vpack.c.bf16 %v529_v60, %v529_v60  ;;  %v6143_v9 = vld [vmem:[%s7403_s4 + $0xf0] sm:$0xff]  }
  0x46   : > { %1044 = vst [vmem:[#allocation3 + $0x50] sm:$0xf] %v5347_v34  ;;  %1045 = vst [vmem:[#allocation3 + $0x74] sm:$0xf] %v5348_v35  ;;  %v390_v10 = vmax.f32 %v358_v62, 0.0  ;;  %v391_v12 = vmax.f32 %v359_v1, 0.0 }
  0x47   : > { %1618 = vst [vmem:[#allocation3 + $0x14] sm:$0xf] %v5347_v34  ;;  %1619 = vst [vmem:[#allocation3 + $0x38] sm:$0xf] %v5348_v35  ;;  %v6135_v8 = vld [vmem:[#allocation3 + $0x360] ss:$36 sps:$4 sm:$0xff]  }
  0x48   : > { %474 = vst [vmem:[#allocation2 + $0x79] sm:$0xff] %v387_v41  ;;  %664 = vst [vmem:[#allocation3 + $0xd8] sm:$0xf] %v5287_v46  ;;  %v6137_v14 = vld [vmem:[#allocation3 + $0x364] ss:$36 sps:$4 sm:$0xff]   ;;  %v392_v16 = vmax.f32 %v360_v6, 0.0  ;;  %v5326_v18 = vpack.c.bf16 %v390_v10, %v390_v10  ;;  %v5327_v19 = vpack.c.bf16 %v391_v12, %v391_v12 }
  0x49   : > { %665 = vst [vmem:[#allocation3 + $0xfc] sm:$0xf] %v5288_v47  ;;  %686 = vst [vmem:[#allocation3 + $0x3f0] sm:$0xf] %v5309_v50  ;;  %v6140_v15 = vld [vmem:[#allocation3 + $0x48] ss:$36 sps:$4 sm:$0xff]   ;;  %3827 = vmatprep.mubr.bf16.mxu1 %v6137_v14 }
  0x4a   : > { %475 = vst [vmem:[#allocation2 + $0x81] sm:$0xff] %v388_v53  ;;  %1238 = vst [vmem:[#allocation3 + $0x9c] sm:$0xf] %v5287_v46  ;;  %v6145_v17 = vld [vmem:[#allocation3 + $0x94] ss:$36 sps:$4 sm:$0xff]   ;;  %3740 = vmatmul.mubr.bf16.gmra.mxu0 %v6140_v15  ;;  %v5328_v21 = vpack.c.bf16 %v392_v16, %v392_v16  ;;  %3828 = vmatmul.mubr.bf16.vlgmr.msra.gmra.mxu1 %v6135_v8  ;;  %v6144_v23 = vld [vmem:[%s7403_s4 + $0xb0] sm:$0xff]  }
  0x4b   : > { %1239 = vst [vmem:[#allocation3 + $0xc0] sm:$0xf] %v5288_v47  ;;  %687 = vst [vmem:[#allocation3 + $0x414] sm:$0xf] %v5310_v54  ;;  %v6147_v20 = vld [vmem:[#allocation3 + $0x3ac] ss:$36 sps:$4 sm:$0xff]   ;;  %3747 = vmatprep.mubr.bf16.mxu0 %v6145_v17  ;;  %5682 = vmatpush3.bf16.msra.mxu1 %v6141_v3 }
  0x4c   : > { %666 = vst [vmem:[#allocation3 + $0x120] sm:$0xf] %v5289_v55  ;;  %667 = vst [vmem:[#allocation3 + $0x144] sm:$0xf] %v5290_v56  ;;  %3835 = vmatprep.mubr.bf16.mxu1 %v6147_v20  ;;  %5683 = vmatprep.subr.bf16.mxu1 %v6143_v9  ;;  %v6149_v25 = vld [vmem:[%s7403_s4 + $0xe8] sm:$0xff]   ;;  %v6153_v31 = vld [vmem:[%s7403_s4 + $0xe0] sm:$0xff]  }
  0x4d   : > { %860 = vst [vmem:[#allocation3 + $0x16c] sm:$0xf] %v5323_v57  ;;  %1240 = vst [vmem:[#allocation3 + $0xe4] sm:$0xf] %v5289_v55  ;;  %v6150_v26 = vld [vmem:[#allocation3 + $0x90] ss:$36 sps:$4 sm:$0xff]  }
  0x4e   : > { %1241 = vst [vmem:[#allocation3 + $0x108] sm:$0xf] %v5290_v56  ;;  %861 = vst [vmem:[#allocation3 + $0x190] sm:$0xf] %v5324_v61  ;;  %v6151_v27 = vld [vmem:[#allocation3 + $0x3a8] ss:$36 sps:$4 sm:$0xff]  }
  0x4f   : > { %476 = vst [vmem:[#allocation2 + $0x91] sm:$0xff] %v389_v0  ;;  %688 = vst [vmem:[#allocation3 + $0x438] sm:$0xf] %v5311_v4  ;;  %v508_v22 = vld [vmem:[#allocation2 + $0x78] sm:$0xff]  ;;  %v6157_v28 = vld [vmem:[#allocation3 + $0xdc] ss:$36 sps:$4 sm:$0xff]   ;;  %5684 = vmatpush3.bf16.msra.mxu1 %v6144_v23 }
  0x50   : > { %689 = vst [vmem:[#allocation3 + $0x45c] sm:$0xf] %v5312_v5  ;;  %1046 = vst [vmem:[#allocation3 + $0x98] sm:$0xf] %v5349_v7  ;;  %v5291_v24 = vpack.c.bf16 %v508_v22, %v508_v22  ;;  %v6152_v29 = vld [vmem:[%s7403_s4 + $0xa8] sm:$0xff]   ;;  %5685 = vmatprep.subr.bf16.mxu1 %v6149_v25  ;;  %v6155_v37 = vld [vmem:[%s7403_s4 + $0xa0] sm:$0xff]  }
  0x51   : > { %1620 = vst [vmem:[#allocation3 + $0x5c] sm:$0xf] %v5349_v7  ;;  %477 = vst [vmem:[#allocation2 + $0x99] sm:$0xff] %v390_v10  ;;  %v6159_v30 = vld [vmem:[#allocation3 + $0x3f4] ss:$36 sps:$4 sm:$0xff]   ;;  %v6161_v38 = vld [vmem:[%s7403_s4 + $0xd8] sm:$0xff]  }
  0x52   : > { %862 = vst [vmem:[#allocation3 + $0x1b4] sm:$0xf] %v5325_v11  ;;  %478 = vst [vmem:[#allocation2 + $0xa9] sm:$0xff] %v391_v12  ;;  %v509_v32 = vld [vmem:[#allocation2 + $0x80] sm:$0xff]  ;;  %3748 = vmatmul.mubr.bf16.gmra.mxu0 %v6150_v26  ;;  %3836 = vmatmul.mubr.bf16.gmra.mxu1 %v6151_v27  ;;  %v6162_v43 = vld [vmem:[#allocation3 + $0xd8] ss:$36 sps:$4 sm:$0xff]  }
  0x53   : > { %1047 = vst [vmem:[#allocation3 + $0xbc] sm:$0xf] %v5350_v13  ;;  %1621 = vst [vmem:[#allocation3 + $0x80] sm:$0xf] %v5350_v13  ;;  %v5292_v33 = vpack.c.bf16 %v509_v32, %v509_v32  ;;  %3755 = vmatprep.mubr.bf16.mxu0 %v6157_v28  ;;  %5686 = vmatpush3.bf16.msra.mxu1 %v6152_v29  ;;  %v6164_v44 = vld [vmem:[%s7403_s4 + $0x98] sm:$0xff]   ;;  %v6165_v47 = vld [vmem:[%s7403_s4 + $0xd0] sm:$0xff]  }
  0x54   : > { %479 = vst [vmem:[#allocation2 + $0xb1] sm:$0xff] %v392_v16  ;;  %863 = vst [vmem:[#allocation3 + $0x1d8] sm:$0xf] %v5326_v18  ;;  %3843 = vmatprep.mubr.bf16.mxu1 %v6159_v30  ;;  %5687 = vmatprep.subr.bf16.mxu1 %v6153_v31  ;;  %v6163_v46 = vld [vmem:[#allocation3 + $0x3f0] ss:$36 sps:$4 sm:$0xff]   ;;  %v6203_v51 = vld [vmem:[%s7403_s4 + $0x118] sm:$0xff]  }
  0x55   : > { %864 = vst [vmem:[#allocation3 + $0x1fc] sm:$0xf] %v5327_v19  ;;  %865 = vst [vmem:[#allocation3 + $0x220] sm:$0xf] %v5328_v21  ;;  %v6167_v48 = vld [vmem:[#allocation3 + $0x124] ss:$36 sps:$4 sm:$0xff]   ;;  %5802 = vmatpush3.bf16.msra.mxu0 %v6203_v51 }
  0x56   : > { %668 = vst [vmem:[#allocation3 + $0x168] sm:$0xf] %v5291_v24  ;;  %1242 = vst [vmem:[#allocation3 + $0x12c] sm:$0xf] %v5291_v24  ;;  %v510_v34 = vld [vmem:[#allocation2 + $0x90] sm:$0xff]  ;;  %v288_v53 = vld [vmem:[%s6522_s20 + $0x78] sm:$0xff] }
  0x57   : > { %v5293_v36 = vpack.c.bf16 %v510_v34, %v510_v34  ;;  %669 = vst [vmem:[#allocation3 + $0x18c] sm:$0xf] %v5292_v33  ;;  %1243 = vst [vmem:[#allocation3 + $0x150] sm:$0xf] %v5292_v33  ;;  %5688 = vmatpush3.bf16.msra.mxu1 %v6155_v37  ;;  %v6169_v50 = vld [vmem:[#allocation3 + $0x43c] ss:$36 sps:$4 sm:$0xff]   ;;  %v324_v59 = vmul.f32 %v6548_v49, %v288_v53 }
  0x58   : > { %v511_v35 = vld [vmem:[#allocation2 + $0x98] sm:$0xff]  ;;  %5689 = vmatprep.subr.bf16.mxu1 %v6161_v38  ;;  %v287_v52 = vld [vmem:[%s6522_s20 + $0x70] sm:$0xff]  ;;  %v6171_v58 = vld [vmem:[%s7403_s4 + $0xc8] sm:$0xff]  }
  0x59   : > { %v5294_v39 = vpack.c.bf16 %v511_v35, %v511_v35  ;;  %v512_v40 = vld [vmem:[#allocation2 + $0xa8] sm:$0xff]  ;;  %670 = vst [vmem:[#allocation3 + $0x1b0] sm:$0xf] %v5293_v36  ;;  %1244 = vst [vmem:[#allocation3 + $0x174] sm:$0xf] %v5293_v36  ;;  %v323_v54 = vmul.f32 %v6548_v49, %v287_v52  ;;  %v889_v56 = vld [vmem:[#allocation2 + $0x52] sm:$0xff]  ;;  %v362_v2 = vadd.f32 %v6562_v63, %v324_v59 }
  0x5a   : > { %v5295_v42 = vpack.c.bf16 %v512_v40, %v512_v40  ;;  %3756 = vmatmul.mubr.bf16.gmra.mxu0 %v6162_v43  ;;  %v888_v55 = vld [vmem:[#allocation2 + $0x4a] sm:$0xff]  ;;  %3844 = vmatmul.mubr.bf16.gmra.mxu1 %v6163_v46  ;;  %v5352_v61 = vpack.c.bf16 %v889_v56, %v889_v56  ;;  %v6177_v6 = vld [vmem:[%s7403_s4 + $0xc0] sm:$0xff]   ;;  %v6184_v22 = vld [vmem:[%s7403_s4 + $0x1f8] sm:$0xff]  }
  0x5b   : > { %v513_v41 = vld [vmem:[#allocation2 + $0xb0] sm:$0xff]  ;;  %671 = vst [vmem:[#allocation3 + $0x1d4] sm:$0xf] %v5294_v39  ;;  %1245 = vst [vmem:[#allocation3 + $0x198] sm:$0xf] %v5294_v39  ;;  %3763 = vmatprep.mubr.bf16.mxu0 %v6167_v48  ;;  %v5351_v60 = vpack.c.bf16 %v888_v55, %v888_v55  ;;  %5690 = vmatpush3.bf16.msra.mxu1 %v6164_v44  ;;  %v361_v62 = vadd.f32 %v6562_v63, %v323_v54  ;;  %v6175_v3 = vld [vmem:[%s7403_s4 + $0x88] sm:$0xff]  }
  0x5c   : > { %v5296_v45 = vpack.c.bf16 %v513_v41, %v513_v41  ;;  %672 = vst [vmem:[#allocation3 + $0x1f8] sm:$0xf] %v5295_v42  ;;  %1246 = vst [vmem:[#allocation3 + $0x1bc] sm:$0xf] %v5295_v42  ;;  %v6166_v57 = vld [vmem:[%s7403_s4 + $0x90] sm:$0xff]   ;;  %3851 = vmatprep.mubr.bf16.mxu1 %v6169_v50  ;;  %5691 = vmatprep.subr.bf16.mxu1 %v6165_v47  ;;  %v394_v9 = vmax.f32 %v362_v2, 0.0 }
  0x5d   : > { %v6173_v0 = vld [vmem:[#allocation3 + $0x120] ss:$36 sps:$4 sm:$0xff]   ;;  %v6174_v1 = vld [vmem:[#allocation3 + $0x438] ss:$36 sps:$4 sm:$0xff]   ;;  %1048 = vst [vmem:[#allocation3 + $0xe0] sm:$0xf] %v5351_v60 }
  0x5e   : > { %673 = vst [vmem:[#allocation3 + $0x21c] sm:$0xf] %v5296_v45  ;;  %1247 = vst [vmem:[#allocation3 + $0x1e0] sm:$0xf] %v5296_v45  ;;  %v393_v4 = vmax.f32 %v361_v62, 0.0  ;;  %v6211_v5 = vld [vmem:[%s7403_s4 + $0x150] sm:$0xff]   ;;  %v5330_v13 = vpack.c.bf16 %v394_v9, %v394_v9 }
  0x5f   : > { %1049 = vst [vmem:[#allocation3 + $0x104] sm:$0xf] %v5352_v61  ;;  %1622 = vst [vmem:[#allocation3 + $0xa4] sm:$0xf] %v5351_v60  ;;  %v6179_v7 = vld [vmem:[#allocation3 + $0x16c] ss:$36 sps:$4 sm:$0xff]   ;;  %5692 = vmatpush3.bf16.msra.mxu1 %v6166_v57  ;;  %5803 = vmatprep.subr.bf16.mxu0 %v6211_v5 }
  0x60   : > { %1623 = vst [vmem:[#allocation3 + $0xc8] sm:$0xf] %v5352_v61  ;;  %v6183_v8 = vld [vmem:[#allocation3 + $0xc] ss:$36 sps:$4 sm:$0xff]   ;;  %480 = vst [vmem:[#allocation2 + $0xc1] sm:$0xff] %v393_v4  ;;  %v5329_v10 = vpack.c.bf16 %v393_v4, %v393_v4  ;;  %v6212_v11 = vld [vmem:[%s7403_s4 + $0x110] sm:$0xff]   ;;  %5693 = vmatprep.subr.bf16.mxu1 %v6171_v58 }
  0x61   : > { %v289_v12 = vld [vmem:[%s6522_s20 + $0x80] sm:$0xff]  ;;  %481 = vst [vmem:[#allocation2 + $0xc9] sm:$0xff] %v394_v9  ;;  %v290_v14 = vld [vmem:[%s6522_s20 + $0x88] sm:$0xff]  ;;  %867 = vst [vmem:[#allocation3 + $0x268] sm:$0xf] %v5330_v13  ;;  %5804 = vmatpush3.bf16.msra.mxu0 %v6212_v11 }
  0x62   : > { %v325_v15 = vmul.f32 %v6548_v49, %v289_v12  ;;  %v890_v16 = vld [vmem:[#allocation2 + $0x62] sm:$0xff]  ;;  %v891_v17 = vld [vmem:[#allocation2 + $0x6a] sm:$0xff]  ;;  %3764 = vmatmul.mubr.bf16.gmra.mxu0 %v6173_v0  ;;  %866 = vst [vmem:[#allocation3 + $0x244] sm:$0xf] %v5329_v10  ;;  %v326_v19 = vmul.f32 %v6548_v49, %v290_v14  ;;  %3852 = vmatmul.mubr.bf16.gmra.mxu1 %v6174_v1  ;;  %v6185_v24 = vld [vmem:[#allocation3 + $0x168] ss:$36 sps:$4 sm:$0xff]  }
  0x63   : > { %v6178_v18 = vld [vmem:[%s7403_s4 + $0x80] sm:$0xff]   ;;  %v5353_v20 = vpack.c.bf16 %v890_v16, %v890_v16  ;;  %v5354_v21 = vpack.c.bf16 %v891_v17, %v891_v17  ;;  %3771 = vmatprep.mubr.bf16.mxu0 %v6179_v7  ;;  %5694 = vmatpush3.bf16.msra.mxu1 %v6175_v3  ;;  %v6181_v26 = vld [vmem:[#allocation3 + $0x8] ss:$36 sps:$4 sm:$0xff]   ;;  %v291_v29 = vld [vmem:[%s6522_s20 + $0x90] sm:$0xff] }
  0x64   : > { %v363_v23 = vadd.f32 %v6562_v63, %v325_v15  ;;  %3892 = vmatprep.mubr.bf16.mxu1 %v6183_v8  ;;  %v364_v25 = vadd.f32 %v6562_v63, %v326_v19  ;;  %5695 = vmatprep.subr.bf16.mxu1 %v6177_v6  ;;  %v6189_v27 = vld [vmem:[#allocation3 + $0x1b4] ss:$36 sps:$4 sm:$0xff]   ;;  %v292_v30 = vld [vmem:[%s6522_s20 + $0x98] sm:$0xff]  ;;  %v327_v34 = vmul.f32 %v6548_v49, %v291_v29  ;;  %v6200_v38 = vld [vmem:[%s7403_s4 + $0x1f0] sm:$0xff]  }
  0x65   : > { %1050 = vst [vmem:[#allocation3 + $0x128] sm:$0xf] %v5353_v20  ;;  %1051 = vst [vmem:[#allocation3 + $0x14c] sm:$0xf] %v5354_v21  ;;  %v6186_v31 = vld [vmem:[%s7403_s4 + $0x1b8] sm:$0xff]   ;;  %v328_v35 = vmul.f32 %v6548_v49, %v292_v30  ;;  %v893_v37 = vld [vmem:[#allocation2 + $0x82] sm:$0xff] }
  0x66   : > { %1624 = vst [vmem:[#allocation3 + $0xec] sm:$0xf] %v5353_v20  ;;  %1625 = vst [vmem:[#allocation3 + $0x110] sm:$0xf] %v5354_v21  ;;  %v395_v28 = vmax.f32 %v363_v23, 0.0  ;;  %v396_v33 = vmax.f32 %v364_v25, 0.0  ;;  %v5356_v42 = vpack.c.bf16 %v893_v37, %v893_v37  ;;  %v365_v47 = vadd.f32 %v6562_v63, %v327_v34 }
  0x67   : > { %v6191_v32 = vld [vmem:[#allocation3 + $0x54] ss:$36 sps:$4 sm:$0xff]   ;;  %v892_v36 = vld [vmem:[#allocation2 + $0x7a] sm:$0xff]  ;;  %5696 = vmatpush3.bf16.msra.mxu1 %v6178_v18  ;;  %v366_v48 = vadd.f32 %v6562_v63, %v328_v35  ;;  %v894_v58 = vld [vmem:[#allocation2 + $0x92] sm:$0xff] }
  0x68   : > { %v514_v39 = vld [vmem:[#allocation2 + $0xc0] sm:$0xff]  ;;  %482 = vst [vmem:[#allocation2 + $0xd9] sm:$0xff] %v395_v28  ;;  %v5331_v40 = vpack.c.bf16 %v395_v28, %v395_v28  ;;  %v5355_v41 = vpack.c.bf16 %v892_v36, %v892_v36  ;;  %v6225_v43 = vld [vmem:[%s7403_s4 + $0x148] sm:$0xff]   ;;  %483 = vst [vmem:[#allocation2 + $0xe1] sm:$0xff] %v396_v33  ;;  %v5332_v46 = vpack.c.bf16 %v396_v33, %v396_v33  ;;  %5905 = vmatprep.subr.bf16.mxu1 %v6184_v22 }
  0x69   : > { %v515_v44 = vld [vmem:[#allocation2 + $0xc8] sm:$0xff]  ;;  %v5297_v45 = vpack.c.bf16 %v514_v39, %v514_v39  ;;  %1053 = vst [vmem:[#allocation3 + $0x194] sm:$0xf] %v5356_v42  ;;  %5805 = vmatprep.subr.bf16.mxu0 %v6225_v43  ;;  %v293_v52 = vld [vmem:[%s6522_s20 + $0xa0] sm:$0xff]  ;;  %1627 = vst [vmem:[#allocation3 + $0x158] sm:$0xf] %v5356_v42  ;;  %v5357_v60 = vpack.c.bf16 %v894_v58, %v894_v58 }
  0x6a   : > { %v5298_v50 = vpack.c.bf16 %v515_v44, %v515_v44  ;;  %868 = vst [vmem:[#allocation3 + $0x28c] sm:$0xf] %v5331_v40  ;;  %1052 = vst [vmem:[#allocation3 + $0x170] sm:$0xf] %v5355_v41  ;;  %v6228_v51 = vld [vmem:[%s7403_s4 + $0x108] sm:$0xff]   ;;  %3772 = vmatmul.mubr.bf16.gmra.mxu0 %v6185_v24  ;;  %v397_v54 = vmax.f32 %v365_v47, 0.0  ;;  %v329_v56 = vmul.f32 %v6548_v49, %v293_v52  ;;  %3893 = vmatmul.mubr.bf16.vlgmr.msra.gmra.mxu1 %v6181_v26 }
  0x6b   : > { %v294_v53 = vld [vmem:[%s6522_s20 + $0xa8] sm:$0xff]  ;;  %1626 = vst [vmem:[#allocation3 + $0x134] sm:$0xf] %v5355_v41  ;;  %674 = vst [vmem:[#allocation3 + $0x240] sm:$0xf] %v5297_v45  ;;  %v398_v55 = vmax.f32 %v366_v48, 0.0  ;;  %3779 = vmatprep.mubr.bf16.mxu0 %v6189_v27  ;;  %5906 = vmatpush3.bf16.msra.mxu1 %v6186_v31 }
  0x6c   : > { %869 = vst [vmem:[#allocation3 + $0x2b0] sm:$0xf] %v5332_v46  ;;  %v330_v57 = vmul.f32 %v6548_v49, %v294_v53  ;;  %v895_v59 = vld [vmem:[#allocation2 + $0x9a] sm:$0xff]  ;;  %1248 = vst [vmem:[#allocation3 + $0x204] sm:$0xf] %v5297_v45  ;;  %3900 = vmatprep.mubr.bf16.mxu1 %v6191_v32  ;;  %v6204_v0 = vld [vmem:[%s7403_s4 + $0x1b0] sm:$0xff]   ;;  %v5333_v1 = vpack.c.bf16 %v397_v54, %v397_v54  ;;  %v367_v3 = vadd.f32 %v6562_v63, %v329_v56 }
  0x6d   : > { %675 = vst [vmem:[#allocation3 + $0x264] sm:$0xf] %v5298_v50  ;;  %v5358_v61 = vpack.c.bf16 %v895_v59, %v895_v59  ;;  %1249 = vst [vmem:[#allocation3 + $0x228] sm:$0xf] %v5298_v50  ;;  %v6193_v62 = vld [vmem:[#allocation3 + $0x1b0] ss:$36 sps:$4 sm:$0xff]   ;;  %v5334_v2 = vpack.c.bf16 %v398_v55, %v398_v55  ;;  %5907 = vmatprep.subr.bf16.mxu1 %v6200_v38  ;;  %5806 = vmatpush3.bf16.msra.mxu0 %v6228_v51 }
  0x6e   : > { %484 = vst [vmem:[#allocation2 + $0xf1] sm:$0xff] %v397_v54  ;;  %485 = vst [vmem:[#allocation2 + $0xf9] sm:$0xff] %v398_v55  ;;  %v6194_v4 = vld [vmem:[#allocation3 + $0x50] ss:$36 sps:$4 sm:$0xff]   ;;  %v6195_v5 = vld [vmem:[#allocation3 + $0x1fc] ss:$36 sps:$4 sm:$0xff]   ;;  %v368_v7 = vadd.f32 %v6562_v63, %v330_v57 }
  0x6f   : > { %v6217_v6 = vld [vmem:[%s7403_s4 + $0x1e8] sm:$0xff]   ;;  %1054 = vst [vmem:[#allocation3 + $0x1b8] sm:$0xf] %v5357_v60  ;;  %1055 = vst [vmem:[#allocation3 + $0x1dc] sm:$0xf] %v5358_v61  ;;  %v516_v9 = vld [vmem:[#allocation2 + $0xd8] sm:$0xff]  ;;  %5908 = vmatpush3.bf16.msra.mxu1 %v6204_v0 }
  0x70   : > { %1628 = vst [vmem:[#allocation3 + $0x17c] sm:$0xf] %v5357_v60  ;;  %1629 = vst [vmem:[#allocation3 + $0x1a0] sm:$0xf] %v5358_v61  ;;  %v6197_v8 = vld [vmem:[#allocation3 + $0x9c] ss:$36 sps:$4 sm:$0xff]   ;;  %v5299_v12 = vpack.c.bf16 %v516_v9, %v516_v9  ;;  %5909 = vmatprep.subr.bf16.mxu1 %v6217_v6 }
  0x71   : > { %870 = vst [vmem:[#allocation3 + $0x2d4] sm:$0xf] %v5333_v1  ;;  %871 = vst [vmem:[#allocation3 + $0x2f8] sm:$0xf] %v5334_v2  ;;  %v399_v10 = vmax.f32 %v367_v3, 0.0  ;;  %v517_v11 = vld [vmem:[#allocation2 + $0xe0] sm:$0xff] }
  0x72   : > { %1444 = vst [vmem:[#allocation3 + $0x298] sm:$0xf] %v5333_v1  ;;  %1445 = vst [vmem:[#allocation3 + $0x2bc] sm:$0xf] %v5334_v2  ;;  %v400_v13 = vmax.f32 %v368_v7, 0.0  ;;  %v6237_v14 = vld [vmem:[%s7403_s4 + $0x140] sm:$0xff]   ;;  %v5300_v15 = vpack.c.bf16 %v517_v11, %v517_v11  ;;  %3780 = vmatmul.mubr.bf16.gmra.mxu0 %v6193_v62  ;;  %3901 = vmatmul.mubr.bf16.gmra.mxu1 %v6194_v4 }
  0x73   : > { %v6220_v16 = vld [vmem:[%s7403_s4 + $0x1a8] sm:$0xff]   ;;  %486 = vst [vmem:[#allocation2 + $0x109] sm:$0xff] %v399_v10  ;;  %v5335_v17 = vpack.c.bf16 %v399_v10, %v399_v10  ;;  %676 = vst [vmem:[#allocation3 + $0x288] sm:$0xf] %v5299_v12  ;;  %v6233_v19 = vld [vmem:[%s7403_s4 + $0x1e0] sm:$0xff]   ;;  %5807 = vmatprep.subr.bf16.mxu0 %v6237_v14  ;;  %3787 = vmatprep.mubr.bf16.mxu0 %v6195_v5 }
  0x74   : > { %487 = vst [vmem:[#allocation2 + $0x111] sm:$0xff] %v400_v13  ;;  %v5336_v18 = vpack.c.bf16 %v400_v13, %v400_v13  ;;  %1250 = vst [vmem:[#allocation3 + $0x24c] sm:$0xf] %v5299_v12  ;;  %v6238_v22 = vld [vmem:[%s7403_s4 + $0x100] sm:$0xff]   ;;  %3908 = vmatprep.mubr.bf16.mxu1 %v6197_v8  ;;  %v6201_v23 = vld [vmem:[#allocation3 + $0x1f8] ss:$36 sps:$4 sm:$0xff]   ;;  %5910 = vmatpush3.bf16.msra.mxu1 %v6220_v16 }
  0x75   : > { %677 = vst [vmem:[#allocation3 + $0x2ac] sm:$0xf] %v5300_v15  ;;  %872 = vst [vmem:[#allocation3 + $0x31c] sm:$0xf] %v5335_v17  ;;  %v518_v20 = vld [vmem:[#allocation2 + $0xf0] sm:$0xff]  ;;  %v519_v21 = vld [vmem:[#allocation2 + $0xf8] sm:$0xff]  ;;  %5911 = vmatprep.subr.bf16.mxu1 %v6233_v19  ;;  %5808 = vmatpush3.bf16.msra.mxu0 %v6238_v22 }
  0x76   : > { %1251 = vst [vmem:[#allocation3 + $0x270] sm:$0xf] %v5300_v15  ;;  %1446 = vst [vmem:[#allocation3 + $0x2e0] sm:$0xf] %v5335_v17  ;;  %v5301_v24 = vpack.c.bf16 %v518_v20, %v518_v20  ;;  %v5302_v25 = vpack.c.bf16 %v519_v21, %v519_v21  ;;  %v6236_v26 = vld [vmem:[%s7403_s4 + $0x1a0] sm:$0xff]   ;;  %v896_v29 = vld [vmem:[#allocation2 + $0xaa] sm:$0xff] }
  0x77   : > { %873 = vst [vmem:[#allocation3 + $0x340] sm:$0xf] %v5336_v18  ;;  %1447 = vst [vmem:[#allocation3 + $0x304] sm:$0xf] %v5336_v18  ;;  %v6202_v27 = vld [vmem:[#allocation3 + $0x98] ss:$36 sps:$4 sm:$0xff]   ;;  %v5359_v32 = vpack.c.bf16 %v896_v29, %v896_v29 }
  0x78   : > { %v6205_v28 = vld [vmem:[#allocation3 + $0x244] ss:$36 sps:$4 sm:$0xff]   ;;  %678 = vst [vmem:[#allocation3 + $0x2d0] sm:$0xf] %v5301_v24  ;;  %679 = vst [vmem:[#allocation3 + $0x2f4] sm:$0xf] %v5302_v25  ;;  %5912 = vmatpush3.bf16.msra.mxu1 %v6236_v26 }
  0x79   : > { %v897_v30 = vld [vmem:[#allocation2 + $0xb2] sm:$0xff]  ;;  %v1267_v35 = vld [vmem:[#allocation2 + $0x21] sm:$0xff]  ;;  %1252 = vst [vmem:[#allocation3 + $0x294] sm:$0xf] %v5301_v24  ;;  %1253 = vst [vmem:[#allocation3 + $0x2b8] sm:$0xf] %v5302_v25 }
  0x7a   : > { %v6207_v31 = vld [vmem:[#allocation3 + $0xe4] ss:$36 sps:$4 sm:$0xff]   ;;  %v5360_v33 = vpack.c.bf16 %v897_v30, %v897_v30  ;;  %v898_v36 = vld [vmem:[#allocation2 + $0xc2] sm:$0xff]  ;;  %v5410_v39 = vpack.c.bf16 %v1267_v35, %v1267_v35  ;;  %v899_v40 = vld [vmem:[#allocation2 + $0xca] sm:$0xff]  ;;  %1056 = vst [vmem:[#allocation3 + $0x200] sm:$0xf] %v5359_v32  ;;  %3788 = vmatmul.mubr.bf16.gmra.mxu0 %v6201_v23  ;;  %3909 = vmatmul.mubr.bf16.gmra.mxu1 %v6202_v27 }
  0x7b   : > { %v1266_v34 = vld [vmem:[#allocation2 + $0x19] sm:$0xff]  ;;  %v520_v37 = vld [vmem:[#allocation2 + $0x108] sm:$0xff]  ;;  %v5361_v41 = vpack.c.bf16 %v898_v36, %v898_v36  ;;  %v1268_v42 = vld [vmem:[#allocation2 + $0x31] sm:$0xff]  ;;  %v5362_v45 = vpack.c.bf16 %v899_v40, %v899_v40  ;;  %1630 = vst [vmem:[#allocation3 + $0x1c4] sm:$0xf] %v5359_v32  ;;  %3795 = vmatprep.mubr.bf16.mxu0 %v6205_v28  ;;  %3916 = vmatprep.mubr.bf16.mxu1 %v6207_v31 }
  0x7c   : > { %v5409_v38 = vpack.c.bf16 %v1266_v34, %v1266_v34  ;;  %v521_v43 = vld [vmem:[#allocation2 + $0x110] sm:$0xff]  ;;  %v5303_v44 = vpack.c.bf16 %v520_v37, %v520_v37  ;;  %1057 = vst [vmem:[#allocation3 + $0x224] sm:$0xf] %v5360_v33  ;;  %v1269_v46 = vld [vmem:[#allocation2 + $0x39] sm:$0xff]  ;;  %v5411_v47 = vpack.c.bf16 %v1268_v42, %v1268_v42  ;;  %1631 = vst [vmem:[#allocation3 + $0x1e8] sm:$0xf] %v5360_v33 }
  0x7d   : > { %v5304_v48 = vpack.c.bf16 %v521_v43, %v521_v43  ;;  %1427 = vst [vmem:[#allocation3 + $0x34] sm:$0xf] %v5410_v39  ;;  %1058 = vst [vmem:[#allocation3 + $0x248] sm:$0xf] %v5361_v41  ;;  %v5412_v50 = vpack.c.bf16 %v1269_v46, %v1269_v46  ;;  %v6249_v51 = vld [vmem:[%s7403_s4 + $0x1d8] sm:$0xff]   ;;  %v901_v57 = vld [vmem:[#allocation2 + $0xe2] sm:$0xff] }
  0x7e   : > { %1426 = vst [vmem:[#allocation3 + $0x10] sm:$0xf] %v5409_v38  ;;  %1632 = vst [vmem:[#allocation3 + $0x20c] sm:$0xf] %v5361_v41  ;;  %v6752_v52 = vld [vmem:[%s7403_s4 + $0x238] sm:$0xff]   ;;  %5913 = vmatprep.subr.bf16.mxu1 %v6249_v51  ;;  %v5364_v60 = vpack.c.bf16 %v901_v57, %v901_v57  ;;  %v1270_v2 = vld [vmem:[#allocation2 + $0x49] sm:$0xff] }
  0x7f   : > { %680 = vst [vmem:[#allocation3 + $0x318] sm:$0xf] %v5303_v44  ;;  %1059 = vst [vmem:[#allocation3 + $0x26c] sm:$0xf] %v5362_v45  ;;  %v6253_v53 = vld [vmem:[%s7403_s4 + $0x198] sm:$0xff]   ;;  %6041 = vmatprep.subr.bf16.mxu0 %v6752_v52  ;;  %v5413_v4 = vpack.c.bf16 %v1270_v2, %v1270_v2  ;;  %v1272_v10 = vld [vmem:[#allocation2 + $0x61] sm:$0xff] }
  0x80   : > { %1428 = vst [vmem:[#allocation3 + $0x58] sm:$0xf] %v5411_v47  ;;  %1254 = vst [vmem:[#allocation3 + $0x2dc] sm:$0xf] %v5303_v44  ;;  %v6210_v54 = vld [vmem:[#allocation3 + $0xe0] ss:$36 sps:$4 sm:$0xff]   ;;  %5914 = vmatpush3.bf16.msra.mxu1 %v6253_v53  ;;  %v5415_v13 = vpack.c.bf16 %v1272_v10, %v1272_v10 }
  0x81   : > { %1633 = vst [vmem:[#allocation3 + $0x230] sm:$0xf] %v5362_v45  ;;  %2003 = vst [vmem:[#allocation3 + $0x1c] sm:$0xf] %v5411_v47  ;;  %v6209_v55 = vld [vmem:[#allocation3 + $0x240] ss:$36 sps:$4 sm:$0xff]  }
  0x82   : > { %681 = vst [vmem:[#allocation3 + $0x33c] sm:$0xf] %v5304_v48  ;;  %1429 = vst [vmem:[#allocation3 + $0x7c] sm:$0xf] %v5412_v50  ;;  %v900_v56 = vld [vmem:[#allocation2 + $0xda] sm:$0xff]  ;;  %3796 = vmatmul.mubr.bf16.gmra.mxu0 %v6209_v55  ;;  %3917 = vmatmul.mubr.bf16.gmra.mxu1 %v6210_v54  ;;  %v1271_v3 = vld [vmem:[#allocation2 + $0x51] sm:$0xff] }
  0x83   : > { %1255 = vst [vmem:[#allocation3 + $0x300] sm:$0xf] %v5304_v48  ;;  %2004 = vst [vmem:[#allocation3 + $0x40] sm:$0xf] %v5412_v50  ;;  %v6213_v58 = vld [vmem:[#allocation3 + $0x28c] ss:$36 sps:$4 sm:$0xff]   ;;  %v5363_v59 = vpack.c.bf16 %v900_v56, %v900_v56  ;;  %v5414_v7 = vpack.c.bf16 %v1271_v3, %v1271_v3 }
  0x84   : > { %v6215_v61 = vld [vmem:[#allocation3 + $0x12c] ss:$36 sps:$4 sm:$0xff]   ;;  %1061 = vst [vmem:[#allocation3 + $0x2b4] sm:$0xf] %v5364_v60  ;;  %1635 = vst [vmem:[#allocation3 + $0x278] sm:$0xf] %v5364_v60  ;;  %3803 = vmatprep.mubr.bf16.mxu0 %v6213_v58 }
  0x85   : > { %1060 = vst [vmem:[#allocation3 + $0x290] sm:$0xf] %v5363_v59  ;;  %1634 = vst [vmem:[#allocation3 + $0x254] sm:$0xf] %v5363_v59  ;;  %3924 = vmatprep.mubr.bf16.mxu1 %v6215_v61  ;;  %v6218_v62 = vld [vmem:[#allocation3 + $0x288] ss:$36 sps:$4 sm:$0xff]  }
  0x86   : > { %v6219_v0 = vld [vmem:[#allocation3 + $0x128] ss:$36 sps:$4 sm:$0xff]   ;;  %v6221_v1 = vld [vmem:[#allocation3 + $0x2d4] ss:$36 sps:$4 sm:$0xff]   ;;  %1430 = vst [vmem:[#allocation3 + $0xa0] sm:$0xf] %v5413_v4 }
  0x87   : > { %v902_v5 = vld [vmem:[#allocation2 + $0xf2] sm:$0xff]  ;;  %v903_v6 = vld [vmem:[#allocation2 + $0xfa] sm:$0xff]  ;;  %v1273_v11 = vld [vmem:[#allocation2 + $0x69] sm:$0xff]  ;;  %2005 = vst [vmem:[#allocation3 + $0x64] sm:$0xf] %v5413_v4 }
  0x88   : > { %v5365_v8 = vpack.c.bf16 %v902_v5, %v902_v5  ;;  %v5366_v9 = vpack.c.bf16 %v903_v6, %v903_v6  ;;  %v6223_v12 = vld [vmem:[#allocation3 + $0x174] ss:$36 sps:$4 sm:$0xff]   ;;  %v5416_v14 = vpack.c.bf16 %v1273_v11, %v1273_v11  ;;  %1431 = vst [vmem:[#allocation3 + $0xc4] sm:$0xf] %v5414_v7  ;;  %v6264_v15 = vld [vmem:[%s7403_s4 + $0x1d0] sm:$0xff]   ;;  %v1274_v27 = vld [vmem:[#allocation2 + $0x79] sm:$0xff] }
  0x89   : > { %2006 = vst [vmem:[#allocation3 + $0x88] sm:$0xf] %v5414_v7  ;;  %1432 = vst [vmem:[#allocation3 + $0xe8] sm:$0xf] %v5415_v13  ;;  %v6268_v16 = vld [vmem:[%s7403_s4 + $0x190] sm:$0xff]   ;;  %5915 = vmatprep.subr.bf16.mxu1 %v6264_v15  ;;  %v1096_v20 = vld [vmem:[#allocation2 + $0x120] sm:$0xff]  ;;  %v5417_v30 = vpack.c.bf16 %v1274_v27, %v1274_v27 }
  0x8a   : > { %1062 = vst [vmem:[#allocation3 + $0x2d8] sm:$0xf] %v5365_v8  ;;  %1063 = vst [vmem:[#allocation3 + $0x2fc] sm:$0xf] %v5366_v9  ;;  %3804 = vmatmul.mubr.bf16.gmra.mxu0 %v6218_v62  ;;  %3925 = vmatmul.mubr.bf16.gmra.mxu1 %v6219_v0  ;;  %v6226_v17 = vld [vmem:[#allocation3 + $0x2d0] ss:$36 sps:$4 sm:$0xff]   ;;  %v5399_v26 = vpack.c.bf16 %v1096_v20, %v1096_v20 }
  0x8b   : > { %1636 = vst [vmem:[#allocation3 + $0x29c] sm:$0xf] %v5365_v8  ;;  %1637 = vst [vmem:[#allocation3 + $0x2c0] sm:$0xf] %v5366_v9  ;;  %3811 = vmatprep.mubr.bf16.mxu0 %v6221_v1  ;;  %3932 = vmatprep.mubr.bf16.mxu1 %v6223_v12  ;;  %v904_v18 = vld [vmem:[#allocation2 + $0x10a] sm:$0xff]  ;;  %v905_v19 = vld [vmem:[#allocation2 + $0x112] sm:$0xff] }
  0x8c   : > { %1433 = vst [vmem:[#allocation3 + $0x10c] sm:$0xf] %v5416_v14  ;;  %2007 = vst [vmem:[#allocation3 + $0xac] sm:$0xf] %v5415_v13  ;;  %v6227_v21 = vld [vmem:[#allocation3 + $0x170] ss:$36 sps:$4 sm:$0xff]   ;;  %5916 = vmatpush3.bf16.msra.mxu1 %v6268_v16  ;;  %v5367_v23 = vpack.c.bf16 %v904_v18, %v904_v18  ;;  %v5368_v24 = vpack.c.bf16 %v905_v19, %v905_v19 }
  0x8d   : > { %2008 = vst [vmem:[#allocation3 + $0xd0] sm:$0xf] %v5416_v14  ;;  %v6229_v22 = vld [vmem:[#allocation3 + $0x31c] ss:$36 sps:$4 sm:$0xff]   ;;  %v1275_v28 = vld [vmem:[#allocation2 + $0x81] sm:$0xff]  ;;  %v1098_v34 = vld [vmem:[#allocation2 + $0x138] sm:$0xff] }
  0x8e   : > { %v1097_v25 = vld [vmem:[#allocation2 + $0x128] sm:$0xff]  ;;  %v5418_v31 = vpack.c.bf16 %v1275_v28, %v1275_v28  ;;  %1064 = vst [vmem:[#allocation3 + $0x320] sm:$0xf] %v5367_v23  ;;  %1065 = vst [vmem:[#allocation3 + $0x344] sm:$0xf] %v5368_v24  ;;  %v1099_v37 = vld [vmem:[#allocation2 + $0x140] sm:$0xff]  ;;  %v5401_v38 = vpack.c.bf16 %v1098_v34, %v1098_v34 }
  0x8f   : > { %v5400_v29 = vpack.c.bf16 %v1097_v25, %v1097_v25  ;;  %v906_v32 = vld [vmem:[#allocation2 + $0x122] sm:$0xff]  ;;  %v907_v33 = vld [vmem:[#allocation2 + $0x12a] sm:$0xff]  ;;  %1256 = vst [vmem:[#allocation3 + $0x324] sm:$0xf] %v5399_v26  ;;  %1638 = vst [vmem:[#allocation3 + $0x2e4] sm:$0xf] %v5367_v23  ;;  %v5402_v41 = vpack.c.bf16 %v1099_v37, %v1099_v37 }
  0x90   : > { %v5369_v35 = vpack.c.bf16 %v906_v32, %v906_v32  ;;  %v5370_v36 = vpack.c.bf16 %v907_v33, %v907_v33  ;;  %v1276_v39 = vld [vmem:[#allocation2 + $0x91] sm:$0xff]  ;;  %1639 = vst [vmem:[#allocation3 + $0x308] sm:$0xf] %v5368_v24  ;;  %1434 = vst [vmem:[#allocation3 + $0x130] sm:$0xf] %v5417_v30  ;;  %v1277_v43 = vld [vmem:[#allocation2 + $0x99] sm:$0xff] }
  0x91   : > { %v6231_v40 = vld [vmem:[#allocation3 + $0x1bc] ss:$36 sps:$4 sm:$0xff]   ;;  %1257 = vst [vmem:[#allocation3 + $0x348] sm:$0xf] %v5400_v29  ;;  %1435 = vst [vmem:[#allocation3 + $0x154] sm:$0xf] %v5418_v31  ;;  %v5419_v42 = vpack.c.bf16 %v1276_v39, %v1276_v39  ;;  %v5420_v44 = vpack.c.bf16 %v1277_v43, %v1277_v43 }
  0x92   : > { %2009 = vst [vmem:[#allocation3 + $0xf4] sm:$0xf] %v5417_v30  ;;  %2010 = vst [vmem:[#allocation3 + $0x118] sm:$0xf] %v5418_v31  ;;  %3812 = vmatmul.mubr.bf16.gmra.mxu0 %v6226_v17  ;;  %3933 = vmatmul.mubr.bf16.gmra.mxu1 %v6227_v21  ;;  %v6279_v45 = vld [vmem:[%s7403_s4 + $0x1c8] sm:$0xff]   ;;  %v908_v53 = vld [vmem:[#allocation2 + $0x13a] sm:$0xff] }
  0x93   : > { %1066 = vst [vmem:[#allocation3 + $0x368] sm:$0xf] %v5369_v35  ;;  %1067 = vst [vmem:[#allocation3 + $0x38c] sm:$0xf] %v5370_v36  ;;  %3819 = vmatprep.mubr.bf16.mxu0 %v6229_v22  ;;  %3940 = vmatprep.mubr.bf16.mxu1 %v6231_v40  ;;  %v6234_v46 = vld [vmem:[#allocation3 + $0x318] ss:$36 sps:$4 sm:$0xff]   ;;  %v5371_v56 = vpack.c.bf16 %v908_v53, %v908_v53 }
  0x94   : > { %1258 = vst [vmem:[#allocation3 + $0x36c] sm:$0xf] %v5401_v38  ;;  %1640 = vst [vmem:[#allocation3 + $0x32c] sm:$0xf] %v5369_v35  ;;  %v6235_v47 = vld [vmem:[#allocation3 + $0x1b8] ss:$36 sps:$4 sm:$0xff]   ;;  %5917 = vmatprep.subr.bf16.mxu1 %v6279_v45 }
  0x95   : > { %1641 = vst [vmem:[#allocation3 + $0x350] sm:$0xf] %v5370_v36  ;;  %1259 = vst [vmem:[#allocation3 + $0x390] sm:$0xf] %v5402_v41  ;;  %v6243_v48 = vld [vmem:[#allocation3 + $0x14] ss:$36 sps:$4 sm:$0xff]  }
  0x96   : > { %1436 = vst [vmem:[#allocation3 + $0x178] sm:$0xf] %v5419_v42  ;;  %2011 = vst [vmem:[#allocation3 + $0x13c] sm:$0xf] %v5419_v42  ;;  %v6239_v50 = vld [vmem:[#allocation3 + $0x204] ss:$36 sps:$4 sm:$0xff]  }
  0x97   : > { %1437 = vst [vmem:[#allocation3 + $0x19c] sm:$0xf] %v5420_v44  ;;  %2012 = vst [vmem:[#allocation3 + $0x160] sm:$0xf] %v5420_v44  ;;  %v6283_v51 = vld [vmem:[%s7403_s4 + $0x188] sm:$0xff]   ;;  %v1100_v58 = vld [vmem:[#allocation2 + $0x150] sm:$0xff] }
  0x98   : > { %v909_v54 = vld [vmem:[#allocation2 + $0x142] sm:$0xff]  ;;  %v1101_v59 = vld [vmem:[#allocation2 + $0x158] sm:$0xff]  ;;  %v6244_v61 = vld [vmem:[#allocation3 + $0x200] ss:$36 sps:$4 sm:$0xff]   ;;  %5918 = vmatpush3.bf16.msra.mxu1 %v6283_v51  ;;  %v5403_v0 = vpack.c.bf16 %v1100_v58, %v1100_v58  ;;  %1068 = vst [vmem:[#allocation3 + $0x3b0] sm:$0xf] %v5371_v56 }
  0x99   : > { %v6241_v55 = vld [vmem:[#allocation3 + $0x10] ss:$36 sps:$4 sm:$0xff]   ;;  %v5372_v57 = vpack.c.bf16 %v909_v54, %v909_v54  ;;  %v1278_v60 = vld [vmem:[#allocation2 + $0xa9] sm:$0xff]  ;;  %v5404_v1 = vpack.c.bf16 %v1101_v59, %v1101_v59  ;;  %v1279_v4 = vld [vmem:[#allocation2 + $0xb1] sm:$0xff]  ;;  %1642 = vst [vmem:[#allocation3 + $0x374] sm:$0xf] %v5371_v56 }
  0x9a   : > { %3820 = vmatmul.mubr.bf16.gmra.mxu0 %v6234_v46  ;;  %3941 = vmatmul.mubr.bf16.gmra.mxu1 %v6235_v47  ;;  %v6247_v62 = vld [vmem:[#allocation3 + $0x5c] ss:$36 sps:$4 sm:$0xff]   ;;  %v5421_v2 = vpack.c.bf16 %v1278_v60, %v1278_v60  ;;  %v6245_v3 = vld [vmem:[#allocation3 + $0x24c] ss:$36 sps:$4 sm:$0xff]   ;;  %1260 = vst [vmem:[#allocation3 + $0x3b4] sm:$0xf] %v5403_v0  ;;  %v5422_v8 = vpack.c.bf16 %v1279_v4, %v1279_v4 }
  0x9b   : > { %4053 = vmatprep.mubr.bf16.mxu0 %v6243_v48  ;;  %3948 = vmatprep.mubr.bf16.mxu1 %v6239_v50  ;;  %1069 = vst [vmem:[#allocation3 + $0x3d4] sm:$0xf] %v5372_v57  ;;  %v910_v5 = vld [vmem:[#allocation2 + $0x152] sm:$0xff]  ;;  %v911_v6 = vld [vmem:[#allocation2 + $0x15a] sm:$0xff]  ;;  %1643 = vst [vmem:[#allocation3 + $0x398] sm:$0xf] %v5372_v57 }
  0x9c   : > { %v6265_v7 = vld [vmem:[%s7403_s4 + $0x230] sm:$0xff]   ;;  %1261 = vst [vmem:[#allocation3 + $0x3d8] sm:$0xf] %v5404_v1  ;;  %1438 = vst [vmem:[#allocation3 + $0x1c0] sm:$0xf] %v5421_v2  ;;  %v5373_v9 = vpack.c.bf16 %v910_v5, %v910_v5  ;;  %v5374_v10 = vpack.c.bf16 %v911_v6, %v911_v6  ;;  %v1102_v11 = vld [vmem:[#allocation2 + $0x168] sm:$0xff] }
  0x9d   : > { %v1103_v12 = vld [vmem:[#allocation2 + $0x170] sm:$0xff]  ;;  %v1280_v13 = vld [vmem:[#allocation2 + $0xc1] sm:$0xff]  ;;  %2013 = vst [vmem:[#allocation3 + $0x184] sm:$0xf] %v5421_v2  ;;  %v5405_v14 = vpack.c.bf16 %v1102_v11, %v1102_v11  ;;  %1439 = vst [vmem:[#allocation3 + $0x1e4] sm:$0xf] %v5422_v8 }
  0x9e   : > { %v5406_v15 = vpack.c.bf16 %v1103_v12, %v1103_v12  ;;  %v1281_v16 = vld [vmem:[#allocation2 + $0xc9] sm:$0xff]  ;;  %v5423_v17 = vpack.c.bf16 %v1280_v13, %v1280_v13  ;;  %1070 = vst [vmem:[#allocation3 + $0x3f8] sm:$0xf] %v5373_v9  ;;  %1071 = vst [vmem:[#allocation3 + $0x41c] sm:$0xf] %v5374_v10  ;;  %v6294_v19 = vld [vmem:[%s7403_s4 + $0x1c0] sm:$0xff]  }
  0x9f   : > { %v5424_v18 = vpack.c.bf16 %v1281_v16, %v1281_v16  ;;  %1644 = vst [vmem:[#allocation3 + $0x3bc] sm:$0xf] %v5373_v9  ;;  %1645 = vst [vmem:[#allocation3 + $0x3e0] sm:$0xf] %v5374_v10  ;;  %v6280_v20 = vld [vmem:[%s7403_s4 + $0x228] sm:$0xff]   ;;  %v6298_v21 = vld [vmem:[%s7403_s4 + $0x180] sm:$0xff]   ;;  %5919 = vmatprep.subr.bf16.mxu1 %v6294_v19 }
  0xa0   : > { %2014 = vst [vmem:[#allocation3 + $0x1a8] sm:$0xf] %v5422_v8  ;;  %1262 = vst [vmem:[#allocation3 + $0x3fc] sm:$0xf] %v5405_v14  ;;  %v303_v22 = vld [vmem:[%s6522_s20 + $0xf0] sm:$0xff]  ;;  %v304_v23 = vld [vmem:[%s6522_s20 + $0xf8] sm:$0xff]  ;;  %5920 = vmatpush3.bf16.msra.mxu1 %v6298_v21 }
  0xa1   : > { %1263 = vst [vmem:[#allocation3 + $0x420] sm:$0xf] %v5406_v15  ;;  %1440 = vst [vmem:[#allocation3 + $0x208] sm:$0xf] %v5423_v17  ;;  %v339_v24 = vmul.f32 %v6548_v49, %v303_v22  ;;  %v340_v25 = vmul.f32 %v6548_v49, %v304_v23  ;;  %v912_v26 = vld [vmem:[#allocation2 + $0x16a] sm:$0xff]  ;;  %v913_v27 = vld [vmem:[#allocation2 + $0x172] sm:$0xff] }
  0xa2   : > { %4054 = vmatmul.mubr.bf16.vlgmr.msra.gmra.mxu0 %v6241_v55  ;;  %2015 = vst [vmem:[#allocation3 + $0x1cc] sm:$0xf] %v5423_v17  ;;  %3949 = vmatmul.mubr.bf16.gmra.mxu1 %v6244_v61  ;;  %1441 = vst [vmem:[#allocation3 + $0x22c] sm:$0xf] %v5424_v18  ;;  %v1282_v28 = vld [vmem:[#allocation2 + $0xd9] sm:$0xff]  ;;  %v5375_v29 = vpack.c.bf16 %v912_v26, %v912_v26  ;;  %v5376_v30 = vpack.c.bf16 %v913_v27, %v913_v27  ;;  %v1283_v31 = vld [vmem:[#allocation2 + $0xe1] sm:$0xff] }
  0xa3   : > { %4061 = vmatprep.mubr.bf16.mxu0 %v6247_v62  ;;  %2016 = vst [vmem:[#allocation3 + $0x1f0] sm:$0xf] %v5424_v18  ;;  %3956 = vmatprep.mubr.bf16.mxu1 %v6245_v3  ;;  %v5425_v32 = vpack.c.bf16 %v1282_v28, %v1282_v28  ;;  %v6252_v33 = vld [vmem:[#allocation3 + $0x58] ss:$36 sps:$4 sm:$0xff]   ;;  %v377_v34 = vadd.f32 %v6562_v63, %v339_v24  ;;  %v6251_v36 = vld [vmem:[#allocation3 + $0x248] ss:$36 sps:$4 sm:$0xff]  }
  0xa4   : > { %6042 = vmatpush3.bf16.msra.mxu0 %v6752_v52  ;;  %v378_v35 = vadd.f32 %v6562_v63, %v340_v25  ;;  %v5426_v52 = vpack.c.bf16 %v1283_v31, %v1283_v31  ;;  %v6256_v37 = vld [vmem:[#allocation3 + $0xa4] ss:$36 sps:$4 sm:$0xff]   ;;  %1072 = vst [vmem:[#allocation3 + $0x440] sm:$0xf] %v5375_v29  ;;  %1073 = vst [vmem:[#allocation3 + $0x464] sm:$0xf] %v5376_v30 }
  0xa5   : > { %6043 = vmatprep.subr.bf16.mxu0 %v6265_v7  ;;  %1442 = vst [vmem:[#allocation3 + $0x250] sm:$0xf] %v5425_v32  ;;  %1646 = vst [vmem:[#allocation3 + $0x404] sm:$0xf] %v5375_v29  ;;  %v6254_v49 = vld [vmem:[#allocation3 + $0x294] ss:$36 sps:$4 sm:$0xff]  }
  0xa6   : > { %1647 = vst [vmem:[#allocation3 + $0x428] sm:$0xf] %v5376_v30  ;;  %2017 = vst [vmem:[#allocation3 + $0x214] sm:$0xf] %v5425_v32  ;;  %v409_v38 = vmax.f32 %v377_v34, 0.0  ;;  %v6295_v39 = vld [vmem:[%s7403_s4 + $0x220] sm:$0xff]  }
  0xa7   : > { %1443 = vst [vmem:[#allocation3 + $0x274] sm:$0xf] %v5426_v52  ;;  %2018 = vst [vmem:[#allocation3 + $0x238] sm:$0xf] %v5426_v52  ;;  %v410_v63 = vmax.f32 %v378_v35, 0.0  ;;  %v1651_v41 = vld [vmem:[#allocation2 + $0x30] sm:$0xff] }
  0xa8   : > { %6044 = vmatpush3.bf16.msra.mxu0 %v6265_v7  ;;  %496 = vst [vmem:[#allocation2 + $0x181] sm:$0xff] %v409_v38  ;;  %v5439_v40 = vpack.c.bf16 %v409_v38, %v409_v38  ;;  %v1652_v43 = vld [vmem:[#allocation2 + $0x38] sm:$0xff]  ;;  %v5473_v44 = vpack.c.bf16 %v1651_v41, %v1651_v41  ;;  %v6259_v47 = vld [vmem:[#allocation3 + $0xa0] ss:$36 sps:$4 sm:$0xff]   ;;  %v6258_v48 = vld [vmem:[#allocation3 + $0x290] ss:$36 sps:$4 sm:$0xff]  }
  0xa9   : > { %6045 = vmatprep.subr.bf16.mxu0 %v6280_v20  ;;  %497 = vst [vmem:[#allocation2 + $0x189] sm:$0xff] %v410_v63  ;;  %v5440_v42 = vpack.c.bf16 %v410_v63, %v410_v63  ;;  %v5474_v45 = vpack.c.bf16 %v1652_v43, %v1652_v43  ;;  %v6310_v46 = vld [vmem:[%s7403_s4 + $0x218] sm:$0xff]   ;;  %v6260_v51 = vld [vmem:[#allocation3 + $0x2dc] ss:$36 sps:$4 sm:$0xff]   ;;  %v1288_v58 = vld [vmem:[#allocation2 + $0x121] sm:$0xff] }
  0xaa   : > { %4062 = vmatmul.mubr.bf16.gmra.mxu0 %v6252_v33  ;;  %3957 = vmatmul.mubr.bf16.gmra.mxu1 %v6251_v36  ;;  %1456 = vst [vmem:[#allocation3 + $0x448] sm:$0xf] %v5439_v40  ;;  %1811 = vst [vmem:[#allocation3 + $0x18] sm:$0xf] %v5473_v44  ;;  %v6262_v50 = vld [vmem:[#allocation3 + $0xec] ss:$36 sps:$4 sm:$0xff]   ;;  %v5431_v62 = vpack.c.bf16 %v1288_v58, %v1288_v58 }
  0xab   : > { %4069 = vmatprep.mubr.bf16.mxu0 %v6256_v37  ;;  %3964 = vmatprep.mubr.bf16.mxu1 %v6254_v49  ;;  %1457 = vst [vmem:[#allocation3 + $0x46c] sm:$0xf] %v5440_v42  ;;  %1812 = vst [vmem:[#allocation3 + $0x3c] sm:$0xf] %v5474_v45  ;;  %v1653_v53 = vld [vmem:[#allocation2 + $0x48] sm:$0xff]  ;;  %v1654_v54 = vld [vmem:[#allocation2 + $0x50] sm:$0xff] }
  0xac   : > { %6046 = vmatpush3.bf16.msra.mxu0 %v6280_v20  ;;  %v5475_v56 = vpack.c.bf16 %v1653_v53, %v1653_v53  ;;  %v5476_v57 = vpack.c.bf16 %v1654_v54, %v1654_v54  ;;  %v1289_v59 = vld [vmem:[#allocation2 + $0x129] sm:$0xff]  ;;  %v1655_v1 = vld [vmem:[#allocation2 + $0x60] sm:$0xff]  ;;  %v6267_v7 = vld [vmem:[#allocation3 + $0xe8] ss:$36 sps:$4 sm:$0xff]   ;;  %1448 = vst [vmem:[#allocation3 + $0x328] sm:$0xf] %v5431_v62 }
  0xad   : > { %6047 = vmatprep.subr.bf16.mxu0 %v6295_v39  ;;  %v5432_v0 = vpack.c.bf16 %v1289_v59, %v1289_v59  ;;  %v1656_v2 = vld [vmem:[#allocation2 + $0x68] sm:$0xff]  ;;  %v5477_v4 = vpack.c.bf16 %v1655_v1, %v1655_v1  ;;  %v6322_v6 = vld [vmem:[%s7403_s4 + $0x210] sm:$0xff]   ;;  %v1290_v8 = vld [vmem:[#allocation2 + $0x139] sm:$0xff]  ;;  %2023 = vst [vmem:[#allocation3 + $0x2ec] sm:$0xf] %v5431_v62 }
  0xae   : > { %1813 = vst [vmem:[#allocation3 + $0x60] sm:$0xf] %v5475_v56  ;;  %1814 = vst [vmem:[#allocation3 + $0x84] sm:$0xf] %v5476_v57  ;;  %v5478_v5 = vpack.c.bf16 %v1656_v2, %v1656_v2  ;;  %v1291_v9 = vld [vmem:[#allocation2 + $0x141] sm:$0xff]  ;;  %v1657_v10 = vld [vmem:[#allocation2 + $0x78] sm:$0xff]  ;;  %v5433_v12 = vpack.c.bf16 %v1290_v8, %v1290_v8 }
  0xaf   : > { %v1104_v55 = vld [vmem:[#allocation2 + $0x180] sm:$0xff]  ;;  %1449 = vst [vmem:[#allocation3 + $0x34c] sm:$0xf] %v5432_v0  ;;  %2024 = vst [vmem:[#allocation3 + $0x310] sm:$0xf] %v5432_v0  ;;  %v5434_v13 = vpack.c.bf16 %v1291_v9, %v1291_v9  ;;  %v5479_v15 = vpack.c.bf16 %v1657_v10, %v1657_v10  ;;  %v1292_v16 = vld [vmem:[#allocation2 + $0x151] sm:$0xff] }
  0xb0   : > { %6048 = vmatpush3.bf16.msra.mxu0 %v6295_v39  ;;  %v1105_v60 = vld [vmem:[#allocation2 + $0x188] sm:$0xff]  ;;  %v5407_v61 = vpack.c.bf16 %v1104_v55, %v1104_v55  ;;  %1815 = vst [vmem:[#allocation3 + $0xa8] sm:$0xf] %v5477_v4  ;;  %1816 = vst [vmem:[#allocation3 + $0xcc] sm:$0xf] %v5478_v5  ;;  %v1658_v14 = vld [vmem:[#allocation2 + $0x80] sm:$0xff]  ;;  %v5435_v20 = vpack.c.bf16 %v1292_v16, %v1292_v16 }
  0xb1   : > { %6049 = vmatprep.subr.bf16.mxu0 %v6310_v46  ;;  %v5408_v3 = vpack.c.bf16 %v1105_v60, %v1105_v60  ;;  %v6266_v11 = vld [vmem:[#allocation3 + $0x2d8] ss:$36 sps:$4 sm:$0xff]   ;;  %v6269_v17 = vld [vmem:[#allocation3 + $0x324] ss:$36 sps:$4 sm:$0xff]   ;;  %v5480_v19 = vpack.c.bf16 %v1658_v14, %v1658_v14  ;;  %1450 = vst [vmem:[#allocation3 + $0x370] sm:$0xf] %v5433_v12 }
  0xb2   : > { %4070 = vmatmul.mubr.bf16.gmra.mxu0 %v6259_v47  ;;  %3965 = vmatmul.mubr.bf16.gmra.mxu1 %v6258_v48  ;;  %1264 = vst [vmem:[#allocation3 + $0x444] sm:$0xf] %v5407_v61  ;;  %v6271_v18 = vld [vmem:[#allocation3 + $0x134] ss:$36 sps:$4 sm:$0xff]   ;;  %1451 = vst [vmem:[#allocation3 + $0x394] sm:$0xf] %v5434_v13 }
  0xb3   : > { %4077 = vmatprep.mubr.bf16.mxu0 %v6262_v50  ;;  %3972 = vmatprep.mubr.bf16.mxu1 %v6260_v51  ;;  %1265 = vst [vmem:[#allocation3 + $0x468] sm:$0xf] %v5408_v3  ;;  %1817 = vst [vmem:[#allocation3 + $0xf0] sm:$0xf] %v5479_v15  ;;  %v1293_v21 = vld [vmem:[#allocation2 + $0x159] sm:$0xff]  ;;  %v1659_v22 = vld [vmem:[#allocation2 + $0x90] sm:$0xff] }
  0xb4   : > { %6050 = vmatpush3.bf16.msra.mxu0 %v6310_v46  ;;  %v1660_v23 = vld [vmem:[#allocation2 + $0x98] sm:$0xff]  ;;  %2025 = vst [vmem:[#allocation3 + $0x334] sm:$0xf] %v5433_v12  ;;  %2026 = vst [vmem:[#allocation3 + $0x358] sm:$0xf] %v5434_v13  ;;  %v5436_v24 = vpack.c.bf16 %v1293_v21, %v1293_v21  ;;  %v5481_v25 = vpack.c.bf16 %v1659_v22, %v1659_v22  ;;  %v6335_v27 = vld [vmem:[%s7403_s4 + $0x208] sm:$0xff]  }
  0xb5   : > { %6051 = vmatprep.subr.bf16.mxu0 %v6322_v6  ;;  %1818 = vst [vmem:[#allocation3 + $0x114] sm:$0xf] %v5480_v19  ;;  %1452 = vst [vmem:[#allocation3 + $0x3b8] sm:$0xf] %v5435_v20  ;;  %v5482_v26 = vpack.c.bf16 %v1660_v23, %v1660_v23  ;;  %v1294_v28 = vld [vmem:[#allocation2 + $0x169] sm:$0xff]  ;;  %v1295_v29 = vld [vmem:[#allocation2 + $0x171] sm:$0xff] }
  0xb6   : > { %2027 = vst [vmem:[#allocation3 + $0x37c] sm:$0xf] %v5435_v20  ;;  %v1661_v30 = vld [vmem:[#allocation2 + $0xa8] sm:$0xff]  ;;  %1453 = vst [vmem:[#allocation3 + $0x3dc] sm:$0xf] %v5436_v24  ;;  %v5437_v31 = vpack.c.bf16 %v1294_v28, %v1294_v28  ;;  %v5438_v32 = vpack.c.bf16 %v1295_v29, %v1295_v29  ;;  %v1662_v38 = vld [vmem:[#allocation2 + $0xb0] sm:$0xff] }
  0xb7   : > { %1819 = vst [vmem:[#allocation3 + $0x138] sm:$0xf] %v5481_v25  ;;  %1820 = vst [vmem:[#allocation3 + $0x15c] sm:$0xf] %v5482_v26  ;;  %v5483_v33 = vpack.c.bf16 %v1661_v30, %v1661_v30  ;;  %v6273_v34 = vld [vmem:[#allocation3 + $0x320] ss:$36 sps:$4 sm:$0xff]   ;;  %v5484_v40 = vpack.c.bf16 %v1662_v38, %v1662_v38 }
  0xb8   : > { %6052 = vmatpush3.bf16.msra.mxu0 %v6322_v6  ;;  %2028 = vst [vmem:[#allocation3 + $0x3a0] sm:$0xf] %v5436_v24  ;;  %1454 = vst [vmem:[#allocation3 + $0x400] sm:$0xf] %v5437_v31  ;;  %v6274_v35 = vld [vmem:[#allocation3 + $0x130] ss:$36 sps:$4 sm:$0xff]  }
  0xb9   : > { %6053 = vmatprep.subr.bf16.mxu0 %v6335_v27  ;;  %1455 = vst [vmem:[#allocation3 + $0x424] sm:$0xf] %v5438_v32  ;;  %1821 = vst [vmem:[#allocation3 + $0x180] sm:$0xf] %v5483_v33  ;;  %v6277_v52 = vld [vmem:[#allocation3 + $0x17c] ss:$36 sps:$4 sm:$0xff]  }
  0xba   : > { %4078 = vmatmul.mubr.bf16.gmra.mxu0 %v6267_v7  ;;  %3973 = vmatmul.mubr.bf16.gmra.mxu1 %v6266_v11  ;;  %2029 = vst [vmem:[#allocation3 + $0x3c4] sm:$0xf] %v5437_v31  ;;  %2030 = vst [vmem:[#allocation3 + $0x3e8] sm:$0xf] %v5438_v32  ;;  %v6275_v36 = vld [vmem:[#allocation3 + $0x36c] ss:$36 sps:$4 sm:$0xff]  }
  0xbb   : > { %4085 = vmatprep.mubr.bf16.mxu0 %v6271_v18  ;;  %3980 = vmatprep.mubr.bf16.mxu1 %v6269_v17  ;;  %v6281_v37 = vld [vmem:[#allocation3 + $0x368] ss:$36 sps:$4 sm:$0xff]   ;;  %v6282_v49 = vld [vmem:[#allocation3 + $0x178] ss:$36 sps:$4 sm:$0xff]   ;;  %v1663_v44 = vld [vmem:[#allocation2 + $0xc0] sm:$0xff] }
  0xbc   : > { %6054 = vmatpush3.bf16.msra.mxu0 %v6335_v27  ;;  %v6284_v39 = vld [vmem:[#allocation3 + $0x3b4] ss:$36 sps:$4 sm:$0xff]   ;;  %v6286_v63 = vld [vmem:[#allocation3 + $0x1c4] ss:$36 sps:$4 sm:$0xff]   ;;  %1822 = vst [vmem:[#allocation3 + $0x1a4] sm:$0xf] %v5484_v40  ;;  %v5485_v47 = vpack.c.bf16 %v1663_v44, %v1663_v44 }
  0xbd   : > { %v1488_v41 = vld [vmem:[#allocation2 + $0x182] sm:$0xff]  ;;  %v1489_v42 = vld [vmem:[#allocation2 + $0x18a] sm:$0xff]  ;;  %v1665_v51 = vld [vmem:[#allocation2 + $0xd8] sm:$0xff] }
  0xbe   : > { %v5471_v43 = vpack.c.bf16 %v1488_v41, %v1488_v41  ;;  %v1664_v45 = vld [vmem:[#allocation2 + $0xc8] sm:$0xff]  ;;  %v5472_v46 = vpack.c.bf16 %v1489_v42, %v1489_v42  ;;  %v6348_v50 = vld [vmem:[%s7403_s4 + $0x200] sm:$0xff]   ;;  %v2035_v54 = vld [vmem:[#allocation2 + $0x32] sm:$0xff]  ;;  %1823 = vst [vmem:[#allocation3 + $0x1c8] sm:$0xf] %v5485_v47  ;;  %v5487_v55 = vpack.c.bf16 %v1665_v51, %v1665_v51 }
  0xbf   : > { %v5486_v48 = vpack.c.bf16 %v1664_v45, %v1664_v45  ;;  %v1666_v53 = vld [vmem:[#allocation2 + $0xe0] sm:$0xff]  ;;  %6055 = vmatprep.subr.bf16.mxu0 %v6348_v50  ;;  %v5537_v58 = vpack.c.bf16 %v2035_v54, %v2035_v54  ;;  %v2037_v59 = vld [vmem:[#allocation2 + $0x4a] sm:$0xff]  ;;  %v2038_v60 = vld [vmem:[#allocation2 + $0x52] sm:$0xff] }
  0xc0   : > { %1648 = vst [vmem:[#allocation3 + $0x44c] sm:$0xf] %v5471_v43  ;;  %2223 = vst [vmem:[#allocation3 + $0x410] sm:$0xf] %v5471_v43  ;;  %v5488_v56 = vpack.c.bf16 %v1666_v53, %v1666_v53  ;;  %v2036_v57 = vld [vmem:[#allocation2 + $0x3a] sm:$0xff]  ;;  %v5539_v62 = vpack.c.bf16 %v2037_v59, %v2037_v59  ;;  %v5540_v0 = vpack.c.bf16 %v2038_v60, %v2038_v60  ;;  %v1667_v1 = vld [vmem:[#allocation2 + $0xf0] sm:$0xff]  ;;  %6056 = vmatpush3.bf16.msra.mxu0 %v6348_v50 }
  0xc1   : > { %1649 = vst [vmem:[#allocation3 + $0x470] sm:$0xf] %v5472_v46  ;;  %1824 = vst [vmem:[#allocation3 + $0x1ec] sm:$0xf] %v5486_v48  ;;  %v5538_v61 = vpack.c.bf16 %v2036_v57, %v2036_v57  ;;  %v1668_v2 = vld [vmem:[#allocation2 + $0xf8] sm:$0xff]  ;;  %v5489_v5 = vpack.c.bf16 %v1667_v1, %v1667_v1  ;;  %v2039_v9 = vld [vmem:[#allocation2 + $0x62] sm:$0xff] }
  0xc2   : > { %4086 = vmatmul.mubr.bf16.gmra.mxu0 %v6274_v35  ;;  %3981 = vmatmul.mubr.bf16.gmra.mxu1 %v6273_v34  ;;  %2224 = vst [vmem:[#allocation3 + $0x434] sm:$0xf] %v5472_v46  ;;  %v1859_v3 = vld [vmem:[#allocation2 + $0xf1] sm:$0xff]  ;;  %1825 = vst [vmem:[#allocation3 + $0x210] sm:$0xf] %v5487_v55  ;;  %v5490_v6 = vpack.c.bf16 %v1668_v2, %v1668_v2  ;;  %v1860_v7 = vld [vmem:[#allocation2 + $0xf9] sm:$0xff]  ;;  %v5541_v13 = vpack.c.bf16 %v2039_v9, %v2039_v9 }
  0xc3   : > { %4093 = vmatprep.mubr.bf16.mxu0 %v6277_v52  ;;  %3988 = vmatprep.mubr.bf16.mxu1 %v6275_v36  ;;  %v6289_v4 = vld [vmem:[#allocation3 + $0x1c0] ss:$36 sps:$4 sm:$0xff]   ;;  %1826 = vst [vmem:[#allocation3 + $0x234] sm:$0xf] %v5488_v56  ;;  %2195 = vst [vmem:[#allocation3 + $0x20] sm:$0xf] %v5537_v58  ;;  %v5521_v8 = vpack.c.bf16 %v1859_v3, %v1859_v3  ;;  %v5522_v12 = vpack.c.bf16 %v1860_v7, %v1860_v7 }
  0xc4   : > { %v2040_v10 = vld [vmem:[#allocation2 + $0x6a] sm:$0xff]  ;;  %v6288_v11 = vld [vmem:[#allocation3 + $0x3b0] ss:$36 sps:$4 sm:$0xff]   ;;  %2196 = vst [vmem:[#allocation3 + $0x44] sm:$0xf] %v5538_v61  ;;  %v2043_v29 = vld [vmem:[#allocation2 + $0x92] sm:$0xff] }
  0xc5   : > { %2197 = vst [vmem:[#allocation3 + $0x68] sm:$0xf] %v5539_v62  ;;  %2198 = vst [vmem:[#allocation3 + $0x8c] sm:$0xf] %v5540_v0  ;;  %v5542_v14 = vpack.c.bf16 %v2040_v10, %v2040_v10  ;;  %v2041_v15 = vld [vmem:[#allocation2 + $0x7a] sm:$0xff]  ;;  %v2042_v16 = vld [vmem:[#allocation2 + $0x82] sm:$0xff]  ;;  %v5545_v31 = vpack.c.bf16 %v2043_v29, %v2043_v29 }
  0xc6   : > { %v1669_v17 = vld [vmem:[#allocation2 + $0x108] sm:$0xff]  ;;  %1827 = vst [vmem:[#allocation3 + $0x258] sm:$0xf] %v5489_v5  ;;  %1828 = vst [vmem:[#allocation3 + $0x27c] sm:$0xf] %v5490_v6  ;;  %v5543_v18 = vpack.c.bf16 %v2041_v15, %v2041_v15  ;;  %v5544_v19 = vpack.c.bf16 %v2042_v16, %v2042_v16  ;;  %v1670_v20 = vld [vmem:[#allocation2 + $0x110] sm:$0xff] }
  0xc7   : > { %2019 = vst [vmem:[#allocation3 + $0x25c] sm:$0xf] %v5521_v8  ;;  %v5491_v21 = vpack.c.bf16 %v1669_v17, %v1669_v17  ;;  %v1861_v22 = vld [vmem:[#allocation2 + $0x109] sm:$0xff]  ;;  %v1862_v23 = vld [vmem:[#allocation2 + $0x111] sm:$0xff]  ;;  %v6292_v25 = vld [vmem:[#allocation3 + $0x20c] ss:$36 sps:$4 sm:$0xff]   ;;  %v5492_v26 = vpack.c.bf16 %v1670_v20, %v1670_v20 }
  0xc8   : > { %v6290_v24 = vld [vmem:[#allocation3 + $0x3fc] ss:$36 sps:$4 sm:$0xff]   ;;  %2020 = vst [vmem:[#allocation3 + $0x280] sm:$0xf] %v5522_v12  ;;  %2199 = vst [vmem:[#allocation3 + $0xb0] sm:$0xf] %v5541_v13  ;;  %v5523_v27 = vpack.c.bf16 %v1861_v22, %v1861_v22  ;;  %v5524_v28 = vpack.c.bf16 %v1862_v23, %v1862_v23 }
  0xc9   : > { %2200 = vst [vmem:[#allocation3 + $0xd4] sm:$0xf] %v5542_v14  ;;  %2201 = vst [vmem:[#allocation3 + $0xf8] sm:$0xf] %v5543_v18  ;;  %v2044_v30 = vld [vmem:[#allocation2 + $0x9a] sm:$0xff]  ;;  %v2045_v38 = vld [vmem:[#allocation2 + $0xaa] sm:$0xff] }
  0xca   : > { %4094 = vmatmul.mubr.bf16.gmra.mxu0 %v6282_v49  ;;  %3989 = vmatmul.mubr.bf16.gmra.mxu1 %v6281_v37  ;;  %2202 = vst [vmem:[#allocation3 + $0x11c] sm:$0xf] %v5544_v19  ;;  %1829 = vst [vmem:[#allocation3 + $0x2a0] sm:$0xf] %v5491_v21  ;;  %v5546_v32 = vpack.c.bf16 %v2044_v30, %v2044_v30  ;;  %v6297_v33 = vld [vmem:[#allocation3 + $0x208] ss:$36 sps:$4 sm:$0xff]   ;;  %v5547_v41 = vpack.c.bf16 %v2045_v38, %v2045_v38 }
  0xcb   : > { %4101 = vmatprep.mubr.bf16.mxu0 %v6286_v63  ;;  %3996 = vmatprep.mubr.bf16.mxu1 %v6284_v39  ;;  %1830 = vst [vmem:[#allocation3 + $0x2c4] sm:$0xf] %v5492_v26  ;;  %2021 = vst [vmem:[#allocation3 + $0x2a4] sm:$0xf] %v5523_v27  ;;  %v6296_v34 = vld [vmem:[#allocation3 + $0x3f8] ss:$36 sps:$4 sm:$0xff]  }
  0xcc   : > { %2022 = vst [vmem:[#allocation3 + $0x2c8] sm:$0xf] %v5524_v28  ;;  %2203 = vst [vmem:[#allocation3 + $0x140] sm:$0xf] %v5545_v31  ;;  %v6301_v35 = vld [vmem:[#allocation3 + $0x254] ss:$36 sps:$4 sm:$0xff]  }
  0xcd   : > { %2204 = vst [vmem:[#allocation3 + $0x164] sm:$0xf] %v5546_v32  ;;  %v6396_v52 = vld [vmem:[#allocation2] sm:$0xff]  ;;  %v6299_v37 = vld [vmem:[#allocation3 + $0x444] ss:$36 sps:$4 sm:$0xff]   ;;  %v1672_v44 = vld [vmem:[#allocation2 + $0x128] sm:$0xff] }
  0xce   : > { %v5503_v36 = vpack.c.bf16 %v6396_v52, %v6396_v52  ;;  %v6304_v49 = vld [vmem:[#allocation3 + $0x250] ss:$36 sps:$4 sm:$0xff]   ;;  %v2046_v39 = vld [vmem:[#allocation2 + $0xb2] sm:$0xff]  ;;  %v5494_v48 = vpack.c.bf16 %v1672_v44, %v1672_v44  ;;  %v2048_v50 = vld [vmem:[#allocation2 + $0xca] sm:$0xff]  ;;  %2205 = vst [vmem:[#allocation3 + $0x188] sm:$0xf] %v5547_v41 }
  0xcf   : > { %v6303_v63 = vld [vmem:[#allocation3 + $0x440] ss:$36 sps:$4 sm:$0xff]   ;;  %v5548_v42 = vpack.c.bf16 %v2046_v39, %v2046_v39  ;;  %v1671_v43 = vld [vmem:[#allocation2 + $0x120] sm:$0xff]  ;;  %v5550_v55 = vpack.c.bf16 %v2048_v50, %v2048_v50  ;;  %v1673_v58 = vld [vmem:[#allocation2 + $0x138] sm:$0xff] }
  0xd0   : > { %1841 = vst [vmem:[#allocation3 + $0x450] sm:$0xf] %v5503_v36  ;;  %1842 = vst [vmem:[#allocation3 + $0x474] sm:$0xf] %v5503_v36  ;;  %v6305_v40 = vld [vmem:[#allocation3 + $0x29c] ss:$36 sps:$4 sm:$0xff]   ;;  %v5493_v47 = vpack.c.bf16 %v1671_v43, %v1671_v43  ;;  %v5495_v61 = vpack.c.bf16 %v1673_v58, %v1673_v58 }
  0xd1   : > { %v2047_v45 = vld [vmem:[#allocation2 + $0xc2] sm:$0xff]  ;;  %v6309_v46 = vld [vmem:[#allocation3 + $0x1c] ss:$36 sps:$4 sm:$0xff]   ;;  %v2049_v53 = vld [vmem:[#allocation2 + $0xda] sm:$0xff]  ;;  %2206 = vst [vmem:[#allocation3 + $0x1ac] sm:$0xf] %v5548_v42 }
  0xd2   : > { %4102 = vmatmul.mubr.bf16.gmra.mxu0 %v6289_v4  ;;  %3997 = vmatmul.mubr.bf16.gmra.mxu1 %v6288_v11  ;;  %v5549_v51 = vpack.c.bf16 %v2047_v45, %v2047_v45  ;;  %v2050_v54 = vld [vmem:[#allocation2 + $0xe2] sm:$0xff]  ;;  %v5551_v56 = vpack.c.bf16 %v2049_v53, %v2049_v53  ;;  %v2051_v60 = vld [vmem:[#allocation2 + $0xf2] sm:$0xff]  ;;  %1831 = vst [vmem:[#allocation3 + $0x2e8] sm:$0xf] %v5493_v47  ;;  %1832 = vst [vmem:[#allocation3 + $0x30c] sm:$0xf] %v5494_v48 }
  0xd3   : > { %4109 = vmatprep.mubr.bf16.mxu0 %v6292_v25  ;;  %4004 = vmatprep.mubr.bf16.mxu1 %v6290_v24  ;;  %v5552_v57 = vpack.c.bf16 %v2050_v54, %v2050_v54  ;;  %v1674_v59 = vld [vmem:[#allocation2 + $0x140] sm:$0xff]  ;;  %v5553_v1 = vpack.c.bf16 %v2051_v60, %v2051_v60  ;;  %v2053_v2 = vld [vmem:[#allocation2 + $0x10a] sm:$0xff]  ;;  %v2054_v3 = vld [vmem:[#allocation2 + $0x112] sm:$0xff]  ;;  %2208 = vst [vmem:[#allocation3 + $0x1f4] sm:$0xf] %v5550_v55 }
  0xd4   : > { %2207 = vst [vmem:[#allocation3 + $0x1d0] sm:$0xf] %v5549_v51  ;;  %v5496_v62 = vpack.c.bf16 %v1674_v59, %v1674_v59  ;;  %v2052_v0 = vld [vmem:[#allocation2 + $0xfa] sm:$0xff]  ;;  %2209 = vst [vmem:[#allocation3 + $0x218] sm:$0xf] %v5551_v56  ;;  %v5555_v5 = vpack.c.bf16 %v2053_v2, %v2053_v2  ;;  %v5556_v6 = vpack.c.bf16 %v2054_v3, %v2054_v3  ;;  %v1675_v7 = vld [vmem:[#allocation2 + $0x150] sm:$0xff] }
  0xd5   : > { %2210 = vst [vmem:[#allocation3 + $0x23c] sm:$0xf] %v5552_v57  ;;  %v5554_v4 = vpack.c.bf16 %v2052_v0, %v2052_v0  ;;  %v1676_v8 = vld [vmem:[#allocation2 + $0x158] sm:$0xff]  ;;  %v2055_v9 = vld [vmem:[#allocation2 + $0x122] sm:$0xff]  ;;  %1833 = vst [vmem:[#allocation3 + $0x330] sm:$0xf] %v5495_v61  ;;  %v5497_v10 = vpack.c.bf16 %v1675_v7, %v1675_v7 }
  0xd6   : > { %1834 = vst [vmem:[#allocation3 + $0x354] sm:$0xf] %v5496_v62  ;;  %2211 = vst [vmem:[#allocation3 + $0x260] sm:$0xf] %v5553_v1  ;;  %v5498_v11 = vpack.c.bf16 %v1676_v8, %v1676_v8  ;;  %v2056_v12 = vld [vmem:[#allocation2 + $0x12a] sm:$0xff]  ;;  %v5557_v13 = vpack.c.bf16 %v2055_v9, %v2055_v9  ;;  %v2057_v14 = vld [vmem:[#allocation2 + $0x13a] sm:$0xff] }
  0xd7   : > { %v2058_v15 = vld [vmem:[#allocation2 + $0x142] sm:$0xff]  ;;  %2212 = vst [vmem:[#allocation3 + $0x284] sm:$0xf] %v5554_v4  ;;  %2213 = vst [vmem:[#allocation3 + $0x2a8] sm:$0xf] %v5555_v5  ;;  %v5558_v16 = vpack.c.bf16 %v2056_v12, %v2056_v12  ;;  %v5559_v17 = vpack.c.bf16 %v2057_v14, %v2057_v14  ;;  %v1678_v20 = vld [vmem:[#allocation2 + $0x170] sm:$0xff] }
  0xd8   : > { %2214 = vst [vmem:[#allocation3 + $0x2cc] sm:$0xf] %v5556_v6  ;;  %v5560_v18 = vpack.c.bf16 %v2058_v15, %v2058_v15  ;;  %v1677_v19 = vld [vmem:[#allocation2 + $0x168] sm:$0xff]  ;;  %v2059_v21 = vld [vmem:[#allocation2 + $0x152] sm:$0xff]  ;;  %1835 = vst [vmem:[#allocation3 + $0x378] sm:$0xf] %v5497_v10  ;;  %v5500_v24 = vpack.c.bf16 %v1678_v20, %v1678_v20 }
  0xd9   : > { %v6311_v22 = vld [vmem:[#allocation3 + $0x298] ss:$36 sps:$4 sm:$0xff]   ;;  %1836 = vst [vmem:[#allocation3 + $0x39c] sm:$0xf] %v5498_v11  ;;  %2215 = vst [vmem:[#allocation3 + $0x2f0] sm:$0xf] %v5557_v13  ;;  %v5499_v23 = vpack.c.bf16 %v1677_v19, %v1677_v19  ;;  %v5561_v26 = vpack.c.bf16 %v2059_v21, %v2059_v21 }
  0xda   : > { %4110 = vmatmul.mubr.bf16.gmra.mxu0 %v6297_v33  ;;  %4005 = vmatmul.mubr.bf16.gmra.mxu1 %v6296_v34  ;;  %v2060_v25 = vld [vmem:[#allocation2 + $0x15a] sm:$0xff]  ;;  %v2061_v27 = vld [vmem:[#allocation2 + $0x16a] sm:$0xff]  ;;  %v2062_v28 = vld [vmem:[#allocation2 + $0x172] sm:$0xff]  ;;  %2216 = vst [vmem:[#allocation3 + $0x314] sm:$0xf] %v5558_v16 }
  0xdb   : > { %4117 = vmatprep.mubr.bf16.mxu0 %v6301_v35  ;;  %4012 = vmatprep.mubr.bf16.mxu1 %v6299_v37  ;;  %2217 = vst [vmem:[#allocation3 + $0x338] sm:$0xf] %v5559_v17  ;;  %2218 = vst [vmem:[#allocation3 + $0x35c] sm:$0xf] %v5560_v18  ;;  %v5562_v29 = vpack.c.bf16 %v2060_v25, %v2060_v25  ;;  %v5563_v30 = vpack.c.bf16 %v2061_v27, %v2061_v27  ;;  %v1679_v32 = vld [vmem:[#allocation2 + $0x180] sm:$0xff]  ;;  %v1680_v33 = vld [vmem:[#allocation2 + $0x188] sm:$0xff] }
  0xdc   : > { %v5564_v31 = vpack.c.bf16 %v2062_v28, %v2062_v28  ;;  %v1871_v34 = vld [vmem:[#allocation2 + $0x181] sm:$0xff]  ;;  %v6312_v35 = vld [vmem:[#allocation3 + $0x2e4] ss:$36 sps:$4 sm:$0xff]   ;;  %1837 = vst [vmem:[#allocation3 + $0x3c0] sm:$0xf] %v5499_v23  ;;  %v5501_v52 = vpack.c.bf16 %v1679_v32, %v1679_v32  ;;  %v5502_v36 = vpack.c.bf16 %v1680_v33, %v1680_v33  ;;  %v1872_v48 = vld [vmem:[#allocation2 + $0x189] sm:$0xff] }
  0xdd   : > { %1838 = vst [vmem:[#allocation3 + $0x3e4] sm:$0xf] %v5500_v24  ;;  %2219 = vst [vmem:[#allocation3 + $0x380] sm:$0xf] %v5561_v26  ;;  %v5533_v37 = vpack.c.bf16 %v1871_v34, %v1871_v34  ;;  %v6314_v38 = vld [vmem:[#allocation3 + $0x64] ss:$36 sps:$4 sm:$0xff]   ;;  %v5534_v51 = vpack.c.bf16 %v1872_v48, %v1872_v48 }
  0xde   : > { %2220 = vst [vmem:[#allocation3 + $0x3a4] sm:$0xf] %v5562_v29  ;;  %2221 = vst [vmem:[#allocation3 + $0x3c8] sm:$0xf] %v5563_v30  ;;  %v6316_v42 = vld [vmem:[#allocation3 + $0x2e0] ss:$36 sps:$4 sm:$0xff]  }
  0xdf   : > { %2222 = vst [vmem:[#allocation3 + $0x3ec] sm:$0xf] %v5564_v31  ;;  %1839 = vst [vmem:[#allocation3 + $0x408] sm:$0xf] %v5501_v52  ;;  %v6317_v43 = vld [vmem:[#allocation3 + $0x60] ss:$36 sps:$4 sm:$0xff]  }
  0xe0   : > { %1840 = vst [vmem:[#allocation3 + $0x42c] sm:$0xf] %v5502_v36  ;;  %2031 = vst [vmem:[#allocation3 + $0x40c] sm:$0xf] %v5533_v37  ;;  %v6318_v44 = vld [vmem:[#allocation3 + $0x32c] ss:$36 sps:$4 sm:$0xff]  }
  0xe1   : > { %v6323_v50 = vld [vmem:[#allocation3 + $0x328] ss:$36 sps:$4 sm:$0xff]   ;;  %v2066_v54 = vld [vmem:[#allocation2 + $0x1a2] sm:$0xff]  ;;  %2032 = vst [vmem:[#allocation3 + $0x430] sm:$0xf] %v5534_v51 }
  0xe2   : > { %4118 = vmatmul.mubr.bf16.gmra.mxu0 %v6304_v49  ;;  %4013 = vmatmul.mubr.bf16.gmra.mxu1 %v6303_v63  ;;  %v6307_v49 = vld [vmem:[#allocation3 + $0x18] ss:$36 sps:$4 sm:$0xff]   ;;  %v2065_v53 = vld [vmem:[#allocation2 + $0x19a] sm:$0xff]  ;;  %v5568_v59 = vpack.c.bf16 %v2066_v54, %v2066_v54  ;;  %v6342_v16 = vld [vmem:[#allocation3 + $0x400] ss:$36 sps:$4 sm:$0xff]  }
  0xe3   : > { %4125 = vmatprep.mubr.bf16.mxu0 %v6305_v40  ;;  %4214 = vmatprep.mubr.bf16.mxu1 %v6309_v46  ;;  %v6320_v46 = vld [vmem:[#allocation3 + $0xac] ss:$36 sps:$4 sm:$0xff]   ;;  %v6325_v57 = vld [vmem:[#allocation3 + $0x374] ss:$36 sps:$4 sm:$0xff]   ;;  %v5567_v58 = vpack.c.bf16 %v2065_v53, %v2065_v53  ;;  %v6331_v3 = vld [vmem:[#allocation3 + $0x3bc] ss:$36 sps:$4 sm:$0xff]  }
  0xe4   : > { %v1873_v55 = vld [vmem:[#allocation2 + $0x199] sm:$0xff]  ;;  %v1874_v60 = vld [vmem:[#allocation2 + $0x1a1] sm:$0xff]  ;;  %2226 = vst [vmem:[#allocation3 + $0x47c] sm:$0xf] %v5568_v59  ;;  %v6333_v4 = vld [vmem:[#allocation3 + $0x13c] ss:$36 sps:$4 sm:$0xff]  }
  0xe5   : > { %v6324_v56 = vld [vmem:[#allocation3 + $0xa8] ss:$36 sps:$4 sm:$0xff]   ;;  %v5535_v61 = vpack.c.bf16 %v1873_v55, %v1873_v55  ;;  %v6327_v62 = vld [vmem:[#allocation3 + $0xf4] ss:$36 sps:$4 sm:$0xff]   ;;  %v5536_v0 = vpack.c.bf16 %v1874_v60, %v1874_v60  ;;  %2225 = vst [vmem:[#allocation3 + $0x458] sm:$0xf] %v5567_v58 }
  0xe6   : > { %v6329_v1 = vld [vmem:[#allocation3 + $0x370] ss:$36 sps:$4 sm:$0xff]   ;;  %v6336_v5 = vld [vmem:[#allocation3 + $0x3b8] ss:$36 sps:$4 sm:$0xff]   ;;  %v6338_v7 = vld [vmem:[#allocation3 + $0x404] ss:$36 sps:$4 sm:$0xff]  }
  0xe7   : > { %2033 = vst [vmem:[#allocation3 + $0x454] sm:$0xf] %v5535_v61  ;;  %2034 = vst [vmem:[#allocation3 + $0x478] sm:$0xf] %v5536_v0  ;;  %v6330_v2 = vld [vmem:[#allocation3 + $0xf0] ss:$36 sps:$4 sm:$0xff]  }
  0xe8   : > { %v6337_v6 = vld [vmem:[#allocation3 + $0x138] ss:$36 sps:$4 sm:$0xff]   ;;  %v6340_v8 = vld [vmem:[#allocation3 + $0x184] ss:$36 sps:$4 sm:$0xff]   ;;  %v6344_v19 = vld [vmem:[#allocation3 + $0x44c] ss:$36 sps:$4 sm:$0xff]  }
  0xe9   : > { %v6343_v18 = vld [vmem:[#allocation3 + $0x180] ss:$36 sps:$4 sm:$0xff]   ;;  %v6346_v21 = vld [vmem:[#allocation3 + $0x1cc] ss:$36 sps:$4 sm:$0xff]   ;;  %v6351_v36 = vld [vmem:[#allocation3 + $0x214] ss:$36 sps:$4 sm:$0xff]  }
  0xea   : > { %4126 = vmatmul.mubr.bf16.gmra.mxu0 %v6311_v22  ;;  %4215 = vmatmul.mubr.bf16.vlgmr.msra.gmra.mxu1 %v6307_v49  ;;  %v6349_v32 = vld [vmem:[#allocation3 + $0x448] ss:$36 sps:$4 sm:$0xff]   ;;  %v6359_v51 = vld [vmem:[#allocation3 + $0xb0] ss:$36 sps:$4 sm:$0xff]   ;;  %v6358_v54 = vld [vmem:[#allocation3 + $0x25c] ss:$36 sps:$4 sm:$0xff]  }
  0xeb   : > { %4133 = vmatprep.mubr.bf16.mxu0 %v6312_v35  ;;  %4222 = vmatprep.mubr.bf16.mxu1 %v6314_v38  ;;  %v6350_v34 = vld [vmem:[#allocation3 + $0x1c8] ss:$36 sps:$4 sm:$0xff]   ;;  %v6353_v35 = vld [vmem:[#allocation3 + $0x20] ss:$36 sps:$4 sm:$0xff]  }
  0xf1   : > { %v5585_v39 = vpop.f32.mrf.mxu0 }
  0xf2   : > { %4134 = vmatmul.mubr.bf16.gmra.mxu0 %v6316_v42  ;;  %4223 = vmatmul.mubr.bf16.gmra.mxu1 %v6317_v43 }
  0xf3   : > { %v5586_v63 = vpop.f32.mrf.mxu0  ;;  %4141 = vmatprep.mubr.bf16.mxu0 %v6318_v44  ;;  %4230 = vmatprep.mubr.bf16.mxu1 %v6320_v46  ;;  %v6355_v46 = vld [vmem:[#allocation3 + $0x68] ss:$36 sps:$4 sm:$0xff]  }
  0xf4   : > { %v6804_v40 = vadd.f32 %v5586_v63, %v5585_v39 }
  0xf5   : > { %v5588_v41 = vpop.f32.mrf.mxu0 }
  0xf7   : > { %v5589_v45 = vpop.f32.mrf.mxu0 }
  0xf8   : > { %v6806_v47 = vadd.f32 %v5589_v45, %v5588_v41 }
  0xfa   : > { %4142 = vmatmul.mubr.bf16.gmra.mxu0 %v6323_v50  ;;  %4231 = vmatmul.mubr.bf16.gmra.mxu1 %v6324_v56  ;;  %v6354_v50 = vld [vmem:[#allocation3 + $0x210] ss:$36 sps:$4 sm:$0xff]  }
  0xfb   : > { %4149 = vmatprep.mubr.bf16.mxu0 %v6325_v57  ;;  %4238 = vmatprep.mubr.bf16.mxu1 %v6327_v62 }
 0x102   : > { %4150 = vmatmul.mubr.bf16.gmra.mxu0 %v6329_v1  ;;  %4239 = vmatmul.mubr.bf16.gmra.mxu1 %v6330_v2  ;;  %v6360_v2 = vld [vmem:[#allocation3 + $0xf8] ss:$36 sps:$4 sm:$0xff]  }
 0x103   : > { %4157 = vmatprep.mubr.bf16.mxu0 %v6331_v3  ;;  %4246 = vmatprep.mubr.bf16.mxu1 %v6333_v4  ;;  %v6356_v4 = vld [vmem:[#allocation3 + $0x258] ss:$36 sps:$4 sm:$0xff]  }
 0x10a   : > { %v5591_v9 = vpop.f32.mrf.mxu0  ;;  %4158 = vmatmul.mubr.bf16.gmra.mxu0 %v6336_v5  ;;  %v5657_v10 = vpop.f32.mrf.mxu1  ;;  %4247 = vmatmul.mubr.bf16.gmra.mxu1 %v6337_v6  ;;  %v6364_v5 = vld [vmem:[#allocation3 + $0x140] ss:$36 sps:$4 sm:$0xff]  }
 0x10b   : > { %4165 = vmatprep.mubr.bf16.mxu0 %v6338_v7  ;;  %4254 = vmatprep.mubr.bf16.mxu1 %v6340_v8  ;;  %v6363_v7 = vld [vmem:[#allocation3 + $0x2a4] ss:$36 sps:$4 sm:$0xff]  }
 0x10c   : > { %v5592_v11 = vpop.f32.mrf.mxu0  ;;  %v5658_v13 = vpop.f32.mrf.mxu1 }
 0x10d   : > { %v6808_v12 = vadd.f32 %v5592_v11, %v5591_v9  ;;  %v6810_v14 = vadd.f32 %v5658_v13, %v5657_v10 }
 0x10e   : > { %v5594_v15 = vpop.f32.mrf.mxu0  ;;  %v5660_v17 = vpop.f32.mrf.mxu1 }
 0x110   : > { %v5595_v20 = vpop.f32.mrf.mxu0  ;;  %v5661_v23 = vpop.f32.mrf.mxu1 }
 0x111   : > { %v6812_v22 = vadd.f32 %v5595_v20, %v5594_v15  ;;  %v6814_v24 = vadd.f32 %v5661_v23, %v5660_v17  ;;  %v6365_v20 = vld [vmem:[#allocation3 + $0x188] ss:$36 sps:$4 sm:$0xff]   ;;  %v6361_v23 = vld [vmem:[#allocation3 + $0x2a0] ss:$36 sps:$4 sm:$0xff]  }
 0x112   : > { %v5597_v25 = vpop.f32.mrf.mxu0  ;;  %4166 = vmatmul.mubr.bf16.gmra.mxu0 %v6342_v16  ;;  %v5663_v26 = vpop.f32.mrf.mxu1  ;;  %4255 = vmatmul.mubr.bf16.gmra.mxu1 %v6343_v18 }
 0x113   : > { %4173 = vmatprep.mubr.bf16.mxu0 %v6344_v19  ;;  %4262 = vmatprep.mubr.bf16.mxu1 %v6346_v21 }
 0x114   : > { %v5598_v27 = vpop.f32.mrf.mxu0  ;;  %v5664_v29 = vpop.f32.mrf.mxu1 }
 0x115   : > { %v6816_v28 = vadd.f32 %v5598_v27, %v5597_v25  ;;  %v6818_v30 = vadd.f32 %v5664_v29, %v5663_v26  ;;  %v6369_v25 = vld [vmem:[#allocation3 + $0x1d0] ss:$36 sps:$4 sm:$0xff]  }
 0x116   : > { %v5600_v31 = vpop.f32.mrf.mxu0  ;;  %v5666_v33 = vpop.f32.mrf.mxu1  ;;  %v6368_v29 = vld [vmem:[#allocation3 + $0x2ec] ss:$36 sps:$4 sm:$0xff]  }
 0x118   : > { %v5601_v52 = vpop.f32.mrf.mxu0  ;;  %v5667_v49 = vpop.f32.mrf.mxu1 }
 0x119   : > { %v6820_v37 = vadd.f32 %v5601_v52, %v5600_v31  ;;  %v6822_v38 = vadd.f32 %v5667_v49, %v5666_v33 }
 0x11a   : > { %v5603_v39 = vpop.f32.mrf.mxu0  ;;  %4174 = vmatmul.mubr.bf16.gmra.mxu0 %v6349_v32  ;;  %v5669_v63 = vpop.f32.mrf.mxu1  ;;  %4263 = vmatmul.mubr.bf16.gmra.mxu1 %v6350_v34 }
 0x11b   : > { %6057 = vmatprep.mubr.bf16.mxu0 %v6353_v35  ;;  %4270 = vmatprep.mubr.bf16.mxu1 %v6351_v36 }
 0x11c   : > { %v5604_v41 = vpop.f32.mrf.mxu0  ;;  %v5670_v43 = vpop.f32.mrf.mxu1 }
 0x11d   : > { %v6824_v42 = vadd.f32 %v5604_v41, %v5603_v39  ;;  %v6826_v44 = vadd.f32 %v5670_v43, %v5669_v63  ;;  %v6370_v41 = vld [vmem:[#allocation3 + $0x218] ss:$36 sps:$4 sm:$0xff]  }
 0x11e   : > { %v5606_v45 = vpop.f32.mrf.mxu0  ;;  %v5672_v48 = vpop.f32.mrf.mxu1 }
 0x120   : > { %v5607_v53 = vpop.f32.mrf.mxu0  ;;  %v5673_v56 = vpop.f32.mrf.mxu1 }
 0x121   : > { %v6828_v55 = vadd.f32 %v5607_v53, %v5606_v45  ;;  %v6830_v57 = vadd.f32 %v5673_v56, %v5672_v48  ;;  %v6366_v45 = vld [vmem:[#allocation3 + $0x2e8] ss:$36 sps:$4 sm:$0xff]  }
 0x122   : > { %v5609_v58 = vpop.f32.mrf.mxu0  ;;  %6058 = vmatmul.mubr.bf16.vlgmr.msra.gmra.mxu0 %v6355_v46  ;;  %v5675_v59 = vpop.f32.mrf.mxu1  ;;  %4271 = vmatmul.mubr.bf16.gmra.mxu1 %v6354_v50  ;;  %v6374_v46 = vld [vmem:[#allocation3 + $0x260] ss:$36 sps:$4 sm:$0xff]  }
 0x123   : > { %6061 = vmatprep.mubr.bf16.mxu0 %v6359_v51  ;;  %4278 = vmatprep.mubr.bf16.mxu1 %v6358_v54  ;;  %v6373_v51 = vld [vmem:[#allocation3 + $0x334] ss:$36 sps:$4 sm:$0xff]  }
 0x124   : > { %v5610_v60 = vpop.f32.mrf.mxu0  ;;  %v5676_v62 = vpop.f32.mrf.mxu1 }
 0x125   : > { %v6832_v61 = vadd.f32 %v5610_v60, %v5609_v58  ;;  %v6834_v0 = vadd.f32 %v5676_v62, %v5675_v59 }
 0x126   : > { %v5612_v1 = vpop.f32.mrf.mxu0  ;;  %v5678_v3 = vpop.f32.mrf.mxu1 }
 0x128   : > { %v5613_v6 = vpop.f32.mrf.mxu0  ;;  %v5679_v9 = vpop.f32.mrf.mxu1 }
 0x129   : > { %v6836_v8 = vadd.f32 %v5613_v6, %v5612_v1  ;;  %v6838_v10 = vadd.f32 %v5679_v9, %v5678_v3  ;;  %v6375_v3 = vld [vmem:[#allocation3 + $0x2a8] ss:$36 sps:$4 sm:$0xff]   ;;  %v6379_v6 = vld [vmem:[#allocation3 + $0x2f0] ss:$36 sps:$4 sm:$0xff]  }
 0x12a   : > { %v5615_v11 = vpop.f32.mrf.mxu0  ;;  %6062 = vmatmul.mubr.bf16.gmra.mxu0 %v6360_v2  ;;  %v5697_v13 = vpop.f32.mrf.mxu1  ;;  %4279 = vmatmul.mubr.bf16.gmra.mxu1 %v6356_v4 }
 0x12b   : > { %6065 = vmatprep.mubr.bf16.mxu0 %v6364_v5  ;;  %4286 = vmatprep.mubr.bf16.mxu1 %v6363_v7  ;;  %v6371_v5 = vld [vmem:[#allocation3 + $0x330] ss:$36 sps:$4 sm:$0xff]  }
 0x12c   : > { %v5616_v15 = vpop.f32.mrf.mxu0  ;;  %v5698_v17 = vpop.f32.mrf.mxu1 }
 0x12d   : > { %v6840_v16 = vadd.f32 %v5616_v15, %v5615_v11  ;;  %v5699_v18 = vadd.f32 %v5698_v17, %v5697_v13  ;;  %v6378_v11 = vld [vmem:[#allocation3 + $0x37c] ss:$36 sps:$4 sm:$0xff]  }
 0x12e   : > { %v5618_v19 = vpop.f32.mrf.mxu0  ;;  %v5700_v21 = vpop.f32.mrf.mxu1 }
 0x12f   : > { %v6843_v26 = vadd.f32 %v5699_v18, %v6804_v40 }
 0x130   : > { %v5619_v27 = vpop.f32.mrf.mxu0  ;;  %v5701_v32 = vpop.f32.mrf.mxu1 }
 0x131   : > { %v6845_v31 = vadd.f32 %v5619_v27, %v5618_v19  ;;  %v5702_v33 = vadd.f32 %v5701_v32, %v5700_v21  ;;  %v6380_v27 = vld [vmem:[#allocation3 + $0x338] ss:$36 sps:$4 sm:$0xff]  }
 0x132   : > { %v5621_v34 = vpop.f32.mrf.mxu0  ;;  %6066 = vmatmul.mubr.bf16.gmra.mxu0 %v6365_v20  ;;  %v5703_v35 = vpop.f32.mrf.mxu1  ;;  %4287 = vmatmul.mubr.bf16.gmra.mxu1 %v6361_v23  ;;  %v6376_v32 = vld [vmem:[#allocation3 + $0x378] ss:$36 sps:$4 sm:$0xff]  }
 0x133   : > { %6069 = vmatprep.mubr.bf16.mxu0 %v6369_v25  ;;  %v6848_v52 = vadd.f32 %v5702_v33, %v6806_v47  ;;  %4294 = vmatprep.mubr.bf16.mxu1 %v6368_v29  ;;  %v6384_v33 = vld [vmem:[#allocation3 + $0x380] ss:$36 sps:$4 sm:$0xff]  }
 0x134   : > { %v5622_v36 = vpop.f32.mrf.mxu0  ;;  %v5704_v40 = vpop.f32.mrf.mxu1 }
 0x135   : > { %v6850_v49 = vadd.f32 %v5622_v36, %v5621_v34  ;;  %v5705_v39 = vadd.f32 %v5704_v40, %v5703_v35  ;;  %v6383_v36 = vld [vmem:[#allocation3 + $0x3c4] ss:$36 sps:$4 sm:$0xff]  }
 0x136   : > { %v5624_v63 = vpop.f32.mrf.mxu0  ;;  %v5706_v43 = vpop.f32.mrf.mxu1 }
 0x137   : > { %v6853_v48 = vadd.f32 %v5705_v39, %v6808_v12 }
 0x138   : > { %v5625_v50 = vpop.f32.mrf.mxu0  ;;  %v5707_v47 = vpop.f32.mrf.mxu1 }
 0x139   : > { %v6855_v53 = vadd.f32 %v5625_v50, %v5624_v63  ;;  %v5708_v54 = vadd.f32 %v5707_v47, %v5706_v43  ;;  %v6385_v47 = vld [vmem:[#allocation3 + $0x3c8] ss:$36 sps:$4 sm:$0xff]  }
 0x13a   : > { %v5627_v56 = vpop.f32.mrf.mxu0  ;;  %6070 = vmatmul.mubr.bf16.gmra.mxu0 %v6370_v41  ;;  %v5709_v58 = vpop.f32.mrf.mxu1  ;;  %4295 = vmatmul.mubr.bf16.gmra.mxu1 %v6366_v45 }
 0x13b   : > { %6073 = vmatprep.mubr.bf16.mxu0 %v6374_v46  ;;  %v6858_v59 = vadd.f32 %v5708_v54, %v6812_v22  ;;  %4302 = vmatprep.mubr.bf16.mxu1 %v6373_v51 }
 0x13c   : > { %v5628_v60 = vpop.f32.mrf.mxu0  ;;  %v5710_v12 = vpop.f32.mrf.mxu1 }
 0x13d   : > { %v6860_v62 = vadd.f32 %v5628_v60, %v5627_v56  ;;  %v5711_v1 = vadd.f32 %v5710_v12, %v5709_v58  ;;  %v6381_v56 = vld [vmem:[#allocation3 + $0x3c0] ss:$36 sps:$4 sm:$0xff]   ;;  %v6389_v58 = vld [vmem:[#allocation3 + $0x410] ss:$36 sps:$4 sm:$0xff]  }
 0x13e   : > { %v5630_v2 = vpop.f32.mrf.mxu0  ;;  %v5712_v4 = vpop.f32.mrf.mxu1 }
 0x13f   : > { %v6863_v7 = vadd.f32 %v5711_v1, %v6816_v28  ;;  %v6388_v1 = vld [vmem:[#allocation3 + $0x40c] ss:$36 sps:$4 sm:$0xff]  }
 0x140   : > { %v5631_v9 = vpop.f32.mrf.mxu0  ;;  %v5713_v22 = vpop.f32.mrf.mxu1 }
 0x141   : > { %v6865_v13 = vadd.f32 %v5631_v9, %v5630_v2  ;;  %v5714_v15 = vadd.f32 %v5713_v22, %v5712_v4 }
 0x142   : > { %v5633_v17 = vpop.f32.mrf.mxu0  ;;  %6074 = vmatmul.mubr.bf16.gmra.mxu0 %v6375_v3  ;;  %v5715_v18 = vpop.f32.mrf.mxu1  ;;  %4303 = vmatmul.mubr.bf16.gmra.mxu1 %v6371_v5 }
 0x143   : > { %6077 = vmatprep.mubr.bf16.mxu0 %v6379_v6  ;;  %v6868_v19 = vadd.f32 %v5714_v15, %v6820_v37  ;;  %4310 = vmatprep.mubr.bf16.mxu1 %v6378_v11 }
 0x144   : > { %v5634_v20 = vpop.f32.mrf.mxu0  ;;  %v5716_v28 = vpop.f32.mrf.mxu1 }
 0x145   : > { %v6870_v21 = vadd.f32 %v5634_v20, %v5633_v17  ;;  %v5717_v23 = vadd.f32 %v5716_v28, %v5715_v18  ;;  %v6390_v17 = vld [vmem:[#allocation3 + $0x458] ss:$36 sps:$4 sm:$0xff]   ;;  %v6386_v20 = vld [vmem:[#allocation3 + $0x408] ss:$36 sps:$4 sm:$0xff]  }
 0x146   : > { %v5636_v25 = vpop.f32.mrf.mxu0  ;;  %v5718_v29 = vpop.f32.mrf.mxu1 }
 0x147   : > { %v6873_v34 = vadd.f32 %v5717_v23, %v6824_v42 }
 0x148   : > { %v5637_v35 = vpop.f32.mrf.mxu0  ;;  %v5719_v37 = vpop.f32.mrf.mxu1 }
 0x149   : > { %v6875_v40 = vadd.f32 %v5637_v35, %v5636_v25  ;;  %v5720_v39 = vadd.f32 %v5719_v37, %v5718_v29  ;;  %v6393_v25 = vld [vmem:[#allocation3 + $0x454] ss:$36 sps:$4 sm:$0xff]  }
 0x14a   : > { %v5639_v63 = vpop.f32.mrf.mxu0  ;;  %6078 = vmatmul.mubr.bf16.gmra.mxu0 %v6380_v27  ;;  %v5721_v41 = vpop.f32.mrf.mxu1  ;;  %4311 = vmatmul.mubr.bf16.gmra.mxu1 %v6376_v32 }
 0x14b   : > { %6081 = vmatprep.mubr.bf16.mxu0 %v6384_v33  ;;  %v6878_v43 = vadd.f32 %v5720_v39, %v6828_v55  ;;  %4318 = vmatprep.mubr.bf16.mxu1 %v6383_v36 }
 0x14c   : > { %v5640_v45 = vpop.f32.mrf.mxu0  ;;  %v5722_v42 = vpop.f32.mrf.mxu1 }
 0x14d   : > { %v6880_v46 = vadd.f32 %v5640_v45, %v5639_v63  ;;  %v5723_v50 = vadd.f32 %v5722_v42, %v5721_v41  ;;  %v6391_v45 = vld [vmem:[#allocation3 + $0x450] ss:$36 sps:$4 sm:$0xff]  }
 0x14e   : > { %v5642_v51 = vpop.f32.mrf.mxu0  ;;  %v5724_v54 = vpop.f32.mrf.mxu1 }
 0x14f   : > { %v6883_v60 = vadd.f32 %v5723_v50, %v6832_v61 }
 0x150   : > { %v5643_v12 = vpop.f32.mrf.mxu0  ;;  %v5725_v55 = vpop.f32.mrf.mxu1 }
 0x151   : > { %v6885_v2 = vadd.f32 %v5643_v12, %v5642_v51  ;;  %v5726_v3 = vadd.f32 %v5725_v55, %v5724_v54 }
 0x152   : > { %v5645_v4 = vpop.f32.mrf.mxu0  ;;  %6082 = vmatmul.mubr.bf16.gmra.mxu0 %v6385_v47  ;;  %v5727_v5 = vpop.f32.mrf.mxu1  ;;  %4319 = vmatmul.mubr.bf16.gmra.mxu1 %v6381_v56 }
 0x153   : > { %6085 = vmatprep.mubr.bf16.mxu0 %v6389_v58  ;;  %v6888_v6 = vadd.f32 %v5726_v3, %v6836_v8  ;;  %4326 = vmatprep.mubr.bf16.mxu1 %v6388_v1 }
 0x154   : > { %v5646_v9 = vpop.f32.mrf.mxu0  ;;  %v5728_v61 = vpop.f32.mrf.mxu1 }
 0x155   : > { %v6890_v11 = vadd.f32 %v5646_v9, %v5645_v4  ;;  %v5729_v22 = vadd.f32 %v5728_v61, %v5727_v5 }
 0x156   : > { %v5648_v15 = vpop.f32.mrf.mxu0  ;;  %v5730_v18 = vpop.f32.mrf.mxu1 }
 0x157   : > { %v6893_v28 = vadd.f32 %v5729_v22, %v6840_v16 }
 0x158   : > { %v5649_v23 = vpop.f32.mrf.mxu0  ;;  %v5731_v29 = vpop.f32.mrf.mxu1 }
 0x159   : > { %v6895_v27 = vadd.f32 %v5649_v23, %v5648_v15  ;;  %v5732_v8 = vadd.f32 %v5731_v29, %v5730_v18 }
 0x15a   : > { %v5651_v32 = vpop.f32.mrf.mxu0  ;;  %6086 = vmatmul.mubr.bf16.gmra.mxu0 %v6390_v17  ;;  %v5733_v33 = vpop.f32.mrf.mxu1  ;;  %4327 = vmatmul.mubr.bf16.gmra.mxu1 %v6386_v20 }
 0x15b   : > { %v6898_v35 = vadd.f32 %v5732_v8, %v6845_v31  ;;  %4334 = vmatprep.mubr.bf16.mxu1 %v6393_v25 }
 0x15c   : > { %v5652_v36 = vpop.f32.mrf.mxu0  ;;  %v5734_v39 = vpop.f32.mrf.mxu1 }
 0x15d   : > { %v6900_v37 = vadd.f32 %v5652_v36, %v5651_v32  ;;  %v5735_v16 = vadd.f32 %v5734_v39, %v5733_v33 }
 0x15e   : > { %v5654_v63 = vpop.f32.mrf.mxu0  ;;  %v5736_v41 = vpop.f32.mrf.mxu1 }
 0x15f   : > { %v6903_v42 = vadd.f32 %v5735_v16, %v6850_v49 }
 0x160   : > { %v5655_v50 = vpop.f32.mrf.mxu0  ;;  %v5737_v47 = vpop.f32.mrf.mxu1 }
 0x161   : > { %v6905_v51 = vadd.f32 %v5655_v50, %v5654_v63  ;;  %v5738_v54 = vadd.f32 %v5737_v47, %v5736_v41 }
 0x162   : > { %v5809_v56 = vpop.f32.mrf.mxu0  ;;  %v5739_v31 = vpop.f32.mrf.mxu1  ;;  %4335 = vmatmul.mubr.bf16.gmra.mxu1 %v6391_v45 }
 0x163   : > { %v6908_v58 = vadd.f32 %v5738_v54, %v6855_v53 }
 0x164   : > { %v5810_v12 = vpop.f32.mrf.mxu0  ;;  %v5740_v1 = vpop.f32.mrf.mxu1 }
 0x165   : > { %v5811_v55 = vadd.f32 %v5810_v12, %v5809_v56  ;;  %v5741_v3 = vadd.f32 %v5740_v1, %v5739_v31 }
 0x166   : > { %v5812_v4 = vpop.f32.mrf.mxu0  ;;  %v5742_v49 = vpop.f32.mrf.mxu1 }
 0x167   : > { %v6911_v5 = vadd.f32 %v5811_v55, %v6843_v26  ;;  %v6914_v9 = vadd.f32 %v5741_v3, %v6860_v62 }
 0x168   : > { %v5813_v61 = vpop.f32.mrf.mxu0  ;;  %v5743_v22 = vpop.f32.mrf.mxu1 }
 0x169   : > { %v5814_v15 = vadd.f32 %v5813_v61, %v5812_v4  ;;  %v5744_v17 = vadd.f32 %v5743_v22, %v5742_v49 }
 0x16a   : > { %v5815_v18 = vpop.f32.mrf.mxu0  ;;  %v5745_v20 = vpop.f32.mrf.mxu1 }
 0x16b   : > { %v6917_v53 = vadd.f32 %v5814_v15, %v6848_v52  ;;  %v6920_v23 = vadd.f32 %v5744_v17, %v6865_v13 }
 0x16c   : > { %v5816_v25 = vpop.f32.mrf.mxu0  ;;  %v5746_v29 = vpop.f32.mrf.mxu1 }
 0x16d   : > { %v5817_v26 = vadd.f32 %v5816_v25, %v5815_v18  ;;  %v5747_v8 = vadd.f32 %v5746_v29, %v5745_v20 }
 0x16e   : > { %v5818_v32 = vpop.f32.mrf.mxu0  ;;  %v5748_v33 = vpop.f32.mrf.mxu1 }
 0x16f   : > { %v6923_v62 = vadd.f32 %v5817_v26, %v6853_v48  ;;  %v6926_v36 = vadd.f32 %v5747_v8, %v6870_v21 }
 0x170   : > { %v5819_v39 = vpop.f32.mrf.mxu0  ;;  %v5749_v16 = vpop.f32.mrf.mxu1 }
 0x171   : > { %v5820_v52 = vadd.f32 %v5819_v39, %v5818_v32  ;;  %v5750_v63 = vadd.f32 %v5749_v16, %v5748_v33 }
 0x172   : > { %v5821_v41 = vpop.f32.mrf.mxu0  ;;  %v5751_v45 = vpop.f32.mrf.mxu1 }
 0x173   : > { %v6929_v13 = vadd.f32 %v5820_v52, %v6858_v59  ;;  %v6932_v50 = vadd.f32 %v5750_v63, %v6875_v40 }
 0x174   : > { %v5822_v47 = vpop.f32.mrf.mxu0  ;;  %v5752_v54 = vpop.f32.mrf.mxu1 }
 0x175   : > { %v5823_v48 = vadd.f32 %v5822_v47, %v5821_v41  ;;  %v5753_v56 = vadd.f32 %v5752_v54, %v5751_v45 }
 0x176   : > { %v5824_v31 = vpop.f32.mrf.mxu0  ;;  %v5754_v12 = vpop.f32.mrf.mxu1 }
 0x177   : > { %v6935_v21 = vadd.f32 %v5823_v48, %v6863_v7  ;;  %v6938_v1 = vadd.f32 %v5753_v56, %v6880_v46 }
 0x178   : > { %v5825_v55 = vpop.f32.mrf.mxu0  ;;  %v5755_v3 = vpop.f32.mrf.mxu1 }
 0x179   : > { %v5826_v59 = vadd.f32 %v5825_v55, %v5824_v31  ;;  %v5756_v4 = vadd.f32 %v5755_v3, %v5754_v12 }
 0x17a   : > { %v5827_v49 = vpop.f32.mrf.mxu0  ;;  %v5757_v61 = vpop.f32.mrf.mxu1 }
 0x17b   : > { %v6941_v40 = vadd.f32 %v5826_v59, %v6868_v19  ;;  %v6944_v22 = vadd.f32 %v5756_v4, %v6885_v2 }
 0x17c   : > { %v5828_v15 = vpop.f32.mrf.mxu0  ;;  %v5758_v17 = vpop.f32.mrf.mxu1 }
 0x17d   : > { %v5829_v7 = vadd.f32 %v5828_v15, %v5827_v49  ;;  %v5759_v18 = vadd.f32 %v5758_v17, %v5757_v61 }
 0x17e   : > { %v5830_v20 = vpop.f32.mrf.mxu0  ;;  %v5760_v25 = vpop.f32.mrf.mxu1 }
 0x17f   : > { %v6947_v46 = vadd.f32 %v5829_v7, %v6873_v34  ;;  %v6950_v29 = vadd.f32 %v5759_v18, %v6890_v11 }
 0x180   : > { %v5831_v26 = vpop.f32.mrf.mxu0  ;;  %v5761_v8 = vpop.f32.mrf.mxu1 }
 0x181   : > { %v5832_v19 = vadd.f32 %v5831_v26, %v5830_v20  ;;  %v5762_v32 = vadd.f32 %v5761_v8, %v5760_v25 }
 0x182   : > { %v5833_v33 = vpop.f32.mrf.mxu0  ;;  %v5763_v39 = vpop.f32.mrf.mxu1 }
 0x183   : > { %v6953_v2 = vadd.f32 %v5832_v19, %v6878_v43  ;;  %v6956_v16 = vadd.f32 %v5762_v32, %v6895_v27 }
 0x184   : > { %v5834_v52 = vpop.f32.mrf.mxu0  ;;  %v5764_v63 = vpop.f32.mrf.mxu1 }
 0x185   : > { %v5835_v34 = vadd.f32 %v5834_v52, %v5833_v33  ;;  %v5765_v41 = vadd.f32 %v5764_v63, %v5763_v39 }
 0x186   : > { %v5836_v45 = vpop.f32.mrf.mxu0  ;;  %v5766_v47 = vpop.f32.mrf.mxu1 }
 0x187   : > { %v6959_v11 = vadd.f32 %v5835_v34, %v6883_v60  ;;  %v6962_v54 = vadd.f32 %v5765_v41, %v6900_v37 }
 0x188   : > { %v5837_v48 = vpop.f32.mrf.mxu0  ;;  %v5767_v56 = vpop.f32.mrf.mxu1 }
 0x189   : > { %v5838_v43 = vadd.f32 %v5837_v48, %v5836_v45  ;;  %v5768_v31 = vadd.f32 %v5767_v56, %v5766_v47 }
 0x18a   : > { %v5839_v12 = vpop.f32.mrf.mxu0  ;;  %v5769_v55 = vpop.f32.mrf.mxu1 }
 0x18b   : > { %v6965_v27 = vadd.f32 %v5838_v43, %v6888_v6  ;;  %v6968_v3 = vadd.f32 %v5768_v31, %v6905_v51 }
 0x18c   : > { %v5840_v59 = vpop.f32.mrf.mxu0  ;;  %v5770_v4 = vpop.f32.mrf.mxu1 }
 0x18d   : > { %v5841_v60 = vadd.f32 %v5840_v59, %v5839_v12  ;;  %v5771_v49 = vadd.f32 %v5770_v4, %v5769_v55 }
 0x18e   : > { %v5842_v61 = vpop.f32.mrf.mxu0  ;;  %v5772_v15 = vpop.f32.mrf.mxu1 }
 0x18f   : > { %v6971_v37 = vadd.f32 %v5841_v60, %v6893_v28  ;;  %v6974_v17 = vadd.f32 %v5771_v49, %v6810_v14 }
 0x190   : > { %v5843_v7 = vpop.f32.mrf.mxu0  ;;  %v5773_v18 = vpop.f32.mrf.mxu1 }
 0x191   : > { %v5844_v6 = vadd.f32 %v5843_v7, %v5842_v61  ;;  %v5774_v20 = vadd.f32 %v5773_v18, %v5772_v15 }
 0x192   : > { %v5845_v25 = vpop.f32.mrf.mxu0  ;;  %v5775_v26 = vpop.f32.mrf.mxu1 }
 0x193   : > { %v6977_v51 = vadd.f32 %v5844_v6, %v6898_v35  ;;  %v6980_v8 = vadd.f32 %v5774_v20, %v6814_v24 }
 0x194   : > { %v5846_v19 = vpop.f32.mrf.mxu0  ;;  %v5776_v32 = vpop.f32.mrf.mxu1 }
 0x195   : > { %v5847_v28 = vadd.f32 %v5846_v19, %v5845_v25  ;;  %v5777_v33 = vadd.f32 %v5776_v32, %v5775_v26 }
 0x196   : > { %v5848_v39 = vpop.f32.mrf.mxu0  ;;  %v5778_v52 = vpop.f32.mrf.mxu1 }
 0x197   : > { %v6983_v14 = vadd.f32 %v5847_v28, %v6903_v42  ;;  %v6986_v63 = vadd.f32 %v5777_v33, %v6818_v30 }
 0x198   : > { %v5849_v34 = vpop.f32.mrf.mxu0  ;;  %v5779_v41 = vpop.f32.mrf.mxu1 }
 0x199   : > { %v5850_v35 = vadd.f32 %v5849_v34, %v5848_v39  ;;  %v5780_v45 = vadd.f32 %v5779_v41, %v5778_v52 }
 0x19a   : > { %v5851_v47 = vpop.f32.mrf.mxu0  ;;  %v5781_v48 = vpop.f32.mrf.mxu1 }
 0x19b   : > { %v6989_v24 = vadd.f32 %v5850_v35, %v6908_v58  ;;  %v6992_v56 = vadd.f32 %v5780_v45, %v6822_v38 }
 0x19c   : > { %v5852_v43 = vpop.f32.mrf.mxu0  ;;  %v5782_v31 = vpop.f32.mrf.mxu1 }
 0x19d   : > { %v5853_v42 = vadd.f32 %v5852_v43, %v5851_v47  ;;  %v5783_v12 = vadd.f32 %v5782_v31, %v5781_v48 }
 0x19e   : > { %v5854_v55 = vpop.f32.mrf.mxu0  ;;  %v5784_v59 = vpop.f32.mrf.mxu1 }
 0x19f   : > { %v6995_v30 = vadd.f32 %v5853_v42, %v6914_v9  ;;  %v6998_v4 = vadd.f32 %v5783_v12, %v6826_v44 }
 0x1a0   : > { %v5855_v60 = vpop.f32.mrf.mxu0  ;;  %v5785_v49 = vpop.f32.mrf.mxu1 }
 0x1a1   : > { %v5856_v58 = vadd.f32 %v5855_v60, %v5854_v55  ;;  %v5786_v61 = vadd.f32 %v5785_v49, %v5784_v59 }
 0x1a2   : > { %v5857_v15 = vpop.f32.mrf.mxu0  ;;  %v5787_v7 = vpop.f32.mrf.mxu1 }
 0x1a3   : > { %v7001_v38 = vadd.f32 %v5856_v58, %v6920_v23  ;;  %v7004_v18 = vadd.f32 %v5786_v61, %v6830_v57 }
 0x1a4   : > { %v5858_v6 = vpop.f32.mrf.mxu0  ;;  %v5788_v20 = vpop.f32.mrf.mxu1 }
 0x1a5   : > { %v5859_v9 = vadd.f32 %v5858_v6, %v5857_v15  ;;  %v5789_v25 = vadd.f32 %v5788_v20, %v5787_v7 }
 0x1a6   : > { %v5860_v26 = vpop.f32.mrf.mxu0  ;;  %v5790_v19 = vpop.f32.mrf.mxu1 }
 0x1a7   : > { %v7007_v44 = vadd.f32 %v5859_v9, %v6926_v36  ;;  %v7010_v32 = vadd.f32 %v5789_v25, %v6834_v0 }
 0x1a8   : > { %v5861_v28 = vpop.f32.mrf.mxu0  ;;  %v5791_v33 = vpop.f32.mrf.mxu1 }
 0x1a9   : > { %v5862_v23 = vadd.f32 %v5861_v28, %v5860_v26  ;;  %v5792_v39 = vadd.f32 %v5791_v33, %v5790_v19 }
 0x1aa   : > { %v5863_v52 = vpop.f32.mrf.mxu0  ;;  %v7015_v34 = vpop.f32.mrf.mxu1 }
 0x1ab   : > { %v7013_v57 = vadd.f32 %v5862_v23, %v6932_v50  ;;  %v7018_v41 = vadd.f32 %v5792_v39, %v6838_v10 }
 0x1ac   : > { %v5864_v35 = vpop.f32.mrf.mxu0  ;;  %v7020_v45 = vpop.f32.mrf.mxu1 }
 0x1ad   : > { %v5865_v36 = vadd.f32 %v5864_v35, %v5863_v52 }
 0x1ae   : > { %v5866_v47 = vpop.f32.mrf.mxu0  ;;  %v7025_v48 = vpop.f32.mrf.mxu1 }
 0x1af   : > { %v7023_v0 = vadd.f32 %v5865_v36, %v6938_v1 }
 0x1b0   : > { %v5867_v43 = vpop.f32.mrf.mxu0  ;;  %v7027_v42 = vpop.f32.mrf.mxu1 }
 0x1b1   : > { %v5868_v31 = vadd.f32 %v5867_v43, %v5866_v47 }
 0x1b2   : > { %v5869_v50 = vpop.f32.mrf.mxu0  ;;  %v5927_v10 = vpop.f32.mrf.mxu1 }
 0x1b3   : > { %v7030_v12 = vadd.f32 %v5868_v31, %v6944_v22 }
 0x1b4   : > { %v5870_v55 = vpop.f32.mrf.mxu0  ;;  %v5928_v60 = vpop.f32.mrf.mxu1 }
 0x1b5   : > { %v5871_v59 = vadd.f32 %v5870_v55, %v5869_v50 }
 0x1b6   : > { %v5872_v49 = vpop.f32.mrf.mxu0  ;;  %v7035_v1 = vpop.f32.mrf.mxu1 }
 0x1b7   : > { %v7033_v58 = vadd.f32 %v5871_v59, %v6950_v29 }
 0x1b8   : > { %v5873_v61 = vpop.f32.mrf.mxu0  ;;  %v5931_v7 = vpop.f32.mrf.mxu1 }
 0x1b9   : > { %v5874_v15 = vadd.f32 %v5873_v61, %v5872_v49 }
 0x1ba   : > { %v5875_v6 = vpop.f32.mrf.mxu0  ;;  %v7040_v9 = vpop.f32.mrf.mxu1 }
 0x1bb   : > { %v7038_v20 = vadd.f32 %v5874_v15, %v6956_v16 }
 0x1bc   : > { %v5876_v22 = vpop.f32.mrf.mxu0  ;;  %v7042_v26 = vpop.f32.mrf.mxu1 }
 0x1bd   : > { %v5877_v25 = vadd.f32 %v5876_v22, %v5875_v6 }
 0x1be   : > { %v5878_v19 = vpop.f32.mrf.mxu0  ;;  %v7047_v29 = vpop.f32.mrf.mxu1 }
 0x1bf   : > { %v7045_v28 = vadd.f32 %v5877_v25, %v6962_v54 }
 0x1c0   : > { %v5879_v33 = vpop.f32.mrf.mxu0  ;;  %v7049_v39 = vpop.f32.mrf.mxu1 }
 0x1c1   : > { %v5880_v23 = vadd.f32 %v5879_v33, %v5878_v19 }
 0x1c2   : > { %v5881_v52 = vpop.f32.mrf.mxu0  ;;  %v5939_v35 = vpop.f32.mrf.mxu1 }
 0x1c3   : > { %v7052_v16 = vadd.f32 %v5880_v23, %v6968_v3 }
 0x1c4   : > { %v5882_v36 = vpop.f32.mrf.mxu0  ;;  %v5940_v43 = vpop.f32.mrf.mxu1 }
 0x1c5   : > { %v5883_v47 = vadd.f32 %v5882_v36, %v5881_v52 }
 0x1c6   : > { %v5884_v31 = vpop.f32.mrf.mxu0  ;;  %v7057_v54 = vpop.f32.mrf.mxu1 }
 0x1c7   : > { %v7055_v50 = vadd.f32 %v5883_v47, %v6974_v17 }
 0x1c8   : > { %v5885_v55 = vpop.f32.mrf.mxu0  ;;  %v5943_v49 = vpop.f32.mrf.mxu1 }
 0x1c9   : > { %7406 = vst [vmem:[#allocation4_spill] sm:$0xff] %v7055_v50  ;;  %v5886_v59 = vadd.f32 %v5885_v55, %v5884_v31 }
 0x1ca   : > { %v5887_v61 = vpop.f32.mrf.mxu0  ;;  %v7062_v6 = vpop.f32.mrf.mxu1 }
 0x1cb   : > { %v7060_v15 = vadd.f32 %v5886_v59, %v6980_v8 }
 0x1cc   : > { %v5888_v3 = vpop.f32.mrf.mxu0  ;;  %v7064_v25 = vpop.f32.mrf.mxu1 }
 0x1cd   : > { %7407 = vst [vmem:[#allocation5_spill] sm:$0xff] %v7060_v15  ;;  %v5889_v22 = vadd.f32 %v5888_v3, %v5887_v61 }
 0x1ce   : > { %v5890_v19 = vpop.f32.mrf.mxu0  ;;  %v7069_v17 = vpop.f32.mrf.mxu1 }
 0x1cf   : > { %v7067_v33 = vadd.f32 %v5889_v22, %v6986_v63 }
 0x1d0   : > { %v5891_v23 = vpop.f32.mrf.mxu0  ;;  %v7071_v36 = vpop.f32.mrf.mxu1 }
 0x1d1   : > { %7408 = vst [vmem:[#allocation6_spill] sm:$0xff] %v7067_v33  ;;  %v5892_v52 = vadd.f32 %v5891_v23, %v5890_v19 }
 0x1d2   : > { %v5893_v47 = vpop.f32.mrf.mxu0  ;;  %v5951_v31 = vpop.f32.mrf.mxu1 }
 0x1d3   : > { %v7074_v8 = vadd.f32 %v5892_v52, %v6992_v56 }
 0x1d4   : > { %v5894_v55 = vpop.f32.mrf.mxu0  ;;  %v5952_v61 = vpop.f32.mrf.mxu1 }
 0x1d5   : > { %7409 = vst [vmem:[#allocation7_spill] sm:$0xff] %v7074_v8  ;;  %v5895_v59 = vadd.f32 %v5894_v55, %v5893_v47  ;;  %v5929_v47 = vadd.f32 %v5928_v60, %v5927_v10 }
 0x1d6   : > { %v5896_v3 = vpop.f32.mrf.mxu0  ;;  %v7079_v63 = vpop.f32.mrf.mxu1 }
 0x1d7   : > { %v7077_v15 = vadd.f32 %v5895_v59, %v6998_v4  ;;  %v5923_v59 = vadd.f32 %v7020_v45, %v7015_v34  ;;  %v4225_v10 = vadd.f32 %v5929_v47, %v6923_v62  ;;  %v5926_v34 = vadd.f32 %v7027_v42, %v7025_v48 }
 0x1d8   : > { %v5897_v22 = vpop.f32.mrf.mxu0  ;;  %v7081_v50 = vpop.f32.mrf.mxu1 }
 0x1d9   : > { %7410 = vst [vmem:[#allocation8_spill] sm:$0xff] %v7077_v15  ;;  %v5898_v33 = vadd.f32 %v5897_v22, %v5896_v3  ;;  %v4217_v62 = vadd.f32 %v5923_v59, %v6911_v5  ;;  %v4220_v5 = vadd.f32 %v5926_v34, %v6917_v53 }
 0x1da   : > { %v5899_v19 = vpop.f32.mrf.mxu0  ;;  %v7086_v56 = vpop.f32.mrf.mxu1 }
 0x1db   : > { %v7084_v23 = vadd.f32 %v5898_v33, %v7004_v18  ;;  %v5932_v18 = vadd.f32 %v5931_v7, %v7035_v1 }
 0x1dc   : > { %v5900_v52 = vpop.f32.mrf.mxu0  ;;  %v7088_v8 = vpop.f32.mrf.mxu1 }
 0x1dd   : > { %7411 = vst [vmem:[#allocation9_spill] sm:$0xff] %v7084_v23  ;;  %v5901_v55 = vadd.f32 %v5900_v52, %v5899_v19  ;;  %v4228_v47 = vadd.f32 %v5932_v18, %v6929_v13 }
 0x1de   : > { %v5902_v4 = vpop.f32.mrf.mxu0  ;;  %v7095_v22 = vpop.f32.mrf.mxu1 }
 0x1df   : > { %v7093_v3 = vadd.f32 %v5901_v55, %v7010_v32 }
 0x1e0   : > { %v5903_v15 = vpop.f32.mrf.mxu0  ;;  %v7098_v23 = vpop.f32.mrf.mxu1 }
 0x1e1   : > { %v5904_v33 = vadd.f32 %v5903_v15, %v5902_v4  ;;  %v5941_v15 = vadd.f32 %v5940_v43, %v5939_v35  ;;  %v5944_v43 = vadd.f32 %v5943_v49, %v7057_v54 }
 0x1e2   : > { %v6059_v32 = vpop.f32.mrf.mxu0  ;;  %v5963_v60 = vpop.f32.mrf.mxu1 }
 0x1e3   : > { %v7111_v45 = vadd.f32 %v5904_v33, %v7018_v41  ;;  %v7113_v1 = vadd.f32 %v6059_v32, %v4225_v10  ;;  %v5935_v41 = vadd.f32 %v7042_v26, %v7040_v9  ;;  %v4241_v13 = vadd.f32 %v5941_v15, %v6947_v46 }
 0x1e4   : > { %v4377_v7 = vpop.f32.mrf.mxu0  ;;  %v5964_v19 = vpop.f32.mrf.mxu1  ;;  %v5938_v9 = vadd.f32 %v7049_v39, %v7047_v29  ;;  %v5953_v10 = vadd.f32 %v5952_v61, %v5951_v31  ;;  %v4244_v39 = vadd.f32 %v5944_v43, %v6953_v2 }
 0x1e5   : > { %4506 = vst [vmem:[%s7106_s13 + $0x10] sm:$0xff] %v7113_v1  ;;  %v7118_v52 = vadd.f32 %v4377_v7, %v4217_v62  ;;  %v4233_v49 = vadd.f32 %v5935_v41, %v6935_v21  ;;  %v5947_v62 = vadd.f32 %v7064_v25, %v7062_v6 }
 0x1e6   : > { %v6060_v48 = vpop.f32.mrf.mxu0  ;;  %v5966_v42 = vpop.f32.mrf.mxu1  ;;  %v4236_v7 = vadd.f32 %v5938_v9, %v6941_v40 }
 0x1e7   : > { %4504 = vst [vmem:[%s7106_s13] sm:$0xff] %v7118_v52  ;;  %v7125_v55 = vadd.f32 %v6060_v48, %v4228_v47  ;;  %v5956_v47 = vadd.f32 %v7081_v50, %v7079_v63  ;;  %v4257_v48 = vadd.f32 %v5953_v10, %v6971_v37 }
 0x1e8   : > { %v4380_v35 = vpop.f32.mrf.mxu0  ;;  %v5967_v4 = vpop.f32.mrf.mxu1 }
 0x1e9   : > { %4507 = vst [vmem:[%s7106_s13 + $0x18] sm:$0xff] %v7125_v55  ;;  %v7131_v59 = vadd.f32 %v4380_v35, %v4220_v5  ;;  %v5950_v5 = vadd.f32 %v7071_v36, %v7069_v17  ;;  %v4249_v35 = vadd.f32 %v5947_v62, %v6959_v11  ;;  %v4260_v17 = vadd.f32 %v5956_v47, %v6977_v51 }
 0x1ea   : > { %v6063_v18 = vpop.f32.mrf.mxu0  ;;  %v7140_v26 = vpop.f32.mrf.mxu1  ;;  %v5968_v10 = vadd.f32 %v5967_v4, %v5966_v42 }
 0x1eb   : > { %4505 = vst [vmem:[%s7106_s13 + $0x8] sm:$0xff] %v7131_v59  ;;  %v4536_v53 = vadd.f32 %v7131_v59, %v7118_v52  ;;  %v7142_v54 = vadd.f32 %v6063_v18, %v4241_v13  ;;  %v5965_v13 = vadd.f32 %v5964_v19, %v5963_v60 }
 0x1ec   : > { %v4393_v33 = vpop.f32.mrf.mxu0  ;;  %v5970_v32 = vpop.f32.mrf.mxu1 }
 0x1ed   : > { %v4537_v46 = vadd.f32 %v4536_v53, %v7113_v1  ;;  %4510 = vst [vmem:[%s7106_s13 + $0x30] sm:$0xff] %v7142_v54  ;;  %v7148_v29 = vadd.f32 %v4393_v33, %v4233_v49  ;;  %v5959_v53 = vadd.f32 %v7088_v8, %v7086_v56  ;;  %v4252_v49 = vadd.f32 %v5950_v5, %v6965_v27 }
 0x1ee   : > { %v6064_v34 = vpop.f32.mrf.mxu0  ;;  %v7156_v31 = vpop.f32.mrf.mxu1  ;;  %v4273_v8 = vadd.f32 %v5965_v13, %v6995_v30 }
 0x1ef   : > { %4508 = vst [vmem:[%s7106_s13 + $0x20] sm:$0xff] %v7148_v29  ;;  %v4538_v21 = vadd.f32 %v4537_v46, %v7125_v55  ;;  %v7158_v61 = vadd.f32 %v6064_v34, %v4244_v39  ;;  %v5962_v34 = vadd.f32 %v7098_v23, %v7095_v22  ;;  %v4265_v62 = vadd.f32 %v5959_v53, %v6983_v14 }
 0x1f0   : > { %v4396_v15 = vpop.f32.mrf.mxu0  ;;  %v5973_v6 = vpop.f32.mrf.mxu1  ;;  %v4276_v23 = vadd.f32 %v5968_v10, %v7001_v38 }
 0x1f1   : > { %v4539_v2 = vadd.f32 %v4538_v21, %v7148_v29  ;;  %4511 = vst [vmem:[%s7106_s13 + $0x38] sm:$0xff] %v7158_v61  ;;  %v7166_v25 = vadd.f32 %v4396_v15, %v4236_v7  ;;  %v4268_v5 = vadd.f32 %v5962_v34, %v6989_v24  ;;  %v5974_v13 = vadd.f32 %v5973_v6, %v7156_v31 }
 0x1f2   : > { %v6067_v41 = vpop.f32.mrf.mxu0  ;;  %v5975_v50 = vpop.f32.mrf.mxu1 }
 0x1f3   : > { %4509 = vst [vmem:[%s7106_s13 + $0x28] sm:$0xff] %v7166_v25  ;;  %v4540_v40 = vadd.f32 %v4539_v2, %v7166_v25  ;;  %v7174_v63 = vadd.f32 %v6067_v41, %v4257_v48  ;;  %v5971_v2 = vadd.f32 %v5970_v32, %v7140_v26 }
 0x1f4   : > { %v4409_v43 = vpop.f32.mrf.mxu0  ;;  %v5976_v37 = vpop.f32.mrf.mxu1 }
 0x1f5   : > { %v4541_v18 = vadd.f32 %v4540_v40, %v7142_v54  ;;  %4514 = vst [vmem:[%s7106_s13 + $0x50] sm:$0xff] %v7174_v63  ;;  %v7180_v9 = vadd.f32 %v4409_v43, %v4249_v35  ;;  %v5977_v7 = vadd.f32 %v5976_v37, %v5975_v50 }
 0x1f6   : > { %v6068_v36 = vpop.f32.mrf.mxu0  ;;  %v5978_v60 = vpop.f32.mrf.mxu1 }
 0x1f7   : > { %4512 = vst [vmem:[%s7106_s13 + $0x40] sm:$0xff] %v7180_v9  ;;  %v4542_v11 = vadd.f32 %v4541_v18, %v7158_v61  ;;  %v7188_v19 = vadd.f32 %v6068_v36, %v4260_v17  ;;  %v4289_v26 = vadd.f32 %v5977_v7, %v7023_v0  ;;  %v4281_v17 = vadd.f32 %v5971_v2, %v7007_v44 }
 0x1f8   : > { %v4412_v33 = vpop.f32.mrf.mxu0  ;;  %v5979_v51 = vpop.f32.mrf.mxu1 }
 0x1f9   : > { %v4543_v46 = vadd.f32 %v4542_v11, %v7180_v9  ;;  %4515 = vst [vmem:[%s7106_s13 + $0x58] sm:$0xff] %v7188_v19  ;;  %v7194_v39 = vadd.f32 %v4412_v33, %v4252_v49  ;;  %v5980_v50 = vadd.f32 %v5979_v51, %v5978_v60 }
 0x1fa   : > { %v6071_v56 = vpop.f32.mrf.mxu0  ;;  %v5981_v42 = vpop.f32.mrf.mxu1 }
 0x1fb   : > { %4513 = vst [vmem:[%s7106_s13 + $0x48] sm:$0xff] %v7194_v39  ;;  %v4544_v27 = vadd.f32 %v4543_v46, %v7194_v39  ;;  %v7202_v4 = vadd.f32 %v6071_v56, %v4273_v8  ;;  %v4292_v31 = vadd.f32 %v5980_v50, %v7030_v12  ;;  %v4284_v46 = vadd.f32 %v5974_v13, %v7013_v57 }
 0x1fc   : > { %v4425_v21 = vpop.f32.mrf.mxu0  ;;  %v5982_v30 = vpop.f32.mrf.mxu1 }
 0x1fd   : > { %v4545_v15 = vadd.f32 %v4544_v27, %v7174_v63  ;;  %4518 = vst [vmem:[%s7106_s13 + $0x70] sm:$0xff] %v7202_v4  ;;  %v7208_v47 = vadd.f32 %v4425_v21, %v4265_v62  ;;  %v5983_v49 = vadd.f32 %v5982_v30, %v5981_v42 }
 0x1fe   : > { %v6072_v22 = vpop.f32.mrf.mxu0  ;;  %v5984_v48 = vpop.f32.mrf.mxu1 }
 0x1ff   : > { %4516 = vst [vmem:[%s7106_s13 + $0x60] sm:$0xff] %v7208_v47  ;;  %v4546_v14 = vadd.f32 %v4545_v15, %v7188_v19  ;;  %v7215_v41 = vadd.f32 %v6072_v22, %v4276_v23  ;;  %v4297_v15 = vadd.f32 %v5983_v49, %v7033_v58 }
 0x200   : > { %v4428_v40 = vpop.f32.mrf.mxu0  ;;  %v5985_v38 = vpop.f32.mrf.mxu1 }
 0x201   : > { %v4547_v35 = vadd.f32 %v4546_v14, %v7208_v47  ;;  %4519 = vst [vmem:[%s7106_s13 + $0x78] sm:$0xff] %v7215_v41  ;;  %v7221_v43 = vadd.f32 %v4428_v40, %v4268_v5  ;;  %v5986_v62 = vadd.f32 %v5985_v38, %v5984_v48 }
 0x202   : > { %v6075_v32 = vpop.f32.mrf.mxu0  ;;  %v5987_v18 = vpop.f32.mrf.mxu1 }
 0x203   : > { %4517 = vst [vmem:[%s7106_s13 + $0x68] sm:$0xff] %v7221_v43  ;;  %v4548_v24 = vadd.f32 %v4547_v35, %v7221_v43  ;;  %v7228_v37 = vadd.f32 %v6075_v32, %v4289_v26  ;;  %v4300_v50 = vadd.f32 %v5986_v62, %v7038_v20 }
 0x204   : > { %v4441_v36 = vpop.f32.mrf.mxu0  ;;  %v5988_v0 = vpop.f32.mrf.mxu1 }
 0x205   : > { %v4549_v53 = vadd.f32 %v4548_v24, %v7202_v4  ;;  %4522 = vst [vmem:[%s7106_s13 + $0x90] sm:$0xff] %v7228_v37  ;;  %v7234_v11 = vadd.f32 %v4441_v36, %v4281_v17  ;;  %v5989_v6 = vadd.f32 %v5988_v0, %v5987_v18  ;;  %v7412_v17 = vld [vmem:[#allocation4_spill] sm:$0xff] }
 0x206   : > { %v6076_v60 = vpop.f32.mrf.mxu0  ;;  %v5990_v44 = vpop.f32.mrf.mxu1 }
 0x207   : > { %4520 = vst [vmem:[%s7106_s13 + $0x80] sm:$0xff] %v7234_v11  ;;  %v4550_v33 = vadd.f32 %v4549_v53, %v7215_v41  ;;  %v7240_v10 = vadd.f32 %v6076_v60, %v4292_v31  ;;  %v4305_v34 = vadd.f32 %v5989_v6, %v7045_v28 }
 0x208   : > { %v4444_v51 = vpop.f32.mrf.mxu0  ;;  %v5991_v12 = vpop.f32.mrf.mxu1 }
 0x209   : > { %v4551_v8 = vadd.f32 %v4550_v33, %v7234_v11  ;;  %4523 = vst [vmem:[%s7106_s13 + $0x98] sm:$0xff] %v7240_v10  ;;  %v7246_v56 = vadd.f32 %v4444_v51, %v4284_v46  ;;  %v5992_v27 = vadd.f32 %v5991_v12, %v5990_v44  ;;  %v7413_v44 = vld [vmem:[#allocation5_spill] sm:$0xff]  ;;  %v7414_v51 = vld [vmem:[#allocation6_spill] sm:$0xff] }
 0x20a   : > { %v6079_v42 = vpop.f32.mrf.mxu0  ;;  %v5993_v57 = vpop.f32.mrf.mxu1 }
 0x20b   : > { %4521 = vst [vmem:[%s7106_s13 + $0x88] sm:$0xff] %v7246_v56  ;;  %v4552_v21 = vadd.f32 %v4551_v8, %v7246_v56  ;;  %v7252_v7 = vadd.f32 %v6079_v42, %v4305_v34  ;;  %v4308_v2 = vadd.f32 %v5992_v27, %v7052_v16 }
 0x20c   : > { %v4457_v30 = vpop.f32.mrf.mxu0  ;;  %v5994_v28 = vpop.f32.mrf.mxu1 }
 0x20d   : > { %v4553_v23 = vadd.f32 %v4552_v21, %v7228_v37  ;;  %4526 = vst [vmem:[%s7106_s13 + $0xb0] sm:$0xff] %v7252_v7  ;;  %v7258_v22 = vadd.f32 %v4457_v30, %v4297_v15  ;;  %v5995_v48 = vadd.f32 %v5994_v28, %v5993_v57 }
 0x20e   : > { %v6080_v14 = vpop.f32.mrf.mxu0  ;;  %v5996_v40 = vpop.f32.mrf.mxu1 }
 0x20f   : > { %4524 = vst [vmem:[%s7106_s13 + $0xa0] sm:$0xff] %v7258_v22  ;;  %v4554_v5 = vadd.f32 %v4553_v23, %v7240_v10  ;;  %v7264_v58 = vadd.f32 %v6080_v14, %v4308_v2  ;;  %v4313_v36 = vadd.f32 %v5995_v48, %v7412_v17  ;;  %v7415_v23 = vld [vmem:[#allocation7_spill] sm:$0xff] }
 0x210   : > { %v4460_v35 = vpop.f32.mrf.mxu0  ;;  %v5997_v26 = vpop.f32.mrf.mxu1 }
 0x211   : > { %v4555_v38 = vadd.f32 %v4554_v5, %v7258_v22  ;;  %4527 = vst [vmem:[%s7106_s13 + $0xb8] sm:$0xff] %v7264_v58  ;;  %v7270_v32 = vadd.f32 %v4460_v35, %v4300_v50  ;;  %v5998_v13 = vadd.f32 %v5997_v26, %v5996_v40  ;;  %v7416_v35 = vld [vmem:[#allocation8_spill] sm:$0xff] }
 0x212   : > { %v6083_v16 = vpop.f32.mrf.mxu0  ;;  %v5999_v18 = vpop.f32.mrf.mxu1 }
 0x213   : > { %4525 = vst [vmem:[%s7106_s13 + $0xa8] sm:$0xff] %v7270_v32  ;;  %v4556_v24 = vadd.f32 %v4555_v38, %v7270_v32  ;;  %v4316_v46 = vadd.f32 %v5998_v13, %v7413_v44 }
 0x214   : > { %v4473_v53 = vpop.f32.mrf.mxu0  ;;  %v6000_v0 = vpop.f32.mrf.mxu1 }
 0x215   : > { %v4557_v20 = vadd.f32 %v4556_v24, %v7252_v7  ;;  %v7277_v31 = vadd.f32 %v4473_v53, %v4313_v36  ;;  %v6001_v6 = vadd.f32 %v6000_v0, %v5999_v18  ;;  %v7417_v53 = vld [vmem:[#allocation9_spill] sm:$0xff] }
 0x216   : > { %v6084_v60 = vpop.f32.mrf.mxu0  ;;  %v6002_v33 = vpop.f32.mrf.mxu1 }
 0x217   : > { %4528 = vst [vmem:[%s7106_s13 + $0xc0] sm:$0xff] %v7277_v31  ;;  %v4558_v49 = vadd.f32 %v4557_v20, %v7264_v58  ;;  %v4321_v8 = vadd.f32 %v6001_v6, %v7414_v51 }
 0x218   : > { %v4476_v12 = vpop.f32.mrf.mxu0  ;;  %v6003_v27 = vpop.f32.mrf.mxu1 }
 0x219   : > { %v4559_v34 = vadd.f32 %v4558_v49, %v7277_v31  ;;  %v7285_v42 = vadd.f32 %v4476_v12, %v4316_v46  ;;  %v7287_v62 = vadd.f32 %v6083_v16, %v4321_v8  ;;  %v6004_v21 = vadd.f32 %v6003_v27, %v6002_v33 }
 0x21a   : > { %v6087_v57 = vpop.f32.mrf.mxu0  ;;  %v6005_v30 = vpop.f32.mrf.mxu1 }
 0x21b   : > { %4529 = vst [vmem:[%s7106_s13 + $0xc8] sm:$0xff] %v7285_v42  ;;  %v4560_v15 = vadd.f32 %v4559_v34, %v7285_v42  ;;  %4530 = vst [vmem:[%s7106_s13 + $0xd0] sm:$0xff] %v7287_v62  ;;  %v4324_v28 = vadd.f32 %v6004_v21, %v7415_v23 }
 0x21c   : > { %v6006_v14 = vpop.f32.mrf.mxu1  ;;  %v4489_v48 = vpop.f32.mrf.mxu0 }
 0x21d   : > { %v4561_v2 = vadd.f32 %v4560_v15, %v7287_v62  ;;  %v4485_v5 = vadd.f32 %v6084_v60, %v4324_v28  ;;  %v6007_v40 = vadd.f32 %v6006_v14, %v6005_v30 }
 0x21e   : > { %v6008_v50 = vpop.f32.mrf.mxu1  ;;  %v6088_v13 = vpop.f32.mrf.mxu0 }
 0x21f   : > { %4531 = vst [vmem:[%s7106_s13 + $0xd8] sm:$0xff] %v4485_v5  ;;  %v4329_v38 = vadd.f32 %v6007_v40, %v7416_v35  ;;  %v4562_v26 = vadd.f32 %v4561_v2, %v4485_v5 }
 0x220   : > { %v6009_v16 = vpop.f32.mrf.mxu1  ;;  %v4492_v0 = vpop.f32.mrf.mxu0 }
 0x221   : > { %v4490_v24 = vadd.f32 %v4489_v48, %v4329_v38  ;;  %v6010_v18 = vadd.f32 %v6009_v16, %v6008_v50 }
 0x222   : > { %v6011_v17 = vpop.f32.mrf.mxu1 }
 0x223   : > { %4532 = vst [vmem:[%s7106_s13 + $0xe0] sm:$0xff] %v4490_v24  ;;  %v4563_v36 = vadd.f32 %v4562_v26, %v4490_v24  ;;  %v4332_v20 = vadd.f32 %v6010_v18, %v7417_v53 }
 0x224   : > { %v6012_v6 = vpop.f32.mrf.mxu1 }
 0x225   : > { %v4493_v60 = vadd.f32 %v4492_v0, %v4332_v20  ;;  %v6013_v49 = vadd.f32 %v6012_v6, %v6011_v17 }
 0x226   : > { %v6014_v33 = vpop.f32.mrf.mxu1 }
 0x227   : > { %4533 = vst [vmem:[%s7106_s13 + $0xe8] sm:$0xff] %v4493_v60  ;;  %v4564_v44 = vadd.f32 %v4563_v36, %v4493_v60  ;;  %v4337_v46 = vadd.f32 %v6013_v49, %v7093_v3 }
 0x228   : > { %v6015_v51 = vpop.f32.mrf.mxu1 }
 0x229   : > { %v4498_v8 = vadd.f32 %v6087_v57, %v4337_v46  ;;  %v6016_v12 = vadd.f32 %v6015_v51, %v6014_v33 }
 0x22b   : > { %4534 = vst [vmem:[%s7106_s13 + $0xf0] sm:$0xff] %v4498_v8  ;;  %v4565_v34 = vadd.f32 %v4564_v44, %v4498_v8  ;;  %v4340_v27 = vadd.f32 %v6016_v12, %v7111_v45 }
 0x22d   : > { %v4501_v21 = vadd.f32 %v6088_v13, %v4340_v27 }
 0x22f   : > { %4535 = vst [vmem:[%s7106_s13 + $0xf8] sm:$0xff] %v4501_v21  ;;  %v4566_v15 = vadd.f32 %v4565_v34, %v4501_v21 }
 0x231   : > { %v4567_v30 = vrot.slane %v4566_v15, 4 }
 0x233   : > { %v4568_v23 = vadd.f32 %v4567_v30, %v4566_v15 }
 0x235   : > { %v4569_v28 = vrot.slane %v4568_v23, 2 }
 0x237   : > { %v4570_v2 = vadd.f32 %v4569_v28, %v4568_v23 }
 0x239   : > { %v4571_v14 = vrot.slane %v4570_v2, 1 }
 0x23b   : > { %v4572_v3 = vadd.f32 %v4571_v14, %v4570_v2 }
 0x23d   : > { %4675 = vst [vmem:[%s7309_s16] sm:$0x1] %v4572_v3  ;;  %v4573_v57 = vmul.f32 0.00390625, %v4572_v3 }
 0x23f   : > { %v4587_v45 = vsub.f32 %v7221_v43, %v4573_v57  ;;  %v4590_v48 = vsub.f32 %v7234_v11, %v4573_v57  ;;  %v4591_v40 = vsub.f32 %v7246_v56, %v4573_v57  ;;  %v7316_v50 = vsub.f32 %v7228_v37, %v4573_v57 }
 0x240   : > { %v7319_v35 = vsub.f32 %v7240_v10, %v4573_v57  ;;  %v7322_v38 = vsub.f32 %v7258_v22, %v4573_v57  ;;  %v7325_v26 = vsub.f32 %v7270_v32, %v4573_v57  ;;  %v7328_v16 = vsub.f32 %v7252_v7, %v4573_v57 }
 0x241   : > { %v7331_v43 = vsub.f32 %v7264_v58, %v4573_v57  ;;  %v7334_v11 = vsub.f32 %v7277_v31, %v4573_v57  ;;  %v7337_v37 = vsub.f32 %v7285_v42, %v4573_v57  ;;  %v7340_v10 = vsub.f32 %v7287_v62, %v4573_v57 }
 0x242   : > { %v7342_v56 = vsub.f32 %v4485_v5, %v4573_v57  ;;  %v7344_v22 = vsub.f32 %v4490_v24, %v4573_v57  ;;  %v7346_v32 = vsub.f32 %v4493_v60, %v4573_v57  ;;  %v7348_v7 = vsub.f32 %v4498_v8, %v4573_v57 }
 0x243   : > { %v7350_v13 = vsub.f32 %v4501_v21, %v4573_v57  ;;  %v4574_v58 = vsub.f32 %v7118_v52, %v4573_v57  ;;  %v4575_v31 = vsub.f32 %v7131_v59, %v4573_v57  ;;  %v4576_v42 = vsub.f32 %v7113_v1, %v4573_v57 }
 0x244   : > { %v4577_v62 = vsub.f32 %v7125_v55, %v4573_v57  ;;  %v4578_v5 = vsub.f32 %v7148_v29, %v4573_v57  ;;  %v4579_v53 = vsub.f32 %v7166_v25, %v4573_v57  ;;  %v4580_v6 = vsub.f32 %v7142_v54, %v4573_v57 }
 0x245   : > { %v4606_v18 = vmul.f32 %v4574_v58, %v4574_v58  ;;  %v4607_v17 = vmul.f32 %v4575_v31, %v4575_v31  ;;  %v4608_v24 = vmul.f32 %v4576_v42, %v4576_v42  ;;  %v4581_v59 = vsub.f32 %v7158_v61, %v4573_v57 }
 0x246   : > { %v4609_v20 = vmul.f32 %v4577_v62, %v4577_v62  ;;  %v4610_v60 = vmul.f32 %v4578_v5, %v4578_v5  ;;  %v4611_v49 = vmul.f32 %v4579_v53, %v4579_v53  ;;  %v4582_v33 = vsub.f32 %v7180_v9, %v4573_v57 }
 0x247   : > { %v4638_v36 = vadd.f32 %v4607_v17, %v4606_v18  ;;  %v4612_v44 = vmul.f32 %v4580_v6, %v4580_v6  ;;  %v4583_v29 = vsub.f32 %v7194_v39, %v4573_v57  ;;  %v4613_v46 = vmul.f32 %v4581_v59, %v4581_v59 }
 0x248   : > { %v4584_v25 = vsub.f32 %v7174_v63, %v4573_v57  ;;  %v4614_v8 = vmul.f32 %v4582_v33, %v4582_v33  ;;  %v4585_v54 = vsub.f32 %v7188_v19, %v4573_v57  ;;  %v4586_v61 = vsub.f32 %v7208_v47, %v4573_v57 }
 0x249   : > { %v4639_v0 = vadd.f32 %v4638_v36, %v4608_v24  ;;  %v4615_v34 = vmul.f32 %v4583_v29, %v4583_v29  ;;  %v4588_v23 = vsub.f32 %v7202_v4, %v4573_v57  ;;  %v4589_v2 = vsub.f32 %v7215_v41, %v4573_v57 }
 0x24a   : > { %v4616_v21 = vmul.f32 %v4584_v25, %v4584_v25  ;;  %v4617_v30 = vmul.f32 %v4585_v54, %v4585_v54  ;;  %v4618_v28 = vmul.f32 %v4586_v61, %v4586_v61  ;;  %v4619_v14 = vmul.f32 %v4587_v45, %v4587_v45 }
 0x24b   : > { %v4640_v52 = vadd.f32 %v4639_v0, %v4609_v20  ;;  %v4620_v3 = vmul.f32 %v4588_v23, %v4588_v23  ;;  %v4621_v31 = vmul.f32 %v4589_v2, %v4589_v2  ;;  %v4622_v42 = vmul.f32 %v4590_v48, %v4590_v48 }
 0x24c   : > { %v4623_v17 = vmul.f32 %v4591_v40, %v4591_v40  ;;  %v4624_v62 = vmul.f32 %v7316_v50, %v7316_v50  ;;  %v4625_v4 = vmul.f32 %v7319_v35, %v7319_v35  ;;  %v4626_v41 = vmul.f32 %v7322_v38, %v7322_v38 }
 0x24d   : > { %v4641_v1 = vadd.f32 %v4640_v52, %v4610_v60  ;;  %v4627_v45 = vmul.f32 %v7325_v26, %v7325_v26  ;;  %v4628_v48 = vmul.f32 %v7328_v16, %v7328_v16  ;;  %v4629_v50 = vmul.f32 %v7331_v43, %v7331_v43 }
 0x24e   : > { %v4630_v35 = vmul.f32 %v7334_v11, %v7334_v11  ;;  %v4631_v38 = vmul.f32 %v7337_v37, %v7337_v37  ;;  %v4632_v26 = vmul.f32 %v7340_v10, %v7340_v10  ;;  %v4633_v16 = vmul.f32 %v7342_v56, %v7342_v56 }
 0x24f   : > { %v4642_v55 = vadd.f32 %v4641_v1, %v4611_v49  ;;  %v4634_v43 = vmul.f32 %v7344_v22, %v7344_v22  ;;  %v4635_v11 = vmul.f32 %v7346_v32, %v7346_v32  ;;  %v4636_v37 = vmul.f32 %v7348_v7, %v7348_v7 }
 0x250   : > { %v4637_v10 = vmul.f32 %v7350_v13, %v7350_v13 }
 0x251   : > { %v4643_v51 = vadd.f32 %v4642_v55, %v4612_v44 }
 0x253   : > { %v4644_v12 = vadd.f32 %v4643_v51, %v4613_v46 }
 0x255   : > { %v4645_v27 = vadd.f32 %v4644_v12, %v4614_v8 }
 0x257   : > { %v4646_v15 = vadd.f32 %v4645_v27, %v4615_v34 }
 0x259   : > { %v4647_v9 = vadd.f32 %v4646_v15, %v4616_v21 }
 0x25b   : > { %v4648_v39 = vadd.f32 %v4647_v9, %v4617_v30 }
 0x25d   : > { %v4649_v63 = vadd.f32 %v4648_v39, %v4618_v28 }
 0x25f   : > { %v4650_v58 = vadd.f32 %v4649_v63, %v4619_v14 }
 0x261   : > { %v4651_v19 = vadd.f32 %v4650_v58, %v4620_v3 }
 0x263   : > { %v4652_v18 = vadd.f32 %v4651_v19, %v4621_v31 }
 0x265   : > { %v4653_v47 = vadd.f32 %v4652_v18, %v4622_v42 }
 0x267   : > { %v4654_v5 = vadd.f32 %v4653_v47, %v4623_v17 }
 0x269   : > { %v4655_v24 = vadd.f32 %v4654_v5, %v4624_v62 }
 0x26b   : > { %v4656_v57 = vadd.f32 %v4655_v24, %v4625_v4 }
 0x26d   : > { %v4657_v36 = vadd.f32 %v4656_v57, %v4626_v41 }
 0x26f   : > { %v4658_v40 = vadd.f32 %v4657_v36, %v4627_v45 }
 0x271   : > { %v4659_v53 = vadd.f32 %v4658_v40, %v4628_v48 }
 0x273   : > { %v4660_v20 = vadd.f32 %v4659_v53, %v4629_v50 }
 0x275   : > { %v4661_v0 = vadd.f32 %v4660_v20, %v4630_v35 }
 0x277   : > { %v4662_v6 = vadd.f32 %v4661_v0, %v4631_v38 }
 0x279   : > { %v4663_v60 = vadd.f32 %v4662_v6, %v4632_v26 }
 0x27b   : > { %v4664_v52 = vadd.f32 %v4663_v60, %v4633_v16 }
 0x27d   : > { %v4665_v59 = vadd.f32 %v4664_v52, %v4634_v43 }
 0x27f   : > { %v4666_v49 = vadd.f32 %v4665_v59, %v4635_v11 }
 0x281   : > { %v4667_v1 = vadd.f32 %v4666_v49, %v4636_v37 }
 0x283   : > { %v4668_v33 = vadd.f32 %v4667_v1, %v4637_v10 }
 0x285   : > { %v4669_v56 = vrot.slane %v4668_v33, 4 }
 0x287   : > { %v4670_v44 = vadd.f32 %v4669_v56, %v4668_v33 }
 0x289   : > { %v4671_v55 = vrot.slane %v4670_v44, 2 }
 0x28b   : > { %v4672_v29 = vadd.f32 %v4671_v55, %v4670_v44 }
 0x28d   : > { %v4673_v46 = vrot.slane %v4672_v29, 1 }
 0x28f   : > { %v4674_v22 = vadd.f32 %v4673_v46, %v4672_v29 }
 0x291   : > { %4676 = vst [vmem:[%s7309_s16 + $0x1] sm:$0x1] %v4674_v22 }
 0x292 PF: > { %s17_s21 = sadd.s32 1, %s6403_s21  }
 0x293   : > { %p14_p4 = scmp.ge.s32.totalorder %s17_s21, 4  }
 0x295   :  { %16 = sbr.rel (!%p14_p4) target bundleno = 1 (0x1), region = 84 }

</bundles_post_ra>
